<compile_context>
chip_gen: v7x
topology: tpu7x:2x2x1
jax: 0.10.0
libtpu: 0.0.40
codegen_flags: <defaults>
</compile_context>

<pallas_src>
import functools

import jax
import jax.numpy as jnp
from jax.experimental import pallas as pl
from jax.experimental.pallas import tpu as pltpu


def _round_up(x, m):
    return (x + m - 1) // m * m


# ---------------------------------------------------------------------------
# Pallas kernels
# ---------------------------------------------------------------------------

def _make_matmul_act_kernel(act):
    """Tiled matmul with fused bias + activation epilogue (non-BN layers)."""
    def kernel(a_ref, b_ref, bias_ref, o_ref, acc_ref):
        @pl.when(pl.program_id(2) == 0)
        def _():
            acc_ref[...] = jnp.zeros_like(acc_ref)

        acc_ref[...] += jnp.dot(a_ref[...], b_ref[...],
                                preferred_element_type=jnp.float32)

        # Store (and activate) only on the final K step -> no per-K vst traffic.
        @pl.when(pl.program_id(2) == pl.num_programs(2) - 1)
        def _():
            y = acc_ref[...] + bias_ref[...]
            if act == "leaky_relu":                    # F.leaky_relu(x, 0.3)
                y = jnp.where(y >= 0.0, y, 0.3 * y)
            elif act == "sigmoid":
                y = 1.0 / (1.0 + jnp.exp(-y))
            o_ref[...] = y.astype(o_ref.dtype)
    return kernel


def _matmul_bnstats_kernel(a_ref, b_ref, o_ref, s_ref, q_ref, acc_ref):
    """Tiled matmul; on the final K step also emits per-(row-block, channel)
    partial sum / sum-of-squares for BatchNorm, so no extra HBM pass is needed."""
    @pl.when(pl.program_id(2) == 0)
    def _():
        acc_ref[...] = jnp.zeros_like(acc_ref)

    acc_ref[...] += jnp.dot(a_ref[...], b_ref[...],
                            preferred_element_type=jnp.float32)

    @pl.when(pl.program_id(2) == pl.num_programs(2) - 1)
    def _():
        y = acc_ref[...]
        o_ref[...] = y.astype(o_ref.dtype)
        s_ref[...] = jnp.broadcast_to(jnp.sum(y, axis=0, keepdims=True), s_ref.shape)
        q_ref[...] = jnp.broadcast_to(jnp.sum(y * y, axis=0, keepdims=True), q_ref.shape)


def _affine_lrelu_kernel(x_ref, sc_ref, sh_ref, o_ref):
    """Fused per-channel scale/shift (BatchNorm) + LeakyReLU(0.3)."""
    y = x_ref[...].astype(jnp.float32) * sc_ref[...] + sh_ref[...]
    o_ref[...] = jnp.where(y >= 0.0, y, 0.3 * y).astype(o_ref.dtype)


# ---------------------------------------------------------------------------
# Tiling heuristics / padding helpers
# ---------------------------------------------------------------------------

def _matmul_dims(M, K, N):
    # tm: big tiles when M is large, single tile otherwise (collapse the grid for
    # the tiny late layers — they are weight-streaming bound).
    tm = 512 if M >= 512 else _round_up(M, 16)        # bf16 sublane multiple
    Mp = _round_up(M, tm)
    Kp = _round_up(K, 128)
    tk = min(Kp, 8192 if Mp <= 64 else 2048)          # tiny-M layers: single K step
    while Kp % tk:
        tk //= 2
    Np = _round_up(N, 128)                            # lane-dense output (vst, not vst.msk)
    if Np <= 512:
        tn = Np
    elif Np % 512 == 0:
        tn = 512
    elif Np % 256 == 0:
        tn = 256
    else:
        tn = 128
    return tm, Mp, tk, Kp, tn, Np


def _elem_tile(Mp):
    for t in (1024, 512, 256, 128, 64, 32, 16):
        if t <= Mp and Mp % t == 0:
            return t
    return Mp


def _pad2(x, R, C):
    r, c = x.shape
    if (R, C) != (r, c):
        x = jnp.pad(x, ((0, R - r), (0, C - c)))
    return x


# ---------------------------------------------------------------------------
# pallas_call wrappers (called inside the single top-level jit)
# ---------------------------------------------------------------------------

def _matmul_act(a, b, bias, act, out_dtype):
    """out = act(a @ b + bias); a:[M,K], b:[K,N], bias:[N]. bf16 MXU, f32 acc."""
    M, K = a.shape
    N = b.shape[1]
    tm, Mp, tk, Kp, tn, Np = _matmul_dims(M, K, N)
    a = _pad2(a.astype(jnp.bfloat16), Mp, Kp)
    b = _pad2(b.astype(jnp.bfloat16), Kp, Np)
    bias = jnp.pad(bias.astype(jnp.float32), (0, Np - N)).reshape(1, Np)
    out = pl.pallas_call(
        _make_matmul_act_kernel(act),
        out_shape=jax.ShapeDtypeStruct((Mp, Np), out_dtype),
        grid_spec=pltpu.PrefetchScalarGridSpec(
            num_scalar_prefetch=0,
            grid=(Mp // tm, Np // tn, Kp // tk),
            in_specs=[pl.BlockSpec((tm, tk), lambda i, j, k: (i, k)),
                      pl.BlockSpec((tk, tn), lambda i, j, k: (k, j)),
                      pl.BlockSpec((1, tn), lambda i, j, k: (0, j))],
            out_specs=pl.BlockSpec((tm, tn), lambda i, j, k: (i, j)),
            scratch_shapes=[pltpu.VMEM((tm, tn), jnp.float32)]),
        compiler_params=pltpu.CompilerParams(
            dimension_semantics=("parallel", "parallel", "arbitrary")),
    )(a, b, bias)
    return out[:M, :N]


def _affine_lrelu(y, scale, shift, out_dtype):
    Mp, Np = y.shape
    tm = _elem_tile(Mp)
    return pl.pallas_call(
        _affine_lrelu_kernel,
        out_shape=jax.ShapeDtypeStruct((Mp, Np), out_dtype),
        grid_spec=pltpu.PrefetchScalarGridSpec(
            num_scalar_prefetch=0,
            grid=(Mp // tm,),
            in_specs=[pl.BlockSpec((tm, Np), lambda i: (i, 0)),
                      pl.BlockSpec((1, Np), lambda i: (0, 0)),
                      pl.BlockSpec((1, Np), lambda i: (0, 0))],
            out_specs=pl.BlockSpec((tm, Np), lambda i: (i, 0))),
        compiler_params=pltpu.CompilerParams(dimension_semantics=("parallel",)),
    )(y, scale, shift)


def _matmul_bn_lrelu(a, b, gamma, beta, out_dtype, eps=1e-5):
    """LeakyReLU(BatchNorm(a @ b), 0.3) with training-mode (batch) statistics.
    The per-channel sums are produced by the matmul epilogue itself."""
    M, K = a.shape
    N = b.shape[1]
    tm, Mp, tk, Kp, tn, Np = _matmul_dims(M, K, N)
    G = Mp // tm
    a = _pad2(a.astype(jnp.bfloat16), Mp, Kp)
    b = _pad2(b.astype(jnp.bfloat16), Kp, Np)
    y, s_p, q_p = pl.pallas_call(
        _matmul_bnstats_kernel,
        out_shape=(jax.ShapeDtypeStruct((Mp, Np), jnp.bfloat16),
                   jax.ShapeDtypeStruct((8 * G, Np), jnp.float32),
                   jax.ShapeDtypeStruct((8 * G, Np), jnp.float32)),
        grid_spec=pltpu.PrefetchScalarGridSpec(
            num_scalar_prefetch=0,
            grid=(G, Np // tn, Kp // tk),
            in_specs=[pl.BlockSpec((tm, tk), lambda i, j, k: (i, k)),
                      pl.BlockSpec((tk, tn), lambda i, j, k: (k, j))],
            out_specs=(pl.BlockSpec((tm, tn), lambda i, j, k: (i, j)),
                       pl.BlockSpec((8, tn), lambda i, j, k: (i, j)),
                       pl.BlockSpec((8, tn), lambda i, j, k: (i, j))),
            scratch_shapes=[pltpu.VMEM((tm, tn), jnp.float32)]),
        compiler_params=pltpu.CompilerParams(
            dimension_semantics=("parallel", "parallel", "arbitrary")),
    )(a, b)
    # Tiny final reduction over the G row-blocks (padded rows are exact zeros, so
    # dividing by the true M gives the PyTorch training-mode batch statistics).
    s = jnp.sum(s_p[::8], axis=0)
    q = jnp.sum(q_p[::8], axis=0)
    mean = s / M
    var = jnp.maximum(q / M - mean * mean, 0.0)        # biased variance, clamp fp drift
    gamma_p = jnp.pad(gamma.astype(jnp.float32), (0, Np - N), constant_values=1.0)
    beta_p = jnp.pad(beta.astype(jnp.float32), (0, Np - N))
    inv = gamma_p * jax.lax.rsqrt(var + eps)
    scale = inv.reshape(1, Np)
    shift = (beta_p - mean * inv).reshape(1, Np)
    out = _affine_lrelu(y, scale, shift, out_dtype)
    return out[:M, :N]


# ---------------------------------------------------------------------------
# Conv via im2col + Pallas matmul
# ---------------------------------------------------------------------------

def _im2col_k4p1(x, stride):
    """x: [N,H,W,C] -> patches [N*Ho*Wo, 16*C], K ordered (ky, kx, ci); k=4, p=1."""
    # TODO(synk): patches still materialize a 16x-K (bf16) matrix in HBM; folding the
    # 16 taps into the K grid axis needs strided/Element index maps on the input.
    N, H, W, C = x.shape
    Ho = (H + 2 - 4) // stride + 1
    Wo = (W + 2 - 4) // stride + 1
    xp = jnp.pad(x, ((0, 0), (1, 1), (1, 1), (0, 0)))
    cols = []
    for ky in range(4):
        for kx in range(4):
            cols.append(xp[:, ky:ky + stride * (Ho - 1) + 1:stride,
                           kx:kx + stride * (Wo - 1) + 1:stride, :])
    patches = jnp.stack(cols, axis=3)                  # [N, Ho, Wo, 16, C]
    return patches.reshape(N * Ho * Wo, 16 * C), (N, Ho, Wo)


def _weight_to_matrix(w):
    """Torch Conv2d weight [Cout, Cin, 4, 4] -> [(ky,kx,ci), Cout]."""
    cout, cin = w.shape[0], w.shape[1]
    return jnp.transpose(w, (2, 3, 1, 0)).reshape(16 * cin, cout)


# ---------------------------------------------------------------------------
# Discriminator forward (single top-level jit over all layers)
# ---------------------------------------------------------------------------

D_IN = [6, 64, 128]
D_OUT = [64, 128, 256]


def init_params(key, mean=0.0, std=0.02):
    params = {"down_w": [], "down_bn_gamma": [], "down_bn_beta": []}
    for i, (ci, co) in enumerate(zip(D_IN, D_OUT)):
        key, k = jax.random.split(key)
        params["down_w"].append(mean + std * jax.random.normal(k, (co, ci, 4, 4), jnp.float32))
        if i != 0:                                      # first Down block has no BN
            params["down_bn_gamma"].append(jnp.ones((co,), jnp.float32))
            params["down_bn_beta"].append(jnp.zeros((co,), jnp.float32))
    key, k = jax.random.split(key)
    params["conv1_w"] = mean + std * jax.random.normal(k, (512, 256, 4, 4), jnp.float32)
    params["conv1_b"] = jnp.zeros((512,), jnp.float32)  # init_layer zeroes it
    key, k = jax.random.split(key)
    params["conv2_w"] = mean + std * jax.random.normal(k, (1, 512, 4, 4), jnp.float32)
    params["conv2_b"] = jnp.zeros((1,), jnp.float32)    # init_layer zeroes it
    params["bn_gamma"] = jnp.ones((512,), jnp.float32)
    params["bn_beta"] = jnp.zeros((512,), jnp.float32)
    return params


@jax.jit
def discriminator_forward(params, x_nchw, masks_nchw):
    # torch.cat([x, masks], dim=1), then NCHW -> NHWC, bf16 activations.
    x = jnp.concatenate([x_nchw, masks_nchw], axis=1)
    x = jnp.transpose(x, (0, 2, 3, 1)).astype(jnp.bfloat16)

    # Down blocks: Conv2d(k4, s2, p1, bias=False) -> (BN) -> LeakyReLU(0.3)
    for idx, w in enumerate(params["down_w"]):
        cout = w.shape[0]
        patches, (n, ho, wo) = _im2col_k4p1(x, stride=2)
        wm = _weight_to_matrix(w)
        if idx == 0:
            y = _matmul_act(patches, wm, jnp.zeros((cout,), jnp.float32),
                            "leaky_relu", jnp.bfloat16)
        else:
            y = _matmul_bn_lrelu(patches, wm,
                                 params["down_bn_gamma"][idx - 1],
                                 params["down_bn_beta"][idx - 1],
                                 jnp.bfloat16)
        x = y.reshape(n, ho, wo, cout)

    # conv1 (k4, s1, p1, bias=True) -> BN(512) -> LeakyReLU(0.3).
    # The conv bias is a per-channel constant which training-mode BatchNorm (batch
    # statistics) cancels exactly, so it is dropped from the matmul.
    patches, (n, ho, wo) = _im2col_k4p1(x, stride=1)
    wm1 = _weight_to_matrix(params["conv1_w"])
    y = _matmul_bn_lrelu(patches, wm1, params["bn_gamma"], params["bn_beta"],
                         jnp.bfloat16)
    x = y.reshape(n, ho, wo, 512)

    # conv2 (k4, s1, p1, bias=True) -> sigmoid, fused into the matmul epilogue.
    patches, (n, ho, wo) = _im2col_k4p1(x, stride=1)
    wm2 = _weight_to_matrix(params["conv2_w"])
    y = _matmul_act(patches, wm2, params["conv2_b"], "sigmoid", jnp.float32)
    y = y.reshape(n, ho, wo, 1)
    return jnp.transpose(y, (0, 3, 1, 2))               # NHWC -> NCHW


if __name__ == "__main__":
    key = jax.random.PRNGKey(0)
    pkey, xkey, mkey = jax.random.split(key, 3)
    params = init_params(pkey)
    # 3 stride-2 downsamplings + two valid-ish k4/s1/p1 convs need spatial >= 32.
    x = jax.random.normal(xkey, (2, 3, 32, 32), jnp.float32)
    masks = jax.random.normal(mkey, (2, 3, 32, 32), jnp.float32)
    out = discriminator_forward(params, x, masks)
    out = jax.block_until_ready(out)
    assert out.shape == (2, 1, 2, 2), out.shape
    assert bool(jnp.all(jnp.isfinite(out)))
    assert bool(jnp.all((out >= 0.0) & (out <= 1.0)))
    print("KERNEL_OK")
</pallas_src>

<mosaic_0001>
module attributes {stable_mosaic.version = 11 : i64} {
  func.func @kernel(%arg0: i32, %arg1: i32, %arg2: i32, %arg3: memref<512x128xbf16, #tpu.memory_space<vmem>>, %arg4: memref<128x128xbf16, #tpu.memory_space<vmem>>, %arg5: memref<1x128xf32, #tpu.memory_space<vmem>>, %arg6: memref<512x128xbf16, #tpu.memory_space<vmem>>, %arg7: memref<512x128xf32, #tpu.memory_space<vmem>>) attributes {dimension_semantics = [#tpu.dimension_semantics<parallel>, #tpu.dimension_semantics<parallel>, #tpu.dimension_semantics<arbitrary>], iteration_bounds = array<i64: 1, 1, 1>, scalar_prefetch = 0 : i64, scratch_operands = 1 : i64, tpu.core_type = #tpu.core_type<tc>, window_params = [{transform_indices = @transform_0, window_bounds = array<i64: 512, 128>}, {transform_indices = @transform_1, window_bounds = array<i64: 128, 128>}, {transform_indices = @transform_2, window_bounds = array<i64: 1, 128>}, {transform_indices = @transform_3, window_bounds = array<i64: 512, 128>}]} {
    %c0_i32 = arith.constant 0 : i32
    %0 = arith.cmpi eq, %arg2, %c0_i32 : i32
    %1 = arith.extui %0 : i1 to i32
    %c0_i32_0 = arith.constant 0 : i32
    %2 = arith.cmpi ne, %1, %c0_i32_0 : i32
    scf.if %2 {
      %cst_10 = arith.constant 0.000000e+00 : f32
      %12 = vector.broadcast %cst_10 : f32 to vector<512x128xf32>
      %c0_11 = arith.constant 0 : index
      %c0_12 = arith.constant 0 : index
      %13 = vector.load %arg7[%c0_11, %c0_12] : memref<512x128xf32, #tpu.memory_space<vmem>>, vector<512x128xf32>
      tpu.vector_store %arg7[%c0_11, %c0_12], %12 {strides = array<i32>} : memref<512x128xf32, #tpu.memory_space<vmem>>, vector<512x128xf32>,
    } else {
    }
    %c0 = arith.constant 0 : index
    %c0_1 = arith.constant 0 : index
    %3 = vector.load %arg7[%c0, %c0_1] : memref<512x128xf32, #tpu.memory_space<vmem>>, vector<512x128xf32>
    %c0_2 = arith.constant 0 : index
    %c0_3 = arith.constant 0 : index
    %4 = vector.load %arg3[%c0_2, %c0_3] : memref<512x128xbf16, #tpu.memory_space<vmem>>, vector<512x128xbf16>
    %c0_4 = arith.constant 0 : index
    %c0_5 = arith.constant 0 : index
    %5 = vector.load %arg4[%c0_4, %c0_5] : memref<128x128xbf16, #tpu.memory_space<vmem>>, vector<128x128xbf16>
    %cst = arith.constant dense<0.000000e+00> : vector<512x128xf32>
    %6 = tpu.matmul %4, %5, %cst {dimension_numbers = #tpu.dot_dimension_numbers<[1], [0], [0], [1], [0, 0, 1, 1], [], []>} : vector<512x128xbf16>, vector<128x128xbf16>, vector<512x128xf32> -> vector<512x128xf32>
    %7 = arith.addf %3, %6 : vector<512x128xf32>
    %c0_6 = arith.constant 0 : index
    %c0_7 = arith.constant 0 : index
    %8 = vector.load %arg7[%c0_6, %c0_7] : memref<512x128xf32, #tpu.memory_space<vmem>>, vector<512x128xf32>
    tpu.vector_store %arg7[%c0_6, %c0_7], %7 {strides = array<i32>} : memref<512x128xf32, #tpu.memory_space<vmem>>, vector<512x128xf32>,
    %c0_i32_8 = arith.constant 0 : i32
    %9 = arith.cmpi eq, %arg2, %c0_i32_8 : i32
    %10 = arith.extui %9 : i1 to i32
    %c0_i32_9 = arith.constant 0 : i32
    %11 = arith.cmpi ne, %10, %c0_i32_9 : i32
    scf.if %11 {
      %c0_10 = arith.constant 0 : index
      %c0_11 = arith.constant 0 : index
      %12 = vector.load %arg7[%c0_10, %c0_11] : memref<512x128xf32, #tpu.memory_space<vmem>>, vector<512x128xf32>
      %c0_12 = arith.constant 0 : index
      %c0_13 = arith.constant 0 : index
      %13 = vector.load %arg5[%c0_12, %c0_13] : memref<1x128xf32, #tpu.memory_space<vmem>>, vector<1x128xf32>
      %14 = vector.broadcast %13 : vector<1x128xf32> to vector<512x128xf32>
      %15 = arith.addf %12, %14 : vector<512x128xf32>
      %cst_14 = arith.constant 0.000000e+00 : f32
      %16 = vector.broadcast %cst_14 : f32 to vector<512x128xf32>
      %17 = arith.cmpf oge, %15, %16 : vector<512x128xf32>
      %cst_15 = arith.constant 3.000000e-01 : f32
      %18 = vector.broadcast %cst_15 : f32 to vector<512x128xf32>
      %19 = arith.mulf %18, %15 : vector<512x128xf32>
      %20 = arith.select %17, %15, %19 : vector<512x128xi1>, vector<512x128xf32>
      %21 = arith.truncf %20 : vector<512x128xf32> to vector<512x128xbf16>
      %c0_16 = arith.constant 0 : index
      %c0_17 = arith.constant 0 : index
      %22 = vector.load %arg6[%c0_16, %c0_17] : memref<512x128xbf16, #tpu.memory_space<vmem>>, vector<512x128xbf16>
      tpu.vector_store %arg6[%c0_16, %c0_17], %21 {strides = array<i32>} : memref<512x128xbf16, #tpu.memory_space<vmem>>, vector<512x128xbf16>,
    } else {
    }
    return
  }
  func.func @transform_0(%arg0: i32, %arg1: i32, %arg2: i32) -> (i32, i32) {
    %c0_i32 = arith.constant 0 : i32
    return %arg0, %arg2 : i32, i32
  }
  func.func @transform_1(%arg0: i32, %arg1: i32, %arg2: i32) -> (i32, i32) {
    %c0_i32 = arith.constant 0 : i32
    return %arg2, %arg1 : i32, i32
  }
  func.func @transform_2(%arg0: i32, %arg1: i32, %arg2: i32) -> (i32, i32) {
    %c0_i32 = arith.constant 0 : i32
    %c0_i32_0 = arith.constant 0 : i32
    return %c0_i32, %arg1 : i32, i32
  }
  func.func @transform_3(%arg0: i32, %arg1: i32, %arg2: i32) -> (i32, i32) {
    %c0_i32 = arith.constant 0 : i32
    return %arg0, %arg1 : i32, i32
  }
}

module attributes {stable_mosaic.version = 11 : i64} {
  func.func @_matmul_bnstats_kernel(%arg0: i32, %arg1: i32, %arg2: i32, %arg3: memref<128x1024xbf16, #tpu.memory_space<vmem>>, %arg4: memref<1024x128xbf16, #tpu.memory_space<vmem>>, %arg5: memref<128x128xbf16, #tpu.memory_space<vmem>>, %arg6: memref<8x128xf32, #tpu.memory_space<vmem>>, %arg7: memref<8x128xf32, #tpu.memory_space<vmem>>, %arg8: memref<128x128xf32, #tpu.memory_space<vmem>>) attributes {dimension_semantics = [#tpu.dimension_semantics<parallel>, #tpu.dimension_semantics<parallel>, #tpu.dimension_semantics<arbitrary>], iteration_bounds = array<i64: 1, 1, 1>, scalar_prefetch = 0 : i64, scratch_operands = 1 : i64, tpu.core_type = #tpu.core_type<tc>, window_params = [{transform_indices = @transform_0, window_bounds = array<i64: 128, 1024>}, {transform_indices = @transform_1, window_bounds = array<i64: 1024, 128>}, {transform_indices = @transform_2, window_bounds = array<i64: 128, 128>}, {transform_indices = @transform_3, window_bounds = array<i64: 8, 128>}, {transform_indices = @transform_4, window_bounds = array<i64: 8, 128>}]} {
    %c0_i32 = arith.constant 0 : i32
    %0 = arith.cmpi eq, %arg2, %c0_i32 : i32
    %1 = arith.extui %0 : i1 to i32
    %c0_i32_0 = arith.constant 0 : i32
    %2 = arith.cmpi ne, %1, %c0_i32_0 : i32
    scf.if %2 {
      %cst_10 = arith.constant 0.000000e+00 : f32
      %12 = vector.broadcast %cst_10 : f32 to vector<128x128xf32>
      %c0_11 = arith.constant 0 : index
      %c0_12 = arith.constant 0 : index
      %13 = vector.load %arg8[%c0_11, %c0_12] : memref<128x128xf32, #tpu.memory_space<vmem>>, vector<128x128xf32>
      tpu.vector_store %arg8[%c0_11, %c0_12], %12 {strides = array<i32>} : memref<128x128xf32, #tpu.memory_space<vmem>>, vector<128x128xf32>,
    } else {
    }
    %c0 = arith.constant 0 : index
    %c0_1 = arith.constant 0 : index
    %3 = vector.load %arg8[%c0, %c0_1] : memref<128x128xf32, #tpu.memory_space<vmem>>, vector<128x128xf32>
    %c0_2 = arith.constant 0 : index
    %c0_3 = arith.constant 0 : index
    %4 = vector.load %arg3[%c0_2, %c0_3] : memref<128x1024xbf16, #tpu.memory_space<vmem>>, vector<128x1024xbf16>
    %c0_4 = arith.constant 0 : index
    %c0_5 = arith.constant 0 : index
    %5 = vector.load %arg4[%c0_4, %c0_5] : memref<1024x128xbf16, #tpu.memory_space<vmem>>, vector<1024x128xbf16>
    %cst = arith.constant dense<0.000000e+00> : vector<128x128xf32>
    %6 = tpu.matmul %4, %5, %cst {dimension_numbers = #tpu.dot_dimension_numbers<[1], [0], [0], [1], [0, 0, 1, 1], [], []>} : vector<128x1024xbf16>, vector<1024x128xbf16>, vector<128x128xf32> -> vector<128x128xf32>
    %7 = arith.addf %3, %6 : vector<128x128xf32>
    %c0_6 = arith.constant 0 : index
    %c0_7 = arith.constant 0 : index
    %8 = vector.load %arg8[%c0_6, %c0_7] : memref<128x128xf32, #tpu.memory_space<vmem>>, vector<128x128xf32>
    tpu.vector_store %arg8[%c0_6, %c0_7], %7 {strides = array<i32>} : memref<128x128xf32, #tpu.memory_space<vmem>>, vector<128x128xf32>,
    %c0_i32_8 = arith.constant 0 : i32
    %9 = arith.cmpi eq, %arg2, %c0_i32_8 : i32
    %10 = arith.extui %9 : i1 to i32
    %c0_i32_9 = arith.constant 0 : i32
    %11 = arith.cmpi ne, %10, %c0_i32_9 : i32
    scf.if %11 {
      %c0_10 = arith.constant 0 : index
      %c0_11 = arith.constant 0 : index
      %12 = vector.load %arg8[%c0_10, %c0_11] : memref<128x128xf32, #tpu.memory_space<vmem>>, vector<128x128xf32>
      %13 = arith.truncf %12 : vector<128x128xf32> to vector<128x128xbf16>
      %c0_12 = arith.constant 0 : index
      %c0_13 = arith.constant 0 : index
      %14 = vector.load %arg5[%c0_12, %c0_13] : memref<128x128xbf16, #tpu.memory_space<vmem>>, vector<128x128xbf16>
      tpu.vector_store %arg5[%c0_12, %c0_13], %13 {strides = array<i32>} : memref<128x128xbf16, #tpu.memory_space<vmem>>, vector<128x128xbf16>,
      %cst_14 = arith.constant dense<0.000000e+00> : vector<128xf32>
      %15 = vector.multi_reduction <add>, %12, %cst_14 [0] : vector<128x128xf32> to vector<128xf32>
      %16 = vector.shape_cast %15 : vector<128xf32> to vector<1x128xf32>
      %17 = vector.shape_cast %16 : vector<1x128xf32> to vector<1x128xf32>
      %18 = vector.broadcast %17 : vector<1x128xf32> to vector<8x128xf32>
      %c0_15 = arith.constant 0 : index
      %c0_16 = arith.constant 0 : index
      %19 = vector.load %arg6[%c0_15, %c0_16] : memref<8x128xf32, #tpu.memory_space<vmem>>, vector<8x128xf32>
      tpu.vector_store %arg6[%c0_15, %c0_16], %18 {strides = array<i32>} : memref<8x128xf32, #tpu.memory_space<vmem>>, vector<8x128xf32>,
      %20 = arith.mulf %12, %12 : vector<128x128xf32>
      %cst_17 = arith.constant dense<0.000000e+00> : vector<128xf32>
      %21 = vector.multi_reduction <add>, %20, %cst_17 [0] : vector<128x128xf32> to vector<128xf32>
      %22 = vector.shape_cast %21 : vector<128xf32> to vector<1x128xf32>
      %23 = vector.shape_cast %22 : vector<1x128xf32> to vector<1x128xf32>
      %24 = vector.broadcast %23 : vector<1x128xf32> to vector<8x128xf32>
      %c0_18 = arith.constant 0 : index
      %c0_19 = arith.constant 0 : index
      %25 = vector.load %arg7[%c0_18, %c0_19] : memref<8x128xf32, #tpu.memory_space<vmem>>, vector<8x128xf32>
      tpu.vector_store %arg7[%c0_18, %c0_19], %24 {strides = array<i32>} : memref<8x128xf32, #tpu.memory_space<vmem>>, vector<8x128xf32>,
    } else {
    }
    return
  }
  func.func @transform_0(%arg0: i32, %arg1: i32, %arg2: i32) -> (i32, i32) {
    %c0_i32 = arith.constant 0 : i32
    return %arg0, %arg2 : i32, i32
  }
  func.func @transform_1(%arg0: i32, %arg1: i32, %arg2: i32) -> (i32, i32) {
    %c0_i32 = arith.constant 0 : i32
    return %arg2, %arg1 : i32, i32
  }
  func.func @transform_2(%arg0: i32, %arg1: i32, %arg2: i32) -> (i32, i32) {
    %c0_i32 = arith.constant 0 : i32
    return %arg0, %arg1 : i32, i32
  }
  func.func @transform_3(%arg0: i32, %arg1: i32, %arg2: i32) -> (i32, i32) {
    %c0_i32 = arith.constant 0 : i32
    return %arg0, %arg1 : i32, i32
  }
  func.func @transform_4(%arg0: i32, %arg1: i32, %arg2: i32) -> (i32, i32) {
    %c0_i32 = arith.constant 0 : i32
    return %arg0, %arg1 : i32, i32
  }
}

module attributes {stable_mosaic.version = 11 : i64} {
  func.func @_affine_lrelu_kernel(%arg0: i32, %arg1: memref<128x128xbf16, #tpu.memory_space<vmem>>, %arg2: memref<1x128xf32, #tpu.memory_space<vmem>>, %arg3: memref<1x128xf32, #tpu.memory_space<vmem>>, %arg4: memref<128x128xbf16, #tpu.memory_space<vmem>>) attributes {dimension_semantics = [#tpu.dimension_semantics<parallel>], iteration_bounds = array<i64: 1>, scalar_prefetch = 0 : i64, scratch_operands = 0 : i64, tpu.core_type = #tpu.core_type<tc>, window_params = [{transform_indices = @transform_0, window_bounds = array<i64: 128, 128>}, {pipeline_mode = #tpu.pipeline_mode<synchronous>, transform_indices = @transform_1, window_bounds = array<i64: 1, 128>}, {pipeline_mode = #tpu.pipeline_mode<synchronous>, transform_indices = @transform_2, window_bounds = array<i64: 1, 128>}, {transform_indices = @transform_3, window_bounds = array<i64: 128, 128>}]} {
    %c0 = arith.constant 0 : index
    %c0_0 = arith.constant 0 : index
    %0 = vector.load %arg1[%c0, %c0_0] : memref<128x128xbf16, #tpu.memory_space<vmem>>, vector<128x128xbf16>
    %1 = arith.extf %0 : vector<128x128xbf16> to vector<128x128xf32>
    %c0_1 = arith.constant 0 : index
    %c0_2 = arith.constant 0 : index
    %2 = vector.load %arg2[%c0_1, %c0_2] : memref<1x128xf32, #tpu.memory_space<vmem>>, vector<1x128xf32>
    %3 = vector.broadcast %2 : vector<1x128xf32> to vector<128x128xf32>
    %4 = arith.mulf %1, %3 : vector<128x128xf32>
    %c0_3 = arith.constant 0 : index
    %c0_4 = arith.constant 0 : index
    %5 = vector.load %arg3[%c0_3, %c0_4] : memref<1x128xf32, #tpu.memory_space<vmem>>, vector<1x128xf32>
    %6 = vector.broadcast %5 : vector<1x128xf32> to vector<128x128xf32>
    %7 = arith.addf %4, %6 : vector<128x128xf32>
    %cst = arith.constant 0.000000e+00 : f32
    %8 = vector.broadcast %cst : f32 to vector<128x128xf32>
    %9 = arith.cmpf oge, %7, %8 : vector<128x128xf32>
    %cst_5 = arith.constant 3.000000e-01 : f32
    %10 = vector.broadcast %cst_5 : f32 to vector<128x128xf32>
    %11 = arith.mulf %10, %7 : vector<128x128xf32>
    %12 = arith.select %9, %7, %11 : vector<128x128xi1>, vector<128x128xf32>
    %13 = arith.truncf %12 : vector<128x128xf32> to vector<128x128xbf16>
    %c0_6 = arith.constant 0 : index
    %c0_7 = arith.constant 0 : index
    %14 = vector.load %arg4[%c0_6, %c0_7] : memref<128x128xbf16, #tpu.memory_space<vmem>>, vector<128x128xbf16>
    tpu.vector_store %arg4[%c0_6, %c0_7], %13 {strides = array<i32>} : memref<128x128xbf16, #tpu.memory_space<vmem>>, vector<128x128xbf16>,
    return
  }
  func.func @transform_0(%arg0: i32) -> (i32, i32) {
    %c0_i32 = arith.constant 0 : i32
    %c0_i32_0 = arith.constant 0 : i32
    return %arg0, %c0_i32 : i32, i32
  }
  func.func @transform_1(%arg0: i32) -> (i32, i32) {
    %c0_i32 = arith.constant 0 : i32
    %c0_i32_0 = arith.constant 0 : i32
    %c0_i32_1 = arith.constant 0 : i32
    return %c0_i32, %c0_i32_0 : i32, i32
  }
  func.func @transform_2(%arg0: i32) -> (i32, i32) {
    %c0_i32 = arith.constant 0 : i32
    %c0_i32_0 = arith.constant 0 : i32
    %c0_i32_1 = arith.constant 0 : i32
    return %c0_i32, %c0_i32_0 : i32, i32
  }
  func.func @transform_3(%arg0: i32) -> (i32, i32) {
    %c0_i32 = arith.constant 0 : i32
    %c0_i32_0 = arith.constant 0 : i32
    return %arg0, %c0_i32 : i32, i32
  }
}

module attributes {stable_mosaic.version = 11 : i64} {
  func.func @_matmul_bnstats_kernel(%arg0: i32, %arg1: i32, %arg2: i32, %arg3: memref<32x2048xbf16, #tpu.memory_space<vmem>>, %arg4: memref<2048x256xbf16, #tpu.memory_space<vmem>>, %arg5: memref<32x256xbf16, #tpu.memory_space<vmem>>, %arg6: memref<8x256xf32, #tpu.memory_space<vmem>>, %arg7: memref<8x256xf32, #tpu.memory_space<vmem>>, %arg8: memref<32x256xf32, #tpu.memory_space<vmem>>) attributes {dimension_semantics = [#tpu.dimension_semantics<parallel>, #tpu.dimension_semantics<parallel>, #tpu.dimension_semantics<arbitrary>], iteration_bounds = array<i64: 1, 1, 1>, scalar_prefetch = 0 : i64, scratch_operands = 1 : i64, tpu.core_type = #tpu.core_type<tc>, window_params = [{transform_indices = @transform_0, window_bounds = array<i64: 32, 2048>}, {transform_indices = @transform_1, window_bounds = array<i64: 2048, 256>}, {transform_indices = @transform_2, window_bounds = array<i64: 32, 256>}, {transform_indices = @transform_3, window_bounds = array<i64: 8, 256>}, {transform_indices = @transform_4, window_bounds = array<i64: 8, 256>}]} {
    %c0_i32 = arith.constant 0 : i32
    %0 = arith.cmpi eq, %arg2, %c0_i32 : i32
    %1 = arith.extui %0 : i1 to i32
    %c0_i32_0 = arith.constant 0 : i32
    %2 = arith.cmpi ne, %1, %c0_i32_0 : i32
    scf.if %2 {
      %cst_10 = arith.constant 0.000000e+00 : f32
      %12 = vector.broadcast %cst_10 : f32 to vector<32x256xf32>
      %c0_11 = arith.constant 0 : index
      %c0_12 = arith.constant 0 : index
      %13 = vector.load %arg8[%c0_11, %c0_12] : memref<32x256xf32, #tpu.memory_space<vmem>>, vector<32x256xf32>
      tpu.vector_store %arg8[%c0_11, %c0_12], %12 {strides = array<i32>} : memref<32x256xf32, #tpu.memory_space<vmem>>, vector<32x256xf32>,
    } else {
    }
    %c0 = arith.constant 0 : index
    %c0_1 = arith.constant 0 : index
    %3 = vector.load %arg8[%c0, %c0_1] : memref<32x256xf32, #tpu.memory_space<vmem>>, vector<32x256xf32>
    %c0_2 = arith.constant 0 : index
    %c0_3 = arith.constant 0 : index
    %4 = vector.load %arg3[%c0_2, %c0_3] : memref<32x2048xbf16, #tpu.memory_space<vmem>>, vector<32x2048xbf16>
    %c0_4 = arith.constant 0 : index
    %c0_5 = arith.constant 0 : index
    %5 = vector.load %arg4[%c0_4, %c0_5] : memref<2048x256xbf16, #tpu.memory_space<vmem>>, vector<2048x256xbf16>
    %cst = arith.constant dense<0.000000e+00> : vector<32x256xf32>
    %6 = tpu.matmul %4, %5, %cst {dimension_numbers = #tpu.dot_dimension_numbers<[1], [0], [0], [1], [0, 0, 1, 1], [], []>} : vector<32x2048xbf16>, vector<2048x256xbf16>, vector<32x256xf32> -> vector<32x256xf32>
    %7 = arith.addf %3, %6 : vector<32x256xf32>
    %c0_6 = arith.constant 0 : index
    %c0_7 = arith.constant 0 : index
    %8 = vector.load %arg8[%c0_6, %c0_7] : memref<32x256xf32, #tpu.memory_space<vmem>>, vector<32x256xf32>
    tpu.vector_store %arg8[%c0_6, %c0_7], %7 {strides = array<i32>} : memref<32x256xf32, #tpu.memory_space<vmem>>, vector<32x256xf32>,
    %c0_i32_8 = arith.constant 0 : i32
    %9 = arith.cmpi eq, %arg2, %c0_i32_8 : i32
    %10 = arith.extui %9 : i1 to i32
    %c0_i32_9 = arith.constant 0 : i32
    %11 = arith.cmpi ne, %10, %c0_i32_9 : i32
    scf.if %11 {
      %c0_10 = arith.constant 0 : index
      %c0_11 = arith.constant 0 : index
      %12 = vector.load %arg8[%c0_10, %c0_11] : memref<32x256xf32, #tpu.memory_space<vmem>>, vector<32x256xf32>
      %13 = arith.truncf %12 : vector<32x256xf32> to vector<32x256xbf16>
      %c0_12 = arith.constant 0 : index
      %c0_13 = arith.constant 0 : index
      %14 = vector.load %arg5[%c0_12, %c0_13] : memref<32x256xbf16, #tpu.memory_space<vmem>>, vector<32x256xbf16>
      tpu.vector_store %arg5[%c0_12, %c0_13], %13 {strides = array<i32>} : memref<32x256xbf16, #tpu.memory_space<vmem>>, vector<32x256xbf16>,
      %cst_14 = arith.constant dense<0.000000e+00> : vector<256xf32>
      %15 = vector.multi_reduction <add>, %12, %cst_14 [0] : vector<32x256xf32> to vector<256xf32>
      %16 = vector.shape_cast %15 : vector<256xf32> to vector<1x256xf32>
      %17 = vector.shape_cast %16 : vector<1x256xf32> to vector<1x256xf32>
      %18 = vector.broadcast %17 : vector<1x256xf32> to vector<8x256xf32>
      %c0_15 = arith.constant 0 : index
      %c0_16 = arith.constant 0 : index
      %19 = vector.load %arg6[%c0_15, %c0_16] : memref<8x256xf32, #tpu.memory_space<vmem>>, vector<8x256xf32>
      tpu.vector_store %arg6[%c0_15, %c0_16], %18 {strides = array<i32>} : memref<8x256xf32, #tpu.memory_space<vmem>>, vector<8x256xf32>,
      %20 = arith.mulf %12, %12 : vector<32x256xf32>
      %cst_17 = arith.constant dense<0.000000e+00> : vector<256xf32>
      %21 = vector.multi_reduction <add>, %20, %cst_17 [0] : vector<32x256xf32> to vector<256xf32>
      %22 = vector.shape_cast %21 : vector<256xf32> to vector<1x256xf32>
      %23 = vector.shape_cast %22 : vector<1x256xf32> to vector<1x256xf32>
      %24 = vector.broadcast %23 : vector<1x256xf32> to vector<8x256xf32>
      %c0_18 = arith.constant 0 : index
      %c0_19 = arith.constant 0 : index
      %25 = vector.load %arg7[%c0_18, %c0_19] : memref<8x256xf32, #tpu.memory_space<vmem>>, vector<8x256xf32>
      tpu.vector_store %arg7[%c0_18, %c0_19], %24 {strides = array<i32>} : memref<8x256xf32, #tpu.memory_space<vmem>>, vector<8x256xf32>,
    } else {
    }
    return
  }
  func.func @transform_0(%arg0: i32, %arg1: i32, %arg2: i32) -> (i32, i32) {
    %c0_i32 = arith.constant 0 : i32
    return %arg0, %arg2 : i32, i32
  }
  func.func @transform_1(%arg0: i32, %arg1: i32, %arg2: i32) -> (i32, i32) {
    %c0_i32 = arith.constant 0 : i32
    return %arg2, %arg1 : i32, i32
  }
  func.func @transform_2(%arg0: i32, %arg1: i32, %arg2: i32) -> (i32, i32) {
    %c0_i32 = arith.constant 0 : i32
    return %arg0, %arg1 : i32, i32
  }
  func.func @transform_3(%arg0: i32, %arg1: i32, %arg2: i32) -> (i32, i32) {
    %c0_i32 = arith.constant 0 : i32
    return %arg0, %arg1 : i32, i32
  }
  func.func @transform_4(%arg0: i32, %arg1: i32, %arg2: i32) -> (i32, i32) {
    %c0_i32 = arith.constant 0 : i32
    return %arg0, %arg1 : i32, i32
  }
}

module attributes {stable_mosaic.version = 11 : i64} {
  func.func @_affine_lrelu_kernel(%arg0: i32, %arg1: memref<32x256xbf16, #tpu.memory_space<vmem>>, %arg2: memref<1x256xf32, #tpu.memory_space<vmem>>, %arg3: memref<1x256xf32, #tpu.memory_space<vmem>>, %arg4: memref<32x256xbf16, #tpu.memory_space<vmem>>) attributes {dimension_semantics = [#tpu.dimension_semantics<parallel>], iteration_bounds = array<i64: 1>, scalar_prefetch = 0 : i64, scratch_operands = 0 : i64, tpu.core_type = #tpu.core_type<tc>, window_params = [{transform_indices = @transform_0, window_bounds = array<i64: 32, 256>}, {pipeline_mode = #tpu.pipeline_mode<synchronous>, transform_indices = @transform_1, window_bounds = array<i64: 1, 256>}, {pipeline_mode = #tpu.pipeline_mode<synchronous>, transform_indices = @transform_2, window_bounds = array<i64: 1, 256>}, {transform_indices = @transform_3, window_bounds = array<i64: 32, 256>}]} {
    %c0 = arith.constant 0 : index
    %c0_0 = arith.constant 0 : index
    %0 = vector.load %arg1[%c0, %c0_0] : memref<32x256xbf16, #tpu.memory_space<vmem>>, vector<32x256xbf16>
    %1 = arith.extf %0 : vector<32x256xbf16> to vector<32x256xf32>
    %c0_1 = arith.constant 0 : index
    %c0_2 = arith.constant 0 : index
    %2 = vector.load %arg2[%c0_1, %c0_2] : memref<1x256xf32, #tpu.memory_space<vmem>>, vector<1x256xf32>
    %3 = vector.broadcast %2 : vector<1x256xf32> to vector<32x256xf32>
    %4 = arith.mulf %1, %3 : vector<32x256xf32>
    %c0_3 = arith.constant 0 : index
    %c0_4 = arith.constant 0 : index
    %5 = vector.load %arg3[%c0_3, %c0_4] : memref<1x256xf32, #tpu.memory_space<vmem>>, vector<1x256xf32>
    %6 = vector.broadcast %5 : vector<1x256xf32> to vector<32x256xf32>
    %7 = arith.addf %4, %6 : vector<32x256xf32>
    %cst = arith.constant 0.000000e+00 : f32
    %8 = vector.broadcast %cst : f32 to vector<32x256xf32>
    %9 = arith.cmpf oge, %7, %8 : vector<32x256xf32>
    %cst_5 = arith.constant 3.000000e-01 : f32
    %10 = vector.broadcast %cst_5 : f32 to vector<32x256xf32>
    %11 = arith.mulf %10, %7 : vector<32x256xf32>
    %12 = arith.select %9, %7, %11 : vector<32x256xi1>, vector<32x256xf32>
    %13 = arith.truncf %12 : vector<32x256xf32> to vector<32x256xbf16>
    %c0_6 = arith.constant 0 : index
    %c0_7 = arith.constant 0 : index
    %14 = vector.load %arg4[%c0_6, %c0_7] : memref<32x256xbf16, #tpu.memory_space<vmem>>, vector<32x256xbf16>
    tpu.vector_store %arg4[%c0_6, %c0_7], %13 {strides = array<i32>} : memref<32x256xbf16, #tpu.memory_space<vmem>>, vector<32x256xbf16>,
    return
  }
  func.func @transform_0(%arg0: i32) -> (i32, i32) {
    %c0_i32 = arith.constant 0 : i32
    %c0_i32_0 = arith.constant 0 : i32
    return %arg0, %c0_i32 : i32, i32
  }
  func.func @transform_1(%arg0: i32) -> (i32, i32) {
    %c0_i32 = arith.constant 0 : i32
    %c0_i32_0 = arith.constant 0 : i32
    %c0_i32_1 = arith.constant 0 : i32
    return %c0_i32, %c0_i32_0 : i32, i32
  }
  func.func @transform_2(%arg0: i32) -> (i32, i32) {
    %c0_i32 = arith.constant 0 : i32
    %c0_i32_0 = arith.constant 0 : i32
    %c0_i32_1 = arith.constant 0 : i32
    return %c0_i32, %c0_i32_0 : i32, i32
  }
  func.func @transform_3(%arg0: i32) -> (i32, i32) {
    %c0_i32 = arith.constant 0 : i32
    %c0_i32_0 = arith.constant 0 : i32
    return %arg0, %c0_i32 : i32, i32
  }
}

module attributes {stable_mosaic.version = 11 : i64} {
  func.func @_matmul_bnstats_kernel(%arg0: i32, %arg1: i32, %arg2: i32, %arg3: memref<32x4096xbf16, #tpu.memory_space<vmem>>, %arg4: memref<4096x512xbf16, #tpu.memory_space<vmem>>, %arg5: memref<32x512xbf16, #tpu.memory_space<vmem>>, %arg6: memref<8x512xf32, #tpu.memory_space<vmem>>, %arg7: memref<8x512xf32, #tpu.memory_space<vmem>>, %arg8: memref<32x512xf32, #tpu.memory_space<vmem>>) attributes {dimension_semantics = [#tpu.dimension_semantics<parallel>, #tpu.dimension_semantics<parallel>, #tpu.dimension_semantics<arbitrary>], iteration_bounds = array<i64: 1, 1, 1>, scalar_prefetch = 0 : i64, scratch_operands = 1 : i64, tpu.core_type = #tpu.core_type<tc>, window_params = [{transform_indices = @transform_0, window_bounds = array<i64: 32, 4096>}, {transform_indices = @transform_1, window_bounds = array<i64: 4096, 512>}, {transform_indices = @transform_2, window_bounds = array<i64: 32, 512>}, {transform_indices = @transform_3, window_bounds = array<i64: 8, 512>}, {transform_indices = @transform_4, window_bounds = array<i64: 8, 512>}]} {
    %c0_i32 = arith.constant 0 : i32
    %0 = arith.cmpi eq, %arg2, %c0_i32 : i32
    %1 = arith.extui %0 : i1 to i32
    %c0_i32_0 = arith.constant 0 : i32
    %2 = arith.cmpi ne, %1, %c0_i32_0 : i32
    scf.if %2 {
      %cst_10 = arith.constant 0.000000e+00 : f32
      %12 = vector.broadcast %cst_10 : f32 to vector<32x512xf32>
      %c0_11 = arith.constant 0 : index
      %c0_12 = arith.constant 0 : index
      %13 = vector.load %arg8[%c0_11, %c0_12] : memref<32x512xf32, #tpu.memory_space<vmem>>, vector<32x512xf32>
      tpu.vector_store %arg8[%c0_11, %c0_12], %12 {strides = array<i32>} : memref<32x512xf32, #tpu.memory_space<vmem>>, vector<32x512xf32>,
    } else {
    }
    %c0 = arith.constant 0 : index
    %c0_1 = arith.constant 0 : index
    %3 = vector.load %arg8[%c0, %c0_1] : memref<32x512xf32, #tpu.memory_space<vmem>>, vector<32x512xf32>
    %c0_2 = arith.constant 0 : index
    %c0_3 = arith.constant 0 : index
    %4 = vector.load %arg3[%c0_2, %c0_3] : memref<32x4096xbf16, #tpu.memory_space<vmem>>, vector<32x4096xbf16>
    %c0_4 = arith.constant 0 : index
    %c0_5 = arith.constant 0 : index
    %5 = vector.load %arg4[%c0_4, %c0_5] : memref<4096x512xbf16, #tpu.memory_space<vmem>>, vector<4096x512xbf16>
    %cst = arith.constant dense<0.000000e+00> : vector<32x512xf32>
    %6 = tpu.matmul %4, %5, %cst {dimension_numbers = #tpu.dot_dimension_numbers<[1], [0], [0], [1], [0, 0, 1, 1], [], []>} : vector<32x4096xbf16>, vector<4096x512xbf16>, vector<32x512xf32> -> vector<32x512xf32>
    %7 = arith.addf %3, %6 : vector<32x512xf32>
    %c0_6 = arith.constant 0 : index
    %c0_7 = arith.constant 0 : index
    %8 = vector.load %arg8[%c0_6, %c0_7] : memref<32x512xf32, #tpu.memory_space<vmem>>, vector<32x512xf32>
    tpu.vector_store %arg8[%c0_6, %c0_7], %7 {strides = array<i32>} : memref<32x512xf32, #tpu.memory_space<vmem>>, vector<32x512xf32>,
    %c0_i32_8 = arith.constant 0 : i32
    %9 = arith.cmpi eq, %arg2, %c0_i32_8 : i32
    %10 = arith.extui %9 : i1 to i32
    %c0_i32_9 = arith.constant 0 : i32
    %11 = arith.cmpi ne, %10, %c0_i32_9 : i32
    scf.if %11 {
      %c0_10 = arith.constant 0 : index
      %c0_11 = arith.constant 0 : index
      %12 = vector.load %arg8[%c0_10, %c0_11] : memref<32x512xf32, #tpu.memory_space<vmem>>, vector<32x512xf32>
      %13 = arith.truncf %12 : vector<32x512xf32> to vector<32x512xbf16>
      %c0_12 = arith.constant 0 : index
      %c0_13 = arith.constant 0 : index
      %14 = vector.load %arg5[%c0_12, %c0_13] : memref<32x512xbf16, #tpu.memory_space<vmem>>, vector<32x512xbf16>
      tpu.vector_store %arg5[%c0_12, %c0_13], %13 {strides = array<i32>} : memref<32x512xbf16, #tpu.memory_space<vmem>>, vector<32x512xbf16>,
      %cst_14 = arith.constant dense<0.000000e+00> : vector<512xf32>
      %15 = vector.multi_reduction <add>, %12, %cst_14 [0] : vector<32x512xf32> to vector<512xf32>
      %16 = vector.shape_cast %15 : vector<512xf32> to vector<1x512xf32>
      %17 = vector.shape_cast %16 : vector<1x512xf32> to vector<1x512xf32>
      %18 = vector.broadcast %17 : vector<1x512xf32> to vector<8x512xf32>
      %c0_15 = arith.constant 0 : index
      %c0_16 = arith.constant 0 : index
      %19 = vector.load %arg6[%c0_15, %c0_16] : memref<8x512xf32, #tpu.memory_space<vmem>>, vector<8x512xf32>
      tpu.vector_store %arg6[%c0_15, %c0_16], %18 {strides = array<i32>} : memref<8x512xf32, #tpu.memory_space<vmem>>, vector<8x512xf32>,
      %20 = arith.mulf %12, %12 : vector<32x512xf32>
      %cst_17 = arith.constant dense<0.000000e+00> : vector<512xf32>
      %21 = vector.multi_reduction <add>, %20, %cst_17 [0] : vector<32x512xf32> to vector<512xf32>
      %22 = vector.shape_cast %21 : vector<512xf32> to vector<1x512xf32>
      %23 = vector.shape_cast %22 : vector<1x512xf32> to vector<1x512xf32>
      %24 = vector.broadcast %23 : vector<1x512xf32> to vector<8x512xf32>
      %c0_18 = arith.constant 0 : index
      %c0_19 = arith.constant 0 : index
      %25 = vector.load %arg7[%c0_18, %c0_19] : memref<8x512xf32, #tpu.memory_space<vmem>>, vector<8x512xf32>
      tpu.vector_store %arg7[%c0_18, %c0_19], %24 {strides = array<i32>} : memref<8x512xf32, #tpu.memory_space<vmem>>, vector<8x512xf32>,
    } else {
    }
    return
  }
  func.func @transform_0(%arg0: i32, %arg1: i32, %arg2: i32) -> (i32, i32) {
    %c0_i32 = arith.constant 0 : i32
    return %arg0, %arg2 : i32, i32
  }
  func.func @transform_1(%arg0: i32, %arg1: i32, %arg2: i32) -> (i32, i32) {
    %c0_i32 = arith.constant 0 : i32
    return %arg2, %arg1 : i32, i32
  }
  func.func @transform_2(%arg0: i32, %arg1: i32, %arg2: i32) -> (i32, i32) {
    %c0_i32 = arith.constant 0 : i32
    return %arg0, %arg1 : i32, i32
  }
  func.func @transform_3(%arg0: i32, %arg1: i32, %arg2: i32) -> (i32, i32) {
    %c0_i32 = arith.constant 0 : i32
    return %arg0, %arg1 : i32, i32
  }
  func.func @transform_4(%arg0: i32, %arg1: i32, %arg2: i32) -> (i32, i32) {
    %c0_i32 = arith.constant 0 : i32
    return %arg0, %arg1 : i32, i32
  }
}

module attributes {stable_mosaic.version = 11 : i64} {
  func.func @_affine_lrelu_kernel(%arg0: i32, %arg1: memref<32x512xbf16, #tpu.memory_space<vmem>>, %arg2: memref<1x512xf32, #tpu.memory_space<vmem>>, %arg3: memref<1x512xf32, #tpu.memory_space<vmem>>, %arg4: memref<32x512xbf16, #tpu.memory_space<vmem>>) attributes {dimension_semantics = [#tpu.dimension_semantics<parallel>], iteration_bounds = array<i64: 1>, scalar_prefetch = 0 : i64, scratch_operands = 0 : i64, tpu.core_type = #tpu.core_type<tc>, window_params = [{transform_indices = @transform_0, window_bounds = array<i64: 32, 512>}, {pipeline_mode = #tpu.pipeline_mode<synchronous>, transform_indices = @transform_1, window_bounds = array<i64: 1, 512>}, {pipeline_mode = #tpu.pipeline_mode<synchronous>, transform_indices = @transform_2, window_bounds = array<i64: 1, 512>}, {transform_indices = @transform_3, window_bounds = array<i64: 32, 512>}]} {
    %c0 = arith.constant 0 : index
    %c0_0 = arith.constant 0 : index
    %0 = vector.load %arg1[%c0, %c0_0] : memref<32x512xbf16, #tpu.memory_space<vmem>>, vector<32x512xbf16>
    %1 = arith.extf %0 : vector<32x512xbf16> to vector<32x512xf32>
    %c0_1 = arith.constant 0 : index
    %c0_2 = arith.constant 0 : index
    %2 = vector.load %arg2[%c0_1, %c0_2] : memref<1x512xf32, #tpu.memory_space<vmem>>, vector<1x512xf32>
    %3 = vector.broadcast %2 : vector<1x512xf32> to vector<32x512xf32>
    %4 = arith.mulf %1, %3 : vector<32x512xf32>
    %c0_3 = arith.constant 0 : index
    %c0_4 = arith.constant 0 : index
    %5 = vector.load %arg3[%c0_3, %c0_4] : memref<1x512xf32, #tpu.memory_space<vmem>>, vector<1x512xf32>
    %6 = vector.broadcast %5 : vector<1x512xf32> to vector<32x512xf32>
    %7 = arith.addf %4, %6 : vector<32x512xf32>
    %cst = arith.constant 0.000000e+00 : f32
    %8 = vector.broadcast %cst : f32 to vector<32x512xf32>
    %9 = arith.cmpf oge, %7, %8 : vector<32x512xf32>
    %cst_5 = arith.constant 3.000000e-01 : f32
    %10 = vector.broadcast %cst_5 : f32 to vector<32x512xf32>
    %11 = arith.mulf %10, %7 : vector<32x512xf32>
    %12 = arith.select %9, %7, %11 : vector<32x512xi1>, vector<32x512xf32>
    %13 = arith.truncf %12 : vector<32x512xf32> to vector<32x512xbf16>
    %c0_6 = arith.constant 0 : index
    %c0_7 = arith.constant 0 : index
    %14 = vector.load %arg4[%c0_6, %c0_7] : memref<32x512xbf16, #tpu.memory_space<vmem>>, vector<32x512xbf16>
    tpu.vector_store %arg4[%c0_6, %c0_7], %13 {strides = array<i32>} : memref<32x512xbf16, #tpu.memory_space<vmem>>, vector<32x512xbf16>,
    return
  }
  func.func @transform_0(%arg0: i32) -> (i32, i32) {
    %c0_i32 = arith.constant 0 : i32
    %c0_i32_0 = arith.constant 0 : i32
    return %arg0, %c0_i32 : i32, i32
  }
  func.func @transform_1(%arg0: i32) -> (i32, i32) {
    %c0_i32 = arith.constant 0 : i32
    %c0_i32_0 = arith.constant 0 : i32
    %c0_i32_1 = arith.constant 0 : i32
    return %c0_i32, %c0_i32_0 : i32, i32
  }
  func.func @transform_2(%arg0: i32) -> (i32, i32) {
    %c0_i32 = arith.constant 0 : i32
    %c0_i32_0 = arith.constant 0 : i32
    %c0_i32_1 = arith.constant 0 : i32
    return %c0_i32, %c0_i32_0 : i32, i32
  }
  func.func @transform_3(%arg0: i32) -> (i32, i32) {
    %c0_i32 = arith.constant 0 : i32
    %c0_i32_0 = arith.constant 0 : i32
    return %arg0, %c0_i32 : i32, i32
  }
}

module attributes {stable_mosaic.version = 11 : i64} {
  func.func @kernel(%arg0: i32, %arg1: i32, %arg2: i32, %arg3: memref<16x8192xbf16, #tpu.memory_space<vmem>>, %arg4: memref<8192x128xbf16, #tpu.memory_space<vmem>>, %arg5: memref<1x128xf32, #tpu.memory_space<vmem>>, %arg6: memref<16x128xf32, #tpu.memory_space<vmem>>, %arg7: memref<16x128xf32, #tpu.memory_space<vmem>>) attributes {dimension_semantics = [#tpu.dimension_semantics<parallel>, #tpu.dimension_semantics<parallel>, #tpu.dimension_semantics<arbitrary>], iteration_bounds = array<i64: 1, 1, 1>, scalar_prefetch = 0 : i64, scratch_operands = 1 : i64, tpu.core_type = #tpu.core_type<tc>, window_params = [{transform_indices = @transform_0, window_bounds = array<i64: 16, 8192>}, {transform_indices = @transform_1, window_bounds = array<i64: 8192, 128>}, {transform_indices = @transform_2, window_bounds = array<i64: 1, 128>}, {transform_indices = @transform_3, window_bounds = array<i64: 16, 128>}]} {
    %c0_i32 = arith.constant 0 : i32
    %0 = arith.cmpi eq, %arg2, %c0_i32 : i32
    %1 = arith.extui %0 : i1 to i32
    %c0_i32_0 = arith.constant 0 : i32
    %2 = arith.cmpi ne, %1, %c0_i32_0 : i32
    scf.if %2 {
      %cst_10 = arith.constant 0.000000e+00 : f32
      %12 = vector.broadcast %cst_10 : f32 to vector<16x128xf32>
      %c0_11 = arith.constant 0 : index
      %c0_12 = arith.constant 0 : index
      %13 = vector.load %arg7[%c0_11, %c0_12] : memref<16x128xf32, #tpu.memory_space<vmem>>, vector<16x128xf32>
      tpu.vector_store %arg7[%c0_11, %c0_12], %12 {strides = array<i32>} : memref<16x128xf32, #tpu.memory_space<vmem>>, vector<16x128xf32>,
    } else {
    }
    %c0 = arith.constant 0 : index
    %c0_1 = arith.constant 0 : index
    %3 = vector.load %arg7[%c0, %c0_1] : memref<16x128xf32, #tpu.memory_space<vmem>>, vector<16x128xf32>
    %c0_2 = arith.constant 0 : index
    %c0_3 = arith.constant 0 : index
    %4 = vector.load %arg3[%c0_2, %c0_3] : memref<16x8192xbf16, #tpu.memory_space<vmem>>, vector<16x8192xbf16>
    %c0_4 = arith.constant 0 : index
    %c0_5 = arith.constant 0 : index
    %5 = vector.load %arg4[%c0_4, %c0_5] : memref<8192x128xbf16, #tpu.memory_space<vmem>>, vector<8192x128xbf16>
    %cst = arith.constant dense<0.000000e+00> : vector<16x128xf32>
    %6 = tpu.matmul %4, %5, %cst {dimension_numbers = #tpu.dot_dimension_numbers<[1], [0], [0], [1], [0, 0, 1, 1], [], []>} : vector<16x8192xbf16>, vector<8192x128xbf16>, vector<16x128xf32> -> vector<16x128xf32>
    %7 = arith.addf %3, %6 : vector<16x128xf32>
    %c0_6 = arith.constant 0 : index
    %c0_7 = arith.constant 0 : index
    %8 = vector.load %arg7[%c0_6, %c0_7] : memref<16x128xf32, #tpu.memory_space<vmem>>, vector<16x128xf32>
    tpu.vector_store %arg7[%c0_6, %c0_7], %7 {strides = array<i32>} : memref<16x128xf32, #tpu.memory_space<vmem>>, vector<16x128xf32>,
    %c0_i32_8 = arith.constant 0 : i32
    %9 = arith.cmpi eq, %arg2, %c0_i32_8 : i32
    %10 = arith.extui %9 : i1 to i32
    %c0_i32_9 = arith.constant 0 : i32
    %11 = arith.cmpi ne, %10, %c0_i32_9 : i32
    scf.if %11 {
      %c0_10 = arith.constant 0 : index
      %c0_11 = arith.constant 0 : index
      %12 = vector.load %arg7[%c0_10, %c0_11] : memref<16x128xf32, #tpu.memory_space<vmem>>, vector<16x128xf32>
      %c0_12 = arith.constant 0 : index
      %c0_13 = arith.constant 0 : index
      %13 = vector.load %arg5[%c0_12, %c0_13] : memref<1x128xf32, #tpu.memory_space<vmem>>, vector<1x128xf32>
      %14 = vector.broadcast %13 : vector<1x128xf32> to vector<16x128xf32>
      %15 = arith.addf %12, %14 : vector<16x128xf32>
      %cst_14 = arith.constant 0.000000e+00 : f32
      %16 = vector.broadcast %cst_14 : f32 to vector<16x128xf32>
      %17 = arith.subf %16, %15 : vector<16x128xf32>
      %18 = math.exp %17 : vector<16x128xf32>
      %cst_15 = arith.constant 1.000000e+00 : f32
      %19 = vector.broadcast %cst_15 : f32 to vector<16x128xf32>
      %20 = arith.addf %19, %18 : vector<16x128xf32>
      %cst_16 = arith.constant 1.000000e+00 : f32
      %21 = vector.broadcast %cst_16 : f32 to vector<16x128xf32>
      %22 = arith.divf %21, %20 : vector<16x128xf32>
      %c0_17 = arith.constant 0 : index
      %c0_18 = arith.constant 0 : index
      %23 = vector.load %arg6[%c0_17, %c0_18] : memref<16x128xf32, #tpu.memory_space<vmem>>, vector<16x128xf32>
      tpu.vector_store %arg6[%c0_17, %c0_18], %22 {strides = array<i32>} : memref<16x128xf32, #tpu.memory_space<vmem>>, vector<16x128xf32>,
    } else {
    }
    return
  }
  func.func @transform_0(%arg0: i32, %arg1: i32, %arg2: i32) -> (i32, i32) {
    %c0_i32 = arith.constant 0 : i32
    return %arg0, %arg2 : i32, i32
  }
  func.func @transform_1(%arg0: i32, %arg1: i32, %arg2: i32) -> (i32, i32) {
    %c0_i32 = arith.constant 0 : i32
    return %arg2, %arg1 : i32, i32
  }
  func.func @transform_2(%arg0: i32, %arg1: i32, %arg2: i32) -> (i32, i32) {
    %c0_i32 = arith.constant 0 : i32
    %c0_i32_0 = arith.constant 0 : i32
    return %c0_i32, %arg1 : i32, i32
  }
  func.func @transform_3(%arg0: i32, %arg1: i32, %arg2: i32) -> (i32, i32) {
    %c0_i32 = arith.constant 0 : i32
    return %arg0, %arg1 : i32, i32
  }
}

</mosaic_0001>

<bundles_post_ra>
// kernel: discriminator_forward.8
= control target key start
LH: loop header
LB: loop body
LE: loop exit
PB: predicated region body
PF: predicated region fallthrough
CT: control target
= control target key end

     0   :  { %s2388_s1 = inlined_call_operand.vmem [shape: bf16[128,128], index: 1, kind: input, shape index: {}]   ;;  %s2389_s0 = inlined_call_operand.vmem [shape: bf16[512,128], index: 0, kind: input, shape index: {}]   ;;  %s2390_s2 = inlined_call_operand.vmem [shape: f32[1,128], index: 2, kind: input, shape index: {}]   ;;  %s2391_s3 = inlined_call_operand.vmem [shape: bf16[512,128], index: 3, kind: output, shape index: {}]  }
   0x1   :  { %v2034_v0 = vld [vmem:[%s2388_s1] sm:$0xff]   ;;  %v2035_v1 = vld [vmem:[%s2388_s1 + $0x8] sm:$0xff]   ;;  %v2036_v2 = vld [vmem:[%s2388_s1 + $0x10] sm:$0xff]  }
   0x2   :  { %1938 = vmatprep.subr.bf16.mxu0 %v2034_v0  ;;  %2018 = vmatprep.subr.bf16.mxu1 %v2034_v0  ;;  %v2037_v3 = vld [vmem:[%s2388_s1 + $0x18] sm:$0xff]   ;;  %v2042_v4 = vld [vmem:[%s2389_s0] sm:$0xff]   ;;  %v2039_v7 = vld [vmem:[%s2388_s1 + $0x28] sm:$0xff]  }
   0x3   :  { %1939 = vmatpush3.bf16.msra.mxu0 %v2034_v0  ;;  %2026 = vmatpush3.bf16.msra.mxu1 %v2034_v0  ;;  %v2043_v5 = vld [vmem:[%s2389_s0 + $0x80] sm:$0xff]   ;;  %v2040_v8 = vld [vmem:[%s2388_s1 + $0x30] sm:$0xff]   ;;  %v2041_v9 = vld [vmem:[%s2388_s1 + $0x38] sm:$0xff]  }
   0x4   :  { %1940 = vmatprep.subr.bf16.mxu0 %v2035_v1  ;;  %2019 = vmatprep.subr.bf16.mxu1 %v2035_v1  ;;  %v2038_v6 = vld [vmem:[%s2388_s1 + $0x20] sm:$0xff]   ;;  %v2044_v10 = vld [vmem:[%s2389_s0 + $0x8] sm:$0xff]   ;;  %v2046_v12 = vld [vmem:[%s2389_s0 + $0x10] sm:$0xff]  }
   0x5   :  { %1954 = vmatprep.mubr.bf16.mxu0 %v2042_v4  ;;  %1986 = vmatprep.mubr.bf16.mxu1 %v2043_v5  ;;  %v2045_v11 = vld [vmem:[%s2389_s0 + $0x88] sm:$0xff]   ;;  %v2047_v13 = vld [vmem:[%s2389_s0 + $0x90] sm:$0xff]   ;;  %v2048_v14 = vld [vmem:[%s2389_s0 + $0x18] sm:$0xff]  }
   0x6   :  { %v2049_v15 = vld [vmem:[%s2389_s0 + $0x98] sm:$0xff]   ;;  %v2050_v16 = vld [vmem:[%s2389_s0 + $0x20] sm:$0xff]   ;;  %v2052_v18 = vld [vmem:[%s2389_s0 + $0x28] sm:$0xff]  }
   0x7   :  { %1941 = vmatpush3.bf16.msra.mxu0 %v2035_v1  ;;  %2027 = vmatpush3.bf16.msra.mxu1 %v2035_v1  ;;  %v2051_v17 = vld [vmem:[%s2389_s0 + $0xa0] sm:$0xff]   ;;  %v2053_v19 = vld [vmem:[%s2389_s0 + $0xa8] sm:$0xff]   ;;  %v2054_v20 = vld [vmem:[%s2389_s0 + $0x30] sm:$0xff]  }
   0x8   :  { %1942 = vmatprep.subr.bf16.mxu0 %v2036_v2  ;;  %2020 = vmatprep.subr.bf16.mxu1 %v2036_v2  ;;  %v2055_v21 = vld [vmem:[%s2389_s0 + $0xb0] sm:$0xff]   ;;  %v2056_v22 = vld [vmem:[%s2389_s0 + $0x38] sm:$0xff]   ;;  %v2058_v24 = vld [vmem:[%s2389_s0 + $0x40] sm:$0xff]  }
   0x9   :  { %v2057_v23 = vld [vmem:[%s2389_s0 + $0xb8] sm:$0xff]   ;;  %v2059_v25 = vld [vmem:[%s2389_s0 + $0xc0] sm:$0xff]   ;;  %v2060_v26 = vld [vmem:[%s2389_s0 + $0x48] sm:$0xff]  }
   0xa   :  { %v2061_v27 = vld [vmem:[%s2389_s0 + $0xc8] sm:$0xff]   ;;  %v2062_v28 = vld [vmem:[%s2389_s0 + $0x50] sm:$0xff]   ;;  %v2064_v30 = vld [vmem:[%s2389_s0 + $0x58] sm:$0xff]  }
   0xb   :  { %1943 = vmatpush3.bf16.msra.mxu0 %v2036_v2  ;;  %2028 = vmatpush3.bf16.msra.mxu1 %v2036_v2  ;;  %v2063_v29 = vld [vmem:[%s2389_s0 + $0xd0] sm:$0xff]   ;;  %v2065_v31 = vld [vmem:[%s2389_s0 + $0xd8] sm:$0xff]   ;;  %v2066_v32 = vld [vmem:[%s2389_s0 + $0x60] sm:$0xff]  }
   0xc   :  { %1944 = vmatprep.subr.bf16.mxu0 %v2037_v3  ;;  %2021 = vmatprep.subr.bf16.mxu1 %v2037_v3  ;;  %v2067_v33 = vld [vmem:[%s2389_s0 + $0xe0] sm:$0xff]   ;;  %v2068_v34 = vld [vmem:[%s2389_s0 + $0x68] sm:$0xff]   ;;  %v2070_v36 = vld [vmem:[%s2389_s0 + $0x70] sm:$0xff]  }
   0xd   :  { %v2069_v35 = vld [vmem:[%s2389_s0 + $0xe8] sm:$0xff]   ;;  %v2071_v37 = vld [vmem:[%s2389_s0 + $0xf0] sm:$0xff]   ;;  %v2072_v38 = vld [vmem:[%s2389_s0 + $0x78] sm:$0xff]  }
   0xe   :  { %v2073_v39 = vld [vmem:[%s2389_s0 + $0xf8] sm:$0xff]   ;;  %v2217_v40 = vld [vmem:[%s2390_s2] ss:$0 sm:$0xff] }
   0xf   :  { %1945 = vmatpush3.bf16.msra.mxu0 %v2037_v3  ;;  %2029 = vmatpush3.bf16.msra.mxu1 %v2037_v3 }
  0x10   :  { %1946 = vmatprep.subr.bf16.mxu0 %v2038_v6  ;;  %2022 = vmatprep.subr.bf16.mxu1 %v2038_v6 }
  0x13   :  { %1947 = vmatpush3.bf16.msra.mxu0 %v2038_v6  ;;  %2030 = vmatpush3.bf16.msra.mxu1 %v2038_v6 }
  0x14   :  { %1948 = vmatprep.subr.bf16.mxu0 %v2039_v7  ;;  %2023 = vmatprep.subr.bf16.mxu1 %v2039_v7 }
  0x17   :  { %1949 = vmatpush3.bf16.msra.mxu0 %v2039_v7  ;;  %2031 = vmatpush3.bf16.msra.mxu1 %v2039_v7 }
  0x18   :  { %1950 = vmatprep.subr.bf16.mxu0 %v2040_v8  ;;  %2024 = vmatprep.subr.bf16.mxu1 %v2040_v8 }
  0x1b   :  { %1951 = vmatpush3.bf16.msra.mxu0 %v2040_v8  ;;  %2032 = vmatpush3.bf16.msra.mxu1 %v2040_v8 }
  0x1c   :  { %1952 = vmatprep.subr.bf16.mxu0 %v2041_v9  ;;  %2025 = vmatprep.subr.bf16.mxu1 %v2041_v9 }
  0x1f   :  { %1953 = vmatpush3.bf16.msra.mxu0 %v2041_v9  ;;  %2033 = vmatpush3.bf16.msra.mxu1 %v2041_v9 }
  0x22   :  { %1955 = vmatmul.mubr.bf16.vlgmr.msra.gmra.mrb[0].mxu0 %v2044_v10  ;;  %1987 = vmatmul.mubr.bf16.vlgmr.msra.gmra.mrb[0].mxu1 %v2045_v11 }
  0x23   :  { %1958 = vmatprep.mubr.bf16.mxu0 %v2046_v12  ;;  %1990 = vmatprep.mubr.bf16.mxu1 %v2047_v13 }
  0x2a   :  { %1959 = vmatmul.mubr.bf16.gmra.mrb[4].mxu0 %v2048_v14  ;;  %1991 = vmatmul.mubr.bf16.gmra.mrb[4].mxu1 %v2049_v15 }
  0x2b   :  { %1962 = vmatprep.mubr.bf16.mxu0 %v2050_v16  ;;  %1994 = vmatprep.mubr.bf16.mxu1 %v2051_v17 }
  0x32   :  { %1963 = vmatmul.mubr.bf16.gmra.mrb[8].mxu0 %v2052_v18  ;;  %1995 = vmatmul.mubr.bf16.gmra.mrb[8].mxu1 %v2053_v19 }
  0x33   :  { %1966 = vmatprep.mubr.bf16.mxu0 %v2054_v20  ;;  %1998 = vmatprep.mubr.bf16.mxu1 %v2055_v21 }
  0x3a   :  { %1967 = vmatmul.mubr.bf16.gmra.mrb[12].mxu0 %v2056_v22  ;;  %1999 = vmatmul.mubr.bf16.gmra.mrb[12].mxu1 %v2057_v23 }
  0x3b   :  { %1970 = vmatprep.mubr.bf16.mxu0 %v2058_v24  ;;  %2002 = vmatprep.mubr.bf16.mxu1 %v2059_v25 }
  0x42   :  { %1971 = vmatmul.mubr.bf16.gmra.mrb[16].mxu0 %v2060_v26  ;;  %2003 = vmatmul.mubr.bf16.gmra.mrb[16].mxu1 %v2061_v27 }
  0x43   :  { %1974 = vmatprep.mubr.bf16.mxu0 %v2062_v28  ;;  %2006 = vmatprep.mubr.bf16.mxu1 %v2063_v29 }
  0x4a   :  { %1975 = vmatmul.mubr.bf16.gmra.mrb[20].mxu0 %v2064_v30  ;;  %2007 = vmatmul.mubr.bf16.gmra.mrb[20].mxu1 %v2065_v31 }
  0x4b   :  { %1978 = vmatprep.mubr.bf16.mxu0 %v2066_v32  ;;  %2010 = vmatprep.mubr.bf16.mxu1 %v2067_v33 }
  0x52   :  { %1979 = vmatmul.mubr.bf16.gmra.mrb[24].mxu0 %v2068_v34  ;;  %2011 = vmatmul.mubr.bf16.gmra.mrb[24].mxu1 %v2069_v35 }
  0x53   :  { %1982 = vmatprep.mubr.bf16.mxu0 %v2070_v36  ;;  %2014 = vmatprep.mubr.bf16.mxu1 %v2071_v37 }
  0x5a   :  { %1983 = vmatmul.mubr.bf16.gmra.mrb[28].mxu0 %v2072_v38  ;;  %2015 = vmatmul.mubr.bf16.gmra.mrb[28].mxu1 %v2073_v39 }
  0xf5   :  { %v1956_v41 = vpop.f32.mrb[0].mxu0  ;;  %v1988_v42 = vpop.f32.mrb[0].mxu1 }
  0xf6   :  { %v960_v43 = vadd.f32 %v1956_v41, %v2217_v40  ;;  %v992_v44 = vadd.f32 %v1988_v42, %v2217_v40  ;;  %v501_v45 = vpop.f32.mrb[1].mxu0  ;;  %v629_v46 = vpop.f32.mrb[1].mxu1 }
  0xf7   :  { %v958_v47 = vadd.f32 %v2217_v40, %v501_v45  ;;  %v990_v48 = vadd.f32 %v2217_v40, %v629_v46  ;;  %v1957_v49 = vpop.f32.mrb[2].mxu0  ;;  %v1989_v50 = vpop.f32.mrb[2].mxu1 }
  0xf8   :  { %vm1024_vm0 = vcmp.ge.f32.partialorder %v960_v43, 0.0  ;;  %v1088_v51 = vmul.f32 0.3, %v960_v43  ;;  %vm1056_vm1 = vcmp.ge.f32.partialorder %v992_v44, 0.0  ;;  %v1120_v52 = vmul.f32 0.3, %v992_v44 }
  0xf9   :  { %vm1022_vm2 = vcmp.ge.f32.partialorder %v958_v47, 0.0  ;;  %v1086_v53 = vmul.f32 0.3, %v958_v47  ;;  %vm1054_vm3 = vcmp.ge.f32.partialorder %v990_v48, 0.0  ;;  %v1118_v54 = vmul.f32 0.3, %v990_v48 }
  0xfa   :  { %v961_v55 = vadd.f32 %v1957_v49, %v2217_v40  ;;  %v993_v56 = vadd.f32 %v1989_v50, %v2217_v40  ;;  %v504_v57 = vpop.f32.mrb[3].mxu0  ;;  %v632_v58 = vpop.f32.mrb[3].mxu1  ;;  %v1152_v59 = vsel %vm1024_vm0, %v960_v43, %v1088_v51  ;;  %v1184_v60 = vsel %vm1056_vm1, %v992_v44, %v1120_v52 }
  0xfb   :  { %v959_v61 = vadd.f32 %v2217_v40, %v504_v57  ;;  %v991_v62 = vadd.f32 %v2217_v40, %v632_v58  ;;  %v1150_v3 = vsel %vm1022_vm2, %v958_v47, %v1086_v53  ;;  %v1182_v4 = vsel %vm1054_vm3, %v990_v48, %v1118_v54 }
  0xfc   :  { %vm1025_vm4 = vcmp.ge.f32.partialorder %v961_v55, 0.0  ;;  %v1089_v63 = vmul.f32 0.3, %v961_v55  ;;  %vm1057_vm5 = vcmp.ge.f32.partialorder %v993_v56, 0.0  ;;  %v1121_v0 = vmul.f32 0.3, %v993_v56 }
  0xfd   :  { %vm1023_vm6 = vcmp.ge.f32.partialorder %v959_v61, 0.0  ;;  %v1087_v1 = vmul.f32 0.3, %v959_v61  ;;  %vm1055_vm7 = vcmp.ge.f32.partialorder %v991_v62, 0.0  ;;  %v1119_v2 = vmul.f32 0.3, %v991_v62 }
  0xfe   :  { %v1153_v5 = vsel %vm1025_vm4, %v961_v55, %v1089_v63  ;;  %v1185_v6 = vsel %vm1057_vm5, %v993_v56, %v1121_v0  ;;  %v1960_v7 = vpop.f32.mrb[4].mxu0  ;;  %v1992_v8 = vpop.f32.mrb[4].mxu1 }
  0xff   :  { %v1715_v9 = vpack.c.bf16 %v1153_v5, %v1152_v59  ;;  %v1795_v10 = vpack.c.bf16 %v1185_v6, %v1184_v60  ;;  %v1151_v11 = vsel %vm1023_vm6, %v959_v61, %v1087_v1  ;;  %v1183_v12 = vsel %vm1055_vm7, %v991_v62, %v1119_v2  ;;  %v517_v13 = vpop.f32.mrb[5].mxu0  ;;  %v645_v14 = vpop.f32.mrb[5].mxu1 }
 0x100   :  { %v1710_v15 = vpack.c.bf16 %v1151_v11, %v1150_v3  ;;  %v1790_v16 = vpack.c.bf16 %v1183_v12, %v1182_v4  ;;  %v964_v17 = vadd.f32 %v1960_v7, %v2217_v40  ;;  %v996_v18 = vadd.f32 %v1992_v8, %v2217_v40  ;;  %v1961_v19 = vpop.f32.mrb[6].mxu0  ;;  %v1993_v20 = vpop.f32.mrb[6].mxu1 }
 0x101   :  { %1867 = vst [vmem:[%s2391_s3 + $0x8] sm:$0xff] %v1715_v9   ;;  %1883 = vst [vmem:[%s2391_s3 + $0x88] sm:$0xff] %v1795_v10   ;;  %v962_v21 = vadd.f32 %v2217_v40, %v517_v13  ;;  %v994_v22 = vadd.f32 %v2217_v40, %v645_v14  ;;  %v965_v23 = vadd.f32 %v1961_v19, %v2217_v40  ;;  %v520_v25 = vpop.f32.mrb[7].mxu0  ;;  %v648_v26 = vpop.f32.mrb[7].mxu1 }
 0x102   :  { %v997_v24 = vadd.f32 %v1993_v20, %v2217_v40  ;;  %1711 = vst [vmem:[%s2391_s3] sm:$0xff] %v1710_v15   ;;  %1882 = vst [vmem:[%s2391_s3 + $0x80] sm:$0xff] %v1790_v16   ;;  %vm1028_vm8 = vcmp.ge.f32.partialorder %v964_v17, 0.0  ;;  %v1092_v27 = vmul.f32 0.3, %v964_v17  ;;  %vm1060_vm9 = vcmp.ge.f32.partialorder %v996_v18, 0.0 }
 0x103   :  { %v1124_v28 = vmul.f32 0.3, %v996_v18  ;;  %vm1026_vm10 = vcmp.ge.f32.partialorder %v962_v21, 0.0  ;;  %v1090_v29 = vmul.f32 0.3, %v962_v21  ;;  %vm1058_vm11 = vcmp.ge.f32.partialorder %v994_v22, 0.0 }
 0x104   :  { %v1122_v30 = vmul.f32 0.3, %v994_v22  ;;  %v1156_v31 = vsel %vm1028_vm8, %v964_v17, %v1092_v27  ;;  %vm1029_vm12 = vcmp.ge.f32.partialorder %v965_v23, 0.0  ;;  %v1093_v33 = vmul.f32 0.3, %v965_v23 }
 0x105   :  { %v1188_v32 = vsel %vm1060_vm9, %v996_v18, %v1124_v28  ;;  %v1154_v34 = vsel %vm1026_vm10, %v962_v21, %v1090_v29  ;;  %vm1061_vm13 = vcmp.ge.f32.partialorder %v997_v24, 0.0  ;;  %v1125_v36 = vmul.f32 0.3, %v997_v24  ;;  %v1964_v37 = vpop.f32.mrb[8].mxu0  ;;  %v1996_v38 = vpop.f32.mrb[8].mxu1 }
 0x106   :  { %v1186_v35 = vsel %vm1058_vm11, %v994_v22, %v1122_v30  ;;  %v1157_v39 = vsel %vm1029_vm12, %v965_v23, %v1093_v33  ;;  %v963_v41 = vadd.f32 %v2217_v40, %v520_v25  ;;  %v995_v42 = vadd.f32 %v2217_v40, %v648_v26  ;;  %v533_v44 = vpop.f32.mrb[9].mxu0  ;;  %v661_v45 = vpop.f32.mrb[9].mxu1 }
 0x107   :  { %v968_v43 = vadd.f32 %v1964_v37, %v2217_v40  ;;  %v1725_v46 = vpack.c.bf16 %v1157_v39, %v1156_v31  ;;  %v1189_v47 = vsel %vm1061_vm13, %v997_v24, %v1125_v36  ;;  %v1000_v48 = vadd.f32 %v1996_v38, %v2217_v40  ;;  %v1965_v50 = vpop.f32.mrb[10].mxu0  ;;  %v1997_v51 = vpop.f32.mrb[10].mxu1 }
 0x108   :  { %v966_v49 = vadd.f32 %v2217_v40, %v533_v44  ;;  %v1805_v52 = vpack.c.bf16 %v1189_v47, %v1188_v32  ;;  %vm1027_vm14 = vcmp.ge.f32.partialorder %v963_v41, 0.0  ;;  %v1091_v53 = vmul.f32 0.3, %v963_v41  ;;  %v536_v54 = vpop.f32.mrb[11].mxu0  ;;  %v664_v55 = vpop.f32.mrb[11].mxu1 }
 0x109   :  { %vm1059_vm15 = vcmp.ge.f32.partialorder %v995_v42, 0.0  ;;  %1869 = vst [vmem:[%s2391_s3 + $0x18] sm:$0xff] %v1725_v46   ;;  %v1123_v56 = vmul.f32 0.3, %v995_v42  ;;  %vm1032_vm0 = vcmp.ge.f32.partialorder %v968_v43, 0.0  ;;  %vm1064_vm1 = vcmp.ge.f32.partialorder %v1000_v48, 0.0 }
 0x10a   :  { %v1096_v57 = vmul.f32 0.3, %v968_v43  ;;  %1885 = vst [vmem:[%s2391_s3 + $0x98] sm:$0xff] %v1805_v52   ;;  %v1155_v58 = vsel %vm1027_vm14, %v963_v41, %v1091_v53  ;;  %v1128_v59 = vmul.f32 0.3, %v1000_v48  ;;  %vm1030_vm2 = vcmp.ge.f32.partialorder %v966_v49, 0.0 }
 0x10b   :  { %v1094_v60 = vmul.f32 0.3, %v966_v49  ;;  %v1720_v61 = vpack.c.bf16 %v1155_v58, %v1154_v34  ;;  %v1187_v62 = vsel %vm1059_vm15, %v995_v42, %v1123_v56  ;;  %v998_v0 = vadd.f32 %v2217_v40, %v661_v45 }
 0x10c   :  { %v1160_v63 = vsel %vm1032_vm0, %v968_v43, %v1096_v57  ;;  %v1800_v1 = vpack.c.bf16 %v1187_v62, %v1186_v35  ;;  %v1192_v2 = vsel %vm1064_vm1, %v1000_v48, %v1128_v59  ;;  %v969_v4 = vadd.f32 %v1965_v50, %v2217_v40 }
 0x10d   :  { %v1158_v3 = vsel %vm1030_vm2, %v966_v49, %v1094_v60  ;;  %1868 = vst [vmem:[%s2391_s3 + $0x10] sm:$0xff] %v1720_v61   ;;  %vm1062_vm3 = vcmp.ge.f32.partialorder %v998_v0, 0.0  ;;  %v1126_v5 = vmul.f32 0.3, %v998_v0  ;;  %v1001_v6 = vadd.f32 %v1997_v51, %v2217_v40  ;;  %v1968_v8 = vpop.f32.mrb[12].mxu0  ;;  %v2000_v9 = vpop.f32.mrb[12].mxu1 }
 0x10e   :  { %v967_v7 = vadd.f32 %v2217_v40, %v536_v54  ;;  %1884 = vst [vmem:[%s2391_s3 + $0x90] sm:$0xff] %v1800_v1   ;;  %vm1033_vm4 = vcmp.ge.f32.partialorder %v969_v4, 0.0  ;;  %v1097_v10 = vmul.f32 0.3, %v969_v4  ;;  %v999_v11 = vadd.f32 %v2217_v40, %v664_v55  ;;  %v549_v13 = vpop.f32.mrb[13].mxu0  ;;  %v677_v14 = vpop.f32.mrb[13].mxu1 }
 0x10f   :  { %v972_v12 = vadd.f32 %v1968_v8, %v2217_v40  ;;  %v1190_v15 = vsel %vm1062_vm3, %v998_v0, %v1126_v5  ;;  %vm1065_vm5 = vcmp.ge.f32.partialorder %v1001_v6, 0.0  ;;  %v1129_v16 = vmul.f32 0.3, %v1001_v6  ;;  %v1969_v17 = vpop.f32.mrb[14].mxu0  ;;  %v2001_v18 = vpop.f32.mrb[14].mxu1 }
 0x110   :  { %vm1031_vm6 = vcmp.ge.f32.partialorder %v967_v7, 0.0  ;;  %v1161_v19 = vsel %vm1033_vm4, %v969_v4, %v1097_v10  ;;  %v1095_v20 = vmul.f32 0.3, %v967_v7  ;;  %vm1063_vm7 = vcmp.ge.f32.partialorder %v999_v11, 0.0  ;;  %v552_v22 = vpop.f32.mrb[15].mxu0  ;;  %v680_v26 = vpop.f32.mrb[15].mxu1 }
 0x111   :  { %v1127_v21 = vmul.f32 0.3, %v999_v11  ;;  %v1735_v23 = vpack.c.bf16 %v1161_v19, %v1160_v63  ;;  %v1193_v24 = vsel %vm1065_vm5, %v1001_v6, %v1129_v16  ;;  %vm1036_vm8 = vcmp.ge.f32.partialorder %v972_v12, 0.0 }
 0x112   :  { %v1100_v25 = vmul.f32 0.3, %v972_v12  ;;  %v1815_v27 = vpack.c.bf16 %v1193_v24, %v1192_v2  ;;  %v1159_v28 = vsel %vm1031_vm6, %v967_v7, %v1095_v20  ;;  %v1004_v30 = vadd.f32 %v2000_v9, %v2217_v40 }
 0x113   :  { %v1191_v29 = vsel %vm1063_vm7, %v999_v11, %v1127_v21  ;;  %1871 = vst [vmem:[%s2391_s3 + $0x28] sm:$0xff] %v1735_v23   ;;  %v1730_v31 = vpack.c.bf16 %v1159_v28, %v1158_v3  ;;  %v970_v34 = vadd.f32 %v2217_v40, %v549_v13  ;;  %v1002_v36 = vadd.f32 %v2217_v40, %v677_v14 }
 0x114   :  { %v1810_v32 = vpack.c.bf16 %v1191_v29, %v1190_v15  ;;  %v1164_v33 = vsel %vm1036_vm8, %v972_v12, %v1100_v25  ;;  %1887 = vst [vmem:[%s2391_s3 + $0xa8] sm:$0xff] %v1815_v27   ;;  %vm1068_vm9 = vcmp.ge.f32.partialorder %v1004_v30, 0.0  ;;  %v1132_v35 = vmul.f32 0.3, %v1004_v30 }
 0x115   :  { %v973_v37 = vadd.f32 %v1969_v17, %v2217_v40  ;;  %1870 = vst [vmem:[%s2391_s3 + $0x20] sm:$0xff] %v1730_v31   ;;  %vm1034_vm10 = vcmp.ge.f32.partialorder %v970_v34, 0.0  ;;  %v1098_v38 = vmul.f32 0.3, %v970_v34  ;;  %v1005_v39 = vadd.f32 %v2001_v18, %v2217_v40  ;;  %v1972_v42 = vpop.f32.mrb[16].mxu0  ;;  %v2004_v43 = vpop.f32.mrb[16].mxu1 }
 0x116   :  { %1886 = vst [vmem:[%s2391_s3 + $0xa0] sm:$0xff] %v1810_v32   ;;  %v971_v41 = vadd.f32 %v2217_v40, %v552_v22  ;;  %v1196_v44 = vsel %vm1068_vm9, %v1004_v30, %v1132_v35  ;;  %vm1066_vm11 = vcmp.ge.f32.partialorder %v1002_v36, 0.0  ;;  %v1130_v45 = vmul.f32 0.3, %v1002_v36  ;;  %v565_v46 = vpop.f32.mrb[17].mxu0  ;;  %v693_v47 = vpop.f32.mrb[17].mxu1 }
 0x117   :  { %vm1037_vm12 = vcmp.ge.f32.partialorder %v973_v37, 0.0  ;;  %v1162_v48 = vsel %vm1034_vm10, %v970_v34, %v1098_v38  ;;  %v1101_v49 = vmul.f32 0.3, %v973_v37  ;;  %vm1069_vm13 = vcmp.ge.f32.partialorder %v1005_v39, 0.0  ;;  %v1973_v51 = vpop.f32.mrb[18].mxu0  ;;  %v2005_v55 = vpop.f32.mrb[18].mxu1 }
 0x118   :  { %v1133_v50 = vmul.f32 0.3, %v1005_v39  ;;  %v1194_v52 = vsel %vm1066_vm11, %v1002_v36, %v1130_v45  ;;  %vm1035_vm14 = vcmp.ge.f32.partialorder %v971_v41, 0.0  ;;  %v1099_v53 = vmul.f32 0.3, %v971_v41  ;;  %v568_v56 = vpop.f32.mrb[19].mxu0 }
 0x119   :  { %v1003_v54 = vadd.f32 %v2217_v40, %v680_v26  ;;  %v1165_v57 = vsel %vm1037_vm12, %v973_v37, %v1101_v49  ;;  %v976_v59 = vadd.f32 %v1972_v42, %v2217_v40  ;;  %v1008_v60 = vadd.f32 %v2004_v43, %v2217_v40  ;;  %v696_v61 = vpop.f32.mrb[19].mxu1 }
 0x11a   :  { %v1197_v58 = vsel %vm1069_vm13, %v1005_v39, %v1133_v50  ;;  %v1745_v62 = vpack.c.bf16 %v1165_v57, %v1164_v33  ;;  %v1163_v0 = vsel %vm1035_vm14, %v971_v41, %v1099_v53  ;;  %v974_v5 = vadd.f32 %v2217_v40, %v565_v46 }
 0x11b   :  { %v1825_v63 = vpack.c.bf16 %v1197_v58, %v1196_v44  ;;  %vm1067_vm15 = vcmp.ge.f32.partialorder %v1003_v54, 0.0  ;;  %v1740_v1 = vpack.c.bf16 %v1163_v0, %v1162_v48  ;;  %v1131_v2 = vmul.f32 0.3, %v1003_v54 }
 0x11c   :  { %vm1040_vm0 = vcmp.ge.f32.partialorder %v976_v59, 0.0  ;;  %v1104_v3 = vmul.f32 0.3, %v976_v59  ;;  %1873 = vst [vmem:[%s2391_s3 + $0x38] sm:$0xff] %v1745_v62   ;;  %vm1072_vm1 = vcmp.ge.f32.partialorder %v1008_v60, 0.0  ;;  %v1006_v6 = vadd.f32 %v2217_v40, %v693_v47 }
 0x11d   :  { %1889 = vst [vmem:[%s2391_s3 + $0xb8] sm:$0xff] %v1825_v63   ;;  %v1136_v4 = vmul.f32 0.3, %v1008_v60  ;;  %1872 = vst [vmem:[%s2391_s3 + $0x30] sm:$0xff] %v1740_v1   ;;  %v1195_v7 = vsel %vm1067_vm15, %v1003_v54, %v1131_v2  ;;  %v977_v9 = vadd.f32 %v1973_v51, %v2217_v40  ;;  %v1009_v10 = vadd.f32 %v2005_v55, %v2217_v40  ;;  %v1976_v11 = vpop.f32.mrb[20].mxu0  ;;  %v2008_v12 = vpop.f32.mrb[20].mxu1 }
 0x11e   :  { %v1168_v8 = vsel %vm1040_vm0, %v976_v59, %v1104_v3  ;;  %v1820_v13 = vpack.c.bf16 %v1195_v7, %v1194_v52  ;;  %vm1038_vm2 = vcmp.ge.f32.partialorder %v974_v5, 0.0  ;;  %v1102_v15 = vmul.f32 0.3, %v974_v5  ;;  %v581_v16 = vpop.f32.mrb[21].mxu0  ;;  %v709_v17 = vpop.f32.mrb[21].mxu1 }
 0x11f   :  { %v1200_v14 = vsel %vm1072_vm1, %v1008_v60, %v1136_v4  ;;  %vm1070_vm3 = vcmp.ge.f32.partialorder %v1006_v6, 0.0  ;;  %v1134_v18 = vmul.f32 0.3, %v1006_v6  ;;  %vm1041_vm4 = vcmp.ge.f32.partialorder %v977_v9, 0.0  ;;  %v1977_v23 = vpop.f32.mrb[22].mxu0  ;;  %v2009_v24 = vpop.f32.mrb[22].mxu1 }
 0x120   :  { %v1105_v19 = vmul.f32 0.3, %v977_v9  ;;  %1888 = vst [vmem:[%s2391_s3 + $0xb0] sm:$0xff] %v1820_v13   ;;  %v1166_v20 = vsel %vm1038_vm2, %v974_v5, %v1102_v15  ;;  %vm1073_vm5 = vcmp.ge.f32.partialorder %v1009_v10, 0.0  ;;  %v1137_v21 = vmul.f32 0.3, %v1009_v10 }
 0x121   :  { %v975_v22 = vadd.f32 %v2217_v40, %v568_v56  ;;  %v1198_v25 = vsel %vm1070_vm3, %v1006_v6, %v1134_v18  ;;  %v1007_v27 = vadd.f32 %v2217_v40, %v696_v61  ;;  %v980_v28 = vadd.f32 %v1976_v11, %v2217_v40  ;;  %v584_v29 = vpop.f32.mrb[23].mxu0  ;;  %v712_v30 = vpop.f32.mrb[23].mxu1 }
 0x122   :  { %v1169_v26 = vsel %vm1041_vm4, %v977_v9, %v1105_v19  ;;  %v1201_v32 = vsel %vm1073_vm5, %v1009_v10, %v1137_v21  ;;  %v1012_v38 = vadd.f32 %v2008_v12, %v2217_v40  ;;  %v978_v39 = vadd.f32 %v2217_v40, %v581_v16 }
 0x123   :  { %v1755_v31 = vpack.c.bf16 %v1169_v26, %v1168_v8  ;;  %vm1039_vm6 = vcmp.ge.f32.partialorder %v975_v22, 0.0  ;;  %v1103_v33 = vmul.f32 0.3, %v975_v22  ;;  %v1835_v34 = vpack.c.bf16 %v1201_v32, %v1200_v14 }
 0x124   :  { %vm1071_vm7 = vcmp.ge.f32.partialorder %v1007_v27, 0.0  ;;  %v1135_v35 = vmul.f32 0.3, %v1007_v27  ;;  %vm1044_vm8 = vcmp.ge.f32.partialorder %v980_v28, 0.0  ;;  %v1108_v37 = vmul.f32 0.3, %v980_v28 }
 0x125   :  { %1875 = vst [vmem:[%s2391_s3 + $0x48] sm:$0xff] %v1755_v31   ;;  %v1167_v36 = vsel %vm1039_vm6, %v975_v22, %v1103_v33  ;;  %1891 = vst [vmem:[%s2391_s3 + $0xc8] sm:$0xff] %v1835_v34   ;;  %v1010_v43 = vadd.f32 %v2217_v40, %v709_v17  ;;  %v981_v44 = vadd.f32 %v1977_v23, %v2217_v40  ;;  %v1980_v45 = vpop.f32.mrb[24].mxu0  ;;  %v2012_v46 = vpop.f32.mrb[24].mxu1  ;;  %vm1076_vm9 = vcmp.ge.f32.partialorder %v1012_v38, 0.0 }
 0x126   :  { %v1750_v41 = vpack.c.bf16 %v1167_v36, %v1166_v20  ;;  %v1199_v42 = vsel %vm1071_vm7, %v1007_v27, %v1135_v35  ;;  %v1140_v48 = vmul.f32 0.3, %v1012_v38  ;;  %v597_v49 = vpop.f32.mrb[25].mxu0  ;;  %v725_v50 = vpop.f32.mrb[25].mxu1  ;;  %v1172_v51 = vsel %vm1044_vm8, %v980_v28, %v1108_v37 }
 0x127   :  { %v1830_v47 = vpack.c.bf16 %v1199_v42, %v1198_v25  ;;  %vm1042_vm10 = vcmp.ge.f32.partialorder %v978_v39, 0.0  ;;  %v1106_v52 = vmul.f32 0.3, %v978_v39  ;;  %v1138_v53 = vmul.f32 0.3, %v1010_v43  ;;  %v1981_v56 = vpop.f32.mrb[26].mxu0 }
 0x128   :  { %1874 = vst [vmem:[%s2391_s3 + $0x40] sm:$0xff] %v1750_v41   ;;  %vm1074_vm11 = vcmp.ge.f32.partialorder %v1010_v43, 0.0  ;;  %vm1045_vm12 = vcmp.ge.f32.partialorder %v981_v44, 0.0  ;;  %v1109_v54 = vmul.f32 0.3, %v981_v44  ;;  %v1013_v55 = vadd.f32 %v2009_v24, %v2217_v40  ;;  %v2013_v57 = vpop.f32.mrb[26].mxu1 }
 0x129   :  { %1890 = vst [vmem:[%s2391_s3 + $0xc0] sm:$0xff] %v1830_v47   ;;  %v1204_v58 = vsel %vm1076_vm9, %v1012_v38, %v1140_v48  ;;  %v1170_v59 = vsel %vm1042_vm10, %v978_v39, %v1106_v52  ;;  %v979_v60 = vadd.f32 %v2217_v40, %v584_v29  ;;  %v1011_v61 = vadd.f32 %v2217_v40, %v712_v30  ;;  %v600_v62 = vpop.f32.mrb[27].mxu0  ;;  %v728_v63 = vpop.f32.mrb[27].mxu1 }
 0x12a   :  { %v1173_v0 = vsel %vm1045_vm12, %v981_v44, %v1109_v54  ;;  %vm1077_vm13 = vcmp.ge.f32.partialorder %v1013_v55, 0.0  ;;  %v1141_v1 = vmul.f32 0.3, %v1013_v55  ;;  %v984_v2 = vadd.f32 %v1980_v45, %v2217_v40 }
 0x12b   :  { %v1765_v3 = vpack.c.bf16 %v1173_v0, %v1172_v51  ;;  %vm1043_vm14 = vcmp.ge.f32.partialorder %v979_v60, 0.0  ;;  %v1107_v4 = vmul.f32 0.3, %v979_v60  ;;  %vm1075_vm15 = vcmp.ge.f32.partialorder %v1011_v61, 0.0 }
 0x12c   :  { %v1205_v5 = vsel %vm1077_vm13, %v1013_v55, %v1141_v1  ;;  %v1139_v6 = vmul.f32 0.3, %v1011_v61  ;;  %vm1048_vm0 = vcmp.ge.f32.partialorder %v984_v2, 0.0  ;;  %v1112_v7 = vmul.f32 0.3, %v984_v2 }
 0x12d   :  { %1877 = vst [vmem:[%s2391_s3 + $0x58] sm:$0xff] %v1765_v3   ;;  %v1845_v8 = vpack.c.bf16 %v1205_v5, %v1204_v58  ;;  %v1171_v9 = vsel %vm1043_vm14, %v979_v60, %v1107_v4  ;;  %v1016_v10 = vadd.f32 %v2012_v46, %v2217_v40  ;;  %v982_v11 = vadd.f32 %v2217_v40, %v597_v49  ;;  %v1984_v12 = vpop.f32.mrb[28].mxu0  ;;  %v2016_v13 = vpop.f32.mrb[28].mxu1 }
 0x12e   :  { %v1202_v14 = vsel %vm1074_vm11, %v1010_v43, %v1138_v53  ;;  %v1760_v15 = vpack.c.bf16 %v1171_v9, %v1170_v59  ;;  %v1203_v16 = vsel %vm1075_vm15, %v1011_v61, %v1139_v6  ;;  %v1014_v17 = vadd.f32 %v2217_v40, %v725_v50  ;;  %v613_v18 = vpop.f32.mrb[29].mxu0  ;;  %v741_v19 = vpop.f32.mrb[29].mxu1 }
 0x12f   :  { %1893 = vst [vmem:[%s2391_s3 + $0xd8] sm:$0xff] %v1845_v8   ;;  %v1840_v20 = vpack.c.bf16 %v1203_v16, %v1202_v14  ;;  %vm1080_vm1 = vcmp.ge.f32.partialorder %v1016_v10, 0.0  ;;  %v1144_v21 = vmul.f32 0.3, %v1016_v10  ;;  %vm1046_vm2 = vcmp.ge.f32.partialorder %v982_v11, 0.0  ;;  %v1985_v22 = vpop.f32.mrb[30].mxu0 }
 0x130   :  { %v2017_v23 = vpop.f32.mrb[30].mxu1  ;;  %1876 = vst [vmem:[%s2391_s3 + $0x50] sm:$0xff] %v1760_v15   ;;  %v1176_v24 = vsel %vm1048_vm0, %v984_v2, %v1112_v7  ;;  %v1110_v25 = vmul.f32 0.3, %v982_v11  ;;  %vm1078_vm3 = vcmp.ge.f32.partialorder %v1014_v17, 0.0  ;;  %v985_v26 = vadd.f32 %v1981_v56, %v2217_v40  ;;  %v616_v27 = vpop.f32.mrb[31].mxu0 }
 0x131   :  { %1892 = vst [vmem:[%s2391_s3 + $0xd0] sm:$0xff] %v1840_v20   ;;  %v1142_v28 = vmul.f32 0.3, %v1014_v17  ;;  %v1017_v29 = vadd.f32 %v2013_v57, %v2217_v40  ;;  %v983_v30 = vadd.f32 %v2217_v40, %v600_v62  ;;  %v1015_v31 = vadd.f32 %v2217_v40, %v728_v63  ;;  %v744_v32 = vpop.f32.mrb[31].mxu1 }
 0x132   :  { %v1208_v33 = vsel %vm1080_vm1, %v1016_v10, %v1144_v21  ;;  %v1174_v34 = vsel %vm1046_vm2, %v982_v11, %v1110_v25  ;;  %vm1049_vm4 = vcmp.ge.f32.partialorder %v985_v26, 0.0  ;;  %v1113_v35 = vmul.f32 0.3, %v985_v26 }
 0x133   :  { %vm1081_vm5 = vcmp.ge.f32.partialorder %v1017_v29, 0.0  ;;  %v1145_v36 = vmul.f32 0.3, %v1017_v29  ;;  %vm1047_vm6 = vcmp.ge.f32.partialorder %v983_v30, 0.0  ;;  %v1111_v37 = vmul.f32 0.3, %v983_v30 }
 0x134   :  { %v1177_v38 = vsel %vm1049_vm4, %v985_v26, %v1113_v35  ;;  %vm1079_vm7 = vcmp.ge.f32.partialorder %v1015_v31, 0.0  ;;  %v1143_v39 = vmul.f32 0.3, %v1015_v31  ;;  %v988_v41 = vadd.f32 %v1984_v12, %v2217_v40 }
 0x135   :  { %v1775_v42 = vpack.c.bf16 %v1177_v38, %v1176_v24  ;;  %v1209_v43 = vsel %vm1081_vm5, %v1017_v29, %v1145_v36  ;;  %v1175_v44 = vsel %vm1047_vm6, %v983_v30, %v1111_v37  ;;  %v1020_v45 = vadd.f32 %v2016_v13, %v2217_v40 }
 0x136   :  { %v1206_v46 = vsel %vm1078_vm3, %v1014_v17, %v1142_v28  ;;  %v1855_v47 = vpack.c.bf16 %v1209_v43, %v1208_v33  ;;  %v1770_v48 = vpack.c.bf16 %v1175_v44, %v1174_v34  ;;  %v1207_v49 = vsel %vm1079_vm7, %v1015_v31, %v1143_v39 }
 0x137   :  { %1879 = vst [vmem:[%s2391_s3 + $0x68] sm:$0xff] %v1775_v42   ;;  %v1850_v50 = vpack.c.bf16 %v1207_v49, %v1206_v46  ;;  %vm1052_vm8 = vcmp.ge.f32.partialorder %v988_v41, 0.0  ;;  %v1116_v51 = vmul.f32 0.3, %v988_v41  ;;  %v1148_v52 = vmul.f32 0.3, %v1020_v45 }
 0x138   :  { %1895 = vst [vmem:[%s2391_s3 + $0xe8] sm:$0xff] %v1855_v47   ;;  %1878 = vst [vmem:[%s2391_s3 + $0x60] sm:$0xff] %v1770_v48   ;;  %v986_v53 = vadd.f32 %v2217_v40, %v613_v18  ;;  %v1018_v54 = vadd.f32 %v2217_v40, %v741_v19  ;;  %v989_v55 = vadd.f32 %v1985_v22, %v2217_v40  ;;  %vm1084_vm9 = vcmp.ge.f32.partialorder %v1020_v45, 0.0 }
 0x139   :  { %v1021_v56 = vadd.f32 %v2017_v23, %v2217_v40  ;;  %1894 = vst [vmem:[%s2391_s3 + $0xe0] sm:$0xff] %v1850_v50   ;;  %v987_v57 = vadd.f32 %v2217_v40, %v616_v27  ;;  %v1019_v58 = vadd.f32 %v2217_v40, %v744_v32  ;;  %v1180_v59 = vsel %vm1052_vm8, %v988_v41, %v1116_v51 }
 0x13a   :  { %vm1050_vm10 = vcmp.ge.f32.partialorder %v986_v53, 0.0  ;;  %v1114_v60 = vmul.f32 0.3, %v986_v53  ;;  %v1146_v61 = vmul.f32 0.3, %v1018_v54  ;;  %vm1053_vm11 = vcmp.ge.f32.partialorder %v989_v55, 0.0 }
 0x13b   :  { %v1117_v62 = vmul.f32 0.3, %v989_v55  ;;  %vm1085_vm12 = vcmp.ge.f32.partialorder %v1021_v56, 0.0  ;;  %v1149_v63 = vmul.f32 0.3, %v1021_v56  ;;  %v1212_v0 = vsel %vm1084_vm9, %v1020_v45, %v1148_v52 }
 0x13c   :  { %vm1082_vm13 = vcmp.ge.f32.partialorder %v1018_v54, 0.0  ;;  %vm1051_vm14 = vcmp.ge.f32.partialorder %v987_v57, 0.0  ;;  %v1115_v1 = vmul.f32 0.3, %v987_v57  ;;  %vm1083_vm15 = vcmp.ge.f32.partialorder %v1019_v58, 0.0 }
 0x13d   :  { %v1181_v2 = vsel %vm1053_vm11, %v989_v55, %v1117_v62  ;;  %v1213_v3 = vsel %vm1085_vm12, %v1021_v56, %v1149_v63  ;;  %v1147_v4 = vmul.f32 0.3, %v1019_v58  ;;  %v1178_v5 = vsel %vm1050_vm10, %v986_v53, %v1114_v60 }
 0x13e   :  { %v1785_v6 = vpack.c.bf16 %v1181_v2, %v1180_v59  ;;  %v1865_v7 = vpack.c.bf16 %v1213_v3, %v1212_v0  ;;  %v1179_v40 = vsel %vm1051_vm14, %v987_v57, %v1115_v1  ;;  %v1210_v8 = vsel %vm1082_vm13, %v1018_v54, %v1146_v61 }
 0x13f   :  { %v1780_v9 = vpack.c.bf16 %v1179_v40, %v1178_v5  ;;  %v1211_v10 = vsel %vm1083_vm15, %v1019_v58, %v1147_v4 }
 0x140   :  { %1881 = vst [vmem:[%s2391_s3 + $0x78] sm:$0xff] %v1785_v6   ;;  %1897 = vst [vmem:[%s2391_s3 + $0xf8] sm:$0xff] %v1865_v7   ;;  %v1860_v11 = vpack.c.bf16 %v1211_v10, %v1210_v8 }
 0x141   :  { %1880 = vst [vmem:[%s2391_s3 + $0x70] sm:$0xff] %v1780_v9  }
 0x142   :  { %1896 = vst [vmem:[%s2391_s3 + $0xf0] sm:$0xff] %v1860_v11  }

// kernel: discriminator_forward.9
= control target key start
LH: loop header
LB: loop body
LE: loop exit
PB: predicated region body
PF: predicated region fallthrough
CT: control target
= control target key end

     0   :  { %s2552_s1 = inlined_call_operand.vmem [shape: bf16[1024,128], index: 1, kind: input, shape index: {}]   ;;  %s2553_s0 = inlined_call_operand.vmem [shape: bf16[128,1024], index: 0, kind: input, shape index: {}]   ;;  %s2554_s2 = inlined_call_operand.vmem [shape: bf16[128,128], index: 2, kind: output, shape index: {0}]   ;;  %s2555_s3 = inlined_call_operand.vmem [shape: f32[8,128], index: 3, kind: output, shape index: {1}]   ;;  %s2556_s4 = inlined_call_operand.vmem [shape: f32[8,128], index: 4, kind: output, shape index: {2}]  }
   0x1   :  { %v2001_v0 = vld [vmem:[%s2552_s1 + $0x40] sm:$0xff]   ;;  %v2005_v4 = vld [vmem:[%s2552_s1 + $0x48] sm:$0xff]   ;;  %v2009_v8 = vld [vmem:[%s2552_s1 + $0x50] sm:$0xff]  }
   0x2   :  { %v2002_v1 = vld [vmem:[%s2552_s1 + $0xc0] sm:$0xff]   ;;  %1745 = vmatprep.subr.bf16.mxu0 %v2001_v0  ;;  %v2006_v5 = vld [vmem:[%s2552_s1 + $0xc8] sm:$0xff]   ;;  %v2010_v9 = vld [vmem:[%s2552_s1 + $0xd0] sm:$0xff]  }
   0x3   :  { %v2003_v2 = vld [vmem:[%s2552_s1] sm:$0xff]   ;;  %1809 = vmatprep.subr.bf16.mxu1 %v2002_v1  ;;  %v2007_v6 = vld [vmem:[%s2552_s1 + $0x8] sm:$0xff]   ;;  %v2011_v10 = vld [vmem:[%s2552_s1 + $0x10] sm:$0xff]  }
   0x4   :  { %v2004_v3 = vld [vmem:[%s2552_s1 + $0x80] sm:$0xff]   ;;  %1746 = vmatpush3.bf16.msra.mxu0 %v2003_v2  ;;  %v2008_v7 = vld [vmem:[%s2552_s1 + $0x88] sm:$0xff]   ;;  %v2012_v11 = vld [vmem:[%s2552_s1 + $0x90] sm:$0xff]  }
   0x5   :  { %1810 = vmatpush3.bf16.msra.mxu1 %v2004_v3  ;;  %1747 = vmatprep.subr.bf16.mxu0 %v2005_v4  ;;  %v2013_v12 = vld [vmem:[%s2552_s1 + $0x58] sm:$0xff]   ;;  %v2017_v16 = vld [vmem:[%s2552_s1 + $0x60] sm:$0xff]   ;;  %v2021_v20 = vld [vmem:[%s2552_s1 + $0x68] sm:$0xff]  }
   0x6   :  { %1811 = vmatprep.subr.bf16.mxu1 %v2006_v5  ;;  %v2014_v13 = vld [vmem:[%s2552_s1 + $0xd8] sm:$0xff]   ;;  %v2018_v17 = vld [vmem:[%s2552_s1 + $0xe0] sm:$0xff]   ;;  %v2022_v21 = vld [vmem:[%s2552_s1 + $0xe8] sm:$0xff]  }
   0x7   :  { %v2015_v14 = vld [vmem:[%s2552_s1 + $0x18] sm:$0xff]   ;;  %v2019_v18 = vld [vmem:[%s2552_s1 + $0x20] sm:$0xff]   ;;  %v2023_v22 = vld [vmem:[%s2552_s1 + $0x28] sm:$0xff]  }
   0x8   :  { %1748 = vmatpush3.bf16.msra.mxu0 %v2007_v6  ;;  %v2016_v15 = vld [vmem:[%s2552_s1 + $0x98] sm:$0xff]   ;;  %v2020_v19 = vld [vmem:[%s2552_s1 + $0xa0] sm:$0xff]   ;;  %v2024_v23 = vld [vmem:[%s2552_s1 + $0xa8] sm:$0xff]  }
   0x9   :  { %1812 = vmatpush3.bf16.msra.mxu1 %v2008_v7  ;;  %1749 = vmatprep.subr.bf16.mxu0 %v2009_v8  ;;  %v2025_v24 = vld [vmem:[%s2552_s1 + $0x70] sm:$0xff]   ;;  %v2029_v28 = vld [vmem:[%s2552_s1 + $0x78] sm:$0xff]   ;;  %v51_v32 = vld [vmem:[%s2553_s0] sm:$0xff] }
   0xa   :  { %1813 = vmatprep.subr.bf16.mxu1 %v2010_v9  ;;  %v2026_v25 = vld [vmem:[%s2552_s1 + $0xf0] sm:$0xff]   ;;  %v2030_v29 = vld [vmem:[%s2552_s1 + $0xf8] sm:$0xff]   ;;  %v55_v33 = vld [vmem:[%s2553_s0 + $0x20] sm:$0xff] }
   0xb   :  { %v2027_v26 = vld [vmem:[%s2552_s1 + $0x30] sm:$0xff]   ;;  %v2031_v30 = vld [vmem:[%s2552_s1 + $0x38] sm:$0xff]   ;;  %v52_v34 = vld [vmem:[%s2553_s0 + $0x8] sm:$0xff]  ;;  %v1538_v35 = vcombine.low %v51_v32, %v55_v33  ;;  %v1539_v36 = vcombine.high %v51_v32, %v55_v33 }
   0xc   :  { %1750 = vmatpush3.bf16.msra.mxu0 %v2011_v10  ;;  %v2028_v27 = vld [vmem:[%s2552_s1 + $0xb0] sm:$0xff]   ;;  %v2032_v31 = vld [vmem:[%s2552_s1 + $0xb8] sm:$0xff]   ;;  %v56_v37 = vld [vmem:[%s2553_s0 + $0x28] sm:$0xff] }
   0xd   :  { %1814 = vmatpush3.bf16.msra.mxu1 %v2012_v11  ;;  %1751 = vmatprep.subr.bf16.mxu0 %v2013_v12  ;;  %v1540_v38 = vcombine.low %v52_v34, %v56_v37  ;;  %v1541_v39 = vcombine.high %v52_v34, %v56_v37  ;;  %v2033_v40 = vld [vmem:[%s2552_s1 + $0x140] sm:$0xff]   ;;  %v60_v47 = vld [vmem:[%s2553_s0 + $0x48] sm:$0xff]  ;;  %v2041_v62 = vld [vmem:[%s2552_s1 + $0x150] sm:$0xff]  }
   0xe   :  { %1815 = vmatprep.subr.bf16.mxu1 %v2014_v13  ;;  %979 = vmatprep.mubr.bf16.mxu0 %v1539_v36  ;;  %v2034_v41 = vld [vmem:[%s2552_s1 + $0x100] sm:$0xff]   ;;  %v64_v48 = vld [vmem:[%s2553_s0 + $0x68] sm:$0xff]  ;;  %v2042_v63 = vld [vmem:[%s2552_s1 + $0x110] sm:$0xff]  }
   0xf   :  { %1076 = vmatprep.mubr.bf16.mxu1 %v1541_v39  ;;  %v2035_v42 = vld [vmem:[%s2552_s1 + $0x1c0] sm:$0xff]   ;;  %v1549_v49 = vcombine.high %v60_v47, %v64_v48  ;;  %v2037_v50 = vld [vmem:[%s2552_s1 + $0x148] sm:$0xff]   ;;  %v1548_v53 = vcombine.low %v60_v47, %v64_v48  ;;  %v2043_v0 = vld [vmem:[%s2552_s1 + $0x1d0] sm:$0xff]  }
  0x10   :  { %1752 = vmatpush3.bf16.msra.mxu0 %v2015_v14  ;;  %v2036_v43 = vld [vmem:[%s2552_s1 + $0x180] sm:$0xff]   ;;  %v2038_v52 = vld [vmem:[%s2552_s1 + $0x108] sm:$0xff]   ;;  %v2044_v1 = vld [vmem:[%s2552_s1 + $0x190] sm:$0xff]  }
  0x11   :  { %1816 = vmatpush3.bf16.msra.mxu1 %v2016_v15  ;;  %1753 = vmatprep.subr.bf16.mxu0 %v2017_v16  ;;  %v59_v44 = vld [vmem:[%s2553_s0 + $0x40] sm:$0xff]  ;;  %v2039_v54 = vld [vmem:[%s2552_s1 + $0x1c8] sm:$0xff]   ;;  %v2045_v10 = vld [vmem:[%s2552_s1 + $0x158] sm:$0xff]  }
  0x12   :  { %1817 = vmatprep.subr.bf16.mxu1 %v2018_v17  ;;  %v63_v45 = vld [vmem:[%s2553_s0 + $0x60] sm:$0xff]  ;;  %v2040_v55 = vld [vmem:[%s2552_s1 + $0x188] sm:$0xff]   ;;  %v2046_v11 = vld [vmem:[%s2552_s1 + $0x118] sm:$0xff]  }
  0x13   :  { %v1547_v46 = vcombine.high %v59_v44, %v63_v45  ;;  %v1546_v51 = vcombine.low %v59_v44, %v63_v45  ;;  %v67_v56 = vld [vmem:[%s2553_s0 + $0x80] sm:$0xff]  ;;  %v68_v58 = vld [vmem:[%s2553_s0 + $0x88] sm:$0xff]  ;;  %v2047_v12 = vld [vmem:[%s2552_s1 + $0x1d8] sm:$0xff]  }
  0x14   :  { %1754 = vmatpush3.bf16.msra.mxu0 %v2019_v18  ;;  %v71_v57 = vld [vmem:[%s2553_s0 + $0xa0] sm:$0xff]  ;;  %v72_v59 = vld [vmem:[%s2553_s0 + $0xa8] sm:$0xff]  ;;  %v2048_v13 = vld [vmem:[%s2552_s1 + $0x198] sm:$0xff]  }
  0x15   :  { %1818 = vmatpush3.bf16.msra.mxu1 %v2020_v19  ;;  %1755 = vmatprep.subr.bf16.mxu0 %v2021_v20  ;;  %v1555_v60 = vcombine.high %v67_v56, %v71_v57  ;;  %v1557_v61 = vcombine.high %v68_v58, %v72_v59  ;;  %v1554_v2 = vcombine.low %v67_v56, %v71_v57  ;;  %v75_v3 = vld [vmem:[%s2553_s0 + $0xc0] sm:$0xff]  ;;  %v76_v5 = vld [vmem:[%s2553_s0 + $0xc8] sm:$0xff]  ;;  %v2058_v39 = vld [vmem:[%s2552_s1 + $0x130] sm:$0xff]  }
  0x16   :  { %1819 = vmatprep.subr.bf16.mxu1 %v2022_v21  ;;  %v79_v4 = vld [vmem:[%s2553_s0 + $0xe0] sm:$0xff]  ;;  %v1556_v6 = vcombine.low %v68_v58, %v72_v59  ;;  %v80_v8 = vld [vmem:[%s2553_s0 + $0xe8] sm:$0xff]  ;;  %v2062_v48 = vld [vmem:[%s2552_s1 + $0x138] sm:$0xff]  }
  0x17   :  { %v1563_v7 = vcombine.high %v75_v3, %v79_v4  ;;  %v1565_v9 = vcombine.high %v76_v5, %v80_v8  ;;  %v83_v14 = vld [vmem:[%s2553_s0 + $0x100] sm:$0xff]  ;;  %v84_v16 = vld [vmem:[%s2553_s0 + $0x108] sm:$0xff]  ;;  %v1562_v19 = vcombine.low %v75_v3, %v79_v4  ;;  %v1564_v21 = vcombine.low %v76_v5, %v80_v8  ;;  %v62_v8 = vld [vmem:[%s2553_s0 + $0x58] sm:$0xff] }
  0x18   :  { %1756 = vmatpush3.bf16.msra.mxu0 %v2023_v22  ;;  %v87_v15 = vld [vmem:[%s2553_s0 + $0x120] sm:$0xff]  ;;  %v88_v17 = vld [vmem:[%s2553_s0 + $0x128] sm:$0xff] }
  0x19   :  { %1820 = vmatpush3.bf16.msra.mxu1 %v2024_v23  ;;  %1757 = vmatprep.subr.bf16.mxu0 %v2025_v24  ;;  %v2049_v18 = vld [vmem:[%s2552_s1 + $0x160] sm:$0xff]   ;;  %v1571_v22 = vcombine.high %v83_v14, %v87_v15  ;;  %v1573_v24 = vcombine.high %v84_v16, %v88_v17  ;;  %v2055_v32 = vld [vmem:[%s2552_s1 + $0x1e8] sm:$0xff]   ;;  %v1570_v34 = vcombine.low %v83_v14, %v87_v15  ;;  %v69_v14 = vld [vmem:[%s2553_s0 + $0x90] sm:$0xff] }
  0x1a   :  { %1821 = vmatprep.subr.bf16.mxu1 %v2026_v25  ;;  %v2050_v20 = vld [vmem:[%s2552_s1 + $0x120] sm:$0xff]   ;;  %v2056_v33 = vld [vmem:[%s2552_s1 + $0x1a8] sm:$0xff]   ;;  %v73_v15 = vld [vmem:[%s2553_s0 + $0xb0] sm:$0xff] }
  0x1b   :  { %v2051_v23 = vld [vmem:[%s2552_s1 + $0x1e0] sm:$0xff]   ;;  %v100_v44 = vld [vmem:[%s2553_s0 + $0x188] sm:$0xff] }
  0x1c   :  { %1758 = vmatpush3.bf16.msra.mxu0 %v2027_v26  ;;  %v2052_v25 = vld [vmem:[%s2552_s1 + $0x1a0] sm:$0xff]   ;;  %v104_v45 = vld [vmem:[%s2553_s0 + $0x1a8] sm:$0xff] }
  0x1d   :  { %1822 = vmatpush3.bf16.msra.mxu1 %v2028_v27  ;;  %1759 = vmatprep.subr.bf16.mxu0 %v2029_v28  ;;  %v91_v26 = vld [vmem:[%s2553_s0 + $0x140] sm:$0xff]  ;;  %v2053_v28 = vld [vmem:[%s2552_s1 + $0x168] sm:$0xff]   ;;  %v1588_v59 = vcombine.low %v100_v44, %v104_v45 }
  0x1e   :  { %1823 = vmatprep.subr.bf16.mxu1 %v2030_v29  ;;  %v95_v27 = vld [vmem:[%s2553_s0 + $0x160] sm:$0xff]  ;;  %v92_v29 = vld [vmem:[%s2553_s0 + $0x148] sm:$0xff] }
  0x1f   :  { %v1579_v36 = vcombine.high %v91_v26, %v95_v27  ;;  %v1578_v47 = vcombine.low %v91_v26, %v95_v27  ;;  %v108_v56 = vld [vmem:[%s2553_s0 + $0x1c8] sm:$0xff]  ;;  %v1558_v26 = vcombine.low %v69_v14, %v73_v15 }
  0x20   :  { %1760 = vmatpush3.bf16.msra.mxu0 %v2031_v30  ;;  %v96_v30 = vld [vmem:[%s2553_s0 + $0x168] sm:$0xff] }
  0x21   :  { %1824 = vmatpush3.bf16.msra.mxu1 %v2032_v31  ;;  %1873 = vmatprep.subr.bf16.mxu0 %v2033_v40  ;;  %v2054_v31 = vld [vmem:[%s2552_s1 + $0x128] sm:$0xff]   ;;  %v1581_v37 = vcombine.high %v92_v29, %v96_v30  ;;  %v2059_v40 = vld [vmem:[%s2552_s1 + $0x1f0] sm:$0xff]  }
  0x22   :  { %1937 = vmatprep.subr.bf16.mxu1 %v2035_v42  ;;  %v103_v42 = vld [vmem:[%s2553_s0 + $0x1a0] sm:$0xff]  ;;  %v112_v57 = vld [vmem:[%s2553_s0 + $0x1e8] sm:$0xff] }
  0x23   :  { %980 = vmatmul.mubr.bf16.vlgmr.msra.gmra.mrb[0].mxu0 %v1538_v35  ;;  %v1572_v35 = vcombine.low %v84_v16, %v88_v17  ;;  %v1596_v3 = vcombine.low %v108_v56, %v112_v57  ;;  %v70_v16 = vld [vmem:[%s2553_s0 + $0x98] sm:$0xff] }
  0x24   :  { %1077 = vmatmul.mubr.bf16.vlgmr.msra.gmra.mrb[0].mxu1 %v1540_v38  ;;  %1874 = vmatpush3.bf16.msra.mxu0 %v2034_v41  ;;  %v2057_v38 = vld [vmem:[%s2552_s1 + $0x170] sm:$0xff]   ;;  %v99_v41 = vld [vmem:[%s2553_s0 + $0x180] sm:$0xff]  ;;  %v74_v17 = vld [vmem:[%s2553_s0 + $0xb8] sm:$0xff] }
  0x25   :  { %1938 = vmatpush3.bf16.msra.mxu1 %v2036_v43  ;;  %987 = vmatprep.mubr.bf16.mxu0 %v1547_v46  ;;  %v2060_v43 = vld [vmem:[%s2552_s1 + $0x1b0] sm:$0xff]   ;;  %v2061_v46 = vld [vmem:[%s2552_s1 + $0x178] sm:$0xff]   ;;  %v1586_v58 = vcombine.low %v99_v41, %v103_v42  ;;  %v1560_v27 = vcombine.low %v70_v16, %v74_v17 }
  0x26   :  { %1084 = vmatprep.mubr.bf16.mxu1 %v1549_v49  ;;  %1875 = vmatprep.subr.bf16.mxu0 %v2037_v50  ;;  %v1580_v49 = vcombine.low %v92_v29, %v96_v30  ;;  %v1587_v50 = vcombine.high %v99_v41, %v103_v42  ;;  %v85_v30 = vld [vmem:[%s2553_s0 + $0x110] sm:$0xff]  ;;  %v98_v41 = vld [vmem:[%s2553_s0 + $0x178] sm:$0xff] }
  0x27   :  { %1939 = vmatprep.subr.bf16.mxu1 %v2039_v54  ;;  %v107_v54 = vld [vmem:[%s2553_s0 + $0x1c0] sm:$0xff] }
  0x28   :  { %1876 = vmatpush3.bf16.msra.mxu0 %v2038_v52  ;;  %v1589_v52 = vcombine.high %v100_v44, %v104_v45 }
  0x29   :  { %1940 = vmatpush3.bf16.msra.mxu1 %v2040_v55  ;;  %1877 = vmatprep.subr.bf16.mxu0 %v2041_v62  ;;  %v111_v55 = vld [vmem:[%s2553_s0 + $0x1e0] sm:$0xff]  ;;  %v53_v62 = vld [vmem:[%s2553_s0 + $0x10] sm:$0xff] }
  0x2a   :  { %1941 = vmatprep.subr.bf16.mxu1 %v2043_v0  ;;  %v54_v0 = vld [vmem:[%s2553_s0 + $0x18] sm:$0xff] }
  0x2b   :  { %988 = vmatmul.mubr.bf16.gmra.mrb[4].mxu0 %v1546_v51  ;;  %v2063_v51 = vld [vmem:[%s2552_s1 + $0x1f8] sm:$0xff]  }
  0x2c   :  { %1085 = vmatmul.mubr.bf16.gmra.mrb[4].mxu1 %v1548_v53  ;;  %995 = vmatprep.mubr.bf16.mxu0 %v1555_v60  ;;  %v2064_v53 = vld [vmem:[%s2552_s1 + $0x1b8] sm:$0xff]   ;;  %v1595_v60 = vcombine.high %v107_v54, %v111_v55 }
  0x2d   :  { %1092 = vmatprep.mubr.bf16.mxu1 %v1557_v61  ;;  %1878 = vmatpush3.bf16.msra.mxu0 %v2042_v63  ;;  %v1597_v61 = vcombine.high %v108_v56, %v112_v57  ;;  %v57_v63 = vld [vmem:[%s2553_s0 + $0x30] sm:$0xff]  ;;  %v110_v56 = vld [vmem:[%s2553_s0 + $0x1d8] sm:$0xff] }
  0x2e   :  { %1942 = vmatpush3.bf16.msra.mxu1 %v2044_v1  ;;  %1879 = vmatprep.subr.bf16.mxu0 %v2045_v10  ;;  %v58_v1 = vld [vmem:[%s2553_s0 + $0x38] sm:$0xff]  ;;  %v1543_v4 = vcombine.high %v53_v62, %v57_v63  ;;  %v1542_v10 = vcombine.low %v53_v62, %v57_v63 }
  0x2f   :  { %1943 = vmatprep.subr.bf16.mxu1 %v2047_v12  ;;  %v1545_v5 = vcombine.high %v54_v0, %v58_v1  ;;  %v114_v57 = vld [vmem:[%s2553_s0 + $0x1f8] sm:$0xff] }
  0x30   :  { %v1600_v63 = vcombine.low %v110_v56, %v114_v57 }
  0x31   :  { %1880 = vmatpush3.bf16.msra.mxu0 %v2046_v11  ;;  %v1544_v11 = vcombine.low %v54_v0, %v58_v1 }
  0x32   :  { %1944 = vmatpush3.bf16.msra.mxu1 %v2048_v13  ;;  %1881 = vmatprep.subr.bf16.mxu0 %v2049_v18 }
  0x33   :  { %996 = vmatmul.mubr.bf16.gmra.mrb[8].mxu0 %v1554_v2  ;;  %1945 = vmatprep.subr.bf16.mxu1 %v2051_v23  ;;  %v1594_v2 = vcombine.low %v107_v54, %v111_v55  ;;  %v81_v23 = vld [vmem:[%s2553_s0 + $0xf0] sm:$0xff] }
  0x34   :  { %1093 = vmatmul.mubr.bf16.gmra.mrb[8].mxu1 %v1556_v6  ;;  %1003 = vmatprep.mubr.bf16.mxu0 %v1563_v7  ;;  %v61_v6 = vld [vmem:[%s2553_s0 + $0x50] sm:$0xff] }
  0x35   :  { %1100 = vmatprep.mubr.bf16.mxu1 %v1565_v9  ;;  %1882 = vmatpush3.bf16.msra.mxu0 %v2050_v20  ;;  %v65_v7 = vld [vmem:[%s2553_s0 + $0x70] sm:$0xff]  ;;  %v66_v9 = vld [vmem:[%s2553_s0 + $0x78] sm:$0xff]  ;;  %v1559_v20 = vcombine.high %v69_v14, %v73_v15 }
  0x36   :  { %1946 = vmatpush3.bf16.msra.mxu1 %v2052_v25  ;;  %1883 = vmatprep.subr.bf16.mxu0 %v2053_v28  ;;  %v1551_v12 = vcombine.high %v61_v6, %v65_v7  ;;  %v1553_v13 = vcombine.high %v62_v8, %v66_v9  ;;  %v1550_v18 = vcombine.low %v61_v6, %v65_v7  ;;  %v82_v25 = vld [vmem:[%s2553_s0 + $0xf8] sm:$0xff]  ;;  %v109_v54 = vld [vmem:[%s2553_s0 + $0x1d0] sm:$0xff] }
  0x37   :  { %1947 = vmatprep.subr.bf16.mxu1 %v2055_v32  ;;  %v86_v32 = vld [vmem:[%s2553_s0 + $0x118] sm:$0xff]  ;;  %v113_v55 = vld [vmem:[%s2553_s0 + $0x1f0] sm:$0xff] }
  0x38   :  { %v1598_v62 = vcombine.low %v109_v54, %v113_v55 }
  0x39   :  { %1884 = vmatpush3.bf16.msra.mxu0 %v2054_v31  ;;  %v89_v31 = vld [vmem:[%s2553_s0 + $0x130] sm:$0xff] }
  0x3a   :  { %1948 = vmatpush3.bf16.msra.mxu1 %v2056_v33  ;;  %1885 = vmatprep.subr.bf16.mxu0 %v2057_v38  ;;  %v90_v33 = vld [vmem:[%s2553_s0 + $0x138] sm:$0xff]  ;;  %v93_v38 = vld [vmem:[%s2553_s0 + $0x150] sm:$0xff]  ;;  %v1574_v42 = vcombine.low %v85_v30, %v89_v31 }
  0x3b   :  { %1004 = vmatmul.mubr.bf16.gmra.mrb[12].mxu0 %v1562_v19  ;;  %1949 = vmatprep.subr.bf16.mxu1 %v2059_v40  ;;  %v1552_v19 = vcombine.low %v62_v8, %v66_v9  ;;  %v94_v40 = vld [vmem:[%s2553_s0 + $0x158] sm:$0xff] }
  0x3c   :  { %1101 = vmatmul.mubr.bf16.gmra.mrb[12].mxu1 %v1564_v21  ;;  %1011 = vmatprep.mubr.bf16.mxu0 %v1571_v22  ;;  %v1561_v21 = vcombine.high %v70_v16, %v74_v17  ;;  %v77_v22 = vld [vmem:[%s2553_s0 + $0xd0] sm:$0xff]  ;;  %v1585_v45 = vcombine.high %v94_v40, %v98_v41 }
  0x3d   :  { %1108 = vmatprep.mubr.bf16.mxu1 %v1573_v24  ;;  %1886 = vmatpush3.bf16.msra.mxu0 %v2058_v39  ;;  %v78_v24 = vld [vmem:[%s2553_s0 + $0xd8] sm:$0xff]  ;;  %v1567_v28 = vcombine.high %v77_v22, %v81_v23  ;;  %v97_v39 = vld [vmem:[%s2553_s0 + $0x170] sm:$0xff] }
  0x3e   :  { %1950 = vmatpush3.bf16.msra.mxu1 %v2060_v43  ;;  %1887 = vmatprep.subr.bf16.mxu0 %v2061_v46  ;;  %v1569_v29 = vcombine.high %v78_v24, %v82_v25  ;;  %v1576_v43 = vcombine.low %v86_v32, %v90_v33  ;;  %v1583_v44 = vcombine.high %v93_v38, %v97_v39  ;;  %v101_v46 = vld [vmem:[%s2553_s0 + $0x190] sm:$0xff] }
  0x3f   :  { %1951 = vmatprep.subr.bf16.mxu1 %v2063_v51  ;;  %v1584_v51 = vcombine.low %v94_v40, %v98_v41 }
  0x41   :  { %1888 = vmatpush3.bf16.msra.mxu0 %v2062_v48  ;;  %v102_v48 = vld [vmem:[%s2553_s0 + $0x198] sm:$0xff] }
  0x42   :  { %1952 = vmatpush3.bf16.msra.mxu1 %v2064_v53 }
  0x43   :  { %1012 = vmatmul.mubr.bf16.gmra.mrb[16].mxu0 %v1570_v34  ;;  %v1566_v34 = vcombine.low %v77_v22, %v81_v23 }
  0x44   :  { %1109 = vmatmul.mubr.bf16.gmra.mrb[16].mxu1 %v1572_v35  ;;  %1019 = vmatprep.mubr.bf16.mxu0 %v1579_v36  ;;  %v1568_v35 = vcombine.low %v78_v24, %v82_v25  ;;  %v1575_v36 = vcombine.high %v85_v30, %v89_v31 }
  0x45   :  { %1116 = vmatprep.mubr.bf16.mxu1 %v1581_v37  ;;  %v1577_v37 = vcombine.high %v86_v32, %v90_v33 }
  0x4b   :  { %1020 = vmatmul.mubr.bf16.gmra.mrb[20].mxu0 %v1578_v47  ;;  %v105_v47 = vld [vmem:[%s2553_s0 + $0x1b0] sm:$0xff] }
  0x4c   :  { %1117 = vmatmul.mubr.bf16.gmra.mrb[20].mxu1 %v1580_v49  ;;  %1027 = vmatprep.mubr.bf16.mxu0 %v1587_v50  ;;  %v106_v49 = vld [vmem:[%s2553_s0 + $0x1b8] sm:$0xff]  ;;  %v1582_v50 = vcombine.low %v93_v38, %v97_v39 }
  0x4d   :  { %1124 = vmatprep.mubr.bf16.mxu1 %v1589_v52  ;;  %v1591_v52 = vcombine.high %v101_v46, %v105_v47  ;;  %v1593_v53 = vcombine.high %v102_v48, %v106_v49 }
  0x53   :  { %1028 = vmatmul.mubr.bf16.gmra.mrb[24].mxu0 %v1586_v58  ;;  %v1590_v58 = vcombine.low %v101_v46, %v105_v47 }
  0x54   :  { %1125 = vmatmul.mubr.bf16.gmra.mrb[24].mxu1 %v1588_v59  ;;  %1035 = vmatprep.mubr.bf16.mxu0 %v1595_v60  ;;  %v1592_v59 = vcombine.low %v102_v48, %v106_v49  ;;  %v1599_v60 = vcombine.high %v109_v54, %v113_v55 }
  0x55   :  { %1132 = vmatprep.mubr.bf16.mxu1 %v1597_v61  ;;  %v1601_v61 = vcombine.high %v110_v56, %v114_v57 }
  0x5b   :  { %1036 = vmatmul.mubr.bf16.gmra.mrb[28].mxu0 %v1594_v2 }
  0x5c   :  { %1133 = vmatmul.mubr.bf16.gmra.mrb[28].mxu1 %v1596_v3  ;;  %1173 = vmatprep.mubr.bf16.mxu0 %v1543_v4 }
  0x5d   :  { %1270 = vmatprep.mubr.bf16.mxu1 %v1545_v5 }
  0x63   :  { %1174 = vmatmul.mubr.bf16.vlgmr.msra.gmra.mrb[32].mxu0 %v1542_v10 }
  0x64   :  { %1271 = vmatmul.mubr.bf16.vlgmr.msra.gmra.mrb[32].mxu1 %v1544_v11  ;;  %1181 = vmatprep.mubr.bf16.mxu0 %v1551_v12 }
  0x65   :  { %1278 = vmatprep.mubr.bf16.mxu1 %v1553_v13 }
  0x6b   :  { %1182 = vmatmul.mubr.bf16.gmra.mrb[36].mxu0 %v1550_v18 }
  0x6c   :  { %1279 = vmatmul.mubr.bf16.gmra.mrb[36].mxu1 %v1552_v19  ;;  %1189 = vmatprep.mubr.bf16.mxu0 %v1559_v20 }
  0x6d   :  { %1286 = vmatprep.mubr.bf16.mxu1 %v1561_v21 }
  0x73   :  { %1190 = vmatmul.mubr.bf16.gmra.mrb[40].mxu0 %v1558_v26 }
  0x74   :  { %1287 = vmatmul.mubr.bf16.gmra.mrb[40].mxu1 %v1560_v27  ;;  %1197 = vmatprep.mubr.bf16.mxu0 %v1567_v28 }
  0x75   :  { %1294 = vmatprep.mubr.bf16.mxu1 %v1569_v29 }
  0x7b   :  { %1198 = vmatmul.mubr.bf16.gmra.mrb[44].mxu0 %v1566_v34 }
  0x7c   :  { %1295 = vmatmul.mubr.bf16.gmra.mrb[44].mxu1 %v1568_v35  ;;  %1205 = vmatprep.mubr.bf16.mxu0 %v1575_v36 }
  0x7d   :  { %1302 = vmatprep.mubr.bf16.mxu1 %v1577_v37 }
  0x83   :  { %1206 = vmatmul.mubr.bf16.gmra.mrb[48].mxu0 %v1574_v42 }
  0x84   :  { %1303 = vmatmul.mubr.bf16.gmra.mrb[48].mxu1 %v1576_v43  ;;  %1213 = vmatprep.mubr.bf16.mxu0 %v1583_v44 }
  0x85   :  { %1310 = vmatprep.mubr.bf16.mxu1 %v1585_v45 }
  0x8b   :  { %1214 = vmatmul.mubr.bf16.gmra.mrb[52].mxu0 %v1582_v50 }
  0x8c   :  { %1311 = vmatmul.mubr.bf16.gmra.mrb[52].mxu1 %v1584_v51  ;;  %1221 = vmatprep.mubr.bf16.mxu0 %v1591_v52 }
  0x8d   :  { %1318 = vmatprep.mubr.bf16.mxu1 %v1593_v53 }
  0x93   :  { %1222 = vmatmul.mubr.bf16.gmra.mrb[56].mxu0 %v1590_v58 }
  0x94   :  { %1319 = vmatmul.mubr.bf16.gmra.mrb[56].mxu1 %v1592_v59  ;;  %1229 = vmatprep.mubr.bf16.mxu0 %v1599_v60 }
  0x95   :  { %1326 = vmatprep.mubr.bf16.mxu1 %v1601_v61 }
  0x9b   :  { %1230 = vmatmul.mubr.bf16.gmra.mrb[60].mxu0 %v1598_v62 }
  0x9c   :  { %1327 = vmatmul.mubr.bf16.gmra.mrb[60].mxu1 %v1600_v63 }
  0xf6   :  { %v1761_v0 = vpop.f32.mrb[0].mxu0 }
  0xf7   :  { %v1825_v1 = vpop.f32.mrb[0].mxu1  ;;  %v1762_v2 = vpop.f32.mrb[1].mxu0 }
  0xf8   :  { %v1763_v3 = vadd.f32 %v1762_v2, %v1761_v0  ;;  %v1826_v4 = vpop.f32.mrb[1].mxu1  ;;  %v1764_v5 = vpop.f32.mrb[2].mxu0 }
  0xf9   :  { %v1827_v6 = vadd.f32 %v1826_v4, %v1825_v1  ;;  %v1828_v7 = vpop.f32.mrb[2].mxu1  ;;  %v1765_v8 = vpop.f32.mrb[3].mxu0 }
  0xfa   :  { %v1766_v9 = vadd.f32 %v1765_v8, %v1764_v5  ;;  %v1829_v10 = vpop.f32.mrb[3].mxu1 }
  0xfb   :  { %v2474_v11 = vadd.f32 %v1827_v6, %v1763_v3  ;;  %v1830_v12 = vadd.f32 %v1829_v10, %v1828_v7 }
  0xfd   :  { %v2476_v13 = vadd.f32 %v1830_v12, %v1766_v9 }
  0xfe   :  { %v1767_v14 = vpop.f32.mrb[4].mxu0 }
  0xff   :  { %v1831_v15 = vpop.f32.mrb[4].mxu1  ;;  %v1768_v16 = vpop.f32.mrb[5].mxu0 }
 0x100   :  { %v1769_v17 = vadd.f32 %v1768_v16, %v1767_v14  ;;  %v1832_v18 = vpop.f32.mrb[5].mxu1  ;;  %v1770_v19 = vpop.f32.mrb[6].mxu0 }
 0x101   :  { %v1833_v20 = vadd.f32 %v1832_v18, %v1831_v15  ;;  %v1834_v21 = vpop.f32.mrb[6].mxu1  ;;  %v1771_v22 = vpop.f32.mrb[7].mxu0 }
 0x102   :  { %v1772_v23 = vadd.f32 %v1771_v22, %v1770_v19  ;;  %v1835_v24 = vpop.f32.mrb[7].mxu1 }
 0x103   :  { %v2478_v25 = vadd.f32 %v1833_v20, %v1769_v17  ;;  %v1836_v26 = vadd.f32 %v1835_v24, %v1834_v21 }
 0x105   :  { %v2480_v27 = vadd.f32 %v1836_v26, %v1772_v23 }
 0x106   :  { %v1773_v28 = vpop.f32.mrb[8].mxu0 }
 0x107   :  { %v1837_v29 = vpop.f32.mrb[8].mxu1  ;;  %v1774_v30 = vpop.f32.mrb[9].mxu0 }
 0x108   :  { %v1775_v31 = vadd.f32 %v1774_v30, %v1773_v28  ;;  %v1838_v32 = vpop.f32.mrb[9].mxu1  ;;  %v1776_v33 = vpop.f32.mrb[10].mxu0 }
 0x109   :  { %v1839_v34 = vadd.f32 %v1838_v32, %v1837_v29  ;;  %v1840_v35 = vpop.f32.mrb[10].mxu1  ;;  %v1777_v36 = vpop.f32.mrb[11].mxu0 }
 0x10a   :  { %v1778_v37 = vadd.f32 %v1777_v36, %v1776_v33  ;;  %v1841_v38 = vpop.f32.mrb[11].mxu1 }
 0x10b   :  { %v2482_v39 = vadd.f32 %v1839_v34, %v1775_v31  ;;  %v1842_v40 = vadd.f32 %v1841_v38, %v1840_v35 }
 0x10d   :  { %v2484_v41 = vadd.f32 %v1842_v40, %v1778_v37 }
 0x10e   :  { %v1779_v42 = vpop.f32.mrb[12].mxu0 }
 0x10f   :  { %v1843_v43 = vpop.f32.mrb[12].mxu1  ;;  %v1780_v44 = vpop.f32.mrb[13].mxu0 }
 0x110   :  { %v1781_v45 = vadd.f32 %v1780_v44, %v1779_v42  ;;  %v1844_v46 = vpop.f32.mrb[13].mxu1  ;;  %v1782_v47 = vpop.f32.mrb[14].mxu0 }
 0x111   :  { %v1845_v48 = vadd.f32 %v1844_v46, %v1843_v43  ;;  %v1846_v49 = vpop.f32.mrb[14].mxu1  ;;  %v1783_v50 = vpop.f32.mrb[15].mxu0 }
 0x112   :  { %v1784_v51 = vadd.f32 %v1783_v50, %v1782_v47  ;;  %v1847_v52 = vpop.f32.mrb[15].mxu1 }
 0x113   :  { %v2486_v53 = vadd.f32 %v1845_v48, %v1781_v45  ;;  %v1848_v54 = vadd.f32 %v1847_v52, %v1846_v49 }
 0x115   :  { %v2488_v55 = vadd.f32 %v1848_v54, %v1784_v51 }
 0x116   :  { %v1785_v56 = vpop.f32.mrb[16].mxu0 }
 0x117   :  { %v1849_v57 = vpop.f32.mrb[16].mxu1  ;;  %v1786_v58 = vpop.f32.mrb[17].mxu0 }
 0x118   :  { %v1787_v59 = vadd.f32 %v1786_v58, %v1785_v56  ;;  %v1850_v60 = vpop.f32.mrb[17].mxu1  ;;  %v1788_v61 = vpop.f32.mrb[18].mxu0 }
 0x119   :  { %v1851_v62 = vadd.f32 %v1850_v60, %v1849_v57  ;;  %v1852_v63 = vpop.f32.mrb[18].mxu1  ;;  %v1789_v0 = vpop.f32.mrb[19].mxu0 }
 0x11a   :  { %v1790_v1 = vadd.f32 %v1789_v0, %v1788_v61  ;;  %v1853_v2 = vpop.f32.mrb[19].mxu1 }
 0x11b   :  { %v2490_v3 = vadd.f32 %v1851_v62, %v1787_v59  ;;  %v1854_v4 = vadd.f32 %v1853_v2, %v1852_v63 }
 0x11d   :  { %v2492_v5 = vadd.f32 %v1854_v4, %v1790_v1 }
 0x11e   :  { %v1791_v6 = vpop.f32.mrb[20].mxu0 }
 0x11f   :  { %v1855_v7 = vpop.f32.mrb[20].mxu1  ;;  %v1792_v8 = vpop.f32.mrb[21].mxu0 }
 0x120   :  { %v1793_v9 = vadd.f32 %v1792_v8, %v1791_v6  ;;  %v1856_v10 = vpop.f32.mrb[21].mxu1  ;;  %v1794_v12 = vpop.f32.mrb[22].mxu0 }
 0x121   :  { %v1857_v14 = vadd.f32 %v1856_v10, %v1855_v7  ;;  %v1858_v15 = vpop.f32.mrb[22].mxu1  ;;  %v1795_v16 = vpop.f32.mrb[23].mxu0 }
 0x122   :  { %v1796_v17 = vadd.f32 %v1795_v16, %v1794_v12  ;;  %v1859_v18 = vpop.f32.mrb[23].mxu1 }
 0x123   :  { %v2494_v19 = vadd.f32 %v1857_v14, %v1793_v9  ;;  %v1860_v20 = vadd.f32 %v1859_v18, %v1858_v15 }
 0x125   :  { %v2496_v21 = vadd.f32 %v1860_v20, %v1796_v17 }
 0x126   :  { %v1797_v22 = vpop.f32.mrb[24].mxu0 }
 0x127   :  { %v1861_v23 = vpop.f32.mrb[24].mxu1  ;;  %v1798_v24 = vpop.f32.mrb[25].mxu0 }
 0x128   :  { %v1799_v26 = vadd.f32 %v1798_v24, %v1797_v22  ;;  %v1862_v28 = vpop.f32.mrb[25].mxu1  ;;  %v1800_v29 = vpop.f32.mrb[26].mxu0 }
 0x129   :  { %v1863_v30 = vadd.f32 %v1862_v28, %v1861_v23  ;;  %v1864_v31 = vpop.f32.mrb[26].mxu1  ;;  %v1801_v32 = vpop.f32.mrb[27].mxu0 }
 0x12a   :  { %v1802_v33 = vadd.f32 %v1801_v32, %v1800_v29  ;;  %v1865_v34 = vpop.f32.mrb[27].mxu1 }
 0x12b   :  { %v2498_v35 = vadd.f32 %v1863_v30, %v1799_v26  ;;  %v1866_v36 = vadd.f32 %v1865_v34, %v1864_v31 }
 0x12d   :  { %v2500_v37 = vadd.f32 %v1866_v36, %v1802_v33 }
 0x12e   :  { %v1803_v38 = vpop.f32.mrb[28].mxu0 }
 0x12f   :  { %v1867_v40 = vpop.f32.mrb[28].mxu1  ;;  %v1804_v42 = vpop.f32.mrb[29].mxu0 }
 0x130   :  { %v1805_v43 = vadd.f32 %v1804_v42, %v1803_v38  ;;  %v1868_v44 = vpop.f32.mrb[29].mxu1  ;;  %v1806_v45 = vpop.f32.mrb[30].mxu0 }
 0x131   :  { %v1869_v46 = vadd.f32 %v1868_v44, %v1867_v40  ;;  %v1870_v47 = vpop.f32.mrb[30].mxu1  ;;  %v1807_v48 = vpop.f32.mrb[31].mxu0 }
 0x132   :  { %v1808_v49 = vadd.f32 %v1807_v48, %v1806_v45  ;;  %v1871_v50 = vpop.f32.mrb[31].mxu1 }
 0x133   :  { %v2502_v51 = vadd.f32 %v1869_v46, %v1805_v43  ;;  %v1872_v52 = vadd.f32 %v1871_v50, %v1870_v47 }
 0x135   :  { %v2504_v54 = vadd.f32 %v1872_v52, %v1808_v49 }
 0x136   :  { %v1889_v56 = vpop.f32.mrb[32].mxu0 }
 0x137   :  { %v1953_v57 = vpop.f32.mrb[32].mxu1  ;;  %v1890_v58 = vpop.f32.mrb[33].mxu0 }
 0x138   :  { %v1891_v59 = vadd.f32 %v1890_v58, %v1889_v56  ;;  %v1954_v60 = vpop.f32.mrb[33].mxu1  ;;  %v1892_v61 = vpop.f32.mrb[34].mxu0 }
 0x139   :  { %v1955_v62 = vadd.f32 %v1954_v60, %v1953_v57  ;;  %v1956_v63 = vpop.f32.mrb[34].mxu1  ;;  %v1893_v0 = vpop.f32.mrb[35].mxu0 }
 0x13a   :  { %v1176_v1 = vadd.f32 %v1891_v59, %v2474_v11  ;;  %v1894_v2 = vadd.f32 %v1893_v0, %v1892_v61  ;;  %v1957_v4 = vpop.f32.mrb[35].mxu1 }
 0x13b   :  { %v1958_v6 = vadd.f32 %v1957_v4, %v1956_v63 }
 0x13c   :  { %v1273_v7 = vadd.f32 %v1955_v62, %v1176_v1  ;;  %v1179_v8 = vadd.f32 %v1894_v2, %v2476_v13 }
 0x13e   :  { %v1276_v9 = vadd.f32 %v1958_v6, %v1179_v8  ;;  %v1895_v10 = vpop.f32.mrb[36].mxu0  ;;  %v1488_v12 = vmul.f32 %v1273_v7, %v1273_v7 }
 0x13f   :  { %v1959_v14 = vpop.f32.mrb[36].mxu1  ;;  %v1896_v15 = vpop.f32.mrb[37].mxu0 }
 0x140   :  { %v1701_v16 = vpack.c.bf16 %v1276_v9, %v1273_v7  ;;  %v1466_v17 = vadd.f32 %v1276_v9, %v1273_v7  ;;  %v1489_v18 = vmul.f32 %v1276_v9, %v1276_v9  ;;  %v1897_v20 = vadd.f32 %v1896_v15, %v1895_v10  ;;  %v1960_v22 = vpop.f32.mrb[37].mxu1  ;;  %v1898_v23 = vpop.f32.mrb[38].mxu0 }
 0x141   :  { %v1961_v24 = vadd.f32 %v1960_v22, %v1959_v14  ;;  %v1962_v26 = vpop.f32.mrb[38].mxu1  ;;  %v1899_v11 = vpop.f32.mrb[39].mxu0 }
 0x142   :  { %1702 = vst [vmem:[%s2554_s2] sm:$0xff] %v1701_v16   ;;  %v1504_v28 = vadd.f32 %v1489_v18, %v1488_v12  ;;  %v1184_v13 = vadd.f32 %v1897_v20, %v2478_v25  ;;  %v1900_v29 = vadd.f32 %v1899_v11, %v1898_v23  ;;  %v1963_v30 = vpop.f32.mrb[39].mxu1 }
 0x143   :  { %v1964_v31 = vadd.f32 %v1963_v30, %v1962_v26 }
 0x144   :  { %v1281_v32 = vadd.f32 %v1961_v24, %v1184_v13  ;;  %v1187_v33 = vadd.f32 %v1900_v29, %v2480_v27 }
 0x146   :  { %v1467_v34 = vadd.f32 %v1466_v17, %v1281_v32  ;;  %v1490_v36 = vmul.f32 %v1281_v32, %v1281_v32  ;;  %v1284_v38 = vadd.f32 %v1964_v31, %v1187_v33  ;;  %v1901_v40 = vpop.f32.mrb[40].mxu0 }
 0x147   :  { %v1965_v42 = vpop.f32.mrb[40].mxu1  ;;  %v1902_v43 = vpop.f32.mrb[41].mxu0 }
 0x148   :  { %v1505_v44 = vadd.f32 %v1504_v28, %v1490_v36  ;;  %v1706_v45 = vpack.c.bf16 %v1284_v38, %v1281_v32  ;;  %v1468_v46 = vadd.f32 %v1467_v34, %v1284_v38  ;;  %v1491_v47 = vmul.f32 %v1284_v38, %v1284_v38  ;;  %v1966_v48 = vpop.f32.mrb[41].mxu1  ;;  %v1904_v49 = vpop.f32.mrb[42].mxu0 }
 0x149   :  { %v1903_v50 = vadd.f32 %v1902_v43, %v1901_v40  ;;  %v1967_v25 = vadd.f32 %v1966_v48, %v1965_v42  ;;  %v1968_v52 = vpop.f32.mrb[42].mxu1  ;;  %v1905_v56 = vpop.f32.mrb[43].mxu0 }
 0x14a   :  { %1738 = vst [vmem:[%s2554_s2 + $0x8] sm:$0xff] %v1706_v45   ;;  %v1506_v27 = vadd.f32 %v1505_v44, %v1491_v47  ;;  %v1906_v57 = vadd.f32 %v1905_v56, %v1904_v49  ;;  %v1969_v58 = vpop.f32.mrb[43].mxu1 }
 0x14b   :  { %v1192_v59 = vadd.f32 %v1903_v50, %v2482_v39  ;;  %v1970_v60 = vadd.f32 %v1969_v58, %v1968_v52 }
 0x14c   :  { %v1195_v61 = vadd.f32 %v1906_v57, %v2484_v41 }
 0x14d   :  { %v1289_v62 = vadd.f32 %v1967_v25, %v1192_v59 }
 0x14e   :  { %v1292_v63 = vadd.f32 %v1970_v60, %v1195_v61  ;;  %v1907_v0 = vpop.f32.mrb[44].mxu0 }
 0x14f   :  { %v1469_v1 = vadd.f32 %v1468_v46, %v1289_v62  ;;  %v1492_v2 = vmul.f32 %v1289_v62, %v1289_v62  ;;  %v1971_v4 = vpop.f32.mrb[44].mxu1  ;;  %v1908_v6 = vpop.f32.mrb[45].mxu0 }
 0x150   :  { %v1711_v7 = vpack.c.bf16 %v1292_v63, %v1289_v62  ;;  %v1493_v8 = vmul.f32 %v1292_v63, %v1292_v63  ;;  %v1909_v9 = vadd.f32 %v1908_v6, %v1907_v0  ;;  %v1972_v10 = vpop.f32.mrb[45].mxu1  ;;  %v1910_v12 = vpop.f32.mrb[46].mxu0 }
 0x151   :  { %v1507_v14 = vadd.f32 %v1506_v27, %v1492_v2  ;;  %v1470_v15 = vadd.f32 %v1469_v1, %v1292_v63  ;;  %v1973_v16 = vadd.f32 %v1972_v10, %v1971_v4  ;;  %v1974_v17 = vpop.f32.mrb[46].mxu1  ;;  %v1911_v39 = vpop.f32.mrb[47].mxu0 }
 0x152   :  { %1739 = vst [vmem:[%s2554_s2 + $0x10] sm:$0xff] %v1711_v7   ;;  %v1200_v41 = vadd.f32 %v1909_v9, %v2486_v53  ;;  %v1912_v18 = vadd.f32 %v1911_v39, %v1910_v12  ;;  %v1975_v20 = vpop.f32.mrb[47].mxu1 }
 0x153   :  { %v1508_v22 = vadd.f32 %v1507_v14, %v1493_v8  ;;  %v1976_v23 = vadd.f32 %v1975_v20, %v1974_v17 }
 0x154   :  { %v1297_v24 = vadd.f32 %v1973_v16, %v1200_v41  ;;  %v1203_v26 = vadd.f32 %v1912_v18, %v2488_v55 }
 0x156   :  { %v1471_v11 = vadd.f32 %v1470_v15, %v1297_v24  ;;  %v1494_v28 = vmul.f32 %v1297_v24, %v1297_v24  ;;  %v1300_v13 = vadd.f32 %v1976_v23, %v1203_v26  ;;  %v1913_v29 = vpop.f32.mrb[48].mxu0 }
 0x157   :  { %v1977_v30 = vpop.f32.mrb[48].mxu1  ;;  %v1914_v31 = vpop.f32.mrb[49].mxu0 }
 0x158   :  { %v1509_v32 = vadd.f32 %v1508_v22, %v1494_v28  ;;  %v1716_v33 = vpack.c.bf16 %v1300_v13, %v1297_v24  ;;  %v1472_v34 = vadd.f32 %v1471_v11, %v1300_v13  ;;  %v1495_v36 = vmul.f32 %v1300_v13, %v1300_v13  ;;  %v1978_v38 = vpop.f32.mrb[49].mxu1  ;;  %v1916_v40 = vpop.f32.mrb[50].mxu0 }
 0x159   :  { %v1915_v53 = vadd.f32 %v1914_v31, %v1913_v29  ;;  %v1979_v42 = vadd.f32 %v1978_v38, %v1977_v30  ;;  %v1980_v43 = vpop.f32.mrb[50].mxu1  ;;  %v1917_v44 = vpop.f32.mrb[51].mxu0 }
 0x15a   :  { %1740 = vst [vmem:[%s2554_s2 + $0x18] sm:$0xff] %v1716_v33   ;;  %v1510_v55 = vadd.f32 %v1509_v32, %v1495_v36  ;;  %v1918_v45 = vadd.f32 %v1917_v44, %v1916_v40  ;;  %v1981_v46 = vpop.f32.mrb[51].mxu1 }
 0x15b   :  { %v1208_v47 = vadd.f32 %v1915_v53, %v2490_v3  ;;  %v1982_v48 = vadd.f32 %v1981_v46, %v1980_v43 }
 0x15c   :  { %v1211_v49 = vadd.f32 %v1918_v45, %v2492_v5 }
 0x15d   :  { %v1305_v50 = vadd.f32 %v1979_v42, %v1208_v47 }
 0x15e   :  { %v1308_v25 = vadd.f32 %v1982_v48, %v1211_v49  ;;  %v1919_v52 = vpop.f32.mrb[52].mxu0 }
 0x15f   :  { %v1473_v56 = vadd.f32 %v1472_v34, %v1305_v50  ;;  %v1496_v27 = vmul.f32 %v1305_v50, %v1305_v50  ;;  %v1983_v57 = vpop.f32.mrb[52].mxu1  ;;  %v1920_v58 = vpop.f32.mrb[53].mxu0 }
 0x160   :  { %v1721_v59 = vpack.c.bf16 %v1308_v25, %v1305_v50  ;;  %v1497_v60 = vmul.f32 %v1308_v25, %v1308_v25  ;;  %v1921_v61 = vadd.f32 %v1920_v58, %v1919_v52  ;;  %v1984_v62 = vpop.f32.mrb[53].mxu1  ;;  %v1922_v63 = vpop.f32.mrb[54].mxu0 }
 0x161   :  { %v1511_v0 = vadd.f32 %v1510_v55, %v1496_v27  ;;  %v1474_v1 = vadd.f32 %v1473_v56, %v1308_v25  ;;  %v1985_v2 = vadd.f32 %v1984_v62, %v1983_v57  ;;  %v1986_v4 = vpop.f32.mrb[54].mxu1  ;;  %v1923_v3 = vpop.f32.mrb[55].mxu0 }
 0x162   :  { %1741 = vst [vmem:[%s2554_s2 + $0x20] sm:$0xff] %v1721_v59   ;;  %v1216_v5 = vadd.f32 %v1921_v61, %v2494_v19  ;;  %v1924_v6 = vadd.f32 %v1923_v3, %v1922_v63  ;;  %v1987_v7 = vpop.f32.mrb[55].mxu1 }
 0x163   :  { %v1512_v8 = vadd.f32 %v1511_v0, %v1497_v60  ;;  %v1988_v9 = vadd.f32 %v1987_v7, %v1986_v4 }
 0x164   :  { %v1313_v10 = vadd.f32 %v1985_v2, %v1216_v5  ;;  %v1219_v12 = vadd.f32 %v1924_v6, %v2496_v21 }
 0x166   :  { %v1475_v14 = vadd.f32 %v1474_v1, %v1313_v10  ;;  %v1498_v15 = vmul.f32 %v1313_v10, %v1313_v10  ;;  %v1316_v16 = vadd.f32 %v1988_v9, %v1219_v12  ;;  %v1925_v17 = vpop.f32.mrb[56].mxu0 }
 0x167   :  { %v1989_v39 = vpop.f32.mrb[56].mxu1  ;;  %v1926_v41 = vpop.f32.mrb[57].mxu0 }
 0x168   :  { %v1513_v18 = vadd.f32 %v1512_v8, %v1498_v15  ;;  %v1726_v20 = vpack.c.bf16 %v1316_v16, %v1313_v10  ;;  %v1476_v22 = vadd.f32 %v1475_v14, %v1316_v16  ;;  %v1499_v23 = vmul.f32 %v1316_v16, %v1316_v16  ;;  %v1990_v24 = vpop.f32.mrb[57].mxu1  ;;  %v1928_v26 = vpop.f32.mrb[58].mxu0 }
 0x169   :  { %v1927_v19 = vadd.f32 %v1926_v41, %v1925_v17  ;;  %v1991_v11 = vadd.f32 %v1990_v24, %v1989_v39  ;;  %v1992_v28 = vpop.f32.mrb[58].mxu1  ;;  %v1929_v13 = vpop.f32.mrb[59].mxu0 }
 0x16a   :  { %1742 = vst [vmem:[%s2554_s2 + $0x28] sm:$0xff] %v1726_v20   ;;  %v1514_v21 = vadd.f32 %v1513_v18, %v1499_v23  ;;  %v1930_v29 = vadd.f32 %v1929_v13, %v1928_v26  ;;  %v1993_v30 = vpop.f32.mrb[59].mxu1 }
 0x16b   :  { %v1224_v31 = vadd.f32 %v1927_v19, %v2498_v35  ;;  %v1994_v32 = vadd.f32 %v1993_v30, %v1992_v28 }
 0x16c   :  { %v1227_v33 = vadd.f32 %v1930_v29, %v2500_v37 }
 0x16d   :  { %v1321_v34 = vadd.f32 %v1991_v11, %v1224_v31 }
 0x16e   :  { %v1324_v36 = vadd.f32 %v1994_v32, %v1227_v33  ;;  %v1931_v38 = vpop.f32.mrb[60].mxu0 }
 0x16f   :  { %v1477_v40 = vadd.f32 %v1476_v22, %v1321_v34  ;;  %v1500_v53 = vmul.f32 %v1321_v34, %v1321_v34  ;;  %v1995_v42 = vpop.f32.mrb[60].mxu1  ;;  %v1932_v43 = vpop.f32.mrb[61].mxu0 }
 0x170   :  { %v1731_v44 = vpack.c.bf16 %v1324_v36, %v1321_v34  ;;  %v1501_v55 = vmul.f32 %v1324_v36, %v1324_v36  ;;  %v1933_v45 = vadd.f32 %v1932_v43, %v1931_v38  ;;  %v1996_v46 = vpop.f32.mrb[61].mxu1  ;;  %v1934_v47 = vpop.f32.mrb[62].mxu0 }
 0x171   :  { %v1515_v48 = vadd.f32 %v1514_v21, %v1500_v53  ;;  %v1478_v49 = vadd.f32 %v1477_v40, %v1324_v36  ;;  %v1997_v50 = vadd.f32 %v1996_v46, %v1995_v42  ;;  %v1998_v25 = vpop.f32.mrb[62].mxu1  ;;  %v1935_v35 = vpop.f32.mrb[63].mxu0 }
 0x172   :  { %1743 = vst [vmem:[%s2554_s2 + $0x30] sm:$0xff] %v1731_v44   ;;  %v1232_v37 = vadd.f32 %v1933_v45, %v2502_v51  ;;  %v1936_v52 = vadd.f32 %v1935_v35, %v1934_v47  ;;  %v1999_v56 = vpop.f32.mrb[63].mxu1 }
 0x173   :  { %v1516_v27 = vadd.f32 %v1515_v48, %v1501_v55  ;;  %v2000_v57 = vadd.f32 %v1999_v56, %v1998_v25 }
 0x174   :  { %v1329_v58 = vadd.f32 %v1997_v50, %v1232_v37  ;;  %v1235_v59 = vadd.f32 %v1936_v52, %v2504_v54 }
 0x176   :  { %v1479_v60 = vadd.f32 %v1478_v49, %v1329_v58  ;;  %v1502_v61 = vmul.f32 %v1329_v58, %v1329_v58  ;;  %v1332_v62 = vadd.f32 %v2000_v57, %v1235_v59 }
 0x178   :  { %v1517_v63 = vadd.f32 %v1516_v27, %v1502_v61  ;;  %v1736_v0 = vpack.c.bf16 %v1332_v62, %v1329_v58  ;;  %v1480_v1 = vadd.f32 %v1479_v60, %v1332_v62  ;;  %v1503_v2 = vmul.f32 %v1332_v62, %v1332_v62 }
 0x17a   :  { %1744 = vst [vmem:[%s2554_s2 + $0x38] sm:$0xff] %v1736_v0   ;;  %v1481_v4 = vrot.slane %v1480_v1, 4  ;;  %v1518_v51 = vadd.f32 %v1517_v63, %v1503_v2 }
 0x17c   :  { %v1482_v3 = vadd.f32 %v1481_v4, %v1480_v1  ;;  %v1519_v5 = vrot.slane %v1518_v51, 4 }
 0x17e   :  { %v1483_v6 = vrot.slane %v1482_v3, 2  ;;  %v1520_v7 = vadd.f32 %v1519_v5, %v1518_v51 }
 0x180   :  { %v1484_v8 = vadd.f32 %v1483_v6, %v1482_v3  ;;  %v1521_v9 = vrot.slane %v1520_v7, 2 }
 0x182   :  { %v1485_v54 = vrot.slane %v1484_v8, 1  ;;  %v1522_v10 = vadd.f32 %v1521_v9, %v1520_v7 }
 0x184   :  { %v1486_v12 = vadd.f32 %v1485_v54, %v1484_v8  ;;  %v1523_v14 = vrot.slane %v1522_v10, 1 }
 0x186   :  { %1487 = vst [vmem:[%s2555_s3] sm:$0xff] %v1486_v12  ;;  %v1524_v15 = vadd.f32 %v1523_v14, %v1522_v10 }
 0x188   :  { %1525 = vst [vmem:[%s2556_s4] sm:$0xff] %v1524_v15 }

// kernel: discriminator_forward.10
= control target key start
LH: loop header
LB: loop body
LE: loop exit
PB: predicated region body
PF: predicated region fallthrough
CT: control target
= control target key end

     0   :  { %s455_s0 = inlined_call_operand.vmem [shape: bf16[128,128], index: 0, kind: input, shape index: {}]   ;;  %s456_s1 = inlined_call_operand.vmem [shape: f32[1,128], index: 1, kind: input, shape index: {}]   ;;  %s457_s2 = inlined_call_operand.vmem [shape: f32[1,128], index: 2, kind: input, shape index: {}]   ;;  %s458_s3 = inlined_call_operand.vmem [shape: bf16[128,128], index: 3, kind: output, shape index: {}]  }
   0x1   :  { %v259_v0 = vld [vmem:[%s455_s0] sm:$0xff]   ;;  %v330_v4 = vld [vmem:[%s455_s0 + $0x8] sm:$0xff]   ;;  %v331_v5 = vld [vmem:[%s455_s0 + $0x10] sm:$0xff]  }
   0x2   :  { %v370_v1 = vld [vmem:[%s456_s1] ss:$0 sm:$0xff]  ;;  %v260_v2 = vunpack.c.l.bf16 %v259_v0  ;;  %v261_v3 = vunpack.c.h.bf16 %v259_v0  ;;  %v332_v6 = vld [vmem:[%s455_s0 + $0x18] sm:$0xff]   ;;  %v264_v8 = vunpack.c.l.bf16 %v330_v4  ;;  %v265_v9 = vunpack.c.h.bf16 %v330_v4  ;;  %v334_v35 = vld [vmem:[%s455_s0 + $0x28] sm:$0xff]  }
   0x3   :  { %v384_v7 = vld [vmem:[%s457_s2] ss:$0 sm:$0xff]  ;;  %v268_v10 = vunpack.c.l.bf16 %v331_v5  ;;  %v269_v11 = vunpack.c.h.bf16 %v331_v5  ;;  %v272_v14 = vunpack.c.l.bf16 %v332_v6  ;;  %v273_v15 = vunpack.c.h.bf16 %v332_v6  ;;  %v335_v48 = vld [vmem:[%s455_s0 + $0x30] sm:$0xff]   ;;  %v336_v4 = vld [vmem:[%s455_s0 + $0x38] sm:$0xff]  }
   0x4   :  { %v53_v12 = vmul.f32 %v260_v2, %v370_v1  ;;  %v54_v13 = vmul.f32 %v261_v3, %v370_v1  ;;  %v55_v16 = vmul.f32 %v264_v8, %v370_v1  ;;  %v56_v17 = vmul.f32 %v265_v9, %v370_v1  ;;  %v333_v34 = vld [vmem:[%s455_s0 + $0x20] sm:$0xff]  }
   0x5   :  { %v57_v18 = vmul.f32 %v268_v10, %v370_v1  ;;  %v58_v19 = vmul.f32 %v269_v11, %v370_v1  ;;  %v59_v22 = vmul.f32 %v272_v14, %v370_v1  ;;  %v60_v23 = vmul.f32 %v273_v15, %v370_v1 }
   0x6   :  { %v76_v20 = vadd.f32 %v384_v7, %v53_v12  ;;  %v77_v21 = vadd.f32 %v384_v7, %v54_v13  ;;  %v78_v24 = vadd.f32 %v384_v7, %v55_v16  ;;  %v79_v25 = vadd.f32 %v384_v7, %v56_v17 }
   0x7   :  { %v80_v26 = vadd.f32 %v384_v7, %v57_v18  ;;  %v81_v27 = vadd.f32 %v384_v7, %v58_v19  ;;  %v82_v42 = vadd.f32 %v384_v7, %v59_v22  ;;  %v83_v43 = vadd.f32 %v384_v7, %v60_v23 }
   0x8   :  { %vm92_vm0 = vcmp.ge.f32.partialorder %v76_v20, 0.0  ;;  %vm93_vm1 = vcmp.ge.f32.partialorder %v77_v21, 0.0  ;;  %v108_v28 = vmul.f32 0.3, %v76_v20  ;;  %v109_v29 = vmul.f32 0.3, %v77_v21 }
   0x9   :  { %vm94_vm2 = vcmp.ge.f32.partialorder %v78_v24, 0.0  ;;  %vm95_vm3 = vcmp.ge.f32.partialorder %v79_v25, 0.0  ;;  %v110_v30 = vmul.f32 0.3, %v78_v24  ;;  %v111_v31 = vmul.f32 0.3, %v79_v25 }
   0xa   :  { %v124_v32 = vsel %vm92_vm0, %v76_v20, %v108_v28  ;;  %v125_v33 = vsel %vm93_vm1, %v77_v21, %v109_v29  ;;  %vm96_vm4 = vcmp.ge.f32.partialorder %v80_v26, 0.0  ;;  %vm97_vm5 = vcmp.ge.f32.partialorder %v81_v27, 0.0 }
   0xb   :  { %v293_v36 = vpack.c.bf16 %v125_v33, %v124_v32  ;;  %v126_v37 = vsel %vm94_vm2, %v78_v24, %v110_v30  ;;  %v127_v38 = vsel %vm95_vm3, %v79_v25, %v111_v31  ;;  %v112_v39 = vmul.f32 0.3, %v80_v26 }
   0xc   :  { %v298_v40 = vpack.c.bf16 %v127_v38, %v126_v37  ;;  %v113_v41 = vmul.f32 0.3, %v81_v27  ;;  %v276_v45 = vunpack.c.l.bf16 %v333_v34  ;;  %v277_v46 = vunpack.c.h.bf16 %v333_v34 }
   0xd   :  { %294 = vst [vmem:[%s458_s3] sm:$0xff] %v293_v36   ;;  %v128_v44 = vsel %vm96_vm4, %v80_v26, %v112_v39  ;;  %v280_v47 = vunpack.c.l.bf16 %v334_v35  ;;  %vm98_vm6 = vcmp.ge.f32.partialorder %v82_v42, 0.0  ;;  %vm99_vm7 = vcmp.ge.f32.partialorder %v83_v43, 0.0 }
   0xe   :  { %337 = vst [vmem:[%s458_s3 + $0x8] sm:$0xff] %v298_v40   ;;  %v129_v49 = vsel %vm97_vm5, %v81_v27, %v113_v41  ;;  %v114_v50 = vmul.f32 0.3, %v82_v42  ;;  %v115_v52 = vmul.f32 0.3, %v83_v43  ;;  %v61_v53 = vmul.f32 %v276_v45, %v370_v1 }
   0xf   :  { %v303_v51 = vpack.c.bf16 %v129_v49, %v128_v44  ;;  %v62_v54 = vmul.f32 %v277_v46, %v370_v1  ;;  %v281_v56 = vunpack.c.h.bf16 %v334_v35  ;;  %v63_v57 = vmul.f32 %v280_v47, %v370_v1 }
  0x10   :  { %v130_v55 = vsel %vm98_vm6, %v82_v42, %v114_v50  ;;  %v284_v58 = vunpack.c.l.bf16 %v335_v48  ;;  %v131_v59 = vsel %vm99_vm7, %v83_v43, %v115_v52  ;;  %v84_v60 = vadd.f32 %v384_v7, %v61_v53 }
  0x11   :  { %338 = vst [vmem:[%s458_s3 + $0x10] sm:$0xff] %v303_v51   ;;  %v85_v61 = vadd.f32 %v384_v7, %v62_v54  ;;  %v285_v62 = vunpack.c.h.bf16 %v335_v48  ;;  %v308_v63 = vpack.c.bf16 %v131_v59, %v130_v55  ;;  %v64_v0 = vmul.f32 %v281_v56, %v370_v1 }
  0x12   :  { %v86_v2 = vadd.f32 %v384_v7, %v63_v57  ;;  %v65_v3 = vmul.f32 %v284_v58, %v370_v1  ;;  %vm100_vm8 = vcmp.ge.f32.partialorder %v84_v60, 0.0  ;;  %v116_v5 = vmul.f32 0.3, %v84_v60 }
  0x13   :  { %vm101_vm9 = vcmp.ge.f32.partialorder %v85_v61, 0.0  ;;  %v117_v6 = vmul.f32 0.3, %v85_v61  ;;  %339 = vst [vmem:[%s458_s3 + $0x18] sm:$0xff] %v308_v63   ;;  %v87_v8 = vadd.f32 %v384_v7, %v64_v0  ;;  %v66_v10 = vmul.f32 %v285_v62, %v370_v1 }
  0x14   :  { %vm102_vm10 = vcmp.ge.f32.partialorder %v86_v2, 0.0  ;;  %v118_v9 = vmul.f32 0.3, %v86_v2  ;;  %v132_v11 = vsel %vm100_vm8, %v84_v60, %v116_v5  ;;  %v88_v13 = vadd.f32 %v384_v7, %v65_v3 }
  0x15   :  { %v133_v12 = vsel %vm101_vm9, %v85_v61, %v117_v6  ;;  %v288_v14 = vunpack.c.l.bf16 %v336_v4  ;;  %vm103_vm11 = vcmp.ge.f32.partialorder %v87_v8, 0.0  ;;  %v119_v16 = vmul.f32 0.3, %v87_v8 }
  0x16   :  { %v313_v15 = vpack.c.bf16 %v133_v12, %v132_v11  ;;  %v134_v17 = vsel %vm102_vm10, %v86_v2, %v118_v9  ;;  %v89_v18 = vadd.f32 %v384_v7, %v66_v10  ;;  %vm104_vm12 = vcmp.ge.f32.partialorder %v88_v13, 0.0 }
  0x17   :  { %v120_v19 = vmul.f32 0.3, %v88_v13  ;;  %v289_v20 = vunpack.c.h.bf16 %v336_v4  ;;  %v135_v21 = vsel %vm103_vm11, %v87_v8, %v119_v16  ;;  %v67_v22 = vmul.f32 %v288_v14, %v370_v1 }
  0x18   :  { %340 = vst [vmem:[%s458_s3 + $0x20] sm:$0xff] %v313_v15   ;;  %v318_v23 = vpack.c.bf16 %v135_v21, %v134_v17  ;;  %vm105_vm13 = vcmp.ge.f32.partialorder %v89_v18, 0.0  ;;  %v121_v24 = vmul.f32 0.3, %v89_v18 }
  0x19   :  { %v136_v25 = vsel %vm104_vm12, %v88_v13, %v120_v19  ;;  %v68_v26 = vmul.f32 %v289_v20, %v370_v1  ;;  %v90_v27 = vadd.f32 %v384_v7, %v67_v22 }
  0x1a   :  { %341 = vst [vmem:[%s458_s3 + $0x28] sm:$0xff] %v318_v23   ;;  %v137_v28 = vsel %vm105_vm13, %v89_v18, %v121_v24 }
  0x1b   :  { %v323_v29 = vpack.c.bf16 %v137_v28, %v136_v25  ;;  %v91_v30 = vadd.f32 %v384_v7, %v68_v26  ;;  %vm106_vm14 = vcmp.ge.f32.partialorder %v90_v27, 0.0  ;;  %v122_v31 = vmul.f32 0.3, %v90_v27 }
  0x1d   :  { %342 = vst [vmem:[%s458_s3 + $0x30] sm:$0xff] %v323_v29   ;;  %vm107_vm15 = vcmp.ge.f32.partialorder %v91_v30, 0.0  ;;  %v123_v32 = vmul.f32 0.3, %v91_v30  ;;  %v138_v33 = vsel %vm106_vm14, %v90_v27, %v122_v31 }
  0x1f   :  { %v139_v1 = vsel %vm107_vm15, %v91_v30, %v123_v32 }
  0x20   :  { %v328_v34 = vpack.c.bf16 %v139_v1, %v138_v33 }
  0x22   :  { %343 = vst [vmem:[%s458_s3 + $0x38] sm:$0xff] %v328_v34  }

// kernel: discriminator_forward.11
= control target key start
LH: loop header
LB: loop body
LE: loop exit
PB: predicated region body
PF: predicated region fallthrough
CT: control target
= control target key end

     0   :  { %s3998_s1 = inlined_call_operand.vmem [shape: bf16[2048,256], index: 1, kind: input, shape index: {}]   ;;  %s3999_s0 = inlined_call_operand.vmem [shape: bf16[32,2048], index: 0, kind: input, shape index: {}]   ;;  %s4000_s2 = inlined_call_operand.vmem [shape: bf16[32,256], index: 2, kind: output, shape index: {0}]   ;;  %s4001_s3 = inlined_call_operand.vmem [shape: f32[8,256], index: 3, kind: output, shape index: {1}]   ;;  %s4002_s4 = inlined_call_operand.vmem [shape: f32[8,256], index: 4, kind: output, shape index: {2}]  }
   0x1   :  { %v2653_v0 = vld [vmem:[%s3998_s1 + $0x4] ss:$8 sps:$4 sm:$0xff]   ;;  %v2657_v2 = vld [vmem:[%s3998_s1] ss:$8 sps:$4 sm:$0xff]   ;;  %v2659_v4 = vld [vmem:[%s3998_s1 + $0x14] ss:$8 sps:$4 sm:$0xff]  }
   0x2   :  { %v2655_v1 = vld [vmem:[%s3998_s1 + $0x404] ss:$8 sps:$4 sm:$0xff]   ;;  %1762 = vmatprep.subr.bf16.mxu1 %v2653_v0  ;;  %v2658_v3 = vld [vmem:[%s3998_s1 + $0x400] ss:$8 sps:$4 sm:$0xff]   ;;  %v2661_v5 = vld [vmem:[%s3998_s1 + $0x414] ss:$8 sps:$4 sm:$0xff]  }
   0x3   :  { %1974 = vmatprep.subr.bf16.mxu0 %v2655_v1  ;;  %1763 = vmatpush1.bf16.msra.mxu1 %v2657_v2  ;;  %v2663_v6 = vld [vmem:[%s3998_s1 + $0x10] ss:$8 sps:$4 sm:$0xff]   ;;  %v2665_v8 = vld [vmem:[%s3998_s1 + $0x24] ss:$8 sps:$4 sm:$0xff]   ;;  %v2669_v10 = vld [vmem:[%s3998_s1 + $0x20] ss:$8 sps:$4 sm:$0xff]  }
   0x4   :  { %1975 = vmatpush1.bf16.msra.mxu0 %v2658_v3  ;;  %1764 = vmatprep.subr.bf16.mxu1 %v2659_v4  ;;  %v2664_v7 = vld [vmem:[%s3998_s1 + $0x410] ss:$8 sps:$4 sm:$0xff]   ;;  %v2667_v9 = vld [vmem:[%s3998_s1 + $0x424] ss:$8 sps:$4 sm:$0xff]   ;;  %v2670_v11 = vld [vmem:[%s3998_s1 + $0x420] ss:$8 sps:$4 sm:$0xff]  }
   0x5   :  { %1976 = vmatprep.subr.bf16.mxu0 %v2661_v5  ;;  %v2671_v12 = vld [vmem:[%s3998_s1 + $0x34] ss:$8 sps:$4 sm:$0xff]   ;;  %v2675_v14 = vld [vmem:[%s3998_s1 + $0x30] ss:$8 sps:$4 sm:$0xff]   ;;  %v2677_v16 = vld [vmem:[%s3998_s1 + $0x44] ss:$8 sps:$4 sm:$0xff]  }
   0x6   :  { %v2673_v13 = vld [vmem:[%s3998_s1 + $0x434] ss:$8 sps:$4 sm:$0xff]   ;;  %v2676_v15 = vld [vmem:[%s3998_s1 + $0x430] ss:$8 sps:$4 sm:$0xff]   ;;  %v2679_v17 = vld [vmem:[%s3998_s1 + $0x444] ss:$8 sps:$4 sm:$0xff]  }
   0x7   :  { %1765 = vmatpush1.bf16.msra.mxu1 %v2663_v6  ;;  %v2681_v18 = vld [vmem:[%s3998_s1 + $0x40] ss:$8 sps:$4 sm:$0xff]   ;;  %v2683_v20 = vld [vmem:[%s3998_s1 + $0x54] ss:$8 sps:$4 sm:$0xff]   ;;  %v2687_v22 = vld [vmem:[%s3998_s1 + $0x50] ss:$8 sps:$4 sm:$0xff]  }
   0x8   :  { %1977 = vmatpush1.bf16.msra.mxu0 %v2664_v7  ;;  %1766 = vmatprep.subr.bf16.mxu1 %v2665_v8  ;;  %v2682_v19 = vld [vmem:[%s3998_s1 + $0x440] ss:$8 sps:$4 sm:$0xff]   ;;  %v2685_v21 = vld [vmem:[%s3998_s1 + $0x454] ss:$8 sps:$4 sm:$0xff]   ;;  %v2688_v23 = vld [vmem:[%s3998_s1 + $0x450] ss:$8 sps:$4 sm:$0xff]  }
   0x9   :  { %1978 = vmatprep.subr.bf16.mxu0 %v2667_v9  ;;  %v2689_v24 = vld [vmem:[%s3998_s1 + $0x64] ss:$8 sps:$4 sm:$0xff]   ;;  %v2693_v26 = vld [vmem:[%s3998_s1 + $0x60] ss:$8 sps:$4 sm:$0xff]   ;;  %v2695_v28 = vld [vmem:[%s3998_s1 + $0x74] ss:$8 sps:$4 sm:$0xff]  }
   0xa   :  { %v2691_v25 = vld [vmem:[%s3998_s1 + $0x464] ss:$8 sps:$4 sm:$0xff]   ;;  %v2694_v27 = vld [vmem:[%s3998_s1 + $0x460] ss:$8 sps:$4 sm:$0xff]   ;;  %v2697_v29 = vld [vmem:[%s3998_s1 + $0x474] ss:$8 sps:$4 sm:$0xff]  }
   0xb   :  { %1767 = vmatpush1.bf16.msra.mxu1 %v2669_v10  ;;  %v2699_v30 = vld [vmem:[%s3998_s1 + $0x70] ss:$8 sps:$4 sm:$0xff]   ;;  %v2701_v32 = vld [vmem:[%s3998_s1 + $0x84] ss:$8 sps:$4 sm:$0xff]   ;;  %v2705_v34 = vld [vmem:[%s3998_s1 + $0x80] ss:$8 sps:$4 sm:$0xff]  }
   0xc   :  { %1979 = vmatpush1.bf16.msra.mxu0 %v2670_v11  ;;  %1768 = vmatprep.subr.bf16.mxu1 %v2671_v12  ;;  %v2700_v31 = vld [vmem:[%s3998_s1 + $0x470] ss:$8 sps:$4 sm:$0xff]   ;;  %v2703_v33 = vld [vmem:[%s3998_s1 + $0x484] ss:$8 sps:$4 sm:$0xff]   ;;  %v2706_v35 = vld [vmem:[%s3998_s1 + $0x480] ss:$8 sps:$4 sm:$0xff]  }
   0xd   :  { %1980 = vmatprep.subr.bf16.mxu0 %v2673_v13  ;;  %v2707_v36 = vld [vmem:[%s3998_s1 + $0x94] ss:$8 sps:$4 sm:$0xff]   ;;  %v2711_v38 = vld [vmem:[%s3998_s1 + $0x90] ss:$8 sps:$4 sm:$0xff]   ;;  %v2713_v40 = vld [vmem:[%s3998_s1 + $0xa4] ss:$8 sps:$4 sm:$0xff]  }
   0xe   :  { %v2709_v37 = vld [vmem:[%s3998_s1 + $0x494] ss:$8 sps:$4 sm:$0xff]   ;;  %v2712_v39 = vld [vmem:[%s3998_s1 + $0x490] ss:$8 sps:$4 sm:$0xff]   ;;  %v2715_v41 = vld [vmem:[%s3998_s1 + $0x4a4] ss:$8 sps:$4 sm:$0xff]  }
   0xf   :  { %1769 = vmatpush1.bf16.msra.mxu1 %v2675_v14  ;;  %v2717_v42 = vld [vmem:[%s3998_s1 + $0xa0] ss:$8 sps:$4 sm:$0xff]   ;;  %v2719_v44 = vld [vmem:[%s3998_s1 + $0xb4] ss:$8 sps:$4 sm:$0xff]   ;;  %v2723_v46 = vld [vmem:[%s3998_s1 + $0xb0] ss:$8 sps:$4 sm:$0xff]  }
  0x10   :  { %1981 = vmatpush1.bf16.msra.mxu0 %v2676_v15  ;;  %1770 = vmatprep.subr.bf16.mxu1 %v2677_v16  ;;  %v2718_v43 = vld [vmem:[%s3998_s1 + $0x4a0] ss:$8 sps:$4 sm:$0xff]   ;;  %v2721_v45 = vld [vmem:[%s3998_s1 + $0x4b4] ss:$8 sps:$4 sm:$0xff]   ;;  %v2724_v47 = vld [vmem:[%s3998_s1 + $0x4b0] ss:$8 sps:$4 sm:$0xff]  }
  0x11   :  { %1982 = vmatprep.subr.bf16.mxu0 %v2679_v17  ;;  %v34_v48 = vld [vmem:[%s3999_s0] sm:$0xff]  ;;  %v2731_v58 = vld [vmem:[%s3998_s1 + $0xd4] ss:$8 sps:$4 sm:$0xff]   ;;  %v2735_v60 = vld [vmem:[%s3998_s1 + $0xd0] ss:$8 sps:$4 sm:$0xff]  }
  0x12   :  { %v42_v49 = vld [vmem:[%s3999_s0 + $0x40] sm:$0xff]  ;;  %v2733_v59 = vld [vmem:[%s3998_s1 + $0x4d4] ss:$8 sps:$4 sm:$0xff]   ;;  %v2736_v61 = vld [vmem:[%s3998_s1 + $0x4d0] ss:$8 sps:$4 sm:$0xff]  }
  0x13   :  { %1771 = vmatpush1.bf16.msra.mxu1 %v2681_v18  ;;  %v2725_v50 = vld [vmem:[%s3998_s1 + $0xc4] ss:$8 sps:$4 sm:$0xff]   ;;  %v2302_v52 = vcombine.high %v34_v48, %v42_v49  ;;  %v2729_v56 = vld [vmem:[%s3998_s1 + $0xc0] ss:$8 sps:$4 sm:$0xff]   ;;  %v2743_v2 = vld [vmem:[%s3998_s1 + $0xf4] ss:$8 sps:$4 sm:$0xff]   ;;  %v2301_v8 = vcombine.low %v34_v48, %v42_v49 }
  0x14   :  { %1983 = vmatpush1.bf16.msra.mxu0 %v2682_v19  ;;  %1772 = vmatprep.subr.bf16.mxu1 %v2683_v20  ;;  %v2727_v51 = vld [vmem:[%s3998_s1 + $0x4c4] ss:$8 sps:$4 sm:$0xff]   ;;  %v2730_v57 = vld [vmem:[%s3998_s1 + $0x4c0] ss:$8 sps:$4 sm:$0xff]   ;;  %v2745_v3 = vld [vmem:[%s3998_s1 + $0x4f4] ss:$8 sps:$4 sm:$0xff]  }
  0x15   :  { %1984 = vmatprep.subr.bf16.mxu0 %v2685_v21  ;;  %v38_v53 = vld [vmem:[%s3999_s0 + $0x20] sm:$0xff]  ;;  %1794 = vmatprep.mubr.bf16.mxu1 %v2302_v52  ;;  %v2747_v4 = vld [vmem:[%s3998_s1 + $0xf0] ss:$8 sps:$4 sm:$0xff]   ;;  %v2757_v12 = vld [vmem:[%s3998_s1 + $0x114] ss:$8 sps:$4 sm:$0xff]  }
  0x16   :  { %v46_v54 = vld [vmem:[%s3999_s0 + $0x60] sm:$0xff]  ;;  %v2748_v5 = vld [vmem:[%s3998_s1 + $0x4f0] ss:$8 sps:$4 sm:$0xff]   ;;  %v2760_v13 = vld [vmem:[%s3998_s1 + $0x514] ss:$8 sps:$4 sm:$0xff]  }
  0x17   :  { %1773 = vmatpush1.bf16.msra.mxu1 %v2687_v22  ;;  %v2310_v55 = vcombine.high %v38_v53, %v46_v54  ;;  %v2737_v62 = vld [vmem:[%s3998_s1 + $0xe4] ss:$8 sps:$4 sm:$0xff]   ;;  %v2741_v0 = vld [vmem:[%s3998_s1 + $0xe0] ss:$8 sps:$4 sm:$0xff]   ;;  %v2309_v10 = vcombine.low %v38_v53, %v46_v54  ;;  %v2755_v14 = vld [vmem:[%s3998_s1 + $0x110] ss:$8 sps:$4 sm:$0xff]  }
  0x18   :  { %1985 = vmatpush1.bf16.msra.mxu0 %v2688_v23  ;;  %1774 = vmatprep.subr.bf16.mxu1 %v2689_v24  ;;  %v2739_v63 = vld [vmem:[%s3998_s1 + $0x4e4] ss:$8 sps:$4 sm:$0xff]   ;;  %v2742_v1 = vld [vmem:[%s3998_s1 + $0x4e0] ss:$8 sps:$4 sm:$0xff]   ;;  %v2758_v15 = vld [vmem:[%s3998_s1 + $0x510] ss:$8 sps:$4 sm:$0xff]  }
  0x19   :  { %1986 = vmatprep.subr.bf16.mxu0 %v2691_v25  ;;  %2006 = vmatprep.mubr.bf16.mxu0 %v2310_v55  ;;  %v2751_v6 = vld [vmem:[%s3998_s1 + $0x104] ss:$8 sps:$4 sm:$0xff]   ;;  %v2749_v9 = vld [vmem:[%s3998_s1 + $0x100] ss:$8 sps:$4 sm:$0xff]   ;;  %v2769_v20 = vld [vmem:[%s3998_s1 + $0x134] ss:$8 sps:$4 sm:$0xff]  }
  0x1a   :  { %v2754_v7 = vld [vmem:[%s3998_s1 + $0x504] ss:$8 sps:$4 sm:$0xff]   ;;  %v2752_v11 = vld [vmem:[%s3998_s1 + $0x500] ss:$8 sps:$4 sm:$0xff]   ;;  %v2772_v21 = vld [vmem:[%s3998_s1 + $0x534] ss:$8 sps:$4 sm:$0xff]  }
  0x1b   :  { %1775 = vmatpush1.bf16.msra.mxu1 %v2693_v26  ;;  %v2763_v16 = vld [vmem:[%s3998_s1 + $0x124] ss:$8 sps:$4 sm:$0xff]   ;;  %v2761_v18 = vld [vmem:[%s3998_s1 + $0x120] ss:$8 sps:$4 sm:$0xff]   ;;  %v2767_v22 = vld [vmem:[%s3998_s1 + $0x130] ss:$8 sps:$4 sm:$0xff]  }
  0x1c   :  { %1987 = vmatpush1.bf16.msra.mxu0 %v2694_v27  ;;  %1776 = vmatprep.subr.bf16.mxu1 %v2695_v28  ;;  %v2766_v17 = vld [vmem:[%s3998_s1 + $0x524] ss:$8 sps:$4 sm:$0xff]   ;;  %v2764_v19 = vld [vmem:[%s3998_s1 + $0x520] ss:$8 sps:$4 sm:$0xff]   ;;  %v2770_v23 = vld [vmem:[%s3998_s1 + $0x530] ss:$8 sps:$4 sm:$0xff]  }
  0x1d   :  { %1988 = vmatprep.subr.bf16.mxu0 %v2697_v29  ;;  %v2775_v24 = vld [vmem:[%s3998_s1 + $0x144] ss:$8 sps:$4 sm:$0xff]   ;;  %v2773_v26 = vld [vmem:[%s3998_s1 + $0x140] ss:$8 sps:$4 sm:$0xff]   ;;  %v2781_v28 = vld [vmem:[%s3998_s1 + $0x154] ss:$8 sps:$4 sm:$0xff]  }
  0x1e   :  { %v2778_v25 = vld [vmem:[%s3998_s1 + $0x544] ss:$8 sps:$4 sm:$0xff]   ;;  %v2776_v27 = vld [vmem:[%s3998_s1 + $0x540] ss:$8 sps:$4 sm:$0xff]   ;;  %v2784_v29 = vld [vmem:[%s3998_s1 + $0x554] ss:$8 sps:$4 sm:$0xff]  }
  0x1f   :  { %1777 = vmatpush1.bf16.msra.mxu1 %v2699_v30  ;;  %v50_v30 = vld [vmem:[%s3999_s0 + $0x80] sm:$0xff]  ;;  %v3383_v49 = vld [vmem:[%s3999_s0 + $0x28] sm:$0xff]  ;;  %v2794_v52 = vld [vmem:[%s3998_s1 + $0x570] ss:$8 sps:$4 sm:$0xff]  }
  0x20   :  { %1989 = vmatpush1.bf16.msra.mxu0 %v2700_v31  ;;  %1778 = vmatprep.subr.bf16.mxu1 %v2701_v32  ;;  %v58_v31 = vld [vmem:[%s3999_s0 + $0xc0] sm:$0xff]  ;;  %v2779_v32 = vld [vmem:[%s3998_s1 + $0x150] ss:$8 sps:$4 sm:$0xff]  }
  0x21   :  { %1990 = vmatprep.subr.bf16.mxu0 %v2703_v33  ;;  %v2318_v33 = vcombine.high %v50_v30, %v58_v31  ;;  %v2799_v54 = vld [vmem:[%s3998_s1 + $0x184] ss:$8 sps:$4 sm:$0xff]  }
  0x22   :  { %v2802_v55 = vld [vmem:[%s3998_s1 + $0x584] ss:$8 sps:$4 sm:$0xff]  }
  0x23   :  { %1779 = vmatpush1.bf16.msra.mxu1 %v2705_v34  ;;  %v2782_v34 = vld [vmem:[%s3998_s1 + $0x550] ss:$8 sps:$4 sm:$0xff]  }
  0x24   :  { %1991 = vmatpush1.bf16.msra.mxu0 %v2706_v35  ;;  %1780 = vmatprep.subr.bf16.mxu1 %v2707_v36  ;;  %v54_v35 = vld [vmem:[%s3999_s0 + $0xa0] sm:$0xff] }
  0x25   :  { %1992 = vmatprep.subr.bf16.mxu0 %v2709_v37  ;;  %v62_v36 = vld [vmem:[%s3999_s0 + $0xe0] sm:$0xff]  ;;  %v2317_v37 = vcombine.low %v50_v30, %v58_v31  ;;  %v2853_v30 = vld [vmem:[%s3998_s1 + $0x214] ss:$8 sps:$4 sm:$0xff]  }
  0x26   :  { %v2856_v31 = vld [vmem:[%s3998_s1 + $0x614] ss:$8 sps:$4 sm:$0xff]  }
  0x27   :  { %1781 = vmatpush1.bf16.msra.mxu1 %v2711_v38  ;;  %v2787_v38 = vld [vmem:[%s3998_s1 + $0x164] ss:$8 sps:$4 sm:$0xff]  }
  0x28   :  { %1993 = vmatpush1.bf16.msra.mxu0 %v2712_v39  ;;  %1782 = vmatprep.subr.bf16.mxu1 %v2713_v40  ;;  %v2326_v39 = vcombine.high %v54_v35, %v62_v36  ;;  %v2325_v40 = vcombine.low %v54_v35, %v62_v36  ;;  %v2851_v36 = vld [vmem:[%s3998_s1 + $0x210] ss:$8 sps:$4 sm:$0xff]  }
  0x29   :  { %1994 = vmatprep.subr.bf16.mxu0 %v2715_v41  ;;  %v2790_v41 = vld [vmem:[%s3998_s1 + $0x564] ss:$8 sps:$4 sm:$0xff]  }
  0x2b   :  { %1783 = vmatpush1.bf16.msra.mxu1 %v2717_v42  ;;  %v2785_v42 = vld [vmem:[%s3998_s1 + $0x160] ss:$8 sps:$4 sm:$0xff]  }
  0x2c   :  { %1995 = vmatpush1.bf16.msra.mxu0 %v2718_v43  ;;  %1784 = vmatprep.subr.bf16.mxu1 %v2719_v44  ;;  %v2788_v43 = vld [vmem:[%s3998_s1 + $0x560] ss:$8 sps:$4 sm:$0xff]  }
  0x2d   :  { %1996 = vmatprep.subr.bf16.mxu0 %v2721_v45  ;;  %v3365_v44 = vld [vmem:[%s3999_s0 + $0x8] sm:$0xff] }
  0x2e   :  { %v3370_v45 = vld [vmem:[%s3999_s0 + $0x48] sm:$0xff] }
  0x2f   :  { %1785 = vmatpush1.bf16.msra.mxu1 %v2723_v46  ;;  %v2793_v46 = vld [vmem:[%s3998_s1 + $0x174] ss:$8 sps:$4 sm:$0xff]   ;;  %v2304_v48 = vcombine.high %v3365_v44, %v3370_v45 }
  0x30   :  { %1997 = vmatpush1.bf16.msra.mxu0 %v2724_v47  ;;  %1786 = vmatprep.subr.bf16.mxu1 %v2725_v50  ;;  %v2796_v47 = vld [vmem:[%s3998_s1 + $0x574] ss:$8 sps:$4 sm:$0xff]   ;;  %v3388_v50 = vld [vmem:[%s3999_s0 + $0x68] sm:$0xff] }
  0x31   :  { %1998 = vmatprep.subr.bf16.mxu0 %v2727_v51  ;;  %v2791_v51 = vld [vmem:[%s3998_s1 + $0x170] ss:$8 sps:$4 sm:$0xff]   ;;  %v2312_v53 = vcombine.high %v3383_v49, %v3388_v50 }
  0x33   :  { %1787 = vmatpush1.bf16.msra.mxu1 %v2729_v56  ;;  %v2797_v56 = vld [vmem:[%s3998_s1 + $0x180] ss:$8 sps:$4 sm:$0xff]  }
  0x34   :  { %1999 = vmatpush1.bf16.msra.mxu0 %v2730_v57  ;;  %1788 = vmatprep.subr.bf16.mxu1 %v2731_v58  ;;  %v2800_v57 = vld [vmem:[%s3998_s1 + $0x580] ss:$8 sps:$4 sm:$0xff]   ;;  %v2805_v58 = vld [vmem:[%s3998_s1 + $0x194] ss:$8 sps:$4 sm:$0xff]  }
  0x35   :  { %2000 = vmatprep.subr.bf16.mxu0 %v2733_v59  ;;  %v2808_v59 = vld [vmem:[%s3998_s1 + $0x594] ss:$8 sps:$4 sm:$0xff]  }
  0x37   :  { %1789 = vmatpush1.bf16.msra.mxu1 %v2735_v60  ;;  %v2803_v60 = vld [vmem:[%s3998_s1 + $0x190] ss:$8 sps:$4 sm:$0xff]  }
  0x38   :  { %2001 = vmatpush1.bf16.msra.mxu0 %v2736_v61  ;;  %1790 = vmatprep.subr.bf16.mxu1 %v2737_v62  ;;  %v2806_v61 = vld [vmem:[%s3998_s1 + $0x590] ss:$8 sps:$4 sm:$0xff]   ;;  %v2811_v62 = vld [vmem:[%s3998_s1 + $0x1a4] ss:$8 sps:$4 sm:$0xff]  }
  0x39   :  { %2002 = vmatprep.subr.bf16.mxu0 %v2739_v63  ;;  %v2814_v63 = vld [vmem:[%s3998_s1 + $0x5a4] ss:$8 sps:$4 sm:$0xff]  }
  0x3b   :  { %1791 = vmatpush1.bf16.msra.mxu1 %v2741_v0  ;;  %v2809_v0 = vld [vmem:[%s3998_s1 + $0x1a0] ss:$8 sps:$4 sm:$0xff]  }
  0x3c   :  { %2003 = vmatpush1.bf16.msra.mxu0 %v2742_v1  ;;  %1792 = vmatprep.subr.bf16.mxu1 %v2743_v2  ;;  %v2812_v1 = vld [vmem:[%s3998_s1 + $0x5a0] ss:$8 sps:$4 sm:$0xff]   ;;  %v2817_v2 = vld [vmem:[%s3998_s1 + $0x1b4] ss:$8 sps:$4 sm:$0xff]  }
  0x3d   :  { %2004 = vmatprep.subr.bf16.mxu0 %v2745_v3  ;;  %v2820_v3 = vld [vmem:[%s3998_s1 + $0x5b4] ss:$8 sps:$4 sm:$0xff]  }
  0x3f   :  { %1793 = vmatpush1.bf16.msra.mxu1 %v2747_v4  ;;  %v2815_v4 = vld [vmem:[%s3998_s1 + $0x1b0] ss:$8 sps:$4 sm:$0xff]  }
  0x40   :  { %2005 = vmatpush1.bf16.msra.mxu0 %v2748_v5  ;;  %1815 = vmatprep.subr.bf16.mxu1 %v2751_v6  ;;  %v2818_v5 = vld [vmem:[%s3998_s1 + $0x5b0] ss:$8 sps:$4 sm:$0xff]   ;;  %v2823_v6 = vld [vmem:[%s3998_s1 + $0x1c4] ss:$8 sps:$4 sm:$0xff]  }
  0x41   :  { %2027 = vmatprep.subr.bf16.mxu0 %v2754_v7  ;;  %v2826_v7 = vld [vmem:[%s3998_s1 + $0x5c4] ss:$8 sps:$4 sm:$0xff]  }
  0x42   :  { %1795 = vmatmul.mubr.bf16.vlgmr.msra.gmra.mrb[0].mxu1 %v2301_v8  ;;  %v2821_v8 = vld [vmem:[%s3998_s1 + $0x1c0] ss:$8 sps:$4 sm:$0xff]  }
  0x43   :  { %2007 = vmatmul.mubr.bf16.vlgmr.msra.gmra.mrb[0].mxu0 %v2309_v10  ;;  %1816 = vmatpush1.bf16.msra.mxu1 %v2749_v9  ;;  %v2824_v9 = vld [vmem:[%s3998_s1 + $0x5c0] ss:$8 sps:$4 sm:$0xff]   ;;  %v2829_v10 = vld [vmem:[%s3998_s1 + $0x1d4] ss:$8 sps:$4 sm:$0xff]  }
  0x44   :  { %2028 = vmatpush1.bf16.msra.mxu0 %v2752_v11  ;;  %1817 = vmatprep.subr.bf16.mxu1 %v2757_v12  ;;  %v2832_v11 = vld [vmem:[%s3998_s1 + $0x5d4] ss:$8 sps:$4 sm:$0xff]   ;;  %v2827_v12 = vld [vmem:[%s3998_s1 + $0x1d0] ss:$8 sps:$4 sm:$0xff]  }
  0x45   :  { %2029 = vmatprep.subr.bf16.mxu0 %v2760_v13  ;;  %1804 = vmatprep.mubr.bf16.mxu1 %v2318_v33  ;;  %v2830_v13 = vld [vmem:[%s3998_s1 + $0x5d0] ss:$8 sps:$4 sm:$0xff]   ;;  %v63_v33 = vld [vmem:[%s3999_s0 + $0xe8] sm:$0xff] }
  0x46   :  { %2016 = vmatprep.mubr.bf16.mxu0 %v2326_v39  ;;  %v2862_v39 = vld [vmem:[%s3998_s1 + $0x624] ss:$8 sps:$4 sm:$0xff]  }
  0x47   :  { %1818 = vmatpush1.bf16.msra.mxu1 %v2755_v14  ;;  %v2835_v14 = vld [vmem:[%s3998_s1 + $0x1e4] ss:$8 sps:$4 sm:$0xff]  }
  0x48   :  { %2030 = vmatpush1.bf16.msra.mxu0 %v2758_v15  ;;  %1819 = vmatprep.subr.bf16.mxu1 %v2763_v16  ;;  %v2838_v15 = vld [vmem:[%s3998_s1 + $0x5e4] ss:$8 sps:$4 sm:$0xff]   ;;  %v2833_v16 = vld [vmem:[%s3998_s1 + $0x1e0] ss:$8 sps:$4 sm:$0xff]  }
  0x49   :  { %2031 = vmatprep.subr.bf16.mxu0 %v2766_v17  ;;  %v2836_v17 = vld [vmem:[%s3998_s1 + $0x5e0] ss:$8 sps:$4 sm:$0xff]  }
  0x4a   :  { %1805 = vmatmul.mubr.bf16.gmra.mrb[4].mxu1 %v2317_v37  ;;  %v2854_v37 = vld [vmem:[%s3998_s1 + $0x610] ss:$8 sps:$4 sm:$0xff]  }
  0x4b   :  { %1820 = vmatpush1.bf16.msra.mxu1 %v2761_v18  ;;  %2017 = vmatmul.mubr.bf16.gmra.mrb[4].mxu0 %v2325_v40  ;;  %v2841_v18 = vld [vmem:[%s3998_s1 + $0x1f4] ss:$8 sps:$4 sm:$0xff]   ;;  %v2857_v40 = vld [vmem:[%s3998_s1 + $0x220] ss:$8 sps:$4 sm:$0xff]  }
  0x4c   :  { %2032 = vmatpush1.bf16.msra.mxu0 %v2764_v19  ;;  %1821 = vmatprep.subr.bf16.mxu1 %v2769_v20  ;;  %v2844_v19 = vld [vmem:[%s3998_s1 + $0x5f4] ss:$8 sps:$4 sm:$0xff]   ;;  %v2839_v20 = vld [vmem:[%s3998_s1 + $0x1f0] ss:$8 sps:$4 sm:$0xff]  }
  0x4d   :  { %2033 = vmatprep.subr.bf16.mxu0 %v2772_v21  ;;  %1847 = vmatprep.mubr.bf16.mxu1 %v2304_v48  ;;  %v2842_v21 = vld [vmem:[%s3998_s1 + $0x5f0] ss:$8 sps:$4 sm:$0xff]   ;;  %v2865_v48 = vld [vmem:[%s3998_s1 + $0x234] ss:$8 sps:$4 sm:$0xff]  }
  0x4e   :  { %2059 = vmatprep.mubr.bf16.mxu0 %v2312_v53  ;;  %v2866_v53 = vld [vmem:[%s3998_s1 + $0x630] ss:$8 sps:$4 sm:$0xff]  }
  0x4f   :  { %1822 = vmatpush1.bf16.msra.mxu1 %v2767_v22  ;;  %v2847_v22 = vld [vmem:[%s3998_s1 + $0x204] ss:$8 sps:$4 sm:$0xff]  }
  0x50   :  { %2034 = vmatpush1.bf16.msra.mxu0 %v2770_v23  ;;  %1823 = vmatprep.subr.bf16.mxu1 %v2775_v24  ;;  %v2850_v23 = vld [vmem:[%s3998_s1 + $0x604] ss:$8 sps:$4 sm:$0xff]   ;;  %v2845_v24 = vld [vmem:[%s3998_s1 + $0x200] ss:$8 sps:$4 sm:$0xff]  }
  0x51   :  { %2035 = vmatprep.subr.bf16.mxu0 %v2778_v25  ;;  %v2848_v25 = vld [vmem:[%s3998_s1 + $0x600] ss:$8 sps:$4 sm:$0xff]  }
  0x53   :  { %1824 = vmatpush1.bf16.msra.mxu1 %v2773_v26  ;;  %v51_v26 = vld [vmem:[%s3999_s0 + $0x88] sm:$0xff] }
  0x54   :  { %2036 = vmatpush1.bf16.msra.mxu0 %v2776_v27  ;;  %1825 = vmatprep.subr.bf16.mxu1 %v2781_v28  ;;  %v2303_v27 = vcombine.low %v3365_v44, %v3370_v45  ;;  %v2311_v28 = vcombine.low %v3383_v49, %v3388_v50  ;;  %v3554_v45 = vld [vmem:[%s3999_s0 + $0x50] sm:$0xff] }
  0x55   :  { %2037 = vmatprep.subr.bf16.mxu0 %v2784_v29  ;;  %v59_v29 = vld [vmem:[%s3999_s0 + $0xc8] sm:$0xff]  ;;  %v2868_v49 = vld [vmem:[%s3998_s1 + $0x634] ss:$8 sps:$4 sm:$0xff]  }
  0x57   :  { %1826 = vmatpush1.bf16.msra.mxu1 %v2779_v32  ;;  %v55_v32 = vld [vmem:[%s3999_s0 + $0xa8] sm:$0xff] }
  0x58   :  { %2038 = vmatpush1.bf16.msra.mxu0 %v2782_v34  ;;  %1827 = vmatprep.subr.bf16.mxu1 %v2787_v38  ;;  %v2320_v34 = vcombine.high %v51_v26, %v59_v29  ;;  %v2328_v35 = vcombine.high %v55_v32, %v63_v33  ;;  %v2859_v38 = vld [vmem:[%s3998_s1 + $0x224] ss:$8 sps:$4 sm:$0xff]   ;;  %v2327_v44 = vcombine.low %v55_v32, %v63_v33  ;;  %v2929_v32 = vld [vmem:[%s3998_s1 + $0x2e0] ss:$8 sps:$4 sm:$0xff]  }
  0x59   :  { %2039 = vmatprep.subr.bf16.mxu0 %v2790_v41  ;;  %v2860_v41 = vld [vmem:[%s3998_s1 + $0x620] ss:$8 sps:$4 sm:$0xff]  }
  0x5a   :  { %v2932_v33 = vld [vmem:[%s3998_s1 + $0x6e0] ss:$8 sps:$4 sm:$0xff]  }
  0x5b   :  { %1828 = vmatpush1.bf16.msra.mxu1 %v2785_v42  ;;  %v3549_v42 = vld [vmem:[%s3999_s0 + $0x10] sm:$0xff] }
  0x5c   :  { %2040 = vmatpush1.bf16.msra.mxu0 %v2788_v43  ;;  %1829 = vmatprep.subr.bf16.mxu1 %v2793_v46  ;;  %v2319_v43 = vcombine.low %v51_v26, %v59_v29  ;;  %v3559_v46 = vld [vmem:[%s3999_s0 + $0x30] sm:$0xff]  ;;  %v2306_v50 = vcombine.high %v3549_v42, %v3554_v45 }
  0x5d   :  { %2041 = vmatprep.subr.bf16.mxu0 %v2796_v47  ;;  %v3564_v47 = vld [vmem:[%s3999_s0 + $0x70] sm:$0xff] }
  0x5e   :  { %v2925_v26 = vld [vmem:[%s3998_s1 + $0x2d4] ss:$8 sps:$4 sm:$0xff]   ;;  %v2926_v29 = vld [vmem:[%s3998_s1 + $0x6d0] ss:$8 sps:$4 sm:$0xff]  }
  0x5f   :  { %1830 = vmatpush1.bf16.msra.mxu1 %v2791_v51  ;;  %v2314_v51 = vcombine.high %v3559_v46, %v3564_v47 }
  0x60   :  { %2042 = vmatpush1.bf16.msra.mxu0 %v2794_v52  ;;  %1831 = vmatprep.subr.bf16.mxu1 %v2799_v54  ;;  %v2863_v52 = vld [vmem:[%s3998_s1 + $0x230] ss:$8 sps:$4 sm:$0xff]   ;;  %v2871_v54 = vld [vmem:[%s3998_s1 + $0x244] ss:$8 sps:$4 sm:$0xff]  }
  0x61   :  { %2043 = vmatprep.subr.bf16.mxu0 %v2802_v55  ;;  %v2874_v55 = vld [vmem:[%s3998_s1 + $0x644] ss:$8 sps:$4 sm:$0xff]  }
  0x63   :  { %1832 = vmatpush1.bf16.msra.mxu1 %v2797_v56  ;;  %v2869_v56 = vld [vmem:[%s3998_s1 + $0x240] ss:$8 sps:$4 sm:$0xff]  }
  0x64   :  { %2044 = vmatpush1.bf16.msra.mxu0 %v2800_v57  ;;  %1833 = vmatprep.subr.bf16.mxu1 %v2805_v58  ;;  %v2872_v57 = vld [vmem:[%s3998_s1 + $0x640] ss:$8 sps:$4 sm:$0xff]   ;;  %v2877_v58 = vld [vmem:[%s3998_s1 + $0x254] ss:$8 sps:$4 sm:$0xff]  }
  0x65   :  { %2045 = vmatprep.subr.bf16.mxu0 %v2808_v59  ;;  %v2880_v59 = vld [vmem:[%s3998_s1 + $0x654] ss:$8 sps:$4 sm:$0xff]  }
  0x67   :  { %1834 = vmatpush1.bf16.msra.mxu1 %v2803_v60  ;;  %v2875_v60 = vld [vmem:[%s3998_s1 + $0x250] ss:$8 sps:$4 sm:$0xff]  }
  0x68   :  { %2046 = vmatpush1.bf16.msra.mxu0 %v2806_v61  ;;  %1835 = vmatprep.subr.bf16.mxu1 %v2811_v62  ;;  %v2878_v61 = vld [vmem:[%s3998_s1 + $0x650] ss:$8 sps:$4 sm:$0xff]   ;;  %v2883_v62 = vld [vmem:[%s3998_s1 + $0x264] ss:$8 sps:$4 sm:$0xff]  }
  0x69   :  { %2047 = vmatprep.subr.bf16.mxu0 %v2814_v63  ;;  %v2886_v63 = vld [vmem:[%s3998_s1 + $0x664] ss:$8 sps:$4 sm:$0xff]  }
  0x6b   :  { %1836 = vmatpush1.bf16.msra.mxu1 %v2809_v0  ;;  %v2881_v0 = vld [vmem:[%s3998_s1 + $0x260] ss:$8 sps:$4 sm:$0xff]  }
  0x6c   :  { %2048 = vmatpush1.bf16.msra.mxu0 %v2812_v1  ;;  %1837 = vmatprep.subr.bf16.mxu1 %v2817_v2  ;;  %v2884_v1 = vld [vmem:[%s3998_s1 + $0x660] ss:$8 sps:$4 sm:$0xff]   ;;  %v2889_v2 = vld [vmem:[%s3998_s1 + $0x274] ss:$8 sps:$4 sm:$0xff]  }
  0x6d   :  { %2049 = vmatprep.subr.bf16.mxu0 %v2820_v3  ;;  %v2892_v3 = vld [vmem:[%s3998_s1 + $0x674] ss:$8 sps:$4 sm:$0xff]  }
  0x6f   :  { %1838 = vmatpush1.bf16.msra.mxu1 %v2815_v4  ;;  %v2887_v4 = vld [vmem:[%s3998_s1 + $0x270] ss:$8 sps:$4 sm:$0xff]  }
  0x70   :  { %2050 = vmatpush1.bf16.msra.mxu0 %v2818_v5  ;;  %1839 = vmatprep.subr.bf16.mxu1 %v2823_v6  ;;  %v2890_v5 = vld [vmem:[%s3998_s1 + $0x670] ss:$8 sps:$4 sm:$0xff]   ;;  %v2895_v6 = vld [vmem:[%s3998_s1 + $0x284] ss:$8 sps:$4 sm:$0xff]  }
  0x71   :  { %2051 = vmatprep.subr.bf16.mxu0 %v2826_v7  ;;  %v2898_v7 = vld [vmem:[%s3998_s1 + $0x684] ss:$8 sps:$4 sm:$0xff]  }
  0x73   :  { %1840 = vmatpush1.bf16.msra.mxu1 %v2821_v8  ;;  %v2893_v8 = vld [vmem:[%s3998_s1 + $0x280] ss:$8 sps:$4 sm:$0xff]  }
  0x74   :  { %2052 = vmatpush1.bf16.msra.mxu0 %v2824_v9  ;;  %1841 = vmatprep.subr.bf16.mxu1 %v2829_v10  ;;  %v2896_v9 = vld [vmem:[%s3998_s1 + $0x680] ss:$8 sps:$4 sm:$0xff]   ;;  %v2901_v10 = vld [vmem:[%s3998_s1 + $0x294] ss:$8 sps:$4 sm:$0xff]  }
  0x75   :  { %2053 = vmatprep.subr.bf16.mxu0 %v2832_v11  ;;  %v2904_v11 = vld [vmem:[%s3998_s1 + $0x694] ss:$8 sps:$4 sm:$0xff]  }
  0x77   :  { %1842 = vmatpush1.bf16.msra.mxu1 %v2827_v12  ;;  %v2899_v12 = vld [vmem:[%s3998_s1 + $0x290] ss:$8 sps:$4 sm:$0xff]  }
  0x78   :  { %2054 = vmatpush1.bf16.msra.mxu0 %v2830_v13  ;;  %1843 = vmatprep.subr.bf16.mxu1 %v2835_v14  ;;  %v2902_v13 = vld [vmem:[%s3998_s1 + $0x690] ss:$8 sps:$4 sm:$0xff]   ;;  %v2907_v14 = vld [vmem:[%s3998_s1 + $0x2a4] ss:$8 sps:$4 sm:$0xff]  }
  0x79   :  { %2055 = vmatprep.subr.bf16.mxu0 %v2838_v15  ;;  %v2910_v15 = vld [vmem:[%s3998_s1 + $0x6a4] ss:$8 sps:$4 sm:$0xff]  }
  0x7b   :  { %1844 = vmatpush1.bf16.msra.mxu1 %v2833_v16  ;;  %v2905_v16 = vld [vmem:[%s3998_s1 + $0x2a0] ss:$8 sps:$4 sm:$0xff]  }
  0x7c   :  { %2056 = vmatpush1.bf16.msra.mxu0 %v2836_v17  ;;  %1845 = vmatprep.subr.bf16.mxu1 %v2841_v18  ;;  %v2908_v17 = vld [vmem:[%s3998_s1 + $0x6a0] ss:$8 sps:$4 sm:$0xff]   ;;  %v2913_v18 = vld [vmem:[%s3998_s1 + $0x2b4] ss:$8 sps:$4 sm:$0xff]  }
  0x7d   :  { %2057 = vmatprep.subr.bf16.mxu0 %v2844_v19  ;;  %v2916_v19 = vld [vmem:[%s3998_s1 + $0x6b4] ss:$8 sps:$4 sm:$0xff]  }
  0x7f   :  { %1846 = vmatpush1.bf16.msra.mxu1 %v2839_v20  ;;  %v2911_v20 = vld [vmem:[%s3998_s1 + $0x2b0] ss:$8 sps:$4 sm:$0xff]  }
  0x80   :  { %2058 = vmatpush1.bf16.msra.mxu0 %v2842_v21  ;;  %1868 = vmatprep.subr.bf16.mxu1 %v2847_v22  ;;  %v2914_v21 = vld [vmem:[%s3998_s1 + $0x6b0] ss:$8 sps:$4 sm:$0xff]   ;;  %v2919_v22 = vld [vmem:[%s3998_s1 + $0x2c4] ss:$8 sps:$4 sm:$0xff]  }
  0x81   :  { %2080 = vmatprep.subr.bf16.mxu0 %v2850_v23  ;;  %v2922_v23 = vld [vmem:[%s3998_s1 + $0x6c4] ss:$8 sps:$4 sm:$0xff]  }
  0x82   :  { %1848 = vmatmul.mubr.bf16.vlgmr.msra.gmra.mrb[0].mxu1 %v2303_v27  ;;  %v2928_v27 = vld [vmem:[%s3998_s1 + $0x6d4] ss:$8 sps:$4 sm:$0xff]  }
  0x83   :  { %2060 = vmatmul.mubr.bf16.vlgmr.msra.gmra.mrb[0].mxu0 %v2311_v28  ;;  %1869 = vmatpush1.bf16.msra.mxu1 %v2845_v24  ;;  %v2917_v24 = vld [vmem:[%s3998_s1 + $0x2c0] ss:$8 sps:$4 sm:$0xff]   ;;  %v2923_v28 = vld [vmem:[%s3998_s1 + $0x2d0] ss:$8 sps:$4 sm:$0xff]  }
  0x84   :  { %2081 = vmatpush1.bf16.msra.mxu0 %v2848_v25  ;;  %1870 = vmatprep.subr.bf16.mxu1 %v2853_v30  ;;  %v2920_v25 = vld [vmem:[%s3998_s1 + $0x6c0] ss:$8 sps:$4 sm:$0xff]   ;;  %v2931_v30 = vld [vmem:[%s3998_s1 + $0x2e4] ss:$8 sps:$4 sm:$0xff]  }
  0x85   :  { %2082 = vmatprep.subr.bf16.mxu0 %v2856_v31  ;;  %1857 = vmatprep.mubr.bf16.mxu1 %v2320_v34  ;;  %v2934_v31 = vld [vmem:[%s3998_s1 + $0x6e4] ss:$8 sps:$4 sm:$0xff]   ;;  %v2937_v34 = vld [vmem:[%s3998_s1 + $0x2f4] ss:$8 sps:$4 sm:$0xff]  }
  0x86   :  { %2069 = vmatprep.mubr.bf16.mxu0 %v2328_v35  ;;  %v2940_v35 = vld [vmem:[%s3998_s1 + $0x6f4] ss:$8 sps:$4 sm:$0xff]  }
  0x87   :  { %1871 = vmatpush1.bf16.msra.mxu1 %v2851_v36  ;;  %v2935_v36 = vld [vmem:[%s3998_s1 + $0x2f0] ss:$8 sps:$4 sm:$0xff]  }
  0x88   :  { %2083 = vmatpush1.bf16.msra.mxu0 %v2854_v37  ;;  %1872 = vmatprep.subr.bf16.mxu1 %v2859_v38  ;;  %v2938_v37 = vld [vmem:[%s3998_s1 + $0x6f0] ss:$8 sps:$4 sm:$0xff]   ;;  %v2943_v38 = vld [vmem:[%s3998_s1 + $0x304] ss:$8 sps:$4 sm:$0xff]  }
  0x89   :  { %2084 = vmatprep.subr.bf16.mxu0 %v2862_v39  ;;  %v2946_v39 = vld [vmem:[%s3998_s1 + $0x704] ss:$8 sps:$4 sm:$0xff]  }
  0x8a   :  { %1858 = vmatmul.mubr.bf16.gmra.mrb[4].mxu1 %v2319_v43  ;;  %v2313_v43 = vcombine.low %v3559_v46, %v3564_v47  ;;  %v2949_v46 = vld [vmem:[%s3998_s1 + $0x314] ss:$8 sps:$4 sm:$0xff]  }
  0x8b   :  { %2070 = vmatmul.mubr.bf16.gmra.mrb[4].mxu0 %v2327_v44  ;;  %1873 = vmatpush1.bf16.msra.mxu1 %v2857_v40  ;;  %v52_v40 = vld [vmem:[%s3999_s0 + $0x90] sm:$0xff] }
  0x8c   :  { %2085 = vmatpush1.bf16.msra.mxu0 %v2860_v41  ;;  %1874 = vmatprep.subr.bf16.mxu1 %v2865_v48  ;;  %v2305_v41 = vcombine.low %v3549_v42, %v3554_v45  ;;  %v60_v44 = vld [vmem:[%s3999_s0 + $0xd0] sm:$0xff]  ;;  %v2941_v42 = vld [vmem:[%s3998_s1 + $0x300] ss:$8 sps:$4 sm:$0xff]  }
  0x8d   :  { %2086 = vmatprep.subr.bf16.mxu0 %v2868_v49  ;;  %1900 = vmatprep.mubr.bf16.mxu1 %v2306_v50  ;;  %v56_v48 = vld [vmem:[%s3999_s0 + $0xb0] sm:$0xff]  ;;  %v2944_v45 = vld [vmem:[%s3998_s1 + $0x700] ss:$8 sps:$4 sm:$0xff]   ;;  %v2322_v50 = vcombine.high %v52_v40, %v60_v44 }
  0x8e   :  { %2112 = vmatprep.mubr.bf16.mxu0 %v2314_v51  ;;  %v64_v49 = vld [vmem:[%s3999_s0 + $0xf0] sm:$0xff] }
  0x8f   :  { %1875 = vmatpush1.bf16.msra.mxu1 %v2863_v52  ;;  %v2952_v47 = vld [vmem:[%s3998_s1 + $0x714] ss:$8 sps:$4 sm:$0xff]   ;;  %v2330_v51 = vcombine.high %v56_v48, %v64_v49  ;;  %v2947_v52 = vld [vmem:[%s3998_s1 + $0x310] ss:$8 sps:$4 sm:$0xff]  }
  0x90   :  { %2087 = vmatpush1.bf16.msra.mxu0 %v2866_v53  ;;  %1876 = vmatprep.subr.bf16.mxu1 %v2871_v54  ;;  %v2950_v53 = vld [vmem:[%s3998_s1 + $0x710] ss:$8 sps:$4 sm:$0xff]   ;;  %v2955_v54 = vld [vmem:[%s3998_s1 + $0x324] ss:$8 sps:$4 sm:$0xff]  }
  0x91   :  { %2088 = vmatprep.subr.bf16.mxu0 %v2874_v55  ;;  %v2958_v55 = vld [vmem:[%s3998_s1 + $0x724] ss:$8 sps:$4 sm:$0xff]  }
  0x93   :  { %1877 = vmatpush1.bf16.msra.mxu1 %v2869_v56  ;;  %v3775_v56 = vld [vmem:[%s3999_s0 + $0x18] sm:$0xff] }
  0x94   :  { %2089 = vmatpush1.bf16.msra.mxu0 %v2872_v57  ;;  %1878 = vmatprep.subr.bf16.mxu1 %v2877_v58  ;;  %v2321_v57 = vcombine.low %v52_v40, %v60_v44  ;;  %v2329_v58 = vcombine.low %v56_v48, %v64_v49  ;;  %v3013_v40 = vld [vmem:[%s3998_s1 + $0x3c0] ss:$8 sps:$4 sm:$0xff]   ;;  %v3024_v44 = vld [vmem:[%s3998_s1 + $0x7d4] ss:$8 sps:$4 sm:$0xff]   ;;  %v3019_v48 = vld [vmem:[%s3998_s1 + $0x3d0] ss:$8 sps:$4 sm:$0xff]  }
  0x95   :  { %2090 = vmatprep.subr.bf16.mxu0 %v2880_v59  ;;  %v3780_v59 = vld [vmem:[%s3999_s0 + $0x58] sm:$0xff] }
  0x96   :  { %v3022_v49 = vld [vmem:[%s3998_s1 + $0x7d0] ss:$8 sps:$4 sm:$0xff]  }
  0x97   :  { %1879 = vmatpush1.bf16.msra.mxu1 %v2875_v60  ;;  %v3785_v60 = vld [vmem:[%s3999_s0 + $0x38] sm:$0xff] }
  0x98   :  { %2091 = vmatpush1.bf16.msra.mxu0 %v2878_v61  ;;  %1880 = vmatprep.subr.bf16.mxu1 %v2883_v62  ;;  %v3790_v61 = vld [vmem:[%s3999_s0 + $0x78] sm:$0xff]  ;;  %v2953_v62 = vld [vmem:[%s3998_s1 + $0x320] ss:$8 sps:$4 sm:$0xff]  }
  0x99   :  { %2092 = vmatprep.subr.bf16.mxu0 %v2886_v63  ;;  %v2956_v63 = vld [vmem:[%s3998_s1 + $0x720] ss:$8 sps:$4 sm:$0xff]  }
  0x9b   :  { %1881 = vmatpush1.bf16.msra.mxu1 %v2881_v0  ;;  %v2961_v0 = vld [vmem:[%s3998_s1 + $0x334] ss:$8 sps:$4 sm:$0xff]  }
  0x9c   :  { %2093 = vmatpush1.bf16.msra.mxu0 %v2884_v1  ;;  %1882 = vmatprep.subr.bf16.mxu1 %v2889_v2  ;;  %v2964_v1 = vld [vmem:[%s3998_s1 + $0x734] ss:$8 sps:$4 sm:$0xff]   ;;  %v2308_v2 = vcombine.high %v3775_v56, %v3780_v59 }
  0x9d   :  { %2094 = vmatprep.subr.bf16.mxu0 %v2892_v3  ;;  %v2316_v3 = vcombine.high %v3785_v60, %v3790_v61 }
  0x9f   :  { %1883 = vmatpush1.bf16.msra.mxu1 %v2887_v4  ;;  %v2959_v4 = vld [vmem:[%s3998_s1 + $0x330] ss:$8 sps:$4 sm:$0xff]  }
  0xa0   :  { %2095 = vmatpush1.bf16.msra.mxu0 %v2890_v5  ;;  %1884 = vmatprep.subr.bf16.mxu1 %v2895_v6  ;;  %v2962_v5 = vld [vmem:[%s3998_s1 + $0x730] ss:$8 sps:$4 sm:$0xff]   ;;  %v2967_v6 = vld [vmem:[%s3998_s1 + $0x344] ss:$8 sps:$4 sm:$0xff]  }
  0xa1   :  { %2096 = vmatprep.subr.bf16.mxu0 %v2898_v7  ;;  %v2970_v7 = vld [vmem:[%s3998_s1 + $0x744] ss:$8 sps:$4 sm:$0xff]  }
  0xa3   :  { %1885 = vmatpush1.bf16.msra.mxu1 %v2893_v8  ;;  %v2965_v8 = vld [vmem:[%s3998_s1 + $0x340] ss:$8 sps:$4 sm:$0xff]  }
  0xa4   :  { %2097 = vmatpush1.bf16.msra.mxu0 %v2896_v9  ;;  %1886 = vmatprep.subr.bf16.mxu1 %v2901_v10  ;;  %v2968_v9 = vld [vmem:[%s3998_s1 + $0x740] ss:$8 sps:$4 sm:$0xff]   ;;  %v2973_v10 = vld [vmem:[%s3998_s1 + $0x354] ss:$8 sps:$4 sm:$0xff]  }
  0xa5   :  { %2098 = vmatprep.subr.bf16.mxu0 %v2904_v11  ;;  %v2976_v11 = vld [vmem:[%s3998_s1 + $0x754] ss:$8 sps:$4 sm:$0xff]  }
  0xa7   :  { %1887 = vmatpush1.bf16.msra.mxu1 %v2899_v12  ;;  %v2971_v12 = vld [vmem:[%s3998_s1 + $0x350] ss:$8 sps:$4 sm:$0xff]  }
  0xa8   :  { %2099 = vmatpush1.bf16.msra.mxu0 %v2902_v13  ;;  %1888 = vmatprep.subr.bf16.mxu1 %v2907_v14  ;;  %v2974_v13 = vld [vmem:[%s3998_s1 + $0x750] ss:$8 sps:$4 sm:$0xff]   ;;  %v2979_v14 = vld [vmem:[%s3998_s1 + $0x364] ss:$8 sps:$4 sm:$0xff]  }
  0xa9   :  { %2100 = vmatprep.subr.bf16.mxu0 %v2910_v15  ;;  %v2982_v15 = vld [vmem:[%s3998_s1 + $0x764] ss:$8 sps:$4 sm:$0xff]  }
  0xab   :  { %1889 = vmatpush1.bf16.msra.mxu1 %v2905_v16  ;;  %v2977_v16 = vld [vmem:[%s3998_s1 + $0x360] ss:$8 sps:$4 sm:$0xff]  }
  0xac   :  { %2101 = vmatpush1.bf16.msra.mxu0 %v2908_v17  ;;  %1890 = vmatprep.subr.bf16.mxu1 %v2913_v18  ;;  %v2980_v17 = vld [vmem:[%s3998_s1 + $0x760] ss:$8 sps:$4 sm:$0xff]   ;;  %v2985_v18 = vld [vmem:[%s3998_s1 + $0x374] ss:$8 sps:$4 sm:$0xff]  }
  0xad   :  { %2102 = vmatprep.subr.bf16.mxu0 %v2916_v19  ;;  %v2988_v19 = vld [vmem:[%s3998_s1 + $0x774] ss:$8 sps:$4 sm:$0xff]  }
  0xaf   :  { %1891 = vmatpush1.bf16.msra.mxu1 %v2911_v20  ;;  %v2983_v20 = vld [vmem:[%s3998_s1 + $0x370] ss:$8 sps:$4 sm:$0xff]  }
  0xb0   :  { %2103 = vmatpush1.bf16.msra.mxu0 %v2914_v21  ;;  %1892 = vmatprep.subr.bf16.mxu1 %v2919_v22  ;;  %v2986_v21 = vld [vmem:[%s3998_s1 + $0x770] ss:$8 sps:$4 sm:$0xff]   ;;  %v2991_v22 = vld [vmem:[%s3998_s1 + $0x384] ss:$8 sps:$4 sm:$0xff]  }
  0xb1   :  { %2104 = vmatprep.subr.bf16.mxu0 %v2922_v23  ;;  %v2994_v23 = vld [vmem:[%s3998_s1 + $0x784] ss:$8 sps:$4 sm:$0xff]  }
  0xb3   :  { %1893 = vmatpush1.bf16.msra.mxu1 %v2917_v24  ;;  %v2989_v24 = vld [vmem:[%s3998_s1 + $0x380] ss:$8 sps:$4 sm:$0xff]  }
  0xb4   :  { %2105 = vmatpush1.bf16.msra.mxu0 %v2920_v25  ;;  %1894 = vmatprep.subr.bf16.mxu1 %v2925_v26  ;;  %v2992_v25 = vld [vmem:[%s3998_s1 + $0x780] ss:$8 sps:$4 sm:$0xff]   ;;  %v2997_v26 = vld [vmem:[%s3998_s1 + $0x394] ss:$8 sps:$4 sm:$0xff]  }
  0xb5   :  { %2106 = vmatprep.subr.bf16.mxu0 %v2928_v27  ;;  %v3000_v27 = vld [vmem:[%s3998_s1 + $0x794] ss:$8 sps:$4 sm:$0xff]  }
  0xb7   :  { %1895 = vmatpush1.bf16.msra.mxu1 %v2923_v28  ;;  %v2995_v28 = vld [vmem:[%s3998_s1 + $0x390] ss:$8 sps:$4 sm:$0xff]  }
  0xb8   :  { %2107 = vmatpush1.bf16.msra.mxu0 %v2926_v29  ;;  %1896 = vmatprep.subr.bf16.mxu1 %v2931_v30  ;;  %v2998_v29 = vld [vmem:[%s3998_s1 + $0x790] ss:$8 sps:$4 sm:$0xff]   ;;  %v3003_v30 = vld [vmem:[%s3998_s1 + $0x3a4] ss:$8 sps:$4 sm:$0xff]  }
  0xb9   :  { %2108 = vmatprep.subr.bf16.mxu0 %v2934_v31  ;;  %v3006_v31 = vld [vmem:[%s3998_s1 + $0x7a4] ss:$8 sps:$4 sm:$0xff]  }
  0xbb   :  { %1897 = vmatpush1.bf16.msra.mxu1 %v2929_v32  ;;  %v3001_v32 = vld [vmem:[%s3998_s1 + $0x3a0] ss:$8 sps:$4 sm:$0xff]  }
  0xbc   :  { %2109 = vmatpush1.bf16.msra.mxu0 %v2932_v33  ;;  %1898 = vmatprep.subr.bf16.mxu1 %v2937_v34  ;;  %v3004_v33 = vld [vmem:[%s3998_s1 + $0x7a0] ss:$8 sps:$4 sm:$0xff]   ;;  %v3009_v34 = vld [vmem:[%s3998_s1 + $0x3b4] ss:$8 sps:$4 sm:$0xff]  }
  0xbd   :  { %2110 = vmatprep.subr.bf16.mxu0 %v2940_v35  ;;  %v3012_v35 = vld [vmem:[%s3998_s1 + $0x7b4] ss:$8 sps:$4 sm:$0xff]  }
  0xbf   :  { %1899 = vmatpush1.bf16.msra.mxu1 %v2935_v36  ;;  %v3007_v36 = vld [vmem:[%s3998_s1 + $0x3b0] ss:$8 sps:$4 sm:$0xff]  }
  0xc0   :  { %2111 = vmatpush1.bf16.msra.mxu0 %v2938_v37  ;;  %1921 = vmatprep.subr.bf16.mxu1 %v2943_v38  ;;  %v3010_v37 = vld [vmem:[%s3998_s1 + $0x7b0] ss:$8 sps:$4 sm:$0xff]   ;;  %v3015_v38 = vld [vmem:[%s3998_s1 + $0x3c4] ss:$8 sps:$4 sm:$0xff]  }
  0xc1   :  { %2133 = vmatprep.subr.bf16.mxu0 %v2946_v39  ;;  %v3018_v39 = vld [vmem:[%s3998_s1 + $0x7c4] ss:$8 sps:$4 sm:$0xff]  }
  0xc2   :  { %1901 = vmatmul.mubr.bf16.vlgmr.msra.gmra.mrb[0].mxu1 %v2305_v41  ;;  %v3016_v41 = vld [vmem:[%s3998_s1 + $0x7c0] ss:$8 sps:$4 sm:$0xff]  }
  0xc3   :  { %2113 = vmatmul.mubr.bf16.vlgmr.msra.gmra.mrb[0].mxu0 %v2313_v43  ;;  %1922 = vmatpush1.bf16.msra.mxu1 %v2941_v42  ;;  %v3021_v43 = vld [vmem:[%s3998_s1 + $0x3d4] ss:$8 sps:$4 sm:$0xff]   ;;  %v3027_v42 = vld [vmem:[%s3998_s1 + $0x3e4] ss:$8 sps:$4 sm:$0xff]  }
  0xc4   :  { %2134 = vmatpush1.bf16.msra.mxu0 %v2944_v45  ;;  %1923 = vmatprep.subr.bf16.mxu1 %v2949_v46  ;;  %v3030_v45 = vld [vmem:[%s3998_s1 + $0x7e4] ss:$8 sps:$4 sm:$0xff]   ;;  %v3025_v46 = vld [vmem:[%s3998_s1 + $0x3e0] ss:$8 sps:$4 sm:$0xff]  }
  0xc5   :  { %2135 = vmatprep.subr.bf16.mxu0 %v2952_v47  ;;  %1910 = vmatprep.mubr.bf16.mxu1 %v2322_v50  ;;  %v3028_v47 = vld [vmem:[%s3998_s1 + $0x7e0] ss:$8 sps:$4 sm:$0xff]   ;;  %v3033_v50 = vld [vmem:[%s3998_s1 + $0x3f4] ss:$8 sps:$4 sm:$0xff]  }
  0xc6   :  { %2122 = vmatprep.mubr.bf16.mxu0 %v2330_v51  ;;  %v3036_v51 = vld [vmem:[%s3998_s1 + $0x7f4] ss:$8 sps:$4 sm:$0xff]  }
  0xc7   :  { %1924 = vmatpush1.bf16.msra.mxu1 %v2947_v52  ;;  %v3031_v52 = vld [vmem:[%s3998_s1 + $0x3f0] ss:$8 sps:$4 sm:$0xff]  }
  0xc8   :  { %2136 = vmatpush1.bf16.msra.mxu0 %v2950_v53  ;;  %1925 = vmatprep.subr.bf16.mxu1 %v2955_v54  ;;  %v3034_v53 = vld [vmem:[%s3998_s1 + $0x7f0] ss:$8 sps:$4 sm:$0xff]  }
  0xc9   :  { %2137 = vmatprep.subr.bf16.mxu0 %v2958_v55  ;;  %v53_v54 = vld [vmem:[%s3999_s0 + $0x98] sm:$0xff] }
  0xca   :  { %1911 = vmatmul.mubr.bf16.gmra.mrb[4].mxu1 %v2321_v57  ;;  %v61_v55 = vld [vmem:[%s3999_s0 + $0xd8] sm:$0xff] }
  0xcb   :  { %2123 = vmatmul.mubr.bf16.gmra.mrb[4].mxu0 %v2329_v58  ;;  %1926 = vmatpush1.bf16.msra.mxu1 %v2953_v62  ;;  %v57_v57 = vld [vmem:[%s3999_s0 + $0xb8] sm:$0xff]  ;;  %v2307_v62 = vcombine.low %v3775_v56, %v3780_v59 }
  0xcc   :  { %2138 = vmatpush1.bf16.msra.mxu0 %v2956_v63  ;;  %1927 = vmatprep.subr.bf16.mxu1 %v2961_v0  ;;  %v65_v58 = vld [vmem:[%s3999_s0 + $0xf8] sm:$0xff]  ;;  %v2315_v63 = vcombine.low %v3785_v60, %v3790_v61  ;;  %v2324_v0 = vcombine.high %v53_v54, %v61_v55 }
  0xcd   :  { %2139 = vmatprep.subr.bf16.mxu0 %v2964_v1  ;;  %1953 = vmatprep.mubr.bf16.mxu1 %v2308_v2  ;;  %v2332_v1 = vcombine.high %v57_v57, %v65_v58  ;;  %v2323_v2 = vcombine.low %v53_v54, %v61_v55 }
  0xce   :  { %2165 = vmatprep.mubr.bf16.mxu0 %v2316_v3  ;;  %v2331_v3 = vcombine.low %v57_v57, %v65_v58 }
  0xcf   :  { %1928 = vmatpush1.bf16.msra.mxu1 %v2959_v4 }
  0xd0   :  { %2140 = vmatpush1.bf16.msra.mxu0 %v2962_v5  ;;  %1929 = vmatprep.subr.bf16.mxu1 %v2967_v6 }
  0xd1   :  { %2141 = vmatprep.subr.bf16.mxu0 %v2970_v7 }
  0xd3   :  { %1930 = vmatpush1.bf16.msra.mxu1 %v2965_v8 }
  0xd4   :  { %2142 = vmatpush1.bf16.msra.mxu0 %v2968_v9  ;;  %1931 = vmatprep.subr.bf16.mxu1 %v2973_v10 }
  0xd5   :  { %2143 = vmatprep.subr.bf16.mxu0 %v2976_v11 }
  0xd7   :  { %1932 = vmatpush1.bf16.msra.mxu1 %v2971_v12 }
  0xd8   :  { %2144 = vmatpush1.bf16.msra.mxu0 %v2974_v13  ;;  %1933 = vmatprep.subr.bf16.mxu1 %v2979_v14 }
  0xd9   :  { %2145 = vmatprep.subr.bf16.mxu0 %v2982_v15 }
  0xdb   :  { %1934 = vmatpush1.bf16.msra.mxu1 %v2977_v16 }
  0xdc   :  { %2146 = vmatpush1.bf16.msra.mxu0 %v2980_v17  ;;  %1935 = vmatprep.subr.bf16.mxu1 %v2985_v18 }
  0xdd   :  { %2147 = vmatprep.subr.bf16.mxu0 %v2988_v19 }
  0xdf   :  { %1936 = vmatpush1.bf16.msra.mxu1 %v2983_v20 }
  0xe0   :  { %2148 = vmatpush1.bf16.msra.mxu0 %v2986_v21  ;;  %1937 = vmatprep.subr.bf16.mxu1 %v2991_v22 }
  0xe1   :  { %2149 = vmatprep.subr.bf16.mxu0 %v2994_v23 }
  0xe3   :  { %1938 = vmatpush1.bf16.msra.mxu1 %v2989_v24 }
  0xe4   :  { %2150 = vmatpush1.bf16.msra.mxu0 %v2992_v25  ;;  %1939 = vmatprep.subr.bf16.mxu1 %v2997_v26 }
  0xe5   :  { %2151 = vmatprep.subr.bf16.mxu0 %v3000_v27 }
  0xe7   :  { %1940 = vmatpush1.bf16.msra.mxu1 %v2995_v28 }
  0xe8   :  { %2152 = vmatpush1.bf16.msra.mxu0 %v2998_v29  ;;  %1941 = vmatprep.subr.bf16.mxu1 %v3003_v30 }
  0xe9   :  { %2153 = vmatprep.subr.bf16.mxu0 %v3006_v31 }
  0xeb   :  { %1942 = vmatpush1.bf16.msra.mxu1 %v3001_v32 }
  0xec   :  { %2154 = vmatpush1.bf16.msra.mxu0 %v3004_v33  ;;  %1943 = vmatprep.subr.bf16.mxu1 %v3009_v34 }
  0xed   :  { %2155 = vmatprep.subr.bf16.mxu0 %v3012_v35 }
  0xef   :  { %1944 = vmatpush1.bf16.msra.mxu1 %v3007_v36 }
  0xf0   :  { %2156 = vmatpush1.bf16.msra.mxu0 %v3010_v37  ;;  %1945 = vmatprep.subr.bf16.mxu1 %v3015_v38 }
  0xf1   :  { %2157 = vmatprep.subr.bf16.mxu0 %v3018_v39 }
  0xf3   :  { %1946 = vmatpush1.bf16.msra.mxu1 %v3013_v40 }
  0xf4   :  { %2158 = vmatpush1.bf16.msra.mxu0 %v3016_v41  ;;  %1947 = vmatprep.subr.bf16.mxu1 %v3021_v43 }
  0xf5   :  { %2159 = vmatprep.subr.bf16.mxu0 %v3024_v44 }
  0xf7   :  { %1948 = vmatpush1.bf16.msra.mxu1 %v3019_v48 }
  0xf8   :  { %2160 = vmatpush1.bf16.msra.mxu0 %v3022_v49  ;;  %1949 = vmatprep.subr.bf16.mxu1 %v3027_v42 }
  0xf9   :  { %2161 = vmatprep.subr.bf16.mxu0 %v3030_v45 }
  0xfb   :  { %1950 = vmatpush1.bf16.msra.mxu1 %v3025_v46 }
  0xfc   :  { %2162 = vmatpush1.bf16.msra.mxu0 %v3028_v47  ;;  %1951 = vmatprep.subr.bf16.mxu1 %v3033_v50 }
  0xfd   :  { %2163 = vmatprep.subr.bf16.mxu0 %v3036_v51 }
  0xff   :  { %1952 = vmatpush1.bf16.msra.mxu1 %v3031_v52 }
 0x100   :  { %2164 = vmatpush1.bf16.msra.mxu0 %v3034_v53 }
 0x102   :  { %1954 = vmatmul.mubr.bf16.vlgmr.msra.gmra.mrb[0].mxu1 %v2307_v62 }
 0x103   :  { %2166 = vmatmul.mubr.bf16.vlgmr.msra.gmra.mrb[0].mxu0 %v2315_v63  ;;  %1963 = vmatprep.mubr.bf16.mxu1 %v2324_v0 }
 0x104   :  { %2175 = vmatprep.mubr.bf16.mxu0 %v2332_v1 }
 0x10a   :  { %1964 = vmatmul.mubr.bf16.gmra.mrb[4].mxu1 %v2323_v2 }
 0x10b   :  { %2176 = vmatmul.mubr.bf16.gmra.mrb[4].mxu0 %v2331_v3 }
 0x1d5   :  { %v1955_v4 = vpop.f32.mrb[0].mxu1 }
 0x1d6   :  { %v2167_v5 = vpop.f32.mrb[0].mxu0  ;;  %v1957_v7 = vpop.f32.mrb[1].mxu1 }
 0x1d7   :  { %v2597_v6 = vadd.f32 %v2167_v5, %v1955_v4  ;;  %v2169_v56 = vpop.f32.mrb[1].mxu0  ;;  %v1959_v8 = vpop.f32.mrb[2].mxu1 }
 0x1d8   :  { %v2598_v59 = vadd.f32 %v2169_v56, %v1957_v7  ;;  %v2171_v60 = vpop.f32.mrb[2].mxu0  ;;  %v1961_v9 = vpop.f32.mrb[3].mxu1 }
 0x1d9   :  { %v2599_v61 = vadd.f32 %v2171_v60, %v1959_v8  ;;  %v2173_v10 = vpop.f32.mrb[3].mxu0  ;;  %v2261_v13 = vmul.f32 %v2597_v6, %v2597_v6 }
 0x1da   :  { %v2593_v11 = vpack.c.bf16 %v2598_v59, %v2597_v6  ;;  %v2600_v12 = vadd.f32 %v2173_v10, %v1961_v9  ;;  %v2262_v16 = vmul.f32 %v2598_v59, %v2598_v59 }
 0x1db   :  { %v2241_v14 = vadd.f32 %v2599_v61, %v2597_v6  ;;  %v2263_v15 = vmul.f32 %v2599_v61, %v2599_v61 }
 0x1dc   :  { %2237 = vst [vmem:[%s4000_s2] sm:$0xff] %v2593_v11  ;;  %v2594_v17 = vpack.c.bf16 %v2600_v12, %v2599_v61  ;;  %v2250_v18 = vadd.f32 %v2600_v12, %v2598_v59  ;;  %v2264_v19 = vmul.f32 %v2600_v12, %v2600_v12 }
 0x1dd   :  { %v2269_v20 = vadd.f32 %v2263_v15, %v2261_v13  ;;  %v1965_v22 = vpop.f32.mrb[4].mxu1 }
 0x1de   :  { %2238 = vst [vmem:[%s4000_s2 + $0x8] sm:$0xff] %v2594_v17  ;;  %v2278_v21 = vadd.f32 %v2264_v19, %v2262_v16  ;;  %v2177_v23 = vpop.f32.mrb[4].mxu0  ;;  %v1967_v25 = vpop.f32.mrb[5].mxu1 }
 0x1df   :  { %v2601_v24 = vadd.f32 %v2177_v23, %v1965_v22  ;;  %v2179_v26 = vpop.f32.mrb[5].mxu0  ;;  %v1969_v28 = vpop.f32.mrb[6].mxu1 }
 0x1e0   :  { %v2602_v27 = vadd.f32 %v2179_v26, %v1967_v25  ;;  %v2181_v29 = vpop.f32.mrb[6].mxu0  ;;  %v1971_v33 = vpop.f32.mrb[7].mxu1 }
 0x1e1   :  { %v2242_v30 = vadd.f32 %v2601_v24, %v2241_v14  ;;  %v2265_v31 = vmul.f32 %v2601_v24, %v2601_v24  ;;  %v2603_v32 = vadd.f32 %v2181_v29, %v1969_v28  ;;  %v2183_v34 = vpop.f32.mrb[7].mxu0 }
 0x1e2   :  { %v2595_v35 = vpack.c.bf16 %v2602_v27, %v2601_v24  ;;  %v2251_v36 = vadd.f32 %v2602_v27, %v2250_v18  ;;  %v2266_v37 = vmul.f32 %v2602_v27, %v2602_v27  ;;  %v2604_v38 = vadd.f32 %v2183_v34, %v1971_v33 }
 0x1e3   :  { %v2270_v39 = vadd.f32 %v2269_v20, %v2265_v31  ;;  %v2243_v40 = vadd.f32 %v2603_v32, %v2242_v30  ;;  %v2267_v41 = vmul.f32 %v2603_v32, %v2603_v32 }
 0x1e4   :  { %2239 = vst [vmem:[%s4000_s2 + $0x10] sm:$0xff] %v2595_v35  ;;  %v2279_v43 = vadd.f32 %v2278_v21, %v2266_v37  ;;  %v2596_v44 = vpack.c.bf16 %v2604_v38, %v2603_v32  ;;  %v2252_v48 = vadd.f32 %v2604_v38, %v2251_v36  ;;  %v2268_v49 = vmul.f32 %v2604_v38, %v2604_v38 }
 0x1e5   :  { %v2244_v42 = vrot.slane %v2243_v40, 4  ;;  %v2271_v45 = vadd.f32 %v2270_v39, %v2267_v41 }
 0x1e6   :  { %2240 = vst [vmem:[%s4000_s2 + $0x18] sm:$0xff] %v2596_v44  ;;  %v2253_v46 = vrot.slane %v2252_v48, 4  ;;  %v2280_v47 = vadd.f32 %v2279_v43, %v2268_v49 }
 0x1e7   :  { %v2245_v50 = vadd.f32 %v2244_v42, %v2243_v40  ;;  %v2272_v51 = vrot.slane %v2271_v45, 4 }
 0x1e8   :  { %v2254_v52 = vadd.f32 %v2253_v46, %v2252_v48  ;;  %v2281_v53 = vrot.slane %v2280_v47, 4 }
 0x1e9   :  { %v2246_v54 = vrot.slane %v2245_v50, 2  ;;  %v2273_v55 = vadd.f32 %v2272_v51, %v2271_v45 }
 0x1ea   :  { %v2255_v57 = vrot.slane %v2254_v52, 2  ;;  %v2282_v58 = vadd.f32 %v2281_v53, %v2280_v47 }
 0x1eb   :  { %v2247_v62 = vadd.f32 %v2246_v54, %v2245_v50  ;;  %v2274_v63 = vrot.slane %v2273_v55, 2 }
 0x1ec   :  { %v2256_v0 = vadd.f32 %v2255_v57, %v2254_v52  ;;  %v2283_v1 = vrot.slane %v2282_v58, 2 }
 0x1ed   :  { %v2248_v2 = vrot.slane %v2247_v62, 1  ;;  %v2275_v3 = vadd.f32 %v2274_v63, %v2273_v55 }
 0x1ee   :  { %v2257_v4 = vrot.slane %v2256_v0, 1  ;;  %v2284_v5 = vadd.f32 %v2283_v1, %v2282_v58 }
 0x1ef   :  { %v2249_v6 = vadd.f32 %v2248_v2, %v2247_v62  ;;  %v2276_v7 = vrot.slane %v2275_v3, 1 }
 0x1f0   :  { %v2258_v56 = vadd.f32 %v2257_v4, %v2256_v0  ;;  %v2285_v59 = vrot.slane %v2284_v5, 1 }
 0x1f1   :  { %2259 = vst [vmem:[%s4001_s3] sm:$0xff] %v2249_v6  ;;  %v2277_v8 = vadd.f32 %v2276_v7, %v2275_v3 }
 0x1f2   :  { %2260 = vst [vmem:[%s4001_s3 + $0x8] sm:$0xff] %v2258_v56  ;;  %v2286_v60 = vadd.f32 %v2285_v59, %v2284_v5 }
 0x1f3   :  { %2287 = vst [vmem:[%s4002_s4] sm:$0xff] %v2277_v8 }
 0x1f4   :  { %2288 = vst [vmem:[%s4002_s4 + $0x8] sm:$0xff] %v2286_v60 }

// kernel: discriminator_forward.12
= control target key start
LH: loop header
LB: loop body
LE: loop exit
PB: predicated region body
PF: predicated region fallthrough
CT: control target
= control target key end

     0   :  { %v28_v0 = vlaneseq  ;;  %s180_s0 = inlined_call_operand.vmem [shape: bf16[32,256], index: 0, kind: input, shape index: {}]   ;;  %s181_s1 = inlined_call_operand.vmem [shape: f32[1,256], index: 1, kind: input, shape index: {}]   ;;  %s182_s2 = inlined_call_operand.vmem [shape: f32[1,256], index: 2, kind: input, shape index: {}]   ;;  %s183_s3 = inlined_call_operand.vmem [shape: bf16[32,256], index: 3, kind: output, shape index: {}]  }
   0x1   :  { %v14_v1 = vld [vmem:[%s180_s0] sm:$0xff]  ;;  %v15_v3 = vld [vmem:[%s180_s0 + $0x8] sm:$0xff]  ;;  %v16_v4 = vld [vmem:[%s180_s0 + $0x10] sm:$0xff] }
   0x2   :  { %v29_v2 = vshrl.u32 %v28_v0, 7  ;;  %v17_v5 = vld [vmem:[%s180_s0 + $0x18] sm:$0xff]  ;;  %v18_v6 = vunpack.c.l.bf16 %v14_v1  ;;  %v19_v7 = vunpack.c.h.bf16 %v14_v1  ;;  %v26_v8 = vld [vmem:[%s181_s1] sm:$0x3]  ;;  %v20_v12 = vunpack.c.l.bf16 %v15_v3 }
   0x3   :  { %v46_v9 = vld [vmem:[%s182_s2] sm:$0x3]  ;;  %v21_v13 = vunpack.c.h.bf16 %v15_v3  ;;  %v22_v14 = vunpack.c.l.bf16 %v16_v4  ;;  %v23_v15 = vunpack.c.h.bf16 %v16_v4  ;;  %v24_v16 = vunpack.c.l.bf16 %v17_v5 }
   0x4   :  { %v30_v10 = vsub.s32 0, %v29_v2  ;;  %v34_v11 = vsub.s32 1, %v29_v2  ;;  %v25_v17 = vunpack.c.h.bf16 %v17_v5 }
   0x6   :  { %v31_v18 = vrot.slane %v26_v8, %v30_v10  ;;  %v35_v19 = vrot.slane %v26_v8, %v34_v11  ;;  %v51_v20 = vrot.slane %v46_v9, %v30_v10  ;;  %v55_v21 = vrot.slane %v46_v9, %v34_v11 }
   0x8   :  { %v38_v22 = vmul.f32 %v31_v18, %v18_v6  ;;  %v39_v23 = vmul.f32 %v35_v19, %v19_v7  ;;  %v40_v24 = vmul.f32 %v31_v18, %v20_v12  ;;  %v41_v25 = vmul.f32 %v35_v19, %v21_v13 }
   0x9   :  { %v42_v26 = vmul.f32 %v31_v18, %v22_v14  ;;  %v43_v27 = vmul.f32 %v35_v19, %v23_v15  ;;  %v44_v28 = vmul.f32 %v31_v18, %v24_v16  ;;  %v45_v29 = vmul.f32 %v35_v19, %v25_v17 }
   0xa   :  { %v58_v30 = vadd.f32 %v51_v20, %v38_v22  ;;  %v59_v31 = vadd.f32 %v55_v21, %v39_v23  ;;  %v60_v32 = vadd.f32 %v51_v20, %v40_v24  ;;  %v61_v33 = vadd.f32 %v55_v21, %v41_v25 }
   0xb   :  { %v62_v34 = vadd.f32 %v51_v20, %v42_v26  ;;  %v63_v35 = vadd.f32 %v55_v21, %v43_v27  ;;  %v64_v36 = vadd.f32 %v51_v20, %v44_v28  ;;  %v65_v37 = vadd.f32 %v55_v21, %v45_v29 }
   0xc   :  { %vm66_vm0 = vcmp.ge.f32.partialorder %v58_v30, 0.0  ;;  %vm67_vm1 = vcmp.ge.f32.partialorder %v59_v31, 0.0  ;;  %v74_v38 = vmul.f32 0.3, %v58_v30  ;;  %v75_v39 = vmul.f32 0.3, %v59_v31 }
   0xd   :  { %vm68_vm2 = vcmp.ge.f32.partialorder %v60_v32, 0.0  ;;  %vm69_vm3 = vcmp.ge.f32.partialorder %v61_v33, 0.0  ;;  %v76_v40 = vmul.f32 0.3, %v60_v32  ;;  %v77_v41 = vmul.f32 0.3, %v61_v33 }
   0xe   :  { %v82_v42 = vsel %vm66_vm0, %v58_v30, %v74_v38  ;;  %v83_v43 = vsel %vm67_vm1, %v59_v31, %v75_v39  ;;  %vm70_vm4 = vcmp.ge.f32.partialorder %v62_v34, 0.0  ;;  %vm71_vm5 = vcmp.ge.f32.partialorder %v63_v35, 0.0 }
   0xf   :  { %v126_v44 = vpack.c.bf16 %v83_v43, %v82_v42  ;;  %v84_v45 = vsel %vm68_vm2, %v60_v32, %v76_v40  ;;  %v85_v46 = vsel %vm69_vm3, %v61_v33, %v77_v41  ;;  %v78_v47 = vmul.f32 0.3, %v62_v34 }
  0x10   :  { %v127_v48 = vpack.c.bf16 %v85_v46, %v84_v45  ;;  %v79_v49 = vmul.f32 0.3, %v63_v35  ;;  %vm72_vm6 = vcmp.ge.f32.partialorder %v64_v36, 0.0  ;;  %vm73_vm7 = vcmp.ge.f32.partialorder %v65_v37, 0.0 }
  0x11   :  { %114 = vst [vmem:[%s183_s3] sm:$0xff] %v126_v44  ;;  %v86_v50 = vsel %vm70_vm4, %v62_v34, %v78_v47  ;;  %v80_v51 = vmul.f32 0.3, %v64_v36  ;;  %v81_v52 = vmul.f32 0.3, %v65_v37 }
  0x12   :  { %115 = vst [vmem:[%s183_s3 + $0x8] sm:$0xff] %v127_v48  ;;  %v87_v53 = vsel %vm71_vm5, %v63_v35, %v79_v49 }
  0x13   :  { %v128_v54 = vpack.c.bf16 %v87_v53, %v86_v50  ;;  %v88_v55 = vsel %vm72_vm6, %v64_v36, %v80_v51  ;;  %v89_v56 = vsel %vm73_vm7, %v65_v37, %v81_v52 }
  0x14   :  { %v129_v57 = vpack.c.bf16 %v89_v56, %v88_v55 }
  0x15   :  { %116 = vst [vmem:[%s183_s3 + $0x10] sm:$0xff] %v128_v54 }
  0x16   :  { %117 = vst [vmem:[%s183_s3 + $0x18] sm:$0xff] %v129_v57 }

// kernel: discriminator_forward.14
= control target key start
LH: loop header
LB: loop body
LE: loop exit
PB: predicated region body
PF: predicated region fallthrough
CT: control target
= control target key end

     0   :  { %v40_v0 = vlaneseq  ;;  %s365_s0 = inlined_call_operand.vmem [shape: bf16[32,512], index: 0, kind: input, shape index: {}]   ;;  %s366_s1 = inlined_call_operand.vmem [shape: f32[1,512], index: 1, kind: input, shape index: {}]   ;;  %s367_s2 = inlined_call_operand.vmem [shape: f32[1,512], index: 2, kind: input, shape index: {}]   ;;  %s368_s3 = inlined_call_operand.vmem [shape: bf16[32,512], index: 3, kind: output, shape index: {}]  }
   0x1   :  { %v14_v1 = vld [vmem:[%s365_s0] sm:$0xff]  ;;  %v15_v5 = vld [vmem:[%s365_s0 + $0x8] sm:$0xff]  ;;  %v16_v6 = vld [vmem:[%s365_s0 + $0x10] sm:$0xff] }
   0x2   :  { %v22_v2 = vunpack.c.l.bf16 %v14_v1  ;;  %v23_v3 = vunpack.c.h.bf16 %v14_v1  ;;  %v41_v4 = vshrl.u32 %v40_v0, 7  ;;  %v17_v7 = vld [vmem:[%s365_s0 + $0x18] sm:$0xff]  ;;  %v38_v8 = vld [vmem:[%s366_s1] sm:$0xf]  ;;  %v24_v10 = vunpack.c.l.bf16 %v15_v5  ;;  %v19_v57 = vld [vmem:[%s365_s0 + $0x28] sm:$0xff] }
   0x3   :  { %v76_v9 = vld [vmem:[%s367_s2] sm:$0xf]  ;;  %v25_v11 = vunpack.c.h.bf16 %v15_v5  ;;  %v26_v12 = vunpack.c.l.bf16 %v16_v6  ;;  %v27_v13 = vunpack.c.h.bf16 %v16_v6  ;;  %v28_v19 = vunpack.c.l.bf16 %v17_v7 }
   0x4   :  { %v279_v14 = vld [vmem:[%s365_s0 + $0x20] sm:$0xff]  ;;  %v42_v15 = vsub.s32 0, %v41_v4  ;;  %v46_v16 = vsub.s32 1, %v41_v4  ;;  %v50_v17 = vsub.s32 2, %v41_v4  ;;  %v54_v18 = vsub.s32 3, %v41_v4  ;;  %v20_v4 = vld [vmem:[%s365_s0 + $0x30] sm:$0xff] }
   0x5   :  { %v29_v20 = vunpack.c.h.bf16 %v17_v7  ;;  %v30_v21 = vunpack.c.l.bf16 %v279_v14  ;;  %v31_v22 = vunpack.c.h.bf16 %v279_v14 }
   0x6   :  { %v283_v23 = vrot.slane %v38_v8, %v42_v15  ;;  %v285_v24 = vrot.slane %v38_v8, %v46_v16  ;;  %v287_v25 = vrot.slane %v76_v9, %v42_v15  ;;  %v289_v26 = vrot.slane %v76_v9, %v46_v16 }
   0x7   :  { %v291_v27 = vrot.slane %v38_v8, %v50_v17  ;;  %v293_v28 = vrot.slane %v38_v8, %v54_v18  ;;  %v295_v29 = vrot.slane %v76_v9, %v50_v17  ;;  %v297_v30 = vrot.slane %v76_v9, %v54_v18 }
   0x8   :  { %v60_v31 = vmul.f32 %v283_v23, %v22_v2  ;;  %v61_v32 = vmul.f32 %v285_v24, %v23_v3  ;;  %v64_v33 = vmul.f32 %v283_v23, %v26_v12  ;;  %v65_v34 = vmul.f32 %v285_v24, %v27_v13  ;;  %v21_v13 = vld [vmem:[%s365_s0 + $0x38] sm:$0xff] }
   0x9   :  { %v62_v35 = vmul.f32 %v291_v27, %v24_v10  ;;  %v63_v36 = vmul.f32 %v293_v28, %v25_v11  ;;  %v66_v37 = vmul.f32 %v291_v27, %v28_v19  ;;  %v67_v38 = vmul.f32 %v293_v28, %v29_v20 }
   0xa   :  { %v98_v39 = vadd.f32 %v287_v25, %v60_v31  ;;  %v99_v40 = vadd.f32 %v289_v26, %v61_v32  ;;  %v102_v41 = vadd.f32 %v287_v25, %v64_v33  ;;  %v103_v42 = vadd.f32 %v289_v26, %v65_v34 }
   0xb   :  { %v100_v43 = vadd.f32 %v295_v29, %v62_v35  ;;  %v101_v44 = vadd.f32 %v297_v30, %v63_v36  ;;  %v104_v45 = vadd.f32 %v295_v29, %v66_v37  ;;  %v105_v46 = vadd.f32 %v297_v30, %v67_v38 }
   0xc   :  { %vm114_vm0 = vcmp.ge.f32.partialorder %v98_v39, 0.0  ;;  %vm115_vm1 = vcmp.ge.f32.partialorder %v99_v40, 0.0  ;;  %v130_v47 = vmul.f32 0.3, %v98_v39  ;;  %v131_v48 = vmul.f32 0.3, %v99_v40 }
   0xd   :  { %vm116_vm2 = vcmp.ge.f32.partialorder %v100_v43, 0.0  ;;  %vm117_vm3 = vcmp.ge.f32.partialorder %v101_v44, 0.0  ;;  %v132_v49 = vmul.f32 0.3, %v100_v43  ;;  %v133_v50 = vmul.f32 0.3, %v101_v44 }
   0xe   :  { %v146_v51 = vsel %vm114_vm0, %v98_v39, %v130_v47  ;;  %v147_v52 = vsel %vm115_vm1, %v99_v40, %v131_v48  ;;  %vm118_vm4 = vcmp.ge.f32.partialorder %v102_v41, 0.0  ;;  %vm119_vm5 = vcmp.ge.f32.partialorder %v103_v42, 0.0 }
   0xf   :  { %v230_v53 = vpack.c.bf16 %v147_v52, %v146_v51  ;;  %v148_v54 = vsel %vm116_vm2, %v100_v43, %v132_v49  ;;  %v149_v55 = vsel %vm117_vm3, %v101_v44, %v133_v50  ;;  %v134_v56 = vmul.f32 0.3, %v102_v41 }
  0x10   :  { %v231_v58 = vpack.c.bf16 %v149_v55, %v148_v54  ;;  %v135_v59 = vmul.f32 0.3, %v103_v42  ;;  %vm120_vm6 = vcmp.ge.f32.partialorder %v104_v45, 0.0  ;;  %vm121_vm7 = vcmp.ge.f32.partialorder %v105_v46, 0.0 }
  0x11   :  { %210 = vst [vmem:[%s368_s3] sm:$0xff] %v230_v53  ;;  %v150_v60 = vsel %vm118_vm4, %v102_v41, %v134_v56  ;;  %v136_v61 = vmul.f32 0.3, %v104_v45  ;;  %v137_v62 = vmul.f32 0.3, %v105_v46  ;;  %v68_v63 = vmul.f32 %v283_v23, %v30_v21 }
  0x12   :  { %211 = vst [vmem:[%s368_s3 + $0x8] sm:$0xff] %v231_v58  ;;  %v151_v0 = vsel %vm119_vm5, %v103_v42, %v135_v59  ;;  %v69_v1 = vmul.f32 %v285_v24, %v31_v22  ;;  %v32_v2 = vunpack.c.l.bf16 %v19_v57  ;;  %v33_v3 = vunpack.c.h.bf16 %v19_v57 }
  0x13   :  { %v232_v5 = vpack.c.bf16 %v151_v0, %v150_v60  ;;  %v152_v6 = vsel %vm120_vm6, %v104_v45, %v136_v61  ;;  %v153_v7 = vsel %vm121_vm7, %v105_v46, %v137_v62  ;;  %v106_v8 = vadd.f32 %v287_v25, %v68_v63 }
  0x14   :  { %v233_v9 = vpack.c.bf16 %v153_v7, %v152_v6  ;;  %v107_v10 = vadd.f32 %v289_v26, %v69_v1  ;;  %v70_v11 = vmul.f32 %v291_v27, %v32_v2  ;;  %v71_v12 = vmul.f32 %v293_v28, %v33_v3 }
  0x15   :  { %212 = vst [vmem:[%s368_s3 + $0x10] sm:$0xff] %v232_v5  ;;  %vm122_vm8 = vcmp.ge.f32.partialorder %v106_v8, 0.0  ;;  %v138_v14 = vmul.f32 0.3, %v106_v8  ;;  %v34_v15 = vunpack.c.l.bf16 %v20_v4  ;;  %v35_v16 = vunpack.c.h.bf16 %v20_v4 }
  0x16   :  { %213 = vst [vmem:[%s368_s3 + $0x18] sm:$0xff] %v233_v9  ;;  %vm123_vm9 = vcmp.ge.f32.partialorder %v107_v10, 0.0  ;;  %v139_v17 = vmul.f32 0.3, %v107_v10  ;;  %v108_v18 = vadd.f32 %v295_v29, %v70_v11  ;;  %v109_v19 = vadd.f32 %v297_v30, %v71_v12 }
  0x17   :  { %v154_v20 = vsel %vm122_vm8, %v106_v8, %v138_v14  ;;  %v72_v21 = vmul.f32 %v283_v23, %v34_v15  ;;  %v73_v22 = vmul.f32 %v285_v24, %v35_v16  ;;  %v36_v31 = vunpack.c.l.bf16 %v21_v13 }
  0x18   :  { %v155_v32 = vsel %vm123_vm9, %v107_v10, %v139_v17  ;;  %vm124_vm10 = vcmp.ge.f32.partialorder %v108_v18, 0.0  ;;  %vm125_vm11 = vcmp.ge.f32.partialorder %v109_v19, 0.0  ;;  %v140_v33 = vmul.f32 0.3, %v108_v18 }
  0x19   :  { %v234_v34 = vpack.c.bf16 %v155_v32, %v154_v20  ;;  %v141_v35 = vmul.f32 0.3, %v109_v19  ;;  %v110_v36 = vadd.f32 %v287_v25, %v72_v21  ;;  %v111_v37 = vadd.f32 %v289_v26, %v73_v22 }
  0x1a   :  { %v156_v38 = vsel %vm124_vm10, %v108_v18, %v140_v33  ;;  %v37_v39 = vunpack.c.h.bf16 %v21_v13  ;;  %v74_v40 = vmul.f32 %v291_v27, %v36_v31 }
  0x1b   :  { %214 = vst [vmem:[%s368_s3 + $0x20] sm:$0xff] %v234_v34  ;;  %v157_v23 = vsel %vm125_vm11, %v109_v19, %v141_v35  ;;  %vm126_vm12 = vcmp.ge.f32.partialorder %v110_v36, 0.0  ;;  %vm127_vm13 = vcmp.ge.f32.partialorder %v111_v37, 0.0  ;;  %v142_v24 = vmul.f32 0.3, %v110_v36 }
  0x1c   :  { %v235_v41 = vpack.c.bf16 %v157_v23, %v156_v38  ;;  %v143_v42 = vmul.f32 0.3, %v111_v37  ;;  %v75_v43 = vmul.f32 %v293_v28, %v37_v39  ;;  %v112_v25 = vadd.f32 %v295_v29, %v74_v40 }
  0x1d   :  { %v158_v44 = vsel %vm126_vm12, %v110_v36, %v142_v24 }
  0x1e   :  { %215 = vst [vmem:[%s368_s3 + $0x28] sm:$0xff] %v235_v41  ;;  %v159_v26 = vsel %vm127_vm13, %v111_v37, %v143_v42  ;;  %v113_v27 = vadd.f32 %v297_v30, %v75_v43  ;;  %vm128_vm14 = vcmp.ge.f32.partialorder %v112_v25, 0.0  ;;  %v144_v45 = vmul.f32 0.3, %v112_v25 }
  0x1f   :  { %v236_v46 = vpack.c.bf16 %v159_v26, %v158_v44 }
  0x20   :  { %vm129_vm15 = vcmp.ge.f32.partialorder %v113_v27, 0.0  ;;  %v145_v47 = vmul.f32 0.3, %v113_v27  ;;  %v160_v48 = vsel %vm128_vm14, %v112_v25, %v144_v45 }
  0x21   :  { %216 = vst [vmem:[%s368_s3 + $0x30] sm:$0xff] %v236_v46 }
  0x22   :  { %v161_v28 = vsel %vm129_vm15, %v113_v27, %v145_v47 }
  0x23   :  { %v237_v29 = vpack.c.bf16 %v161_v28, %v160_v48 }
  0x25   :  { %217 = vst [vmem:[%s368_s3 + $0x38] sm:$0xff] %v237_v29 }

// kernel: discriminator_forward.13
= control target key start
LH: loop header
LB: loop body
LE: loop exit
PB: predicated region body
PF: predicated region fallthrough
CT: control target
= control target key end

     0   :  { %s14826_s1 = inlined_call_operand.vmem [shape: bf16[4096,512], index: 1, kind: input, shape index: {}]   ;;  %s14827_s0 = inlined_call_operand.vmem [shape: bf16[32,4096], index: 0, kind: input, shape index: {}]   ;;  %s14828_s2 = inlined_call_operand.vmem [shape: bf16[32,512], index: 2, kind: output, shape index: {0}]   ;;  %s14829_s3 = inlined_call_operand.vmem [shape: f32[8,512], index: 3, kind: output, shape index: {1}]   ;;  %s14830_s4 = inlined_call_operand.vmem [shape: f32[8,512], index: 4, kind: output, shape index: {2}]  }
   0x1   :  { %v9833_v0 = vld [vmem:[%s14826_s1 + $0x4] ss:$16 sps:$4 sm:$0xff]   ;;  %v9835_v1 = vld [vmem:[%s14826_s1 + $0xc] ss:$16 sps:$4 sm:$0xff]   ;;  %v9837_v2 = vld [vmem:[%s14826_s1] ss:$16 sps:$4 sm:$0xff]  }
   0x2   :  { %6578 = vmatprep.subr.bf16.mxu0 %v9833_v0  ;;  %v9838_v3 = vld [vmem:[%s14826_s1 + $0x8] ss:$16 sps:$4 sm:$0xff]   ;;  %7426 = vmatprep.subr.bf16.mxu1 %v9835_v1  ;;  %v9839_v4 = vld [vmem:[%s14826_s1 + $0x24] ss:$16 sps:$4 sm:$0xff]   ;;  %v9841_v5 = vld [vmem:[%s14826_s1 + $0x2c] ss:$16 sps:$4 sm:$0xff]  }
   0x3   :  { %6579 = vmatpush1.bf16.msra.mxu0 %v9837_v2  ;;  %7427 = vmatpush1.bf16.msra.mxu1 %v9838_v3  ;;  %v9843_v6 = vld [vmem:[%s14826_s1 + $0x20] ss:$16 sps:$4 sm:$0xff]   ;;  %v9844_v7 = vld [vmem:[%s14826_s1 + $0x28] ss:$16 sps:$4 sm:$0xff]   ;;  %v9845_v8 = vld [vmem:[%s14826_s1 + $0x44] ss:$16 sps:$4 sm:$0xff]  }
   0x4   :  { %6580 = vmatprep.subr.bf16.mxu0 %v9839_v4  ;;  %7428 = vmatprep.subr.bf16.mxu1 %v9841_v5  ;;  %v9847_v9 = vld [vmem:[%s14826_s1 + $0x4c] ss:$16 sps:$4 sm:$0xff]   ;;  %v9849_v10 = vld [vmem:[%s14826_s1 + $0x40] ss:$16 sps:$4 sm:$0xff]   ;;  %v9850_v11 = vld [vmem:[%s14826_s1 + $0x48] ss:$16 sps:$4 sm:$0xff]  }
   0x5   :  { %v9851_v12 = vld [vmem:[%s14826_s1 + $0x64] ss:$16 sps:$4 sm:$0xff]   ;;  %v9853_v13 = vld [vmem:[%s14826_s1 + $0x6c] ss:$16 sps:$4 sm:$0xff]   ;;  %v9855_v14 = vld [vmem:[%s14826_s1 + $0x60] ss:$16 sps:$4 sm:$0xff]  }
   0x6   :  { %v9856_v15 = vld [vmem:[%s14826_s1 + $0x68] ss:$16 sps:$4 sm:$0xff]   ;;  %v9857_v16 = vld [vmem:[%s14826_s1 + $0x84] ss:$16 sps:$4 sm:$0xff]   ;;  %v9859_v17 = vld [vmem:[%s14826_s1 + $0x8c] ss:$16 sps:$4 sm:$0xff]  }
   0x7   :  { %6581 = vmatpush1.bf16.msra.mxu0 %v9843_v6  ;;  %7429 = vmatpush1.bf16.msra.mxu1 %v9844_v7  ;;  %v9861_v18 = vld [vmem:[%s14826_s1 + $0x80] ss:$16 sps:$4 sm:$0xff]   ;;  %v9862_v19 = vld [vmem:[%s14826_s1 + $0x88] ss:$16 sps:$4 sm:$0xff]   ;;  %v9863_v20 = vld [vmem:[%s14826_s1 + $0xa4] ss:$16 sps:$4 sm:$0xff]  }
   0x8   :  { %6582 = vmatprep.subr.bf16.mxu0 %v9845_v8  ;;  %7430 = vmatprep.subr.bf16.mxu1 %v9847_v9  ;;  %v9865_v21 = vld [vmem:[%s14826_s1 + $0xac] ss:$16 sps:$4 sm:$0xff]   ;;  %v9867_v22 = vld [vmem:[%s14826_s1 + $0xa0] ss:$16 sps:$4 sm:$0xff]   ;;  %v9868_v23 = vld [vmem:[%s14826_s1 + $0xa8] ss:$16 sps:$4 sm:$0xff]  }
   0x9   :  { %v9869_v24 = vld [vmem:[%s14826_s1 + $0xc4] ss:$16 sps:$4 sm:$0xff]   ;;  %v9871_v25 = vld [vmem:[%s14826_s1 + $0xcc] ss:$16 sps:$4 sm:$0xff]   ;;  %v9873_v26 = vld [vmem:[%s14826_s1 + $0xc0] ss:$16 sps:$4 sm:$0xff]  }
   0xa   :  { %v9874_v27 = vld [vmem:[%s14826_s1 + $0xc8] ss:$16 sps:$4 sm:$0xff]   ;;  %v9875_v28 = vld [vmem:[%s14826_s1 + $0xe4] ss:$16 sps:$4 sm:$0xff]   ;;  %v9877_v29 = vld [vmem:[%s14826_s1 + $0xec] ss:$16 sps:$4 sm:$0xff]  }
   0xb   :  { %6583 = vmatpush1.bf16.msra.mxu0 %v9849_v10  ;;  %7431 = vmatpush1.bf16.msra.mxu1 %v9850_v11  ;;  %v9879_v30 = vld [vmem:[%s14826_s1 + $0xe0] ss:$16 sps:$4 sm:$0xff]   ;;  %v9880_v31 = vld [vmem:[%s14826_s1 + $0xe8] ss:$16 sps:$4 sm:$0xff]   ;;  %v9881_v32 = vld [vmem:[%s14826_s1 + $0x104] ss:$16 sps:$4 sm:$0xff]  }
   0xc   :  { %6584 = vmatprep.subr.bf16.mxu0 %v9851_v12  ;;  %7432 = vmatprep.subr.bf16.mxu1 %v9853_v13  ;;  %v9883_v33 = vld [vmem:[%s14826_s1 + $0x10c] ss:$16 sps:$4 sm:$0xff]   ;;  %v9885_v34 = vld [vmem:[%s14826_s1 + $0x100] ss:$16 sps:$4 sm:$0xff]   ;;  %v9886_v35 = vld [vmem:[%s14826_s1 + $0x108] ss:$16 sps:$4 sm:$0xff]  }
   0xd   :  { %v9887_v36 = vld [vmem:[%s14826_s1 + $0x124] ss:$16 sps:$4 sm:$0xff]   ;;  %v9889_v37 = vld [vmem:[%s14826_s1 + $0x12c] ss:$16 sps:$4 sm:$0xff]   ;;  %v9891_v38 = vld [vmem:[%s14826_s1 + $0x120] ss:$16 sps:$4 sm:$0xff]  }
   0xe   :  { %v9892_v39 = vld [vmem:[%s14826_s1 + $0x128] ss:$16 sps:$4 sm:$0xff]   ;;  %v9893_v40 = vld [vmem:[%s14826_s1 + $0x144] ss:$16 sps:$4 sm:$0xff]   ;;  %v9895_v41 = vld [vmem:[%s14826_s1 + $0x14c] ss:$16 sps:$4 sm:$0xff]  }
   0xf   :  { %6585 = vmatpush1.bf16.msra.mxu0 %v9855_v14  ;;  %7433 = vmatpush1.bf16.msra.mxu1 %v9856_v15  ;;  %v9897_v42 = vld [vmem:[%s14826_s1 + $0x140] ss:$16 sps:$4 sm:$0xff]   ;;  %v9898_v43 = vld [vmem:[%s14826_s1 + $0x148] ss:$16 sps:$4 sm:$0xff]   ;;  %v9899_v44 = vld [vmem:[%s14826_s1 + $0x164] ss:$16 sps:$4 sm:$0xff]  }
  0x10   :  { %6586 = vmatprep.subr.bf16.mxu0 %v9857_v16  ;;  %7434 = vmatprep.subr.bf16.mxu1 %v9859_v17  ;;  %v9901_v45 = vld [vmem:[%s14826_s1 + $0x16c] ss:$16 sps:$4 sm:$0xff]   ;;  %v50_v46 = vld [vmem:[%s14827_s0] sm:$0xff]  ;;  %v9904_v49 = vld [vmem:[%s14826_s1 + $0x168] ss:$16 sps:$4 sm:$0xff]  }
  0x11   :  { %v66_v47 = vld [vmem:[%s14827_s0 + $0x80] sm:$0xff]  ;;  %v9907_v52 = vld [vmem:[%s14826_s1 + $0x18c] ss:$16 sps:$4 sm:$0xff]   ;;  %v9910_v54 = vld [vmem:[%s14826_s1 + $0x188] ss:$16 sps:$4 sm:$0xff]  }
  0x12   :  { %v9903_v48 = vld [vmem:[%s14826_s1 + $0x160] ss:$16 sps:$4 sm:$0xff]   ;;  %v8490_v50 = vcombine.high %v50_v46, %v66_v47  ;;  %v9905_v51 = vld [vmem:[%s14826_s1 + $0x184] ss:$16 sps:$4 sm:$0xff]   ;;  %v9913_v56 = vld [vmem:[%s14826_s1 + $0x1ac] ss:$16 sps:$4 sm:$0xff]   ;;  %v8489_v5 = vcombine.low %v50_v46, %v66_v47 }
  0x13   :  { %6587 = vmatpush1.bf16.msra.mxu0 %v9861_v18  ;;  %7435 = vmatpush1.bf16.msra.mxu1 %v9862_v19  ;;  %v9909_v53 = vld [vmem:[%s14826_s1 + $0x180] ss:$16 sps:$4 sm:$0xff]   ;;  %v9911_v55 = vld [vmem:[%s14826_s1 + $0x1a4] ss:$16 sps:$4 sm:$0xff]   ;;  %v9916_v58 = vld [vmem:[%s14826_s1 + $0x1a8] ss:$16 sps:$4 sm:$0xff]  }
  0x14   :  { %6588 = vmatprep.subr.bf16.mxu0 %v9863_v20  ;;  %7436 = vmatprep.subr.bf16.mxu1 %v9865_v21  ;;  %v9915_v57 = vld [vmem:[%s14826_s1 + $0x1a0] ss:$16 sps:$4 sm:$0xff]   ;;  %v9917_v59 = vld [vmem:[%s14826_s1 + $0x1c4] ss:$16 sps:$4 sm:$0xff]   ;;  %v9919_v60 = vld [vmem:[%s14826_s1 + $0x1cc] ss:$16 sps:$4 sm:$0xff]  }
  0x15   :  { %6610 = vmatprep.mubr.bf16.mxu0 %v8490_v50  ;;  %7458 = vmatprep.mubr.bf16.mxu1 %v8490_v50  ;;  %v9921_v61 = vld [vmem:[%s14826_s1 + $0x1c0] ss:$16 sps:$4 sm:$0xff]   ;;  %v9922_v62 = vld [vmem:[%s14826_s1 + $0x1c8] ss:$16 sps:$4 sm:$0xff]   ;;  %v9923_v63 = vld [vmem:[%s14826_s1 + $0x1e4] ss:$16 sps:$4 sm:$0xff]  }
  0x16   :  { %v9925_v0 = vld [vmem:[%s14826_s1 + $0x1ec] ss:$16 sps:$4 sm:$0xff]   ;;  %v9927_v1 = vld [vmem:[%s14826_s1 + $0x1e0] ss:$16 sps:$4 sm:$0xff]   ;;  %v9928_v2 = vld [vmem:[%s14826_s1 + $0x1e8] ss:$16 sps:$4 sm:$0xff]  }
  0x17   :  { %6589 = vmatpush1.bf16.msra.mxu0 %v9867_v22  ;;  %7437 = vmatpush1.bf16.msra.mxu1 %v9868_v23  ;;  %v9931_v3 = vld [vmem:[%s14826_s1 + $0x204] ss:$16 sps:$4 sm:$0xff]   ;;  %v9934_v4 = vld [vmem:[%s14826_s1 + $0x20c] ss:$16 sps:$4 sm:$0xff]   ;;  %v9929_v6 = vld [vmem:[%s14826_s1 + $0x200] ss:$16 sps:$4 sm:$0xff]  }
  0x18   :  { %6590 = vmatprep.subr.bf16.mxu0 %v9869_v24  ;;  %7438 = vmatprep.subr.bf16.mxu1 %v9871_v25  ;;  %v9932_v7 = vld [vmem:[%s14826_s1 + $0x208] ss:$16 sps:$4 sm:$0xff]   ;;  %v9937_v8 = vld [vmem:[%s14826_s1 + $0x224] ss:$16 sps:$4 sm:$0xff]   ;;  %v9940_v9 = vld [vmem:[%s14826_s1 + $0x22c] ss:$16 sps:$4 sm:$0xff]  }
  0x19   :  { %v9935_v10 = vld [vmem:[%s14826_s1 + $0x220] ss:$16 sps:$4 sm:$0xff]   ;;  %v9938_v11 = vld [vmem:[%s14826_s1 + $0x228] ss:$16 sps:$4 sm:$0xff]   ;;  %v9943_v12 = vld [vmem:[%s14826_s1 + $0x244] ss:$16 sps:$4 sm:$0xff]  }
  0x1a   :  { %v9946_v13 = vld [vmem:[%s14826_s1 + $0x24c] ss:$16 sps:$4 sm:$0xff]   ;;  %v9941_v14 = vld [vmem:[%s14826_s1 + $0x240] ss:$16 sps:$4 sm:$0xff]   ;;  %v9944_v15 = vld [vmem:[%s14826_s1 + $0x248] ss:$16 sps:$4 sm:$0xff]  }
  0x1b   :  { %6591 = vmatpush1.bf16.msra.mxu0 %v9873_v26  ;;  %7439 = vmatpush1.bf16.msra.mxu1 %v9874_v27  ;;  %v9949_v16 = vld [vmem:[%s14826_s1 + $0x264] ss:$16 sps:$4 sm:$0xff]   ;;  %v9952_v17 = vld [vmem:[%s14826_s1 + $0x26c] ss:$16 sps:$4 sm:$0xff]   ;;  %v9947_v18 = vld [vmem:[%s14826_s1 + $0x260] ss:$16 sps:$4 sm:$0xff]  }
  0x1c   :  { %6592 = vmatprep.subr.bf16.mxu0 %v9875_v28  ;;  %7440 = vmatprep.subr.bf16.mxu1 %v9877_v29  ;;  %v9950_v19 = vld [vmem:[%s14826_s1 + $0x268] ss:$16 sps:$4 sm:$0xff]   ;;  %v9955_v20 = vld [vmem:[%s14826_s1 + $0x284] ss:$16 sps:$4 sm:$0xff]   ;;  %v9958_v21 = vld [vmem:[%s14826_s1 + $0x28c] ss:$16 sps:$4 sm:$0xff]  }
  0x1d   :  { %v9953_v22 = vld [vmem:[%s14826_s1 + $0x280] ss:$16 sps:$4 sm:$0xff]   ;;  %v9956_v23 = vld [vmem:[%s14826_s1 + $0x288] ss:$16 sps:$4 sm:$0xff]   ;;  %v9961_v24 = vld [vmem:[%s14826_s1 + $0x2a4] ss:$16 sps:$4 sm:$0xff]  }
  0x1e   :  { %v9964_v25 = vld [vmem:[%s14826_s1 + $0x2ac] ss:$16 sps:$4 sm:$0xff]   ;;  %v82_v26 = vld [vmem:[%s14827_s0 + $0x100] sm:$0xff]  ;;  %v9980_v46 = vld [vmem:[%s14826_s1 + $0x308] ss:$16 sps:$4 sm:$0xff]  }
  0x1f   :  { %6593 = vmatpush1.bf16.msra.mxu0 %v9879_v30  ;;  %7441 = vmatpush1.bf16.msra.mxu1 %v9880_v31  ;;  %v98_v27 = vld [vmem:[%s14827_s0 + $0x180] sm:$0xff]  ;;  %v9962_v30 = vld [vmem:[%s14826_s1 + $0x2a8] ss:$16 sps:$4 sm:$0xff]  }
  0x20   :  { %6594 = vmatprep.subr.bf16.mxu0 %v9881_v32  ;;  %7442 = vmatprep.subr.bf16.mxu1 %v9883_v33  ;;  %v8522_v28 = vcombine.high %v82_v26, %v98_v27  ;;  %v9959_v29 = vld [vmem:[%s14826_s1 + $0x2a0] ss:$16 sps:$4 sm:$0xff]   ;;  %v8521_v31 = vcombine.low %v82_v26, %v98_v27  ;;  %v9967_v32 = vld [vmem:[%s14826_s1 + $0x2c4] ss:$16 sps:$4 sm:$0xff]   ;;  %v9970_v33 = vld [vmem:[%s14826_s1 + $0x2cc] ss:$16 sps:$4 sm:$0xff]  }
  0x21   :  { %v9985_v47 = vld [vmem:[%s14826_s1 + $0x324] ss:$16 sps:$4 sm:$0xff]   ;;  %v9986_v50 = vld [vmem:[%s14826_s1 + $0x328] ss:$16 sps:$4 sm:$0xff]  }
  0x22   :  { %v11848_v27 = vld [vmem:[%s14827_s0 + $0x90] sm:$0xff] }
  0x23   :  { %6595 = vmatpush1.bf16.msra.mxu0 %v9885_v34  ;;  %7443 = vmatpush1.bf16.msra.mxu1 %v9886_v35  ;;  %v11679_v34 = vld [vmem:[%s14827_s0 + $0x8] sm:$0xff] }
  0x24   :  { %6596 = vmatprep.subr.bf16.mxu0 %v9887_v36  ;;  %7444 = vmatprep.subr.bf16.mxu1 %v9889_v37  ;;  %v11684_v35 = vld [vmem:[%s14827_s0 + $0x88] sm:$0xff]  ;;  %v9965_v36 = vld [vmem:[%s14826_s1 + $0x2c0] ss:$16 sps:$4 sm:$0xff]  }
  0x25   :  { %v9968_v37 = vld [vmem:[%s14826_s1 + $0x2c8] ss:$16 sps:$4 sm:$0xff]  }
  0x27   :  { %6597 = vmatpush1.bf16.msra.mxu0 %v9891_v38  ;;  %7445 = vmatpush1.bf16.msra.mxu1 %v9892_v39  ;;  %v8492_v38 = vcombine.high %v11679_v34, %v11684_v35  ;;  %v9973_v39 = vld [vmem:[%s14826_s1 + $0x2e4] ss:$16 sps:$4 sm:$0xff]  }
  0x28   :  { %6598 = vmatprep.subr.bf16.mxu0 %v9893_v40  ;;  %7446 = vmatprep.subr.bf16.mxu1 %v9895_v41  ;;  %v9976_v40 = vld [vmem:[%s14826_s1 + $0x2ec] ss:$16 sps:$4 sm:$0xff]   ;;  %v9971_v41 = vld [vmem:[%s14826_s1 + $0x2e0] ss:$16 sps:$4 sm:$0xff]  }
  0x2b   :  { %6599 = vmatpush1.bf16.msra.mxu0 %v9897_v42  ;;  %7447 = vmatpush1.bf16.msra.mxu1 %v9898_v43  ;;  %v9974_v42 = vld [vmem:[%s14826_s1 + $0x2e8] ss:$16 sps:$4 sm:$0xff]   ;;  %v9979_v43 = vld [vmem:[%s14826_s1 + $0x304] ss:$16 sps:$4 sm:$0xff]  }
  0x2c   :  { %6600 = vmatprep.subr.bf16.mxu0 %v9899_v44  ;;  %7448 = vmatprep.subr.bf16.mxu1 %v9901_v45  ;;  %v9982_v44 = vld [vmem:[%s14826_s1 + $0x30c] ss:$16 sps:$4 sm:$0xff]   ;;  %v9977_v45 = vld [vmem:[%s14826_s1 + $0x300] ss:$16 sps:$4 sm:$0xff]  }
  0x2f   :  { %6601 = vmatpush1.bf16.msra.mxu0 %v9903_v48  ;;  %7449 = vmatpush1.bf16.msra.mxu1 %v9904_v49  ;;  %v9988_v48 = vld [vmem:[%s14826_s1 + $0x32c] ss:$16 sps:$4 sm:$0xff]   ;;  %v9983_v49 = vld [vmem:[%s14826_s1 + $0x320] ss:$16 sps:$4 sm:$0xff]  }
  0x30   :  { %6602 = vmatprep.subr.bf16.mxu0 %v9905_v51  ;;  %7450 = vmatprep.subr.bf16.mxu1 %v9907_v52  ;;  %v9991_v51 = vld [vmem:[%s14826_s1 + $0x344] ss:$16 sps:$4 sm:$0xff]   ;;  %v9994_v52 = vld [vmem:[%s14826_s1 + $0x34c] ss:$16 sps:$4 sm:$0xff]  }
  0x33   :  { %6603 = vmatpush1.bf16.msra.mxu0 %v9909_v53  ;;  %7451 = vmatpush1.bf16.msra.mxu1 %v9910_v54  ;;  %v9989_v53 = vld [vmem:[%s14826_s1 + $0x340] ss:$16 sps:$4 sm:$0xff]   ;;  %v9992_v54 = vld [vmem:[%s14826_s1 + $0x348] ss:$16 sps:$4 sm:$0xff]  }
  0x34   :  { %6604 = vmatprep.subr.bf16.mxu0 %v9911_v55  ;;  %7452 = vmatprep.subr.bf16.mxu1 %v9913_v56  ;;  %v9997_v55 = vld [vmem:[%s14826_s1 + $0x364] ss:$16 sps:$4 sm:$0xff]   ;;  %v10000_v56 = vld [vmem:[%s14826_s1 + $0x36c] ss:$16 sps:$4 sm:$0xff]  }
  0x37   :  { %6605 = vmatpush1.bf16.msra.mxu0 %v9915_v57  ;;  %7453 = vmatpush1.bf16.msra.mxu1 %v9916_v58  ;;  %v9995_v57 = vld [vmem:[%s14826_s1 + $0x360] ss:$16 sps:$4 sm:$0xff]   ;;  %v9998_v58 = vld [vmem:[%s14826_s1 + $0x368] ss:$16 sps:$4 sm:$0xff]  }
  0x38   :  { %6606 = vmatprep.subr.bf16.mxu0 %v9917_v59  ;;  %7454 = vmatprep.subr.bf16.mxu1 %v9919_v60  ;;  %v10003_v59 = vld [vmem:[%s14826_s1 + $0x384] ss:$16 sps:$4 sm:$0xff]   ;;  %v10006_v60 = vld [vmem:[%s14826_s1 + $0x38c] ss:$16 sps:$4 sm:$0xff]  }
  0x3b   :  { %6607 = vmatpush1.bf16.msra.mxu0 %v9921_v61  ;;  %7455 = vmatpush1.bf16.msra.mxu1 %v9922_v62  ;;  %v10001_v61 = vld [vmem:[%s14826_s1 + $0x380] ss:$16 sps:$4 sm:$0xff]   ;;  %v10004_v62 = vld [vmem:[%s14826_s1 + $0x388] ss:$16 sps:$4 sm:$0xff]  }
  0x3c   :  { %6608 = vmatprep.subr.bf16.mxu0 %v9923_v63  ;;  %7456 = vmatprep.subr.bf16.mxu1 %v9925_v0  ;;  %v10009_v63 = vld [vmem:[%s14826_s1 + $0x3a4] ss:$16 sps:$4 sm:$0xff]   ;;  %v10012_v0 = vld [vmem:[%s14826_s1 + $0x3ac] ss:$16 sps:$4 sm:$0xff]  }
  0x3f   :  { %6609 = vmatpush1.bf16.msra.mxu0 %v9927_v1  ;;  %7457 = vmatpush1.bf16.msra.mxu1 %v9928_v2  ;;  %v10007_v1 = vld [vmem:[%s14826_s1 + $0x3a0] ss:$16 sps:$4 sm:$0xff]   ;;  %v10010_v2 = vld [vmem:[%s14826_s1 + $0x3a8] ss:$16 sps:$4 sm:$0xff]  }
  0x40   :  { %6631 = vmatprep.subr.bf16.mxu0 %v9931_v3  ;;  %7479 = vmatprep.subr.bf16.mxu1 %v9934_v4  ;;  %v10015_v3 = vld [vmem:[%s14826_s1 + $0x3c4] ss:$16 sps:$4 sm:$0xff]   ;;  %v10018_v4 = vld [vmem:[%s14826_s1 + $0x3cc] ss:$16 sps:$4 sm:$0xff]  }
  0x42   :  { %6611 = vmatmul.mubr.bf16.vlgmr.msra.gmra.mrb[0].mxu0 %v8489_v5  ;;  %7459 = vmatmul.mubr.bf16.vlgmr.msra.gmra.mrb[0].mxu1 %v8489_v5  ;;  %v10013_v5 = vld [vmem:[%s14826_s1 + $0x3c0] ss:$16 sps:$4 sm:$0xff]  }
  0x43   :  { %6632 = vmatpush1.bf16.msra.mxu0 %v9929_v6  ;;  %7480 = vmatpush1.bf16.msra.mxu1 %v9932_v7  ;;  %v10016_v6 = vld [vmem:[%s14826_s1 + $0x3c8] ss:$16 sps:$4 sm:$0xff]   ;;  %v10021_v7 = vld [vmem:[%s14826_s1 + $0x3e4] ss:$16 sps:$4 sm:$0xff]  }
  0x44   :  { %6633 = vmatprep.subr.bf16.mxu0 %v9937_v8  ;;  %7481 = vmatprep.subr.bf16.mxu1 %v9940_v9  ;;  %v10024_v8 = vld [vmem:[%s14826_s1 + $0x3ec] ss:$16 sps:$4 sm:$0xff]   ;;  %v10019_v9 = vld [vmem:[%s14826_s1 + $0x3e0] ss:$16 sps:$4 sm:$0xff]  }
  0x45   :  { %6620 = vmatprep.mubr.bf16.mxu0 %v8522_v28  ;;  %7468 = vmatprep.mubr.bf16.mxu1 %v8522_v28  ;;  %v10037_v28 = vld [vmem:[%s14826_s1 + $0x440] ss:$16 sps:$4 sm:$0xff]  }
  0x47   :  { %6634 = vmatpush1.bf16.msra.mxu0 %v9935_v10  ;;  %7482 = vmatpush1.bf16.msra.mxu1 %v9938_v11  ;;  %v10022_v10 = vld [vmem:[%s14826_s1 + $0x3e8] ss:$16 sps:$4 sm:$0xff]   ;;  %v10027_v11 = vld [vmem:[%s14826_s1 + $0x404] ss:$16 sps:$4 sm:$0xff]  }
  0x48   :  { %6635 = vmatprep.subr.bf16.mxu0 %v9943_v12  ;;  %7483 = vmatprep.subr.bf16.mxu1 %v9946_v13  ;;  %v10030_v12 = vld [vmem:[%s14826_s1 + $0x40c] ss:$16 sps:$4 sm:$0xff]   ;;  %v10025_v13 = vld [vmem:[%s14826_s1 + $0x400] ss:$16 sps:$4 sm:$0xff]  }
  0x4a   :  { %6621 = vmatmul.mubr.bf16.gmra.mrb[4].mxu0 %v8521_v31  ;;  %7469 = vmatmul.mubr.bf16.gmra.mrb[4].mxu1 %v8521_v31  ;;  %v10048_v31 = vld [vmem:[%s14826_s1 + $0x46c] ss:$16 sps:$4 sm:$0xff]  }
  0x4b   :  { %6636 = vmatpush1.bf16.msra.mxu0 %v9941_v14  ;;  %7484 = vmatpush1.bf16.msra.mxu1 %v9944_v15  ;;  %v10028_v14 = vld [vmem:[%s14826_s1 + $0x408] ss:$16 sps:$4 sm:$0xff]   ;;  %v8491_v15 = vcombine.low %v11679_v34, %v11684_v35  ;;  %v10051_v35 = vld [vmem:[%s14826_s1 + $0x484] ss:$16 sps:$4 sm:$0xff]  }
  0x4c   :  { %6637 = vmatprep.subr.bf16.mxu0 %v9949_v16  ;;  %7485 = vmatprep.subr.bf16.mxu1 %v9952_v17  ;;  %v83_v16 = vld [vmem:[%s14827_s0 + $0x108] sm:$0xff] }
  0x4d   :  { %6663 = vmatprep.mubr.bf16.mxu0 %v8492_v38  ;;  %7511 = vmatprep.mubr.bf16.mxu1 %v8492_v38  ;;  %v99_v17 = vld [vmem:[%s14827_s0 + $0x188] sm:$0xff] }
  0x4e   :  { %v8523_v26 = vcombine.low %v83_v16, %v99_v17  ;;  %v10046_v34 = vld [vmem:[%s14826_s1 + $0x468] ss:$16 sps:$4 sm:$0xff]  }
  0x4f   :  { %6638 = vmatpush1.bf16.msra.mxu0 %v9947_v18  ;;  %7486 = vmatpush1.bf16.msra.mxu1 %v9950_v19  ;;  %v10033_v18 = vld [vmem:[%s14826_s1 + $0x424] ss:$16 sps:$4 sm:$0xff]   ;;  %v10036_v19 = vld [vmem:[%s14826_s1 + $0x42c] ss:$16 sps:$4 sm:$0xff]   ;;  %v10052_v38 = vld [vmem:[%s14826_s1 + $0x488] ss:$16 sps:$4 sm:$0xff]  }
  0x50   :  { %6639 = vmatprep.subr.bf16.mxu0 %v9955_v20  ;;  %7487 = vmatprep.subr.bf16.mxu1 %v9958_v21  ;;  %v8524_v20 = vcombine.high %v83_v16, %v99_v17  ;;  %v10031_v21 = vld [vmem:[%s14826_s1 + $0x420] ss:$16 sps:$4 sm:$0xff]   ;;  %v10120_v16 = vld [vmem:[%s14826_s1 + $0x5ec] ss:$16 sps:$4 sm:$0xff]  }
  0x51   :  { %v10115_v17 = vld [vmem:[%s14826_s1 + $0x5e0] ss:$16 sps:$4 sm:$0xff]  }
  0x53   :  { %6640 = vmatpush1.bf16.msra.mxu0 %v9953_v22  ;;  %7488 = vmatpush1.bf16.msra.mxu1 %v9956_v23  ;;  %v10034_v22 = vld [vmem:[%s14826_s1 + $0x428] ss:$16 sps:$4 sm:$0xff]   ;;  %v10039_v23 = vld [vmem:[%s14826_s1 + $0x444] ss:$16 sps:$4 sm:$0xff]  }
  0x54   :  { %6641 = vmatprep.subr.bf16.mxu0 %v9961_v24  ;;  %7489 = vmatprep.subr.bf16.mxu1 %v9964_v25  ;;  %v10042_v24 = vld [vmem:[%s14826_s1 + $0x44c] ss:$16 sps:$4 sm:$0xff]   ;;  %v11843_v25 = vld [vmem:[%s14827_s0 + $0x10] sm:$0xff] }
  0x57   :  { %6642 = vmatpush1.bf16.msra.mxu0 %v9959_v29  ;;  %7490 = vmatpush1.bf16.msra.mxu1 %v9962_v30  ;;  %v10040_v29 = vld [vmem:[%s14826_s1 + $0x448] ss:$16 sps:$4 sm:$0xff]   ;;  %v10045_v30 = vld [vmem:[%s14826_s1 + $0x464] ss:$16 sps:$4 sm:$0xff]  }
  0x58   :  { %6643 = vmatprep.subr.bf16.mxu0 %v9967_v32  ;;  %7491 = vmatprep.subr.bf16.mxu1 %v9970_v33  ;;  %v8494_v32 = vcombine.high %v11843_v25, %v11848_v27  ;;  %v10043_v33 = vld [vmem:[%s14826_s1 + $0x460] ss:$16 sps:$4 sm:$0xff]  }
  0x5b   :  { %6644 = vmatpush1.bf16.msra.mxu0 %v9965_v36  ;;  %7492 = vmatpush1.bf16.msra.mxu1 %v9968_v37  ;;  %v10054_v36 = vld [vmem:[%s14826_s1 + $0x48c] ss:$16 sps:$4 sm:$0xff]   ;;  %v10049_v37 = vld [vmem:[%s14826_s1 + $0x480] ss:$16 sps:$4 sm:$0xff]  }
  0x5c   :  { %6645 = vmatprep.subr.bf16.mxu0 %v9973_v39  ;;  %7493 = vmatprep.subr.bf16.mxu1 %v9976_v40  ;;  %v10057_v39 = vld [vmem:[%s14826_s1 + $0x4a4] ss:$16 sps:$4 sm:$0xff]   ;;  %v10060_v40 = vld [vmem:[%s14826_s1 + $0x4ac] ss:$16 sps:$4 sm:$0xff]  }
  0x5f   :  { %6646 = vmatpush1.bf16.msra.mxu0 %v9971_v41  ;;  %7494 = vmatpush1.bf16.msra.mxu1 %v9974_v42  ;;  %v10055_v41 = vld [vmem:[%s14826_s1 + $0x4a0] ss:$16 sps:$4 sm:$0xff]   ;;  %v10058_v42 = vld [vmem:[%s14826_s1 + $0x4a8] ss:$16 sps:$4 sm:$0xff]  }
  0x60   :  { %6647 = vmatprep.subr.bf16.mxu0 %v9979_v43  ;;  %7495 = vmatprep.subr.bf16.mxu1 %v9982_v44  ;;  %v10063_v43 = vld [vmem:[%s14826_s1 + $0x4c4] ss:$16 sps:$4 sm:$0xff]   ;;  %v10066_v44 = vld [vmem:[%s14826_s1 + $0x4cc] ss:$16 sps:$4 sm:$0xff]  }
  0x63   :  { %6648 = vmatpush1.bf16.msra.mxu0 %v9977_v45  ;;  %7496 = vmatpush1.bf16.msra.mxu1 %v9980_v46  ;;  %v10061_v45 = vld [vmem:[%s14826_s1 + $0x4c0] ss:$16 sps:$4 sm:$0xff]   ;;  %v10064_v46 = vld [vmem:[%s14826_s1 + $0x4c8] ss:$16 sps:$4 sm:$0xff]  }
  0x64   :  { %6649 = vmatprep.subr.bf16.mxu0 %v9985_v47  ;;  %7497 = vmatprep.subr.bf16.mxu1 %v9988_v48  ;;  %v10069_v47 = vld [vmem:[%s14826_s1 + $0x4e4] ss:$16 sps:$4 sm:$0xff]   ;;  %v10072_v48 = vld [vmem:[%s14826_s1 + $0x4ec] ss:$16 sps:$4 sm:$0xff]  }
  0x67   :  { %6650 = vmatpush1.bf16.msra.mxu0 %v9983_v49  ;;  %7498 = vmatpush1.bf16.msra.mxu1 %v9986_v50  ;;  %v10067_v49 = vld [vmem:[%s14826_s1 + $0x4e0] ss:$16 sps:$4 sm:$0xff]   ;;  %v10070_v50 = vld [vmem:[%s14826_s1 + $0x4e8] ss:$16 sps:$4 sm:$0xff]  }
  0x68   :  { %6651 = vmatprep.subr.bf16.mxu0 %v9991_v51  ;;  %7499 = vmatprep.subr.bf16.mxu1 %v9994_v52  ;;  %v10075_v51 = vld [vmem:[%s14826_s1 + $0x504] ss:$16 sps:$4 sm:$0xff]   ;;  %v10078_v52 = vld [vmem:[%s14826_s1 + $0x50c] ss:$16 sps:$4 sm:$0xff]  }
  0x6b   :  { %6652 = vmatpush1.bf16.msra.mxu0 %v9989_v53  ;;  %7500 = vmatpush1.bf16.msra.mxu1 %v9992_v54  ;;  %v10073_v53 = vld [vmem:[%s14826_s1 + $0x500] ss:$16 sps:$4 sm:$0xff]   ;;  %v10076_v54 = vld [vmem:[%s14826_s1 + $0x508] ss:$16 sps:$4 sm:$0xff]  }
  0x6c   :  { %6653 = vmatprep.subr.bf16.mxu0 %v9997_v55  ;;  %7501 = vmatprep.subr.bf16.mxu1 %v10000_v56  ;;  %v10081_v55 = vld [vmem:[%s14826_s1 + $0x524] ss:$16 sps:$4 sm:$0xff]   ;;  %v10084_v56 = vld [vmem:[%s14826_s1 + $0x52c] ss:$16 sps:$4 sm:$0xff]  }
  0x6f   :  { %6654 = vmatpush1.bf16.msra.mxu0 %v9995_v57  ;;  %7502 = vmatpush1.bf16.msra.mxu1 %v9998_v58  ;;  %v10079_v57 = vld [vmem:[%s14826_s1 + $0x520] ss:$16 sps:$4 sm:$0xff]   ;;  %v10082_v58 = vld [vmem:[%s14826_s1 + $0x528] ss:$16 sps:$4 sm:$0xff]  }
  0x70   :  { %6655 = vmatprep.subr.bf16.mxu0 %v10003_v59  ;;  %7503 = vmatprep.subr.bf16.mxu1 %v10006_v60  ;;  %v10087_v59 = vld [vmem:[%s14826_s1 + $0x544] ss:$16 sps:$4 sm:$0xff]   ;;  %v10090_v60 = vld [vmem:[%s14826_s1 + $0x54c] ss:$16 sps:$4 sm:$0xff]  }
  0x73   :  { %6656 = vmatpush1.bf16.msra.mxu0 %v10001_v61  ;;  %7504 = vmatpush1.bf16.msra.mxu1 %v10004_v62  ;;  %v10085_v61 = vld [vmem:[%s14826_s1 + $0x540] ss:$16 sps:$4 sm:$0xff]   ;;  %v10088_v62 = vld [vmem:[%s14826_s1 + $0x548] ss:$16 sps:$4 sm:$0xff]  }
  0x74   :  { %6657 = vmatprep.subr.bf16.mxu0 %v10009_v63  ;;  %7505 = vmatprep.subr.bf16.mxu1 %v10012_v0  ;;  %v10093_v63 = vld [vmem:[%s14826_s1 + $0x564] ss:$16 sps:$4 sm:$0xff]   ;;  %v10096_v0 = vld [vmem:[%s14826_s1 + $0x56c] ss:$16 sps:$4 sm:$0xff]  }
  0x77   :  { %6658 = vmatpush1.bf16.msra.mxu0 %v10007_v1  ;;  %7506 = vmatpush1.bf16.msra.mxu1 %v10010_v2  ;;  %v10091_v1 = vld [vmem:[%s14826_s1 + $0x560] ss:$16 sps:$4 sm:$0xff]   ;;  %v10094_v2 = vld [vmem:[%s14826_s1 + $0x568] ss:$16 sps:$4 sm:$0xff]  }
  0x78   :  { %6659 = vmatprep.subr.bf16.mxu0 %v10015_v3  ;;  %7507 = vmatprep.subr.bf16.mxu1 %v10018_v4  ;;  %v10099_v3 = vld [vmem:[%s14826_s1 + $0x584] ss:$16 sps:$4 sm:$0xff]   ;;  %v10102_v4 = vld [vmem:[%s14826_s1 + $0x58c] ss:$16 sps:$4 sm:$0xff]  }
  0x7b   :  { %6660 = vmatpush1.bf16.msra.mxu0 %v10013_v5  ;;  %7508 = vmatpush1.bf16.msra.mxu1 %v10016_v6  ;;  %v10097_v5 = vld [vmem:[%s14826_s1 + $0x580] ss:$16 sps:$4 sm:$0xff]   ;;  %v10100_v6 = vld [vmem:[%s14826_s1 + $0x588] ss:$16 sps:$4 sm:$0xff]  }
  0x7c   :  { %6661 = vmatprep.subr.bf16.mxu0 %v10021_v7  ;;  %7509 = vmatprep.subr.bf16.mxu1 %v10024_v8  ;;  %v10105_v7 = vld [vmem:[%s14826_s1 + $0x5a4] ss:$16 sps:$4 sm:$0xff]   ;;  %v10108_v8 = vld [vmem:[%s14826_s1 + $0x5ac] ss:$16 sps:$4 sm:$0xff]  }
  0x7f   :  { %6662 = vmatpush1.bf16.msra.mxu0 %v10019_v9  ;;  %7510 = vmatpush1.bf16.msra.mxu1 %v10022_v10  ;;  %v10103_v9 = vld [vmem:[%s14826_s1 + $0x5a0] ss:$16 sps:$4 sm:$0xff]   ;;  %v10106_v10 = vld [vmem:[%s14826_s1 + $0x5a8] ss:$16 sps:$4 sm:$0xff]  }
  0x80   :  { %6684 = vmatprep.subr.bf16.mxu0 %v10027_v11  ;;  %7532 = vmatprep.subr.bf16.mxu1 %v10030_v12  ;;  %v10111_v11 = vld [vmem:[%s14826_s1 + $0x5c4] ss:$16 sps:$4 sm:$0xff]   ;;  %v10114_v12 = vld [vmem:[%s14826_s1 + $0x5cc] ss:$16 sps:$4 sm:$0xff]  }
  0x82   :  { %6664 = vmatmul.mubr.bf16.vlgmr.msra.gmra.mrb[0].mxu0 %v8491_v15  ;;  %7512 = vmatmul.mubr.bf16.vlgmr.msra.gmra.mrb[0].mxu1 %v8491_v15  ;;  %v10117_v15 = vld [vmem:[%s14826_s1 + $0x5e4] ss:$16 sps:$4 sm:$0xff]  }
  0x83   :  { %6685 = vmatpush1.bf16.msra.mxu0 %v10025_v13  ;;  %7533 = vmatpush1.bf16.msra.mxu1 %v10028_v14  ;;  %v10109_v13 = vld [vmem:[%s14826_s1 + $0x5c0] ss:$16 sps:$4 sm:$0xff]   ;;  %v10112_v14 = vld [vmem:[%s14826_s1 + $0x5c8] ss:$16 sps:$4 sm:$0xff]  }
  0x84   :  { %6686 = vmatprep.subr.bf16.mxu0 %v10033_v18  ;;  %7534 = vmatprep.subr.bf16.mxu1 %v10036_v19  ;;  %v10118_v18 = vld [vmem:[%s14826_s1 + $0x5e8] ss:$16 sps:$4 sm:$0xff]   ;;  %v10123_v19 = vld [vmem:[%s14826_s1 + $0x604] ss:$16 sps:$4 sm:$0xff]  }
  0x85   :  { %6673 = vmatprep.mubr.bf16.mxu0 %v8524_v20  ;;  %7521 = vmatprep.mubr.bf16.mxu1 %v8524_v20  ;;  %v10126_v20 = vld [vmem:[%s14826_s1 + $0x60c] ss:$16 sps:$4 sm:$0xff]  }
  0x87   :  { %6687 = vmatpush1.bf16.msra.mxu0 %v10031_v21  ;;  %7535 = vmatpush1.bf16.msra.mxu1 %v10034_v22  ;;  %v84_v21 = vld [vmem:[%s14827_s0 + $0x110] sm:$0xff]  ;;  %v8493_v22 = vcombine.low %v11843_v25, %v11848_v27  ;;  %v10132_v27 = vld [vmem:[%s14826_s1 + $0x62c] ss:$16 sps:$4 sm:$0xff]  }
  0x88   :  { %6688 = vmatprep.subr.bf16.mxu0 %v10039_v23  ;;  %7536 = vmatprep.subr.bf16.mxu1 %v10042_v24  ;;  %v100_v23 = vld [vmem:[%s14827_s0 + $0x190] sm:$0xff] }
  0x89   :  { %v10121_v24 = vld [vmem:[%s14826_s1 + $0x600] ss:$16 sps:$4 sm:$0xff]   ;;  %v10129_v25 = vld [vmem:[%s14826_s1 + $0x624] ss:$16 sps:$4 sm:$0xff]  }
  0x8a   :  { %6674 = vmatmul.mubr.bf16.gmra.mrb[4].mxu0 %v8523_v26  ;;  %7522 = vmatmul.mubr.bf16.gmra.mrb[4].mxu1 %v8523_v26  ;;  %v10124_v26 = vld [vmem:[%s14826_s1 + $0x608] ss:$16 sps:$4 sm:$0xff]  }
  0x8b   :  { %6689 = vmatpush1.bf16.msra.mxu0 %v10037_v28  ;;  %7537 = vmatpush1.bf16.msra.mxu1 %v10040_v29  ;;  %v8526_v28 = vcombine.high %v84_v21, %v100_v23  ;;  %v10127_v29 = vld [vmem:[%s14826_s1 + $0x620] ss:$16 sps:$4 sm:$0xff]  }
  0x8c   :  { %6690 = vmatprep.subr.bf16.mxu0 %v10045_v30  ;;  %7538 = vmatprep.subr.bf16.mxu1 %v10048_v31  ;;  %v10130_v30 = vld [vmem:[%s14826_s1 + $0x628] ss:$16 sps:$4 sm:$0xff]   ;;  %v10135_v31 = vld [vmem:[%s14826_s1 + $0x644] ss:$16 sps:$4 sm:$0xff]  }
  0x8d   :  { %6716 = vmatprep.mubr.bf16.mxu0 %v8494_v32  ;;  %7564 = vmatprep.mubr.bf16.mxu1 %v8494_v32  ;;  %v10138_v32 = vld [vmem:[%s14826_s1 + $0x64c] ss:$16 sps:$4 sm:$0xff]  }
  0x8f   :  { %6691 = vmatpush1.bf16.msra.mxu0 %v10043_v33  ;;  %7539 = vmatpush1.bf16.msra.mxu1 %v10046_v34  ;;  %v12055_v33 = vld [vmem:[%s14827_s0 + $0x18] sm:$0xff]  ;;  %v8525_v34 = vcombine.low %v84_v21, %v100_v23  ;;  %v10205_v21 = vld [vmem:[%s14826_s1 + $0x7c0] ss:$16 sps:$4 sm:$0xff]   ;;  %v10213_v23 = vld [vmem:[%s14826_s1 + $0x7e4] ss:$16 sps:$4 sm:$0xff]  }
  0x90   :  { %6692 = vmatprep.subr.bf16.mxu0 %v10051_v35  ;;  %7540 = vmatprep.subr.bf16.mxu1 %v10054_v36  ;;  %v12060_v35 = vld [vmem:[%s14827_s0 + $0x98] sm:$0xff]  ;;  %v10133_v36 = vld [vmem:[%s14826_s1 + $0x640] ss:$16 sps:$4 sm:$0xff]  }
  0x93   :  { %6693 = vmatpush1.bf16.msra.mxu0 %v10049_v37  ;;  %7541 = vmatpush1.bf16.msra.mxu1 %v10052_v38  ;;  %v10136_v37 = vld [vmem:[%s14826_s1 + $0x648] ss:$16 sps:$4 sm:$0xff]   ;;  %v10141_v38 = vld [vmem:[%s14826_s1 + $0x664] ss:$16 sps:$4 sm:$0xff]  }
  0x94   :  { %6694 = vmatprep.subr.bf16.mxu0 %v10057_v39  ;;  %7542 = vmatprep.subr.bf16.mxu1 %v10060_v40  ;;  %v10144_v39 = vld [vmem:[%s14826_s1 + $0x66c] ss:$16 sps:$4 sm:$0xff]   ;;  %v8496_v40 = vcombine.high %v12055_v33, %v12060_v35 }
  0x97   :  { %6695 = vmatpush1.bf16.msra.mxu0 %v10055_v41  ;;  %7543 = vmatpush1.bf16.msra.mxu1 %v10058_v42  ;;  %v10139_v41 = vld [vmem:[%s14826_s1 + $0x660] ss:$16 sps:$4 sm:$0xff]   ;;  %v10142_v42 = vld [vmem:[%s14826_s1 + $0x668] ss:$16 sps:$4 sm:$0xff]  }
  0x98   :  { %6696 = vmatprep.subr.bf16.mxu0 %v10063_v43  ;;  %7544 = vmatprep.subr.bf16.mxu1 %v10066_v44  ;;  %v10147_v43 = vld [vmem:[%s14826_s1 + $0x684] ss:$16 sps:$4 sm:$0xff]   ;;  %v10150_v44 = vld [vmem:[%s14826_s1 + $0x68c] ss:$16 sps:$4 sm:$0xff]  }
  0x9b   :  { %6697 = vmatpush1.bf16.msra.mxu0 %v10061_v45  ;;  %7545 = vmatpush1.bf16.msra.mxu1 %v10064_v46  ;;  %v10145_v45 = vld [vmem:[%s14826_s1 + $0x680] ss:$16 sps:$4 sm:$0xff]   ;;  %v10148_v46 = vld [vmem:[%s14826_s1 + $0x688] ss:$16 sps:$4 sm:$0xff]  }
  0x9c   :  { %6698 = vmatprep.subr.bf16.mxu0 %v10069_v47  ;;  %7546 = vmatprep.subr.bf16.mxu1 %v10072_v48  ;;  %v10153_v47 = vld [vmem:[%s14826_s1 + $0x6a4] ss:$16 sps:$4 sm:$0xff]   ;;  %v10156_v48 = vld [vmem:[%s14826_s1 + $0x6ac] ss:$16 sps:$4 sm:$0xff]  }
  0x9f   :  { %6699 = vmatpush1.bf16.msra.mxu0 %v10067_v49  ;;  %7547 = vmatpush1.bf16.msra.mxu1 %v10070_v50  ;;  %v10151_v49 = vld [vmem:[%s14826_s1 + $0x6a0] ss:$16 sps:$4 sm:$0xff]   ;;  %v10154_v50 = vld [vmem:[%s14826_s1 + $0x6a8] ss:$16 sps:$4 sm:$0xff]  }
  0xa0   :  { %6700 = vmatprep.subr.bf16.mxu0 %v10075_v51  ;;  %7548 = vmatprep.subr.bf16.mxu1 %v10078_v52  ;;  %v10159_v51 = vld [vmem:[%s14826_s1 + $0x6c4] ss:$16 sps:$4 sm:$0xff]   ;;  %v10162_v52 = vld [vmem:[%s14826_s1 + $0x6cc] ss:$16 sps:$4 sm:$0xff]  }
  0xa3   :  { %6701 = vmatpush1.bf16.msra.mxu0 %v10073_v53  ;;  %7549 = vmatpush1.bf16.msra.mxu1 %v10076_v54  ;;  %v10157_v53 = vld [vmem:[%s14826_s1 + $0x6c0] ss:$16 sps:$4 sm:$0xff]   ;;  %v10160_v54 = vld [vmem:[%s14826_s1 + $0x6c8] ss:$16 sps:$4 sm:$0xff]  }
  0xa4   :  { %6702 = vmatprep.subr.bf16.mxu0 %v10081_v55  ;;  %7550 = vmatprep.subr.bf16.mxu1 %v10084_v56  ;;  %v10165_v55 = vld [vmem:[%s14826_s1 + $0x6e4] ss:$16 sps:$4 sm:$0xff]   ;;  %v10168_v56 = vld [vmem:[%s14826_s1 + $0x6ec] ss:$16 sps:$4 sm:$0xff]  }
  0xa7   :  { %6703 = vmatpush1.bf16.msra.mxu0 %v10079_v57  ;;  %7551 = vmatpush1.bf16.msra.mxu1 %v10082_v58  ;;  %v10163_v57 = vld [vmem:[%s14826_s1 + $0x6e0] ss:$16 sps:$4 sm:$0xff]   ;;  %v10166_v58 = vld [vmem:[%s14826_s1 + $0x6e8] ss:$16 sps:$4 sm:$0xff]  }
  0xa8   :  { %6704 = vmatprep.subr.bf16.mxu0 %v10087_v59  ;;  %7552 = vmatprep.subr.bf16.mxu1 %v10090_v60  ;;  %v10171_v59 = vld [vmem:[%s14826_s1 + $0x704] ss:$16 sps:$4 sm:$0xff]   ;;  %v10174_v60 = vld [vmem:[%s14826_s1 + $0x70c] ss:$16 sps:$4 sm:$0xff]  }
  0xab   :  { %6705 = vmatpush1.bf16.msra.mxu0 %v10085_v61  ;;  %7553 = vmatpush1.bf16.msra.mxu1 %v10088_v62  ;;  %v10169_v61 = vld [vmem:[%s14826_s1 + $0x700] ss:$16 sps:$4 sm:$0xff]   ;;  %v10172_v62 = vld [vmem:[%s14826_s1 + $0x708] ss:$16 sps:$4 sm:$0xff]  }
  0xac   :  { %6706 = vmatprep.subr.bf16.mxu0 %v10093_v63  ;;  %7554 = vmatprep.subr.bf16.mxu1 %v10096_v0  ;;  %v10177_v63 = vld [vmem:[%s14826_s1 + $0x724] ss:$16 sps:$4 sm:$0xff]   ;;  %v10180_v0 = vld [vmem:[%s14826_s1 + $0x72c] ss:$16 sps:$4 sm:$0xff]  }
  0xaf   :  { %6707 = vmatpush1.bf16.msra.mxu0 %v10091_v1  ;;  %7555 = vmatpush1.bf16.msra.mxu1 %v10094_v2  ;;  %v10175_v1 = vld [vmem:[%s14826_s1 + $0x720] ss:$16 sps:$4 sm:$0xff]   ;;  %v10178_v2 = vld [vmem:[%s14826_s1 + $0x728] ss:$16 sps:$4 sm:$0xff]  }
  0xb0   :  { %6708 = vmatprep.subr.bf16.mxu0 %v10099_v3  ;;  %7556 = vmatprep.subr.bf16.mxu1 %v10102_v4  ;;  %v10183_v3 = vld [vmem:[%s14826_s1 + $0x744] ss:$16 sps:$4 sm:$0xff]   ;;  %v10186_v4 = vld [vmem:[%s14826_s1 + $0x74c] ss:$16 sps:$4 sm:$0xff]  }
  0xb3   :  { %6709 = vmatpush1.bf16.msra.mxu0 %v10097_v5  ;;  %7557 = vmatpush1.bf16.msra.mxu1 %v10100_v6  ;;  %v10181_v5 = vld [vmem:[%s14826_s1 + $0x740] ss:$16 sps:$4 sm:$0xff]   ;;  %v10184_v6 = vld [vmem:[%s14826_s1 + $0x748] ss:$16 sps:$4 sm:$0xff]  }
  0xb4   :  { %6710 = vmatprep.subr.bf16.mxu0 %v10105_v7  ;;  %7558 = vmatprep.subr.bf16.mxu1 %v10108_v8  ;;  %v10189_v7 = vld [vmem:[%s14826_s1 + $0x764] ss:$16 sps:$4 sm:$0xff]   ;;  %v10192_v8 = vld [vmem:[%s14826_s1 + $0x76c] ss:$16 sps:$4 sm:$0xff]  }
  0xb7   :  { %6711 = vmatpush1.bf16.msra.mxu0 %v10103_v9  ;;  %7559 = vmatpush1.bf16.msra.mxu1 %v10106_v10  ;;  %v10187_v9 = vld [vmem:[%s14826_s1 + $0x760] ss:$16 sps:$4 sm:$0xff]   ;;  %v10190_v10 = vld [vmem:[%s14826_s1 + $0x768] ss:$16 sps:$4 sm:$0xff]  }
  0xb8   :  { %6712 = vmatprep.subr.bf16.mxu0 %v10111_v11  ;;  %7560 = vmatprep.subr.bf16.mxu1 %v10114_v12  ;;  %v10195_v11 = vld [vmem:[%s14826_s1 + $0x784] ss:$16 sps:$4 sm:$0xff]   ;;  %v10198_v12 = vld [vmem:[%s14826_s1 + $0x78c] ss:$16 sps:$4 sm:$0xff]  }
  0xbb   :  { %6713 = vmatpush1.bf16.msra.mxu0 %v10109_v13  ;;  %7561 = vmatpush1.bf16.msra.mxu1 %v10112_v14  ;;  %v10193_v13 = vld [vmem:[%s14826_s1 + $0x780] ss:$16 sps:$4 sm:$0xff]   ;;  %v10196_v14 = vld [vmem:[%s14826_s1 + $0x788] ss:$16 sps:$4 sm:$0xff]  }
  0xbc   :  { %6714 = vmatprep.subr.bf16.mxu0 %v10117_v15  ;;  %7562 = vmatprep.subr.bf16.mxu1 %v10120_v16  ;;  %v10201_v15 = vld [vmem:[%s14826_s1 + $0x7a4] ss:$16 sps:$4 sm:$0xff]   ;;  %v10204_v16 = vld [vmem:[%s14826_s1 + $0x7ac] ss:$16 sps:$4 sm:$0xff]  }
  0xbf   :  { %6715 = vmatpush1.bf16.msra.mxu0 %v10115_v17  ;;  %7563 = vmatpush1.bf16.msra.mxu1 %v10118_v18  ;;  %v10199_v17 = vld [vmem:[%s14826_s1 + $0x7a0] ss:$16 sps:$4 sm:$0xff]   ;;  %v10202_v18 = vld [vmem:[%s14826_s1 + $0x7a8] ss:$16 sps:$4 sm:$0xff]  }
  0xc0   :  { %6737 = vmatprep.subr.bf16.mxu0 %v10123_v19  ;;  %7585 = vmatprep.subr.bf16.mxu1 %v10126_v20  ;;  %v10207_v19 = vld [vmem:[%s14826_s1 + $0x7c4] ss:$16 sps:$4 sm:$0xff]   ;;  %v10210_v20 = vld [vmem:[%s14826_s1 + $0x7cc] ss:$16 sps:$4 sm:$0xff]  }
  0xc2   :  { %6717 = vmatmul.mubr.bf16.vlgmr.msra.gmra.mrb[0].mxu0 %v8493_v22  ;;  %7565 = vmatmul.mubr.bf16.vlgmr.msra.gmra.mrb[0].mxu1 %v8493_v22  ;;  %v10208_v22 = vld [vmem:[%s14826_s1 + $0x7c8] ss:$16 sps:$4 sm:$0xff]  }
  0xc3   :  { %6738 = vmatpush1.bf16.msra.mxu0 %v10121_v24  ;;  %7586 = vmatpush1.bf16.msra.mxu1 %v10124_v26  ;;  %v10216_v24 = vld [vmem:[%s14826_s1 + $0x7ec] ss:$16 sps:$4 sm:$0xff]   ;;  %v10211_v26 = vld [vmem:[%s14826_s1 + $0x7e0] ss:$16 sps:$4 sm:$0xff]  }
  0xc4   :  { %6739 = vmatprep.subr.bf16.mxu0 %v10129_v25  ;;  %7587 = vmatprep.subr.bf16.mxu1 %v10132_v27  ;;  %v10214_v25 = vld [vmem:[%s14826_s1 + $0x7e8] ss:$16 sps:$4 sm:$0xff]   ;;  %v10219_v27 = vld [vmem:[%s14826_s1 + $0x804] ss:$16 sps:$4 sm:$0xff]  }
  0xc5   :  { %6726 = vmatprep.mubr.bf16.mxu0 %v8526_v28  ;;  %7574 = vmatprep.mubr.bf16.mxu1 %v8526_v28  ;;  %v10222_v28 = vld [vmem:[%s14826_s1 + $0x80c] ss:$16 sps:$4 sm:$0xff]  }
  0xc7   :  { %6740 = vmatpush1.bf16.msra.mxu0 %v10127_v29  ;;  %7588 = vmatpush1.bf16.msra.mxu1 %v10130_v30  ;;  %v85_v29 = vld [vmem:[%s14827_s0 + $0x118] sm:$0xff]  ;;  %v8495_v30 = vcombine.low %v12055_v33, %v12060_v35 }
  0xc8   :  { %6741 = vmatprep.subr.bf16.mxu0 %v10135_v31  ;;  %7589 = vmatprep.subr.bf16.mxu1 %v10138_v32  ;;  %v101_v31 = vld [vmem:[%s14827_s0 + $0x198] sm:$0xff]  ;;  %v10217_v32 = vld [vmem:[%s14826_s1 + $0x800] ss:$16 sps:$4 sm:$0xff]  }
  0xc9   :  { %v10228_v33 = vld [vmem:[%s14826_s1 + $0x82c] ss:$16 sps:$4 sm:$0xff]   ;;  %v8528_v35 = vcombine.high %v85_v29, %v101_v31 }
  0xca   :  { %6727 = vmatmul.mubr.bf16.gmra.mrb[4].mxu0 %v8525_v34  ;;  %7575 = vmatmul.mubr.bf16.gmra.mrb[4].mxu1 %v8525_v34  ;;  %v10220_v34 = vld [vmem:[%s14826_s1 + $0x808] ss:$16 sps:$4 sm:$0xff]  }
  0xcb   :  { %6742 = vmatpush1.bf16.msra.mxu0 %v10133_v36  ;;  %7590 = vmatpush1.bf16.msra.mxu1 %v10136_v37  ;;  %v10225_v36 = vld [vmem:[%s14826_s1 + $0x824] ss:$16 sps:$4 sm:$0xff]   ;;  %v10223_v37 = vld [vmem:[%s14826_s1 + $0x820] ss:$16 sps:$4 sm:$0xff]  }
  0xcc   :  { %6743 = vmatprep.subr.bf16.mxu0 %v10141_v38  ;;  %7591 = vmatprep.subr.bf16.mxu1 %v10144_v39  ;;  %v10226_v38 = vld [vmem:[%s14826_s1 + $0x828] ss:$16 sps:$4 sm:$0xff]   ;;  %v10231_v39 = vld [vmem:[%s14826_s1 + $0x844] ss:$16 sps:$4 sm:$0xff]  }
  0xcd   :  { %6769 = vmatprep.mubr.bf16.mxu0 %v8496_v40  ;;  %7617 = vmatprep.mubr.bf16.mxu1 %v8496_v40  ;;  %v10234_v40 = vld [vmem:[%s14826_s1 + $0x84c] ss:$16 sps:$4 sm:$0xff]  }
  0xcf   :  { %6744 = vmatpush1.bf16.msra.mxu0 %v10139_v41  ;;  %7592 = vmatpush1.bf16.msra.mxu1 %v10142_v42  ;;  %v12267_v41 = vld [vmem:[%s14827_s0 + $0x20] sm:$0xff]  ;;  %v8527_v42 = vcombine.low %v85_v29, %v101_v31 }
  0xd0   :  { %6745 = vmatprep.subr.bf16.mxu0 %v10147_v43  ;;  %7593 = vmatprep.subr.bf16.mxu1 %v10150_v44  ;;  %v12272_v43 = vld [vmem:[%s14827_s0 + $0xa0] sm:$0xff] }
  0xd1   :  { %v10229_v44 = vld [vmem:[%s14826_s1 + $0x840] ss:$16 sps:$4 sm:$0xff]   ;;  %v10309_v31 = vld [vmem:[%s14826_s1 + $0x9e4] ss:$16 sps:$4 sm:$0xff]  }
  0xd2   :  { %v10301_v29 = vld [vmem:[%s14826_s1 + $0x9c0] ss:$16 sps:$4 sm:$0xff]  }
  0xd3   :  { %6746 = vmatpush1.bf16.msra.mxu0 %v10145_v45  ;;  %7594 = vmatpush1.bf16.msra.mxu1 %v10148_v46  ;;  %v10232_v45 = vld [vmem:[%s14826_s1 + $0x848] ss:$16 sps:$4 sm:$0xff]   ;;  %v10237_v46 = vld [vmem:[%s14826_s1 + $0x864] ss:$16 sps:$4 sm:$0xff]  }
  0xd4   :  { %6747 = vmatprep.subr.bf16.mxu0 %v10153_v47  ;;  %7595 = vmatprep.subr.bf16.mxu1 %v10156_v48  ;;  %v10240_v47 = vld [vmem:[%s14826_s1 + $0x86c] ss:$16 sps:$4 sm:$0xff]   ;;  %v8498_v48 = vcombine.high %v12267_v41, %v12272_v43 }
  0xd7   :  { %6748 = vmatpush1.bf16.msra.mxu0 %v10151_v49  ;;  %7596 = vmatpush1.bf16.msra.mxu1 %v10154_v50  ;;  %v10235_v49 = vld [vmem:[%s14826_s1 + $0x860] ss:$16 sps:$4 sm:$0xff]   ;;  %v10238_v50 = vld [vmem:[%s14826_s1 + $0x868] ss:$16 sps:$4 sm:$0xff]  }
  0xd8   :  { %6749 = vmatprep.subr.bf16.mxu0 %v10159_v51  ;;  %7597 = vmatprep.subr.bf16.mxu1 %v10162_v52  ;;  %v10243_v51 = vld [vmem:[%s14826_s1 + $0x884] ss:$16 sps:$4 sm:$0xff]   ;;  %v10246_v52 = vld [vmem:[%s14826_s1 + $0x88c] ss:$16 sps:$4 sm:$0xff]  }
  0xdb   :  { %6750 = vmatpush1.bf16.msra.mxu0 %v10157_v53  ;;  %7598 = vmatpush1.bf16.msra.mxu1 %v10160_v54  ;;  %v10241_v53 = vld [vmem:[%s14826_s1 + $0x880] ss:$16 sps:$4 sm:$0xff]   ;;  %v10244_v54 = vld [vmem:[%s14826_s1 + $0x888] ss:$16 sps:$4 sm:$0xff]  }
  0xdc   :  { %6751 = vmatprep.subr.bf16.mxu0 %v10165_v55  ;;  %7599 = vmatprep.subr.bf16.mxu1 %v10168_v56  ;;  %v10249_v55 = vld [vmem:[%s14826_s1 + $0x8a4] ss:$16 sps:$4 sm:$0xff]   ;;  %v10252_v56 = vld [vmem:[%s14826_s1 + $0x8ac] ss:$16 sps:$4 sm:$0xff]  }
  0xdf   :  { %6752 = vmatpush1.bf16.msra.mxu0 %v10163_v57  ;;  %7600 = vmatpush1.bf16.msra.mxu1 %v10166_v58  ;;  %v10247_v57 = vld [vmem:[%s14826_s1 + $0x8a0] ss:$16 sps:$4 sm:$0xff]   ;;  %v10250_v58 = vld [vmem:[%s14826_s1 + $0x8a8] ss:$16 sps:$4 sm:$0xff]  }
  0xe0   :  { %6753 = vmatprep.subr.bf16.mxu0 %v10171_v59  ;;  %7601 = vmatprep.subr.bf16.mxu1 %v10174_v60  ;;  %v10255_v59 = vld [vmem:[%s14826_s1 + $0x8c4] ss:$16 sps:$4 sm:$0xff]   ;;  %v10258_v60 = vld [vmem:[%s14826_s1 + $0x8cc] ss:$16 sps:$4 sm:$0xff]  }
  0xe3   :  { %6754 = vmatpush1.bf16.msra.mxu0 %v10169_v61  ;;  %7602 = vmatpush1.bf16.msra.mxu1 %v10172_v62  ;;  %v10253_v61 = vld [vmem:[%s14826_s1 + $0x8c0] ss:$16 sps:$4 sm:$0xff]   ;;  %v10256_v62 = vld [vmem:[%s14826_s1 + $0x8c8] ss:$16 sps:$4 sm:$0xff]  }
  0xe4   :  { %6755 = vmatprep.subr.bf16.mxu0 %v10177_v63  ;;  %7603 = vmatprep.subr.bf16.mxu1 %v10180_v0  ;;  %v10261_v63 = vld [vmem:[%s14826_s1 + $0x8e4] ss:$16 sps:$4 sm:$0xff]   ;;  %v10264_v0 = vld [vmem:[%s14826_s1 + $0x8ec] ss:$16 sps:$4 sm:$0xff]  }
  0xe7   :  { %6756 = vmatpush1.bf16.msra.mxu0 %v10175_v1  ;;  %7604 = vmatpush1.bf16.msra.mxu1 %v10178_v2  ;;  %v10259_v1 = vld [vmem:[%s14826_s1 + $0x8e0] ss:$16 sps:$4 sm:$0xff]   ;;  %v10262_v2 = vld [vmem:[%s14826_s1 + $0x8e8] ss:$16 sps:$4 sm:$0xff]  }
  0xe8   :  { %6757 = vmatprep.subr.bf16.mxu0 %v10183_v3  ;;  %7605 = vmatprep.subr.bf16.mxu1 %v10186_v4  ;;  %v10267_v3 = vld [vmem:[%s14826_s1 + $0x904] ss:$16 sps:$4 sm:$0xff]   ;;  %v10270_v4 = vld [vmem:[%s14826_s1 + $0x90c] ss:$16 sps:$4 sm:$0xff]  }
  0xeb   :  { %6758 = vmatpush1.bf16.msra.mxu0 %v10181_v5  ;;  %7606 = vmatpush1.bf16.msra.mxu1 %v10184_v6  ;;  %v10265_v5 = vld [vmem:[%s14826_s1 + $0x900] ss:$16 sps:$4 sm:$0xff]   ;;  %v10268_v6 = vld [vmem:[%s14826_s1 + $0x908] ss:$16 sps:$4 sm:$0xff]  }
  0xec   :  { %6759 = vmatprep.subr.bf16.mxu0 %v10189_v7  ;;  %7607 = vmatprep.subr.bf16.mxu1 %v10192_v8  ;;  %v10273_v7 = vld [vmem:[%s14826_s1 + $0x924] ss:$16 sps:$4 sm:$0xff]   ;;  %v10276_v8 = vld [vmem:[%s14826_s1 + $0x92c] ss:$16 sps:$4 sm:$0xff]  }
  0xef   :  { %6760 = vmatpush1.bf16.msra.mxu0 %v10187_v9  ;;  %7608 = vmatpush1.bf16.msra.mxu1 %v10190_v10  ;;  %v10271_v9 = vld [vmem:[%s14826_s1 + $0x920] ss:$16 sps:$4 sm:$0xff]   ;;  %v10274_v10 = vld [vmem:[%s14826_s1 + $0x928] ss:$16 sps:$4 sm:$0xff]  }
  0xf0   :  { %6761 = vmatprep.subr.bf16.mxu0 %v10195_v11  ;;  %7609 = vmatprep.subr.bf16.mxu1 %v10198_v12  ;;  %v10279_v11 = vld [vmem:[%s14826_s1 + $0x944] ss:$16 sps:$4 sm:$0xff]   ;;  %v10282_v12 = vld [vmem:[%s14826_s1 + $0x94c] ss:$16 sps:$4 sm:$0xff]  }
  0xf3   :  { %6762 = vmatpush1.bf16.msra.mxu0 %v10193_v13  ;;  %7610 = vmatpush1.bf16.msra.mxu1 %v10196_v14  ;;  %v10277_v13 = vld [vmem:[%s14826_s1 + $0x940] ss:$16 sps:$4 sm:$0xff]   ;;  %v10280_v14 = vld [vmem:[%s14826_s1 + $0x948] ss:$16 sps:$4 sm:$0xff]  }
  0xf4   :  { %6763 = vmatprep.subr.bf16.mxu0 %v10201_v15  ;;  %7611 = vmatprep.subr.bf16.mxu1 %v10204_v16  ;;  %v10285_v15 = vld [vmem:[%s14826_s1 + $0x964] ss:$16 sps:$4 sm:$0xff]   ;;  %v10288_v16 = vld [vmem:[%s14826_s1 + $0x96c] ss:$16 sps:$4 sm:$0xff]  }
  0xf7   :  { %6764 = vmatpush1.bf16.msra.mxu0 %v10199_v17  ;;  %7612 = vmatpush1.bf16.msra.mxu1 %v10202_v18  ;;  %v10283_v17 = vld [vmem:[%s14826_s1 + $0x960] ss:$16 sps:$4 sm:$0xff]   ;;  %v10286_v18 = vld [vmem:[%s14826_s1 + $0x968] ss:$16 sps:$4 sm:$0xff]  }
  0xf8   :  { %6765 = vmatprep.subr.bf16.mxu0 %v10207_v19  ;;  %7613 = vmatprep.subr.bf16.mxu1 %v10210_v20  ;;  %v10291_v19 = vld [vmem:[%s14826_s1 + $0x984] ss:$16 sps:$4 sm:$0xff]   ;;  %v10294_v20 = vld [vmem:[%s14826_s1 + $0x98c] ss:$16 sps:$4 sm:$0xff]  }
  0xfb   :  { %6766 = vmatpush1.bf16.msra.mxu0 %v10205_v21  ;;  %7614 = vmatpush1.bf16.msra.mxu1 %v10208_v22  ;;  %v10289_v21 = vld [vmem:[%s14826_s1 + $0x980] ss:$16 sps:$4 sm:$0xff]   ;;  %v10292_v22 = vld [vmem:[%s14826_s1 + $0x988] ss:$16 sps:$4 sm:$0xff]  }
  0xfc   :  { %6767 = vmatprep.subr.bf16.mxu0 %v10213_v23  ;;  %7615 = vmatprep.subr.bf16.mxu1 %v10216_v24  ;;  %v10297_v23 = vld [vmem:[%s14826_s1 + $0x9a4] ss:$16 sps:$4 sm:$0xff]   ;;  %v10300_v24 = vld [vmem:[%s14826_s1 + $0x9ac] ss:$16 sps:$4 sm:$0xff]  }
  0xff   :  { %6768 = vmatpush1.bf16.msra.mxu0 %v10211_v26  ;;  %7616 = vmatpush1.bf16.msra.mxu1 %v10214_v25  ;;  %v10295_v26 = vld [vmem:[%s14826_s1 + $0x9a0] ss:$16 sps:$4 sm:$0xff]   ;;  %v10298_v25 = vld [vmem:[%s14826_s1 + $0x9a8] ss:$16 sps:$4 sm:$0xff]  }
 0x100   :  { %6790 = vmatprep.subr.bf16.mxu0 %v10219_v27  ;;  %7638 = vmatprep.subr.bf16.mxu1 %v10222_v28  ;;  %v10303_v27 = vld [vmem:[%s14826_s1 + $0x9c4] ss:$16 sps:$4 sm:$0xff]   ;;  %v10306_v28 = vld [vmem:[%s14826_s1 + $0x9cc] ss:$16 sps:$4 sm:$0xff]  }
 0x102   :  { %6770 = vmatmul.mubr.bf16.vlgmr.msra.gmra.mrb[0].mxu0 %v8495_v30  ;;  %7618 = vmatmul.mubr.bf16.vlgmr.msra.gmra.mrb[0].mxu1 %v8495_v30  ;;  %v10304_v30 = vld [vmem:[%s14826_s1 + $0x9c8] ss:$16 sps:$4 sm:$0xff]  }
 0x103   :  { %6791 = vmatpush1.bf16.msra.mxu0 %v10217_v32  ;;  %7639 = vmatpush1.bf16.msra.mxu1 %v10220_v34  ;;  %v10312_v32 = vld [vmem:[%s14826_s1 + $0x9ec] ss:$16 sps:$4 sm:$0xff]   ;;  %v10307_v34 = vld [vmem:[%s14826_s1 + $0x9e0] ss:$16 sps:$4 sm:$0xff]  }
 0x104   :  { %6792 = vmatprep.subr.bf16.mxu0 %v10225_v36  ;;  %7640 = vmatprep.subr.bf16.mxu1 %v10228_v33  ;;  %v10310_v36 = vld [vmem:[%s14826_s1 + $0x9e8] ss:$16 sps:$4 sm:$0xff]   ;;  %v10315_v33 = vld [vmem:[%s14826_s1 + $0xa04] ss:$16 sps:$4 sm:$0xff]  }
 0x105   :  { %6779 = vmatprep.mubr.bf16.mxu0 %v8528_v35  ;;  %7627 = vmatprep.mubr.bf16.mxu1 %v8528_v35  ;;  %v10318_v35 = vld [vmem:[%s14826_s1 + $0xa0c] ss:$16 sps:$4 sm:$0xff]  }
 0x107   :  { %6793 = vmatpush1.bf16.msra.mxu0 %v10223_v37  ;;  %7641 = vmatpush1.bf16.msra.mxu1 %v10226_v38  ;;  %v86_v37 = vld [vmem:[%s14827_s0 + $0x120] sm:$0xff] }
 0x108   :  { %6794 = vmatprep.subr.bf16.mxu0 %v10231_v39  ;;  %7642 = vmatprep.subr.bf16.mxu1 %v10234_v40  ;;  %v102_v38 = vld [vmem:[%s14827_s0 + $0x1a0] sm:$0xff]  ;;  %v8497_v39 = vcombine.low %v12267_v41, %v12272_v43  ;;  %v10324_v41 = vld [vmem:[%s14826_s1 + $0xa2c] ss:$16 sps:$4 sm:$0xff]  }
 0x109   :  { %v10313_v40 = vld [vmem:[%s14826_s1 + $0xa00] ss:$16 sps:$4 sm:$0xff]  }
 0x10a   :  { %6780 = vmatmul.mubr.bf16.gmra.mrb[4].mxu0 %v8527_v42  ;;  %7628 = vmatmul.mubr.bf16.gmra.mrb[4].mxu1 %v8527_v42  ;;  %v10316_v42 = vld [vmem:[%s14826_s1 + $0xa08] ss:$16 sps:$4 sm:$0xff]   ;;  %v10319_v43 = vld [vmem:[%s14826_s1 + $0xa20] ss:$16 sps:$4 sm:$0xff]  }
 0x10b   :  { %6795 = vmatpush1.bf16.msra.mxu0 %v10229_v44  ;;  %7643 = vmatpush1.bf16.msra.mxu1 %v10232_v45  ;;  %v10321_v44 = vld [vmem:[%s14826_s1 + $0xa24] ss:$16 sps:$4 sm:$0xff]   ;;  %v10322_v45 = vld [vmem:[%s14826_s1 + $0xa28] ss:$16 sps:$4 sm:$0xff]  }
 0x10c   :  { %6796 = vmatprep.subr.bf16.mxu0 %v10237_v46  ;;  %7644 = vmatprep.subr.bf16.mxu1 %v10240_v47  ;;  %v8530_v46 = vcombine.high %v86_v37, %v102_v38  ;;  %v10327_v47 = vld [vmem:[%s14826_s1 + $0xa44] ss:$16 sps:$4 sm:$0xff]  }
 0x10d   :  { %6822 = vmatprep.mubr.bf16.mxu0 %v8498_v48  ;;  %7670 = vmatprep.mubr.bf16.mxu1 %v8498_v48  ;;  %v10330_v48 = vld [vmem:[%s14826_s1 + $0xa4c] ss:$16 sps:$4 sm:$0xff]  }
 0x10f   :  { %6797 = vmatpush1.bf16.msra.mxu0 %v10235_v49  ;;  %7645 = vmatpush1.bf16.msra.mxu1 %v10238_v50  ;;  %v12479_v49 = vld [vmem:[%s14827_s0 + $0x28] sm:$0xff] }
 0x110   :  { %6798 = vmatprep.subr.bf16.mxu0 %v10243_v51  ;;  %7646 = vmatprep.subr.bf16.mxu1 %v10246_v52  ;;  %v12484_v50 = vld [vmem:[%s14827_s0 + $0xa8] sm:$0xff]  ;;  %v8529_v51 = vcombine.low %v86_v37, %v102_v38  ;;  %v10325_v52 = vld [vmem:[%s14826_s1 + $0xa40] ss:$16 sps:$4 sm:$0xff]  }
 0x111   :  { %v10397_v37 = vld [vmem:[%s14826_s1 + $0xbc0] ss:$16 sps:$4 sm:$0xff]   ;;  %v10400_v38 = vld [vmem:[%s14826_s1 + $0xbc8] ss:$16 sps:$4 sm:$0xff]  }
 0x113   :  { %6799 = vmatpush1.bf16.msra.mxu0 %v10241_v53  ;;  %7647 = vmatpush1.bf16.msra.mxu1 %v10244_v54  ;;  %v10328_v53 = vld [vmem:[%s14826_s1 + $0xa48] ss:$16 sps:$4 sm:$0xff]   ;;  %v10333_v54 = vld [vmem:[%s14826_s1 + $0xa64] ss:$16 sps:$4 sm:$0xff]  }
 0x114   :  { %6800 = vmatprep.subr.bf16.mxu0 %v10249_v55  ;;  %7648 = vmatprep.subr.bf16.mxu1 %v10252_v56  ;;  %v10336_v55 = vld [vmem:[%s14826_s1 + $0xa6c] ss:$16 sps:$4 sm:$0xff]   ;;  %v8500_v56 = vcombine.high %v12479_v49, %v12484_v50 }
 0x117   :  { %6801 = vmatpush1.bf16.msra.mxu0 %v10247_v57  ;;  %7649 = vmatpush1.bf16.msra.mxu1 %v10250_v58  ;;  %v10331_v57 = vld [vmem:[%s14826_s1 + $0xa60] ss:$16 sps:$4 sm:$0xff]   ;;  %v10334_v58 = vld [vmem:[%s14826_s1 + $0xa68] ss:$16 sps:$4 sm:$0xff]  }
 0x118   :  { %6802 = vmatprep.subr.bf16.mxu0 %v10255_v59  ;;  %7650 = vmatprep.subr.bf16.mxu1 %v10258_v60  ;;  %v10339_v59 = vld [vmem:[%s14826_s1 + $0xa84] ss:$16 sps:$4 sm:$0xff]   ;;  %v10342_v60 = vld [vmem:[%s14826_s1 + $0xa8c] ss:$16 sps:$4 sm:$0xff]  }
 0x11b   :  { %6803 = vmatpush1.bf16.msra.mxu0 %v10253_v61  ;;  %7651 = vmatpush1.bf16.msra.mxu1 %v10256_v62  ;;  %v10337_v61 = vld [vmem:[%s14826_s1 + $0xa80] ss:$16 sps:$4 sm:$0xff]   ;;  %v10340_v62 = vld [vmem:[%s14826_s1 + $0xa88] ss:$16 sps:$4 sm:$0xff]  }
 0x11c   :  { %6804 = vmatprep.subr.bf16.mxu0 %v10261_v63  ;;  %7652 = vmatprep.subr.bf16.mxu1 %v10264_v0  ;;  %v10345_v63 = vld [vmem:[%s14826_s1 + $0xaa4] ss:$16 sps:$4 sm:$0xff]   ;;  %v10348_v0 = vld [vmem:[%s14826_s1 + $0xaac] ss:$16 sps:$4 sm:$0xff]  }
 0x11f   :  { %6805 = vmatpush1.bf16.msra.mxu0 %v10259_v1  ;;  %7653 = vmatpush1.bf16.msra.mxu1 %v10262_v2  ;;  %v10343_v1 = vld [vmem:[%s14826_s1 + $0xaa0] ss:$16 sps:$4 sm:$0xff]   ;;  %v10346_v2 = vld [vmem:[%s14826_s1 + $0xaa8] ss:$16 sps:$4 sm:$0xff]  }
 0x120   :  { %6806 = vmatprep.subr.bf16.mxu0 %v10267_v3  ;;  %7654 = vmatprep.subr.bf16.mxu1 %v10270_v4  ;;  %v10351_v3 = vld [vmem:[%s14826_s1 + $0xac4] ss:$16 sps:$4 sm:$0xff]   ;;  %v10354_v4 = vld [vmem:[%s14826_s1 + $0xacc] ss:$16 sps:$4 sm:$0xff]  }
 0x123   :  { %6807 = vmatpush1.bf16.msra.mxu0 %v10265_v5  ;;  %7655 = vmatpush1.bf16.msra.mxu1 %v10268_v6  ;;  %v10349_v5 = vld [vmem:[%s14826_s1 + $0xac0] ss:$16 sps:$4 sm:$0xff]   ;;  %v10352_v6 = vld [vmem:[%s14826_s1 + $0xac8] ss:$16 sps:$4 sm:$0xff]  }
 0x124   :  { %6808 = vmatprep.subr.bf16.mxu0 %v10273_v7  ;;  %7656 = vmatprep.subr.bf16.mxu1 %v10276_v8  ;;  %v10357_v7 = vld [vmem:[%s14826_s1 + $0xae4] ss:$16 sps:$4 sm:$0xff]   ;;  %v10360_v8 = vld [vmem:[%s14826_s1 + $0xaec] ss:$16 sps:$4 sm:$0xff]  }
 0x127   :  { %6809 = vmatpush1.bf16.msra.mxu0 %v10271_v9  ;;  %7657 = vmatpush1.bf16.msra.mxu1 %v10274_v10  ;;  %v10355_v9 = vld [vmem:[%s14826_s1 + $0xae0] ss:$16 sps:$4 sm:$0xff]   ;;  %v10358_v10 = vld [vmem:[%s14826_s1 + $0xae8] ss:$16 sps:$4 sm:$0xff]  }
 0x128   :  { %6810 = vmatprep.subr.bf16.mxu0 %v10279_v11  ;;  %7658 = vmatprep.subr.bf16.mxu1 %v10282_v12  ;;  %v10363_v11 = vld [vmem:[%s14826_s1 + $0xb04] ss:$16 sps:$4 sm:$0xff]   ;;  %v10366_v12 = vld [vmem:[%s14826_s1 + $0xb0c] ss:$16 sps:$4 sm:$0xff]  }
 0x12b   :  { %6811 = vmatpush1.bf16.msra.mxu0 %v10277_v13  ;;  %7659 = vmatpush1.bf16.msra.mxu1 %v10280_v14  ;;  %v10361_v13 = vld [vmem:[%s14826_s1 + $0xb00] ss:$16 sps:$4 sm:$0xff]   ;;  %v10364_v14 = vld [vmem:[%s14826_s1 + $0xb08] ss:$16 sps:$4 sm:$0xff]  }
 0x12c   :  { %6812 = vmatprep.subr.bf16.mxu0 %v10285_v15  ;;  %7660 = vmatprep.subr.bf16.mxu1 %v10288_v16  ;;  %v10369_v15 = vld [vmem:[%s14826_s1 + $0xb24] ss:$16 sps:$4 sm:$0xff]   ;;  %v10372_v16 = vld [vmem:[%s14826_s1 + $0xb2c] ss:$16 sps:$4 sm:$0xff]  }
 0x12f   :  { %6813 = vmatpush1.bf16.msra.mxu0 %v10283_v17  ;;  %7661 = vmatpush1.bf16.msra.mxu1 %v10286_v18  ;;  %v10367_v17 = vld [vmem:[%s14826_s1 + $0xb20] ss:$16 sps:$4 sm:$0xff]   ;;  %v10370_v18 = vld [vmem:[%s14826_s1 + $0xb28] ss:$16 sps:$4 sm:$0xff]  }
 0x130   :  { %6814 = vmatprep.subr.bf16.mxu0 %v10291_v19  ;;  %7662 = vmatprep.subr.bf16.mxu1 %v10294_v20  ;;  %v10375_v19 = vld [vmem:[%s14826_s1 + $0xb44] ss:$16 sps:$4 sm:$0xff]   ;;  %v10378_v20 = vld [vmem:[%s14826_s1 + $0xb4c] ss:$16 sps:$4 sm:$0xff]  }
 0x133   :  { %6815 = vmatpush1.bf16.msra.mxu0 %v10289_v21  ;;  %7663 = vmatpush1.bf16.msra.mxu1 %v10292_v22  ;;  %v10373_v21 = vld [vmem:[%s14826_s1 + $0xb40] ss:$16 sps:$4 sm:$0xff]   ;;  %v10376_v22 = vld [vmem:[%s14826_s1 + $0xb48] ss:$16 sps:$4 sm:$0xff]  }
 0x134   :  { %6816 = vmatprep.subr.bf16.mxu0 %v10297_v23  ;;  %7664 = vmatprep.subr.bf16.mxu1 %v10300_v24  ;;  %v10381_v23 = vld [vmem:[%s14826_s1 + $0xb64] ss:$16 sps:$4 sm:$0xff]   ;;  %v10384_v24 = vld [vmem:[%s14826_s1 + $0xb6c] ss:$16 sps:$4 sm:$0xff]  }
 0x137   :  { %6817 = vmatpush1.bf16.msra.mxu0 %v10295_v26  ;;  %7665 = vmatpush1.bf16.msra.mxu1 %v10298_v25  ;;  %v10379_v26 = vld [vmem:[%s14826_s1 + $0xb60] ss:$16 sps:$4 sm:$0xff]   ;;  %v10382_v25 = vld [vmem:[%s14826_s1 + $0xb68] ss:$16 sps:$4 sm:$0xff]  }
 0x138   :  { %6818 = vmatprep.subr.bf16.mxu0 %v10303_v27  ;;  %7666 = vmatprep.subr.bf16.mxu1 %v10306_v28  ;;  %v10387_v27 = vld [vmem:[%s14826_s1 + $0xb84] ss:$16 sps:$4 sm:$0xff]   ;;  %v10390_v28 = vld [vmem:[%s14826_s1 + $0xb8c] ss:$16 sps:$4 sm:$0xff]  }
 0x13b   :  { %6819 = vmatpush1.bf16.msra.mxu0 %v10301_v29  ;;  %7667 = vmatpush1.bf16.msra.mxu1 %v10304_v30  ;;  %v10385_v29 = vld [vmem:[%s14826_s1 + $0xb80] ss:$16 sps:$4 sm:$0xff]   ;;  %v10388_v30 = vld [vmem:[%s14826_s1 + $0xb88] ss:$16 sps:$4 sm:$0xff]  }
 0x13c   :  { %6820 = vmatprep.subr.bf16.mxu0 %v10309_v31  ;;  %7668 = vmatprep.subr.bf16.mxu1 %v10312_v32  ;;  %v10393_v31 = vld [vmem:[%s14826_s1 + $0xba4] ss:$16 sps:$4 sm:$0xff]   ;;  %v10396_v32 = vld [vmem:[%s14826_s1 + $0xbac] ss:$16 sps:$4 sm:$0xff]  }
 0x13f   :  { %6821 = vmatpush1.bf16.msra.mxu0 %v10307_v34  ;;  %7669 = vmatpush1.bf16.msra.mxu1 %v10310_v36  ;;  %v10391_v34 = vld [vmem:[%s14826_s1 + $0xba0] ss:$16 sps:$4 sm:$0xff]   ;;  %v10394_v36 = vld [vmem:[%s14826_s1 + $0xba8] ss:$16 sps:$4 sm:$0xff]  }
 0x140   :  { %6843 = vmatprep.subr.bf16.mxu0 %v10315_v33  ;;  %7691 = vmatprep.subr.bf16.mxu1 %v10318_v35  ;;  %v10399_v33 = vld [vmem:[%s14826_s1 + $0xbc4] ss:$16 sps:$4 sm:$0xff]   ;;  %v10402_v35 = vld [vmem:[%s14826_s1 + $0xbcc] ss:$16 sps:$4 sm:$0xff]  }
 0x142   :  { %6823 = vmatmul.mubr.bf16.vlgmr.msra.gmra.mrb[0].mxu0 %v8497_v39  ;;  %7671 = vmatmul.mubr.bf16.vlgmr.msra.gmra.mrb[0].mxu1 %v8497_v39  ;;  %v10405_v39 = vld [vmem:[%s14826_s1 + $0xbe4] ss:$16 sps:$4 sm:$0xff]  }
 0x143   :  { %6844 = vmatpush1.bf16.msra.mxu0 %v10313_v40  ;;  %7692 = vmatpush1.bf16.msra.mxu1 %v10316_v42  ;;  %v10408_v40 = vld [vmem:[%s14826_s1 + $0xbec] ss:$16 sps:$4 sm:$0xff]   ;;  %v10403_v42 = vld [vmem:[%s14826_s1 + $0xbe0] ss:$16 sps:$4 sm:$0xff]  }
 0x144   :  { %6845 = vmatprep.subr.bf16.mxu0 %v10321_v44  ;;  %7693 = vmatprep.subr.bf16.mxu1 %v10324_v41  ;;  %v10406_v44 = vld [vmem:[%s14826_s1 + $0xbe8] ss:$16 sps:$4 sm:$0xff]   ;;  %v10411_v41 = vld [vmem:[%s14826_s1 + $0xc04] ss:$16 sps:$4 sm:$0xff]  }
 0x145   :  { %6832 = vmatprep.mubr.bf16.mxu0 %v8530_v46  ;;  %7680 = vmatprep.mubr.bf16.mxu1 %v8530_v46  ;;  %v103_v46 = vld [vmem:[%s14827_s0 + $0x1a8] sm:$0xff] }
 0x147   :  { %6846 = vmatpush1.bf16.msra.mxu0 %v10319_v43  ;;  %7694 = vmatpush1.bf16.msra.mxu1 %v10322_v45  ;;  %v10414_v43 = vld [vmem:[%s14826_s1 + $0xc0c] ss:$16 sps:$4 sm:$0xff]  }
 0x148   :  { %6847 = vmatprep.subr.bf16.mxu0 %v10327_v47  ;;  %7695 = vmatprep.subr.bf16.mxu1 %v10330_v48  ;;  %v87_v45 = vld [vmem:[%s14827_s0 + $0x128] sm:$0xff]  ;;  %v8499_v47 = vcombine.low %v12479_v49, %v12484_v50  ;;  %v10409_v48 = vld [vmem:[%s14826_s1 + $0xc00] ss:$16 sps:$4 sm:$0xff]  }
 0x149   :  { %v10420_v49 = vld [vmem:[%s14826_s1 + $0xc2c] ss:$16 sps:$4 sm:$0xff]   ;;  %v10415_v50 = vld [vmem:[%s14826_s1 + $0xc20] ss:$16 sps:$4 sm:$0xff]  }
 0x14a   :  { %6833 = vmatmul.mubr.bf16.gmra.mrb[4].mxu0 %v8529_v51  ;;  %7681 = vmatmul.mubr.bf16.gmra.mrb[4].mxu1 %v8529_v51  ;;  %v10412_v51 = vld [vmem:[%s14826_s1 + $0xc08] ss:$16 sps:$4 sm:$0xff]  }
 0x14b   :  { %6848 = vmatpush1.bf16.msra.mxu0 %v10325_v52  ;;  %7696 = vmatpush1.bf16.msra.mxu1 %v10328_v53  ;;  %v10417_v52 = vld [vmem:[%s14826_s1 + $0xc24] ss:$16 sps:$4 sm:$0xff]   ;;  %v10418_v53 = vld [vmem:[%s14826_s1 + $0xc28] ss:$16 sps:$4 sm:$0xff]  }
 0x14c   :  { %6849 = vmatprep.subr.bf16.mxu0 %v10333_v54  ;;  %7697 = vmatprep.subr.bf16.mxu1 %v10336_v55  ;;  %v8532_v54 = vcombine.high %v87_v45, %v103_v46  ;;  %v10423_v55 = vld [vmem:[%s14826_s1 + $0xc44] ss:$16 sps:$4 sm:$0xff]  }
 0x14d   :  { %6875 = vmatprep.mubr.bf16.mxu0 %v8500_v56  ;;  %7723 = vmatprep.mubr.bf16.mxu1 %v8500_v56  ;;  %v10426_v56 = vld [vmem:[%s14826_s1 + $0xc4c] ss:$16 sps:$4 sm:$0xff]  }
 0x14f   :  { %6850 = vmatpush1.bf16.msra.mxu0 %v10331_v57  ;;  %7698 = vmatpush1.bf16.msra.mxu1 %v10334_v58  ;;  %v12691_v57 = vld [vmem:[%s14827_s0 + $0x30] sm:$0xff] }
 0x150   :  { %6851 = vmatprep.subr.bf16.mxu0 %v10339_v59  ;;  %7699 = vmatprep.subr.bf16.mxu1 %v10342_v60  ;;  %v12696_v58 = vld [vmem:[%s14827_s0 + $0xb0] sm:$0xff]  ;;  %v8531_v59 = vcombine.low %v87_v45, %v103_v46  ;;  %v10496_v46 = vld [vmem:[%s14826_s1 + $0xdc8] ss:$16 sps:$4 sm:$0xff]  }
 0x151   :  { %v10421_v60 = vld [vmem:[%s14826_s1 + $0xc40] ss:$16 sps:$4 sm:$0xff]  }
 0x152   :  { %v10493_v45 = vld [vmem:[%s14826_s1 + $0xdc0] ss:$16 sps:$4 sm:$0xff]  }
 0x153   :  { %6852 = vmatpush1.bf16.msra.mxu0 %v10337_v61  ;;  %7700 = vmatpush1.bf16.msra.mxu1 %v10340_v62  ;;  %v10424_v61 = vld [vmem:[%s14826_s1 + $0xc48] ss:$16 sps:$4 sm:$0xff]   ;;  %v10429_v62 = vld [vmem:[%s14826_s1 + $0xc64] ss:$16 sps:$4 sm:$0xff]  }
 0x154   :  { %6853 = vmatprep.subr.bf16.mxu0 %v10345_v63  ;;  %7701 = vmatprep.subr.bf16.mxu1 %v10348_v0  ;;  %v10432_v63 = vld [vmem:[%s14826_s1 + $0xc6c] ss:$16 sps:$4 sm:$0xff]   ;;  %v8502_v0 = vcombine.high %v12691_v57, %v12696_v58 }
 0x157   :  { %6854 = vmatpush1.bf16.msra.mxu0 %v10343_v1  ;;  %7702 = vmatpush1.bf16.msra.mxu1 %v10346_v2  ;;  %v10427_v1 = vld [vmem:[%s14826_s1 + $0xc60] ss:$16 sps:$4 sm:$0xff]   ;;  %v10430_v2 = vld [vmem:[%s14826_s1 + $0xc68] ss:$16 sps:$4 sm:$0xff]  }
 0x158   :  { %6855 = vmatprep.subr.bf16.mxu0 %v10351_v3  ;;  %7703 = vmatprep.subr.bf16.mxu1 %v10354_v4  ;;  %v10435_v3 = vld [vmem:[%s14826_s1 + $0xc84] ss:$16 sps:$4 sm:$0xff]   ;;  %v10438_v4 = vld [vmem:[%s14826_s1 + $0xc8c] ss:$16 sps:$4 sm:$0xff]  }
 0x15b   :  { %6856 = vmatpush1.bf16.msra.mxu0 %v10349_v5  ;;  %7704 = vmatpush1.bf16.msra.mxu1 %v10352_v6  ;;  %v10433_v5 = vld [vmem:[%s14826_s1 + $0xc80] ss:$16 sps:$4 sm:$0xff]   ;;  %v10436_v6 = vld [vmem:[%s14826_s1 + $0xc88] ss:$16 sps:$4 sm:$0xff]  }
 0x15c   :  { %6857 = vmatprep.subr.bf16.mxu0 %v10357_v7  ;;  %7705 = vmatprep.subr.bf16.mxu1 %v10360_v8  ;;  %v10441_v7 = vld [vmem:[%s14826_s1 + $0xca4] ss:$16 sps:$4 sm:$0xff]   ;;  %v10444_v8 = vld [vmem:[%s14826_s1 + $0xcac] ss:$16 sps:$4 sm:$0xff]  }
 0x15f   :  { %6858 = vmatpush1.bf16.msra.mxu0 %v10355_v9  ;;  %7706 = vmatpush1.bf16.msra.mxu1 %v10358_v10  ;;  %v10439_v9 = vld [vmem:[%s14826_s1 + $0xca0] ss:$16 sps:$4 sm:$0xff]   ;;  %v10442_v10 = vld [vmem:[%s14826_s1 + $0xca8] ss:$16 sps:$4 sm:$0xff]  }
 0x160   :  { %6859 = vmatprep.subr.bf16.mxu0 %v10363_v11  ;;  %7707 = vmatprep.subr.bf16.mxu1 %v10366_v12  ;;  %v10447_v11 = vld [vmem:[%s14826_s1 + $0xcc4] ss:$16 sps:$4 sm:$0xff]   ;;  %v10450_v12 = vld [vmem:[%s14826_s1 + $0xccc] ss:$16 sps:$4 sm:$0xff]  }
 0x163   :  { %6860 = vmatpush1.bf16.msra.mxu0 %v10361_v13  ;;  %7708 = vmatpush1.bf16.msra.mxu1 %v10364_v14  ;;  %v10445_v13 = vld [vmem:[%s14826_s1 + $0xcc0] ss:$16 sps:$4 sm:$0xff]   ;;  %v10448_v14 = vld [vmem:[%s14826_s1 + $0xcc8] ss:$16 sps:$4 sm:$0xff]  }
 0x164   :  { %6861 = vmatprep.subr.bf16.mxu0 %v10369_v15  ;;  %7709 = vmatprep.subr.bf16.mxu1 %v10372_v16  ;;  %v10453_v15 = vld [vmem:[%s14826_s1 + $0xce4] ss:$16 sps:$4 sm:$0xff]   ;;  %v10456_v16 = vld [vmem:[%s14826_s1 + $0xcec] ss:$16 sps:$4 sm:$0xff]  }
 0x167   :  { %6862 = vmatpush1.bf16.msra.mxu0 %v10367_v17  ;;  %7710 = vmatpush1.bf16.msra.mxu1 %v10370_v18  ;;  %v10451_v17 = vld [vmem:[%s14826_s1 + $0xce0] ss:$16 sps:$4 sm:$0xff]   ;;  %v10454_v18 = vld [vmem:[%s14826_s1 + $0xce8] ss:$16 sps:$4 sm:$0xff]  }
 0x168   :  { %6863 = vmatprep.subr.bf16.mxu0 %v10375_v19  ;;  %7711 = vmatprep.subr.bf16.mxu1 %v10378_v20  ;;  %v10459_v19 = vld [vmem:[%s14826_s1 + $0xd04] ss:$16 sps:$4 sm:$0xff]   ;;  %v10462_v20 = vld [vmem:[%s14826_s1 + $0xd0c] ss:$16 sps:$4 sm:$0xff]  }
 0x16b   :  { %6864 = vmatpush1.bf16.msra.mxu0 %v10373_v21  ;;  %7712 = vmatpush1.bf16.msra.mxu1 %v10376_v22  ;;  %v10457_v21 = vld [vmem:[%s14826_s1 + $0xd00] ss:$16 sps:$4 sm:$0xff]   ;;  %v10460_v22 = vld [vmem:[%s14826_s1 + $0xd08] ss:$16 sps:$4 sm:$0xff]  }
 0x16c   :  { %6865 = vmatprep.subr.bf16.mxu0 %v10381_v23  ;;  %7713 = vmatprep.subr.bf16.mxu1 %v10384_v24  ;;  %v10465_v23 = vld [vmem:[%s14826_s1 + $0xd24] ss:$16 sps:$4 sm:$0xff]   ;;  %v10468_v24 = vld [vmem:[%s14826_s1 + $0xd2c] ss:$16 sps:$4 sm:$0xff]  }
 0x16f   :  { %6866 = vmatpush1.bf16.msra.mxu0 %v10379_v26  ;;  %7714 = vmatpush1.bf16.msra.mxu1 %v10382_v25  ;;  %v10463_v26 = vld [vmem:[%s14826_s1 + $0xd20] ss:$16 sps:$4 sm:$0xff]   ;;  %v10466_v25 = vld [vmem:[%s14826_s1 + $0xd28] ss:$16 sps:$4 sm:$0xff]  }
 0x170   :  { %6867 = vmatprep.subr.bf16.mxu0 %v10387_v27  ;;  %7715 = vmatprep.subr.bf16.mxu1 %v10390_v28  ;;  %v10471_v27 = vld [vmem:[%s14826_s1 + $0xd44] ss:$16 sps:$4 sm:$0xff]   ;;  %v10474_v28 = vld [vmem:[%s14826_s1 + $0xd4c] ss:$16 sps:$4 sm:$0xff]  }
 0x173   :  { %6868 = vmatpush1.bf16.msra.mxu0 %v10385_v29  ;;  %7716 = vmatpush1.bf16.msra.mxu1 %v10388_v30  ;;  %v10469_v29 = vld [vmem:[%s14826_s1 + $0xd40] ss:$16 sps:$4 sm:$0xff]   ;;  %v10472_v30 = vld [vmem:[%s14826_s1 + $0xd48] ss:$16 sps:$4 sm:$0xff]  }
 0x174   :  { %6869 = vmatprep.subr.bf16.mxu0 %v10393_v31  ;;  %7717 = vmatprep.subr.bf16.mxu1 %v10396_v32  ;;  %v10477_v31 = vld [vmem:[%s14826_s1 + $0xd64] ss:$16 sps:$4 sm:$0xff]   ;;  %v10480_v32 = vld [vmem:[%s14826_s1 + $0xd6c] ss:$16 sps:$4 sm:$0xff]  }
 0x177   :  { %6870 = vmatpush1.bf16.msra.mxu0 %v10391_v34  ;;  %7718 = vmatpush1.bf16.msra.mxu1 %v10394_v36  ;;  %v10475_v34 = vld [vmem:[%s14826_s1 + $0xd60] ss:$16 sps:$4 sm:$0xff]   ;;  %v10478_v36 = vld [vmem:[%s14826_s1 + $0xd68] ss:$16 sps:$4 sm:$0xff]  }
 0x178   :  { %6871 = vmatprep.subr.bf16.mxu0 %v10399_v33  ;;  %7719 = vmatprep.subr.bf16.mxu1 %v10402_v35  ;;  %v10483_v33 = vld [vmem:[%s14826_s1 + $0xd84] ss:$16 sps:$4 sm:$0xff]   ;;  %v10486_v35 = vld [vmem:[%s14826_s1 + $0xd8c] ss:$16 sps:$4 sm:$0xff]  }
 0x17b   :  { %6872 = vmatpush1.bf16.msra.mxu0 %v10397_v37  ;;  %7720 = vmatpush1.bf16.msra.mxu1 %v10400_v38  ;;  %v10481_v37 = vld [vmem:[%s14826_s1 + $0xd80] ss:$16 sps:$4 sm:$0xff]   ;;  %v10484_v38 = vld [vmem:[%s14826_s1 + $0xd88] ss:$16 sps:$4 sm:$0xff]  }
 0x17c   :  { %6873 = vmatprep.subr.bf16.mxu0 %v10405_v39  ;;  %7721 = vmatprep.subr.bf16.mxu1 %v10408_v40  ;;  %v10489_v39 = vld [vmem:[%s14826_s1 + $0xda4] ss:$16 sps:$4 sm:$0xff]   ;;  %v10492_v40 = vld [vmem:[%s14826_s1 + $0xdac] ss:$16 sps:$4 sm:$0xff]  }
 0x17f   :  { %6874 = vmatpush1.bf16.msra.mxu0 %v10403_v42  ;;  %7722 = vmatpush1.bf16.msra.mxu1 %v10406_v44  ;;  %v10487_v42 = vld [vmem:[%s14826_s1 + $0xda0] ss:$16 sps:$4 sm:$0xff]   ;;  %v10490_v44 = vld [vmem:[%s14826_s1 + $0xda8] ss:$16 sps:$4 sm:$0xff]  }
 0x180   :  { %6896 = vmatprep.subr.bf16.mxu0 %v10411_v41  ;;  %7744 = vmatprep.subr.bf16.mxu1 %v10414_v43  ;;  %v10495_v41 = vld [vmem:[%s14826_s1 + $0xdc4] ss:$16 sps:$4 sm:$0xff]   ;;  %v10498_v43 = vld [vmem:[%s14826_s1 + $0xdcc] ss:$16 sps:$4 sm:$0xff]  }
 0x182   :  { %6876 = vmatmul.mubr.bf16.vlgmr.msra.gmra.mrb[0].mxu0 %v8499_v47  ;;  %7724 = vmatmul.mubr.bf16.vlgmr.msra.gmra.mrb[0].mxu1 %v8499_v47  ;;  %v10501_v47 = vld [vmem:[%s14826_s1 + $0xde4] ss:$16 sps:$4 sm:$0xff]  }
 0x183   :  { %6897 = vmatpush1.bf16.msra.mxu0 %v10409_v48  ;;  %7745 = vmatpush1.bf16.msra.mxu1 %v10412_v51  ;;  %v10504_v48 = vld [vmem:[%s14826_s1 + $0xdec] ss:$16 sps:$4 sm:$0xff]   ;;  %v10499_v51 = vld [vmem:[%s14826_s1 + $0xde0] ss:$16 sps:$4 sm:$0xff]  }
 0x184   :  { %6898 = vmatprep.subr.bf16.mxu0 %v10417_v52  ;;  %7746 = vmatprep.subr.bf16.mxu1 %v10420_v49  ;;  %v10502_v52 = vld [vmem:[%s14826_s1 + $0xde8] ss:$16 sps:$4 sm:$0xff]   ;;  %v10507_v49 = vld [vmem:[%s14826_s1 + $0xe04] ss:$16 sps:$4 sm:$0xff]  }
 0x185   :  { %6885 = vmatprep.mubr.bf16.mxu0 %v8532_v54  ;;  %7733 = vmatprep.mubr.bf16.mxu1 %v8532_v54  ;;  %v104_v54 = vld [vmem:[%s14827_s0 + $0x1b0] sm:$0xff] }
 0x187   :  { %6899 = vmatpush1.bf16.msra.mxu0 %v10415_v50  ;;  %7747 = vmatpush1.bf16.msra.mxu1 %v10418_v53  ;;  %v10510_v50 = vld [vmem:[%s14826_s1 + $0xe0c] ss:$16 sps:$4 sm:$0xff]   ;;  %v88_v53 = vld [vmem:[%s14827_s0 + $0x130] sm:$0xff] }
 0x188   :  { %6900 = vmatprep.subr.bf16.mxu0 %v10423_v55  ;;  %7748 = vmatprep.subr.bf16.mxu1 %v10426_v56  ;;  %v8501_v55 = vcombine.low %v12691_v57, %v12696_v58  ;;  %v10505_v56 = vld [vmem:[%s14826_s1 + $0xe00] ss:$16 sps:$4 sm:$0xff]   ;;  %v10516_v57 = vld [vmem:[%s14826_s1 + $0xe2c] ss:$16 sps:$4 sm:$0xff]  }
 0x189   :  { %v10511_v58 = vld [vmem:[%s14826_s1 + $0xe20] ss:$16 sps:$4 sm:$0xff]  }
 0x18a   :  { %6886 = vmatmul.mubr.bf16.gmra.mrb[4].mxu0 %v8531_v59  ;;  %7734 = vmatmul.mubr.bf16.gmra.mrb[4].mxu1 %v8531_v59  ;;  %v10508_v59 = vld [vmem:[%s14826_s1 + $0xe08] ss:$16 sps:$4 sm:$0xff]  }
 0x18b   :  { %6901 = vmatpush1.bf16.msra.mxu0 %v10421_v60  ;;  %7749 = vmatpush1.bf16.msra.mxu1 %v10424_v61  ;;  %v10513_v60 = vld [vmem:[%s14826_s1 + $0xe24] ss:$16 sps:$4 sm:$0xff]   ;;  %v10514_v61 = vld [vmem:[%s14826_s1 + $0xe28] ss:$16 sps:$4 sm:$0xff]  }
 0x18c   :  { %6902 = vmatprep.subr.bf16.mxu0 %v10429_v62  ;;  %7750 = vmatprep.subr.bf16.mxu1 %v10432_v63  ;;  %v8534_v62 = vcombine.high %v88_v53, %v104_v54  ;;  %v10519_v63 = vld [vmem:[%s14826_s1 + $0xe44] ss:$16 sps:$4 sm:$0xff]  }
 0x18d   :  { %6928 = vmatprep.mubr.bf16.mxu0 %v8502_v0  ;;  %7776 = vmatprep.mubr.bf16.mxu1 %v8502_v0  ;;  %v10522_v0 = vld [vmem:[%s14826_s1 + $0xe4c] ss:$16 sps:$4 sm:$0xff]  }
 0x18f   :  { %6903 = vmatpush1.bf16.msra.mxu0 %v10427_v1  ;;  %7751 = vmatpush1.bf16.msra.mxu1 %v10430_v2  ;;  %v12903_v1 = vld [vmem:[%s14827_s0 + $0x38] sm:$0xff] }
 0x190   :  { %6904 = vmatprep.subr.bf16.mxu0 %v10435_v3  ;;  %7752 = vmatprep.subr.bf16.mxu1 %v10438_v4  ;;  %v12908_v2 = vld [vmem:[%s14827_s0 + $0xb8] sm:$0xff]  ;;  %v8533_v3 = vcombine.low %v88_v53, %v104_v54  ;;  %v10517_v4 = vld [vmem:[%s14826_s1 + $0xe40] ss:$16 sps:$4 sm:$0xff]  }
 0x191   :  { %v10589_v53 = vld [vmem:[%s14826_s1 + $0xfc0] ss:$16 sps:$4 sm:$0xff]   ;;  %v10592_v54 = vld [vmem:[%s14826_s1 + $0xfc8] ss:$16 sps:$4 sm:$0xff]  }
 0x193   :  { %6905 = vmatpush1.bf16.msra.mxu0 %v10433_v5  ;;  %7753 = vmatpush1.bf16.msra.mxu1 %v10436_v6  ;;  %v10520_v5 = vld [vmem:[%s14826_s1 + $0xe48] ss:$16 sps:$4 sm:$0xff]   ;;  %v10525_v6 = vld [vmem:[%s14826_s1 + $0xe64] ss:$16 sps:$4 sm:$0xff]  }
 0x194   :  { %6906 = vmatprep.subr.bf16.mxu0 %v10441_v7  ;;  %7754 = vmatprep.subr.bf16.mxu1 %v10444_v8  ;;  %v10528_v7 = vld [vmem:[%s14826_s1 + $0xe6c] ss:$16 sps:$4 sm:$0xff]   ;;  %v8504_v8 = vcombine.high %v12903_v1, %v12908_v2 }
 0x197   :  { %6907 = vmatpush1.bf16.msra.mxu0 %v10439_v9  ;;  %7755 = vmatpush1.bf16.msra.mxu1 %v10442_v10  ;;  %v10523_v9 = vld [vmem:[%s14826_s1 + $0xe60] ss:$16 sps:$4 sm:$0xff]   ;;  %v10526_v10 = vld [vmem:[%s14826_s1 + $0xe68] ss:$16 sps:$4 sm:$0xff]  }
 0x198   :  { %6908 = vmatprep.subr.bf16.mxu0 %v10447_v11  ;;  %7756 = vmatprep.subr.bf16.mxu1 %v10450_v12  ;;  %v10531_v11 = vld [vmem:[%s14826_s1 + $0xe84] ss:$16 sps:$4 sm:$0xff]   ;;  %v10534_v12 = vld [vmem:[%s14826_s1 + $0xe8c] ss:$16 sps:$4 sm:$0xff]  }
 0x19b   :  { %6909 = vmatpush1.bf16.msra.mxu0 %v10445_v13  ;;  %7757 = vmatpush1.bf16.msra.mxu1 %v10448_v14  ;;  %v10529_v13 = vld [vmem:[%s14826_s1 + $0xe80] ss:$16 sps:$4 sm:$0xff]   ;;  %v10532_v14 = vld [vmem:[%s14826_s1 + $0xe88] ss:$16 sps:$4 sm:$0xff]  }
 0x19c   :  { %6910 = vmatprep.subr.bf16.mxu0 %v10453_v15  ;;  %7758 = vmatprep.subr.bf16.mxu1 %v10456_v16  ;;  %v10537_v15 = vld [vmem:[%s14826_s1 + $0xea4] ss:$16 sps:$4 sm:$0xff]   ;;  %v10540_v16 = vld [vmem:[%s14826_s1 + $0xeac] ss:$16 sps:$4 sm:$0xff]  }
 0x19f   :  { %6911 = vmatpush1.bf16.msra.mxu0 %v10451_v17  ;;  %7759 = vmatpush1.bf16.msra.mxu1 %v10454_v18  ;;  %v10535_v17 = vld [vmem:[%s14826_s1 + $0xea0] ss:$16 sps:$4 sm:$0xff]   ;;  %v10538_v18 = vld [vmem:[%s14826_s1 + $0xea8] ss:$16 sps:$4 sm:$0xff]  }
 0x1a0   :  { %6912 = vmatprep.subr.bf16.mxu0 %v10459_v19  ;;  %7760 = vmatprep.subr.bf16.mxu1 %v10462_v20  ;;  %v10543_v19 = vld [vmem:[%s14826_s1 + $0xec4] ss:$16 sps:$4 sm:$0xff]   ;;  %v10546_v20 = vld [vmem:[%s14826_s1 + $0xecc] ss:$16 sps:$4 sm:$0xff]  }
 0x1a3   :  { %6913 = vmatpush1.bf16.msra.mxu0 %v10457_v21  ;;  %7761 = vmatpush1.bf16.msra.mxu1 %v10460_v22  ;;  %v10541_v21 = vld [vmem:[%s14826_s1 + $0xec0] ss:$16 sps:$4 sm:$0xff]   ;;  %v10544_v22 = vld [vmem:[%s14826_s1 + $0xec8] ss:$16 sps:$4 sm:$0xff]  }
 0x1a4   :  { %6914 = vmatprep.subr.bf16.mxu0 %v10465_v23  ;;  %7762 = vmatprep.subr.bf16.mxu1 %v10468_v24  ;;  %v10549_v23 = vld [vmem:[%s14826_s1 + $0xee4] ss:$16 sps:$4 sm:$0xff]   ;;  %v10552_v24 = vld [vmem:[%s14826_s1 + $0xeec] ss:$16 sps:$4 sm:$0xff]  }
 0x1a7   :  { %6915 = vmatpush1.bf16.msra.mxu0 %v10463_v26  ;;  %7763 = vmatpush1.bf16.msra.mxu1 %v10466_v25  ;;  %v10547_v26 = vld [vmem:[%s14826_s1 + $0xee0] ss:$16 sps:$4 sm:$0xff]   ;;  %v10550_v25 = vld [vmem:[%s14826_s1 + $0xee8] ss:$16 sps:$4 sm:$0xff]  }
 0x1a8   :  { %6916 = vmatprep.subr.bf16.mxu0 %v10471_v27  ;;  %7764 = vmatprep.subr.bf16.mxu1 %v10474_v28  ;;  %v10555_v27 = vld [vmem:[%s14826_s1 + $0xf04] ss:$16 sps:$4 sm:$0xff]   ;;  %v10558_v28 = vld [vmem:[%s14826_s1 + $0xf0c] ss:$16 sps:$4 sm:$0xff]  }
 0x1ab   :  { %6917 = vmatpush1.bf16.msra.mxu0 %v10469_v29  ;;  %7765 = vmatpush1.bf16.msra.mxu1 %v10472_v30  ;;  %v10553_v29 = vld [vmem:[%s14826_s1 + $0xf00] ss:$16 sps:$4 sm:$0xff]   ;;  %v10556_v30 = vld [vmem:[%s14826_s1 + $0xf08] ss:$16 sps:$4 sm:$0xff]  }
 0x1ac   :  { %6918 = vmatprep.subr.bf16.mxu0 %v10477_v31  ;;  %7766 = vmatprep.subr.bf16.mxu1 %v10480_v32  ;;  %v10561_v31 = vld [vmem:[%s14826_s1 + $0xf24] ss:$16 sps:$4 sm:$0xff]   ;;  %v10564_v32 = vld [vmem:[%s14826_s1 + $0xf2c] ss:$16 sps:$4 sm:$0xff]  }
 0x1af   :  { %6919 = vmatpush1.bf16.msra.mxu0 %v10475_v34  ;;  %7767 = vmatpush1.bf16.msra.mxu1 %v10478_v36  ;;  %v10559_v34 = vld [vmem:[%s14826_s1 + $0xf20] ss:$16 sps:$4 sm:$0xff]   ;;  %v10562_v36 = vld [vmem:[%s14826_s1 + $0xf28] ss:$16 sps:$4 sm:$0xff]  }
 0x1b0   :  { %6920 = vmatprep.subr.bf16.mxu0 %v10483_v33  ;;  %7768 = vmatprep.subr.bf16.mxu1 %v10486_v35  ;;  %v10567_v33 = vld [vmem:[%s14826_s1 + $0xf44] ss:$16 sps:$4 sm:$0xff]   ;;  %v10570_v35 = vld [vmem:[%s14826_s1 + $0xf4c] ss:$16 sps:$4 sm:$0xff]  }
 0x1b3   :  { %6921 = vmatpush1.bf16.msra.mxu0 %v10481_v37  ;;  %7769 = vmatpush1.bf16.msra.mxu1 %v10484_v38  ;;  %v10565_v37 = vld [vmem:[%s14826_s1 + $0xf40] ss:$16 sps:$4 sm:$0xff]   ;;  %v10568_v38 = vld [vmem:[%s14826_s1 + $0xf48] ss:$16 sps:$4 sm:$0xff]  }
 0x1b4   :  { %6922 = vmatprep.subr.bf16.mxu0 %v10489_v39  ;;  %7770 = vmatprep.subr.bf16.mxu1 %v10492_v40  ;;  %v10573_v39 = vld [vmem:[%s14826_s1 + $0xf64] ss:$16 sps:$4 sm:$0xff]   ;;  %v10576_v40 = vld [vmem:[%s14826_s1 + $0xf6c] ss:$16 sps:$4 sm:$0xff]  }
 0x1b7   :  { %6923 = vmatpush1.bf16.msra.mxu0 %v10487_v42  ;;  %7771 = vmatpush1.bf16.msra.mxu1 %v10490_v44  ;;  %v10571_v42 = vld [vmem:[%s14826_s1 + $0xf60] ss:$16 sps:$4 sm:$0xff]   ;;  %v10574_v44 = vld [vmem:[%s14826_s1 + $0xf68] ss:$16 sps:$4 sm:$0xff]  }
 0x1b8   :  { %6924 = vmatprep.subr.bf16.mxu0 %v10495_v41  ;;  %7772 = vmatprep.subr.bf16.mxu1 %v10498_v43  ;;  %v10579_v41 = vld [vmem:[%s14826_s1 + $0xf84] ss:$16 sps:$4 sm:$0xff]   ;;  %v10582_v43 = vld [vmem:[%s14826_s1 + $0xf8c] ss:$16 sps:$4 sm:$0xff]  }
 0x1bb   :  { %6925 = vmatpush1.bf16.msra.mxu0 %v10493_v45  ;;  %7773 = vmatpush1.bf16.msra.mxu1 %v10496_v46  ;;  %v10577_v45 = vld [vmem:[%s14826_s1 + $0xf80] ss:$16 sps:$4 sm:$0xff]   ;;  %v10580_v46 = vld [vmem:[%s14826_s1 + $0xf88] ss:$16 sps:$4 sm:$0xff]  }
 0x1bc   :  { %6926 = vmatprep.subr.bf16.mxu0 %v10501_v47  ;;  %7774 = vmatprep.subr.bf16.mxu1 %v10504_v48  ;;  %v10585_v47 = vld [vmem:[%s14826_s1 + $0xfa4] ss:$16 sps:$4 sm:$0xff]   ;;  %v10588_v48 = vld [vmem:[%s14826_s1 + $0xfac] ss:$16 sps:$4 sm:$0xff]  }
 0x1bf   :  { %6927 = vmatpush1.bf16.msra.mxu0 %v10499_v51  ;;  %7775 = vmatpush1.bf16.msra.mxu1 %v10502_v52  ;;  %v10583_v51 = vld [vmem:[%s14826_s1 + $0xfa0] ss:$16 sps:$4 sm:$0xff]   ;;  %v10586_v52 = vld [vmem:[%s14826_s1 + $0xfa8] ss:$16 sps:$4 sm:$0xff]  }
 0x1c0   :  { %6949 = vmatprep.subr.bf16.mxu0 %v10507_v49  ;;  %7797 = vmatprep.subr.bf16.mxu1 %v10510_v50  ;;  %v10591_v49 = vld [vmem:[%s14826_s1 + $0xfc4] ss:$16 sps:$4 sm:$0xff]   ;;  %v10594_v50 = vld [vmem:[%s14826_s1 + $0xfcc] ss:$16 sps:$4 sm:$0xff]  }
 0x1c2   :  { %6929 = vmatmul.mubr.bf16.vlgmr.msra.gmra.mrb[0].mxu0 %v8501_v55  ;;  %7777 = vmatmul.mubr.bf16.vlgmr.msra.gmra.mrb[0].mxu1 %v8501_v55  ;;  %v10597_v55 = vld [vmem:[%s14826_s1 + $0xfe4] ss:$16 sps:$4 sm:$0xff]  }
 0x1c3   :  { %6950 = vmatpush1.bf16.msra.mxu0 %v10505_v56  ;;  %7798 = vmatpush1.bf16.msra.mxu1 %v10508_v59  ;;  %v10600_v56 = vld [vmem:[%s14826_s1 + $0xfec] ss:$16 sps:$4 sm:$0xff]   ;;  %v10595_v59 = vld [vmem:[%s14826_s1 + $0xfe0] ss:$16 sps:$4 sm:$0xff]  }
 0x1c4   :  { %6951 = vmatprep.subr.bf16.mxu0 %v10513_v60  ;;  %7799 = vmatprep.subr.bf16.mxu1 %v10516_v57  ;;  %v10598_v60 = vld [vmem:[%s14826_s1 + $0xfe8] ss:$16 sps:$4 sm:$0xff]   ;;  %v10603_v57 = vld [vmem:[%s14826_s1 + $0x1004] ss:$16 sps:$4 sm:$0xff]  }
 0x1c5   :  { %6938 = vmatprep.mubr.bf16.mxu0 %v8534_v62  ;;  %7786 = vmatprep.mubr.bf16.mxu1 %v8534_v62  ;;  %v105_v62 = vld [vmem:[%s14827_s0 + $0x1b8] sm:$0xff] }
 0x1c7   :  { %6952 = vmatpush1.bf16.msra.mxu0 %v10511_v58  ;;  %7800 = vmatpush1.bf16.msra.mxu1 %v10514_v61  ;;  %v10606_v58 = vld [vmem:[%s14826_s1 + $0x100c] ss:$16 sps:$4 sm:$0xff]  }
 0x1c8   :  { %6953 = vmatprep.subr.bf16.mxu0 %v10519_v63  ;;  %7801 = vmatprep.subr.bf16.mxu1 %v10522_v0  ;;  %v89_v61 = vld [vmem:[%s14827_s0 + $0x138] sm:$0xff]  ;;  %v8503_v63 = vcombine.low %v12903_v1, %v12908_v2  ;;  %v10601_v0 = vld [vmem:[%s14826_s1 + $0x1000] ss:$16 sps:$4 sm:$0xff]  }
 0x1c9   :  { %v10612_v1 = vld [vmem:[%s14826_s1 + $0x102c] ss:$16 sps:$4 sm:$0xff]   ;;  %v10607_v2 = vld [vmem:[%s14826_s1 + $0x1020] ss:$16 sps:$4 sm:$0xff]  }
 0x1ca   :  { %6939 = vmatmul.mubr.bf16.gmra.mrb[4].mxu0 %v8533_v3  ;;  %7787 = vmatmul.mubr.bf16.gmra.mrb[4].mxu1 %v8533_v3  ;;  %v10604_v3 = vld [vmem:[%s14826_s1 + $0x1008] ss:$16 sps:$4 sm:$0xff]  }
 0x1cb   :  { %6954 = vmatpush1.bf16.msra.mxu0 %v10517_v4  ;;  %7802 = vmatpush1.bf16.msra.mxu1 %v10520_v5  ;;  %v10609_v4 = vld [vmem:[%s14826_s1 + $0x1024] ss:$16 sps:$4 sm:$0xff]   ;;  %v10610_v5 = vld [vmem:[%s14826_s1 + $0x1028] ss:$16 sps:$4 sm:$0xff]  }
 0x1cc   :  { %6955 = vmatprep.subr.bf16.mxu0 %v10525_v6  ;;  %7803 = vmatprep.subr.bf16.mxu1 %v10528_v7  ;;  %v8536_v6 = vcombine.high %v89_v61, %v105_v62  ;;  %v10615_v7 = vld [vmem:[%s14826_s1 + $0x1044] ss:$16 sps:$4 sm:$0xff]  }
 0x1cd   :  { %6981 = vmatprep.mubr.bf16.mxu0 %v8504_v8  ;;  %7829 = vmatprep.mubr.bf16.mxu1 %v8504_v8  ;;  %v10618_v8 = vld [vmem:[%s14826_s1 + $0x104c] ss:$16 sps:$4 sm:$0xff]  }
 0x1cf   :  { %6956 = vmatpush1.bf16.msra.mxu0 %v10523_v9  ;;  %7804 = vmatpush1.bf16.msra.mxu1 %v10526_v10  ;;  %v13115_v9 = vld [vmem:[%s14827_s0 + $0x40] sm:$0xff] }
 0x1d0   :  { %6957 = vmatprep.subr.bf16.mxu0 %v10531_v11  ;;  %7805 = vmatprep.subr.bf16.mxu1 %v10534_v12  ;;  %v13120_v10 = vld [vmem:[%s14827_s0 + $0xc0] sm:$0xff]  ;;  %v8535_v11 = vcombine.low %v89_v61, %v105_v62  ;;  %v10688_v62 = vld [vmem:[%s14826_s1 + $0x11c8] ss:$16 sps:$4 sm:$0xff]  }
 0x1d1   :  { %v10613_v12 = vld [vmem:[%s14826_s1 + $0x1040] ss:$16 sps:$4 sm:$0xff]  }
 0x1d2   :  { %v10685_v61 = vld [vmem:[%s14826_s1 + $0x11c0] ss:$16 sps:$4 sm:$0xff]  }
 0x1d3   :  { %6958 = vmatpush1.bf16.msra.mxu0 %v10529_v13  ;;  %7806 = vmatpush1.bf16.msra.mxu1 %v10532_v14  ;;  %v10616_v13 = vld [vmem:[%s14826_s1 + $0x1048] ss:$16 sps:$4 sm:$0xff]   ;;  %v10621_v14 = vld [vmem:[%s14826_s1 + $0x1064] ss:$16 sps:$4 sm:$0xff]  }
 0x1d4   :  { %6959 = vmatprep.subr.bf16.mxu0 %v10537_v15  ;;  %7807 = vmatprep.subr.bf16.mxu1 %v10540_v16  ;;  %v10624_v15 = vld [vmem:[%s14826_s1 + $0x106c] ss:$16 sps:$4 sm:$0xff]   ;;  %v8506_v16 = vcombine.high %v13115_v9, %v13120_v10 }
 0x1d7   :  { %6960 = vmatpush1.bf16.msra.mxu0 %v10535_v17  ;;  %7808 = vmatpush1.bf16.msra.mxu1 %v10538_v18  ;;  %v10619_v17 = vld [vmem:[%s14826_s1 + $0x1060] ss:$16 sps:$4 sm:$0xff]   ;;  %v10622_v18 = vld [vmem:[%s14826_s1 + $0x1068] ss:$16 sps:$4 sm:$0xff]  }
 0x1d8   :  { %6961 = vmatprep.subr.bf16.mxu0 %v10543_v19  ;;  %7809 = vmatprep.subr.bf16.mxu1 %v10546_v20  ;;  %v10627_v19 = vld [vmem:[%s14826_s1 + $0x1084] ss:$16 sps:$4 sm:$0xff]   ;;  %v10630_v20 = vld [vmem:[%s14826_s1 + $0x108c] ss:$16 sps:$4 sm:$0xff]  }
 0x1db   :  { %6962 = vmatpush1.bf16.msra.mxu0 %v10541_v21  ;;  %7810 = vmatpush1.bf16.msra.mxu1 %v10544_v22  ;;  %v10625_v21 = vld [vmem:[%s14826_s1 + $0x1080] ss:$16 sps:$4 sm:$0xff]   ;;  %v10628_v22 = vld [vmem:[%s14826_s1 + $0x1088] ss:$16 sps:$4 sm:$0xff]  }
 0x1dc   :  { %6963 = vmatprep.subr.bf16.mxu0 %v10549_v23  ;;  %7811 = vmatprep.subr.bf16.mxu1 %v10552_v24  ;;  %v10633_v23 = vld [vmem:[%s14826_s1 + $0x10a4] ss:$16 sps:$4 sm:$0xff]   ;;  %v10636_v24 = vld [vmem:[%s14826_s1 + $0x10ac] ss:$16 sps:$4 sm:$0xff]  }
 0x1df   :  { %6964 = vmatpush1.bf16.msra.mxu0 %v10547_v26  ;;  %7812 = vmatpush1.bf16.msra.mxu1 %v10550_v25  ;;  %v10631_v26 = vld [vmem:[%s14826_s1 + $0x10a0] ss:$16 sps:$4 sm:$0xff]   ;;  %v10634_v25 = vld [vmem:[%s14826_s1 + $0x10a8] ss:$16 sps:$4 sm:$0xff]  }
 0x1e0   :  { %6965 = vmatprep.subr.bf16.mxu0 %v10555_v27  ;;  %7813 = vmatprep.subr.bf16.mxu1 %v10558_v28  ;;  %v10639_v27 = vld [vmem:[%s14826_s1 + $0x10c4] ss:$16 sps:$4 sm:$0xff]   ;;  %v10642_v28 = vld [vmem:[%s14826_s1 + $0x10cc] ss:$16 sps:$4 sm:$0xff]  }
 0x1e3   :  { %6966 = vmatpush1.bf16.msra.mxu0 %v10553_v29  ;;  %7814 = vmatpush1.bf16.msra.mxu1 %v10556_v30  ;;  %v10637_v29 = vld [vmem:[%s14826_s1 + $0x10c0] ss:$16 sps:$4 sm:$0xff]   ;;  %v10640_v30 = vld [vmem:[%s14826_s1 + $0x10c8] ss:$16 sps:$4 sm:$0xff]  }
 0x1e4   :  { %6967 = vmatprep.subr.bf16.mxu0 %v10561_v31  ;;  %7815 = vmatprep.subr.bf16.mxu1 %v10564_v32  ;;  %v10645_v31 = vld [vmem:[%s14826_s1 + $0x10e4] ss:$16 sps:$4 sm:$0xff]   ;;  %v10648_v32 = vld [vmem:[%s14826_s1 + $0x10ec] ss:$16 sps:$4 sm:$0xff]  }
 0x1e7   :  { %6968 = vmatpush1.bf16.msra.mxu0 %v10559_v34  ;;  %7816 = vmatpush1.bf16.msra.mxu1 %v10562_v36  ;;  %v10643_v34 = vld [vmem:[%s14826_s1 + $0x10e0] ss:$16 sps:$4 sm:$0xff]   ;;  %v10646_v36 = vld [vmem:[%s14826_s1 + $0x10e8] ss:$16 sps:$4 sm:$0xff]  }
 0x1e8   :  { %6969 = vmatprep.subr.bf16.mxu0 %v10567_v33  ;;  %7817 = vmatprep.subr.bf16.mxu1 %v10570_v35  ;;  %v10651_v33 = vld [vmem:[%s14826_s1 + $0x1104] ss:$16 sps:$4 sm:$0xff]   ;;  %v10654_v35 = vld [vmem:[%s14826_s1 + $0x110c] ss:$16 sps:$4 sm:$0xff]  }
 0x1eb   :  { %6970 = vmatpush1.bf16.msra.mxu0 %v10565_v37  ;;  %7818 = vmatpush1.bf16.msra.mxu1 %v10568_v38  ;;  %v10649_v37 = vld [vmem:[%s14826_s1 + $0x1100] ss:$16 sps:$4 sm:$0xff]   ;;  %v10652_v38 = vld [vmem:[%s14826_s1 + $0x1108] ss:$16 sps:$4 sm:$0xff]  }
 0x1ec   :  { %6971 = vmatprep.subr.bf16.mxu0 %v10573_v39  ;;  %7819 = vmatprep.subr.bf16.mxu1 %v10576_v40  ;;  %v10657_v39 = vld [vmem:[%s14826_s1 + $0x1124] ss:$16 sps:$4 sm:$0xff]   ;;  %v10660_v40 = vld [vmem:[%s14826_s1 + $0x112c] ss:$16 sps:$4 sm:$0xff]  }
 0x1ef   :  { %6972 = vmatpush1.bf16.msra.mxu0 %v10571_v42  ;;  %7820 = vmatpush1.bf16.msra.mxu1 %v10574_v44  ;;  %v10655_v42 = vld [vmem:[%s14826_s1 + $0x1120] ss:$16 sps:$4 sm:$0xff]   ;;  %v10658_v44 = vld [vmem:[%s14826_s1 + $0x1128] ss:$16 sps:$4 sm:$0xff]  }
 0x1f0   :  { %6973 = vmatprep.subr.bf16.mxu0 %v10579_v41  ;;  %7821 = vmatprep.subr.bf16.mxu1 %v10582_v43  ;;  %v10663_v41 = vld [vmem:[%s14826_s1 + $0x1144] ss:$16 sps:$4 sm:$0xff]   ;;  %v10666_v43 = vld [vmem:[%s14826_s1 + $0x114c] ss:$16 sps:$4 sm:$0xff]  }
 0x1f3   :  { %6974 = vmatpush1.bf16.msra.mxu0 %v10577_v45  ;;  %7822 = vmatpush1.bf16.msra.mxu1 %v10580_v46  ;;  %v10661_v45 = vld [vmem:[%s14826_s1 + $0x1140] ss:$16 sps:$4 sm:$0xff]   ;;  %v10664_v46 = vld [vmem:[%s14826_s1 + $0x1148] ss:$16 sps:$4 sm:$0xff]  }
 0x1f4   :  { %6975 = vmatprep.subr.bf16.mxu0 %v10585_v47  ;;  %7823 = vmatprep.subr.bf16.mxu1 %v10588_v48  ;;  %v10669_v47 = vld [vmem:[%s14826_s1 + $0x1164] ss:$16 sps:$4 sm:$0xff]   ;;  %v10672_v48 = vld [vmem:[%s14826_s1 + $0x116c] ss:$16 sps:$4 sm:$0xff]  }
 0x1f7   :  { %6976 = vmatpush1.bf16.msra.mxu0 %v10583_v51  ;;  %7824 = vmatpush1.bf16.msra.mxu1 %v10586_v52  ;;  %v10667_v51 = vld [vmem:[%s14826_s1 + $0x1160] ss:$16 sps:$4 sm:$0xff]   ;;  %v10670_v52 = vld [vmem:[%s14826_s1 + $0x1168] ss:$16 sps:$4 sm:$0xff]  }
 0x1f8   :  { %6977 = vmatprep.subr.bf16.mxu0 %v10591_v49  ;;  %7825 = vmatprep.subr.bf16.mxu1 %v10594_v50  ;;  %v10675_v49 = vld [vmem:[%s14826_s1 + $0x1184] ss:$16 sps:$4 sm:$0xff]   ;;  %v10678_v50 = vld [vmem:[%s14826_s1 + $0x118c] ss:$16 sps:$4 sm:$0xff]  }
 0x1fb   :  { %6978 = vmatpush1.bf16.msra.mxu0 %v10589_v53  ;;  %7826 = vmatpush1.bf16.msra.mxu1 %v10592_v54  ;;  %v10673_v53 = vld [vmem:[%s14826_s1 + $0x1180] ss:$16 sps:$4 sm:$0xff]   ;;  %v10676_v54 = vld [vmem:[%s14826_s1 + $0x1188] ss:$16 sps:$4 sm:$0xff]  }
 0x1fc   :  { %6979 = vmatprep.subr.bf16.mxu0 %v10597_v55  ;;  %7827 = vmatprep.subr.bf16.mxu1 %v10600_v56  ;;  %v10681_v55 = vld [vmem:[%s14826_s1 + $0x11a4] ss:$16 sps:$4 sm:$0xff]   ;;  %v10684_v56 = vld [vmem:[%s14826_s1 + $0x11ac] ss:$16 sps:$4 sm:$0xff]  }
 0x1ff   :  { %6980 = vmatpush1.bf16.msra.mxu0 %v10595_v59  ;;  %7828 = vmatpush1.bf16.msra.mxu1 %v10598_v60  ;;  %v10679_v59 = vld [vmem:[%s14826_s1 + $0x11a0] ss:$16 sps:$4 sm:$0xff]   ;;  %v10682_v60 = vld [vmem:[%s14826_s1 + $0x11a8] ss:$16 sps:$4 sm:$0xff]  }
 0x200   :  { %7002 = vmatprep.subr.bf16.mxu0 %v10603_v57  ;;  %7850 = vmatprep.subr.bf16.mxu1 %v10606_v58  ;;  %v10687_v57 = vld [vmem:[%s14826_s1 + $0x11c4] ss:$16 sps:$4 sm:$0xff]   ;;  %v10690_v58 = vld [vmem:[%s14826_s1 + $0x11cc] ss:$16 sps:$4 sm:$0xff]  }
 0x202   :  { %6982 = vmatmul.mubr.bf16.vlgmr.msra.gmra.mrb[0].mxu0 %v8503_v63  ;;  %7830 = vmatmul.mubr.bf16.vlgmr.msra.gmra.mrb[0].mxu1 %v8503_v63  ;;  %v10693_v63 = vld [vmem:[%s14826_s1 + $0x11e4] ss:$16 sps:$4 sm:$0xff]  }
 0x203   :  { %7003 = vmatpush1.bf16.msra.mxu0 %v10601_v0  ;;  %7851 = vmatpush1.bf16.msra.mxu1 %v10604_v3  ;;  %v10696_v0 = vld [vmem:[%s14826_s1 + $0x11ec] ss:$16 sps:$4 sm:$0xff]   ;;  %v10691_v3 = vld [vmem:[%s14826_s1 + $0x11e0] ss:$16 sps:$4 sm:$0xff]  }
 0x204   :  { %7004 = vmatprep.subr.bf16.mxu0 %v10609_v4  ;;  %7852 = vmatprep.subr.bf16.mxu1 %v10612_v1  ;;  %v10694_v4 = vld [vmem:[%s14826_s1 + $0x11e8] ss:$16 sps:$4 sm:$0xff]   ;;  %v10699_v1 = vld [vmem:[%s14826_s1 + $0x1204] ss:$16 sps:$4 sm:$0xff]  }
 0x205   :  { %6991 = vmatprep.mubr.bf16.mxu0 %v8536_v6  ;;  %7839 = vmatprep.mubr.bf16.mxu1 %v8536_v6  ;;  %v106_v6 = vld [vmem:[%s14827_s0 + $0x1c0] sm:$0xff] }
 0x207   :  { %7005 = vmatpush1.bf16.msra.mxu0 %v10607_v2  ;;  %7853 = vmatpush1.bf16.msra.mxu1 %v10610_v5  ;;  %v10702_v2 = vld [vmem:[%s14826_s1 + $0x120c] ss:$16 sps:$4 sm:$0xff]   ;;  %v90_v5 = vld [vmem:[%s14827_s0 + $0x140] sm:$0xff] }
 0x208   :  { %7006 = vmatprep.subr.bf16.mxu0 %v10615_v7  ;;  %7854 = vmatprep.subr.bf16.mxu1 %v10618_v8  ;;  %v8505_v7 = vcombine.low %v13115_v9, %v13120_v10  ;;  %v10697_v8 = vld [vmem:[%s14826_s1 + $0x1200] ss:$16 sps:$4 sm:$0xff]   ;;  %v10708_v9 = vld [vmem:[%s14826_s1 + $0x122c] ss:$16 sps:$4 sm:$0xff]  }
 0x209   :  { %v10703_v10 = vld [vmem:[%s14826_s1 + $0x1220] ss:$16 sps:$4 sm:$0xff]  }
 0x20a   :  { %6992 = vmatmul.mubr.bf16.gmra.mrb[4].mxu0 %v8535_v11  ;;  %7840 = vmatmul.mubr.bf16.gmra.mrb[4].mxu1 %v8535_v11  ;;  %v10700_v11 = vld [vmem:[%s14826_s1 + $0x1208] ss:$16 sps:$4 sm:$0xff]  }
 0x20b   :  { %7007 = vmatpush1.bf16.msra.mxu0 %v10613_v12  ;;  %7855 = vmatpush1.bf16.msra.mxu1 %v10616_v13  ;;  %v10705_v12 = vld [vmem:[%s14826_s1 + $0x1224] ss:$16 sps:$4 sm:$0xff]   ;;  %v10706_v13 = vld [vmem:[%s14826_s1 + $0x1228] ss:$16 sps:$4 sm:$0xff]  }
 0x20c   :  { %7008 = vmatprep.subr.bf16.mxu0 %v10621_v14  ;;  %7856 = vmatprep.subr.bf16.mxu1 %v10624_v15  ;;  %v8538_v14 = vcombine.high %v90_v5, %v106_v6  ;;  %v10711_v15 = vld [vmem:[%s14826_s1 + $0x1244] ss:$16 sps:$4 sm:$0xff]  }
 0x20d   :  { %7034 = vmatprep.mubr.bf16.mxu0 %v8506_v16  ;;  %7882 = vmatprep.mubr.bf16.mxu1 %v8506_v16  ;;  %v10714_v16 = vld [vmem:[%s14826_s1 + $0x124c] ss:$16 sps:$4 sm:$0xff]  }
 0x20f   :  { %7009 = vmatpush1.bf16.msra.mxu0 %v10619_v17  ;;  %7857 = vmatpush1.bf16.msra.mxu1 %v10622_v18  ;;  %v13327_v17 = vld [vmem:[%s14827_s0 + $0x48] sm:$0xff] }
 0x210   :  { %7010 = vmatprep.subr.bf16.mxu0 %v10627_v19  ;;  %7858 = vmatprep.subr.bf16.mxu1 %v10630_v20  ;;  %v13332_v18 = vld [vmem:[%s14827_s0 + $0xc8] sm:$0xff]  ;;  %v8537_v19 = vcombine.low %v90_v5, %v106_v6  ;;  %v10709_v20 = vld [vmem:[%s14826_s1 + $0x1240] ss:$16 sps:$4 sm:$0xff]  }
 0x211   :  { %v10781_v5 = vld [vmem:[%s14826_s1 + $0x13c0] ss:$16 sps:$4 sm:$0xff]   ;;  %v10784_v6 = vld [vmem:[%s14826_s1 + $0x13c8] ss:$16 sps:$4 sm:$0xff]  }
 0x213   :  { %7011 = vmatpush1.bf16.msra.mxu0 %v10625_v21  ;;  %7859 = vmatpush1.bf16.msra.mxu1 %v10628_v22  ;;  %v10712_v21 = vld [vmem:[%s14826_s1 + $0x1248] ss:$16 sps:$4 sm:$0xff]   ;;  %v10717_v22 = vld [vmem:[%s14826_s1 + $0x1264] ss:$16 sps:$4 sm:$0xff]  }
 0x214   :  { %7012 = vmatprep.subr.bf16.mxu0 %v10633_v23  ;;  %7860 = vmatprep.subr.bf16.mxu1 %v10636_v24  ;;  %v10720_v23 = vld [vmem:[%s14826_s1 + $0x126c] ss:$16 sps:$4 sm:$0xff]   ;;  %v8508_v24 = vcombine.high %v13327_v17, %v13332_v18 }
 0x217   :  { %7013 = vmatpush1.bf16.msra.mxu0 %v10631_v26  ;;  %7861 = vmatpush1.bf16.msra.mxu1 %v10634_v25  ;;  %v10715_v26 = vld [vmem:[%s14826_s1 + $0x1260] ss:$16 sps:$4 sm:$0xff]   ;;  %v10718_v25 = vld [vmem:[%s14826_s1 + $0x1268] ss:$16 sps:$4 sm:$0xff]  }
 0x218   :  { %7014 = vmatprep.subr.bf16.mxu0 %v10639_v27  ;;  %7862 = vmatprep.subr.bf16.mxu1 %v10642_v28  ;;  %v10723_v27 = vld [vmem:[%s14826_s1 + $0x1284] ss:$16 sps:$4 sm:$0xff]   ;;  %v10726_v28 = vld [vmem:[%s14826_s1 + $0x128c] ss:$16 sps:$4 sm:$0xff]  }
 0x21b   :  { %7015 = vmatpush1.bf16.msra.mxu0 %v10637_v29  ;;  %7863 = vmatpush1.bf16.msra.mxu1 %v10640_v30  ;;  %v10721_v29 = vld [vmem:[%s14826_s1 + $0x1280] ss:$16 sps:$4 sm:$0xff]   ;;  %v10724_v30 = vld [vmem:[%s14826_s1 + $0x1288] ss:$16 sps:$4 sm:$0xff]  }
 0x21c   :  { %7016 = vmatprep.subr.bf16.mxu0 %v10645_v31  ;;  %7864 = vmatprep.subr.bf16.mxu1 %v10648_v32  ;;  %v10729_v31 = vld [vmem:[%s14826_s1 + $0x12a4] ss:$16 sps:$4 sm:$0xff]   ;;  %v10732_v32 = vld [vmem:[%s14826_s1 + $0x12ac] ss:$16 sps:$4 sm:$0xff]  }
 0x21f   :  { %7017 = vmatpush1.bf16.msra.mxu0 %v10643_v34  ;;  %7865 = vmatpush1.bf16.msra.mxu1 %v10646_v36  ;;  %v10727_v34 = vld [vmem:[%s14826_s1 + $0x12a0] ss:$16 sps:$4 sm:$0xff]   ;;  %v10730_v36 = vld [vmem:[%s14826_s1 + $0x12a8] ss:$16 sps:$4 sm:$0xff]  }
 0x220   :  { %7018 = vmatprep.subr.bf16.mxu0 %v10651_v33  ;;  %7866 = vmatprep.subr.bf16.mxu1 %v10654_v35  ;;  %v10735_v33 = vld [vmem:[%s14826_s1 + $0x12c4] ss:$16 sps:$4 sm:$0xff]   ;;  %v10738_v35 = vld [vmem:[%s14826_s1 + $0x12cc] ss:$16 sps:$4 sm:$0xff]  }
 0x223   :  { %7019 = vmatpush1.bf16.msra.mxu0 %v10649_v37  ;;  %7867 = vmatpush1.bf16.msra.mxu1 %v10652_v38  ;;  %v10733_v37 = vld [vmem:[%s14826_s1 + $0x12c0] ss:$16 sps:$4 sm:$0xff]   ;;  %v10736_v38 = vld [vmem:[%s14826_s1 + $0x12c8] ss:$16 sps:$4 sm:$0xff]  }
 0x224   :  { %7020 = vmatprep.subr.bf16.mxu0 %v10657_v39  ;;  %7868 = vmatprep.subr.bf16.mxu1 %v10660_v40  ;;  %v10741_v39 = vld [vmem:[%s14826_s1 + $0x12e4] ss:$16 sps:$4 sm:$0xff]   ;;  %v10744_v40 = vld [vmem:[%s14826_s1 + $0x12ec] ss:$16 sps:$4 sm:$0xff]  }
 0x227   :  { %7021 = vmatpush1.bf16.msra.mxu0 %v10655_v42  ;;  %7869 = vmatpush1.bf16.msra.mxu1 %v10658_v44  ;;  %v10739_v42 = vld [vmem:[%s14826_s1 + $0x12e0] ss:$16 sps:$4 sm:$0xff]   ;;  %v10742_v44 = vld [vmem:[%s14826_s1 + $0x12e8] ss:$16 sps:$4 sm:$0xff]  }
 0x228   :  { %7022 = vmatprep.subr.bf16.mxu0 %v10663_v41  ;;  %7870 = vmatprep.subr.bf16.mxu1 %v10666_v43  ;;  %v10747_v41 = vld [vmem:[%s14826_s1 + $0x1304] ss:$16 sps:$4 sm:$0xff]   ;;  %v10750_v43 = vld [vmem:[%s14826_s1 + $0x130c] ss:$16 sps:$4 sm:$0xff]  }
 0x22b   :  { %7023 = vmatpush1.bf16.msra.mxu0 %v10661_v45  ;;  %7871 = vmatpush1.bf16.msra.mxu1 %v10664_v46  ;;  %v10745_v45 = vld [vmem:[%s14826_s1 + $0x1300] ss:$16 sps:$4 sm:$0xff]   ;;  %v10748_v46 = vld [vmem:[%s14826_s1 + $0x1308] ss:$16 sps:$4 sm:$0xff]  }
 0x22c   :  { %7024 = vmatprep.subr.bf16.mxu0 %v10669_v47  ;;  %7872 = vmatprep.subr.bf16.mxu1 %v10672_v48  ;;  %v10753_v47 = vld [vmem:[%s14826_s1 + $0x1324] ss:$16 sps:$4 sm:$0xff]   ;;  %v10756_v48 = vld [vmem:[%s14826_s1 + $0x132c] ss:$16 sps:$4 sm:$0xff]  }
 0x22f   :  { %7025 = vmatpush1.bf16.msra.mxu0 %v10667_v51  ;;  %7873 = vmatpush1.bf16.msra.mxu1 %v10670_v52  ;;  %v10751_v51 = vld [vmem:[%s14826_s1 + $0x1320] ss:$16 sps:$4 sm:$0xff]   ;;  %v10754_v52 = vld [vmem:[%s14826_s1 + $0x1328] ss:$16 sps:$4 sm:$0xff]  }
 0x230   :  { %7026 = vmatprep.subr.bf16.mxu0 %v10675_v49  ;;  %7874 = vmatprep.subr.bf16.mxu1 %v10678_v50  ;;  %v10759_v49 = vld [vmem:[%s14826_s1 + $0x1344] ss:$16 sps:$4 sm:$0xff]   ;;  %v10762_v50 = vld [vmem:[%s14826_s1 + $0x134c] ss:$16 sps:$4 sm:$0xff]  }
 0x233   :  { %7027 = vmatpush1.bf16.msra.mxu0 %v10673_v53  ;;  %7875 = vmatpush1.bf16.msra.mxu1 %v10676_v54  ;;  %v10757_v53 = vld [vmem:[%s14826_s1 + $0x1340] ss:$16 sps:$4 sm:$0xff]   ;;  %v10760_v54 = vld [vmem:[%s14826_s1 + $0x1348] ss:$16 sps:$4 sm:$0xff]  }
 0x234   :  { %7028 = vmatprep.subr.bf16.mxu0 %v10681_v55  ;;  %7876 = vmatprep.subr.bf16.mxu1 %v10684_v56  ;;  %v10765_v55 = vld [vmem:[%s14826_s1 + $0x1364] ss:$16 sps:$4 sm:$0xff]   ;;  %v10768_v56 = vld [vmem:[%s14826_s1 + $0x136c] ss:$16 sps:$4 sm:$0xff]  }
 0x237   :  { %7029 = vmatpush1.bf16.msra.mxu0 %v10679_v59  ;;  %7877 = vmatpush1.bf16.msra.mxu1 %v10682_v60  ;;  %v10763_v59 = vld [vmem:[%s14826_s1 + $0x1360] ss:$16 sps:$4 sm:$0xff]   ;;  %v10766_v60 = vld [vmem:[%s14826_s1 + $0x1368] ss:$16 sps:$4 sm:$0xff]  }
 0x238   :  { %7030 = vmatprep.subr.bf16.mxu0 %v10687_v57  ;;  %7878 = vmatprep.subr.bf16.mxu1 %v10690_v58  ;;  %v10771_v57 = vld [vmem:[%s14826_s1 + $0x1384] ss:$16 sps:$4 sm:$0xff]   ;;  %v10774_v58 = vld [vmem:[%s14826_s1 + $0x138c] ss:$16 sps:$4 sm:$0xff]  }
 0x23b   :  { %7031 = vmatpush1.bf16.msra.mxu0 %v10685_v61  ;;  %7879 = vmatpush1.bf16.msra.mxu1 %v10688_v62  ;;  %v10769_v61 = vld [vmem:[%s14826_s1 + $0x1380] ss:$16 sps:$4 sm:$0xff]   ;;  %v10772_v62 = vld [vmem:[%s14826_s1 + $0x1388] ss:$16 sps:$4 sm:$0xff]  }
 0x23c   :  { %7032 = vmatprep.subr.bf16.mxu0 %v10693_v63  ;;  %7880 = vmatprep.subr.bf16.mxu1 %v10696_v0  ;;  %v10777_v63 = vld [vmem:[%s14826_s1 + $0x13a4] ss:$16 sps:$4 sm:$0xff]   ;;  %v10780_v0 = vld [vmem:[%s14826_s1 + $0x13ac] ss:$16 sps:$4 sm:$0xff]  }
 0x23f   :  { %7033 = vmatpush1.bf16.msra.mxu0 %v10691_v3  ;;  %7881 = vmatpush1.bf16.msra.mxu1 %v10694_v4  ;;  %v10775_v3 = vld [vmem:[%s14826_s1 + $0x13a0] ss:$16 sps:$4 sm:$0xff]   ;;  %v10778_v4 = vld [vmem:[%s14826_s1 + $0x13a8] ss:$16 sps:$4 sm:$0xff]  }
 0x240   :  { %7055 = vmatprep.subr.bf16.mxu0 %v10699_v1  ;;  %7903 = vmatprep.subr.bf16.mxu1 %v10702_v2  ;;  %v10783_v1 = vld [vmem:[%s14826_s1 + $0x13c4] ss:$16 sps:$4 sm:$0xff]   ;;  %v10786_v2 = vld [vmem:[%s14826_s1 + $0x13cc] ss:$16 sps:$4 sm:$0xff]  }
 0x242   :  { %7035 = vmatmul.mubr.bf16.vlgmr.msra.gmra.mrb[0].mxu0 %v8505_v7  ;;  %7883 = vmatmul.mubr.bf16.vlgmr.msra.gmra.mrb[0].mxu1 %v8505_v7  ;;  %v10789_v7 = vld [vmem:[%s14826_s1 + $0x13e4] ss:$16 sps:$4 sm:$0xff]  }
 0x243   :  { %7056 = vmatpush1.bf16.msra.mxu0 %v10697_v8  ;;  %7904 = vmatpush1.bf16.msra.mxu1 %v10700_v11  ;;  %v10792_v8 = vld [vmem:[%s14826_s1 + $0x13ec] ss:$16 sps:$4 sm:$0xff]   ;;  %v10787_v11 = vld [vmem:[%s14826_s1 + $0x13e0] ss:$16 sps:$4 sm:$0xff]  }
 0x244   :  { %7057 = vmatprep.subr.bf16.mxu0 %v10705_v12  ;;  %7905 = vmatprep.subr.bf16.mxu1 %v10708_v9  ;;  %v10790_v12 = vld [vmem:[%s14826_s1 + $0x13e8] ss:$16 sps:$4 sm:$0xff]   ;;  %v10795_v9 = vld [vmem:[%s14826_s1 + $0x1404] ss:$16 sps:$4 sm:$0xff]  }
 0x245   :  { %7044 = vmatprep.mubr.bf16.mxu0 %v8538_v14  ;;  %7892 = vmatprep.mubr.bf16.mxu1 %v8538_v14  ;;  %v91_v14 = vld [vmem:[%s14827_s0 + $0x148] sm:$0xff] }
 0x247   :  { %7058 = vmatpush1.bf16.msra.mxu0 %v10703_v10  ;;  %7906 = vmatpush1.bf16.msra.mxu1 %v10706_v13  ;;  %v10798_v10 = vld [vmem:[%s14826_s1 + $0x140c] ss:$16 sps:$4 sm:$0xff]   ;;  %v8507_v13 = vcombine.low %v13327_v17, %v13332_v18  ;;  %v10801_v17 = vld [vmem:[%s14826_s1 + $0x1424] ss:$16 sps:$4 sm:$0xff]  }
 0x248   :  { %7059 = vmatprep.subr.bf16.mxu0 %v10711_v15  ;;  %7907 = vmatprep.subr.bf16.mxu1 %v10714_v16  ;;  %v107_v15 = vld [vmem:[%s14827_s0 + $0x1c8] sm:$0xff]  ;;  %v10793_v16 = vld [vmem:[%s14826_s1 + $0x1400] ss:$16 sps:$4 sm:$0xff]  }
 0x249   :  { %v10804_v18 = vld [vmem:[%s14826_s1 + $0x142c] ss:$16 sps:$4 sm:$0xff]  }
 0x24a   :  { %7045 = vmatmul.mubr.bf16.gmra.mrb[4].mxu0 %v8537_v19  ;;  %7893 = vmatmul.mubr.bf16.gmra.mrb[4].mxu1 %v8537_v19  ;;  %v10796_v19 = vld [vmem:[%s14826_s1 + $0x1408] ss:$16 sps:$4 sm:$0xff]  }
 0x24b   :  { %7060 = vmatpush1.bf16.msra.mxu0 %v10709_v20  ;;  %7908 = vmatpush1.bf16.msra.mxu1 %v10712_v21  ;;  %v8540_v20 = vcombine.high %v91_v14, %v107_v15  ;;  %v10799_v21 = vld [vmem:[%s14826_s1 + $0x1420] ss:$16 sps:$4 sm:$0xff]  }
 0x24c   :  { %7061 = vmatprep.subr.bf16.mxu0 %v10717_v22  ;;  %7909 = vmatprep.subr.bf16.mxu1 %v10720_v23  ;;  %v10802_v22 = vld [vmem:[%s14826_s1 + $0x1428] ss:$16 sps:$4 sm:$0xff]   ;;  %v10807_v23 = vld [vmem:[%s14826_s1 + $0x1444] ss:$16 sps:$4 sm:$0xff]  }
 0x24d   :  { %7087 = vmatprep.mubr.bf16.mxu0 %v8508_v24  ;;  %7935 = vmatprep.mubr.bf16.mxu1 %v8508_v24  ;;  %v10810_v24 = vld [vmem:[%s14826_s1 + $0x144c] ss:$16 sps:$4 sm:$0xff]  }
 0x24f   :  { %7062 = vmatpush1.bf16.msra.mxu0 %v10715_v26  ;;  %7910 = vmatpush1.bf16.msra.mxu1 %v10718_v25  ;;  %v8539_v26 = vcombine.low %v91_v14, %v107_v15  ;;  %v13539_v25 = vld [vmem:[%s14827_s0 + $0x50] sm:$0xff]  ;;  %v10880_v14 = vld [vmem:[%s14826_s1 + $0x15c8] ss:$16 sps:$4 sm:$0xff]  }
 0x250   :  { %7063 = vmatprep.subr.bf16.mxu0 %v10723_v27  ;;  %7911 = vmatprep.subr.bf16.mxu1 %v10726_v28  ;;  %v13544_v27 = vld [vmem:[%s14827_s0 + $0xd0] sm:$0xff] }
 0x251   :  { %v10805_v28 = vld [vmem:[%s14826_s1 + $0x1440] ss:$16 sps:$4 sm:$0xff]   ;;  %v10885_v15 = vld [vmem:[%s14826_s1 + $0x15e4] ss:$16 sps:$4 sm:$0xff]  }
 0x253   :  { %7064 = vmatpush1.bf16.msra.mxu0 %v10721_v29  ;;  %7912 = vmatpush1.bf16.msra.mxu1 %v10724_v30  ;;  %v10808_v29 = vld [vmem:[%s14826_s1 + $0x1448] ss:$16 sps:$4 sm:$0xff]   ;;  %v10813_v30 = vld [vmem:[%s14826_s1 + $0x1464] ss:$16 sps:$4 sm:$0xff]  }
 0x254   :  { %7065 = vmatprep.subr.bf16.mxu0 %v10729_v31  ;;  %7913 = vmatprep.subr.bf16.mxu1 %v10732_v32  ;;  %v10816_v31 = vld [vmem:[%s14826_s1 + $0x146c] ss:$16 sps:$4 sm:$0xff]   ;;  %v8510_v32 = vcombine.high %v13539_v25, %v13544_v27 }
 0x257   :  { %7066 = vmatpush1.bf16.msra.mxu0 %v10727_v34  ;;  %7914 = vmatpush1.bf16.msra.mxu1 %v10730_v36  ;;  %v10811_v34 = vld [vmem:[%s14826_s1 + $0x1460] ss:$16 sps:$4 sm:$0xff]   ;;  %v10814_v36 = vld [vmem:[%s14826_s1 + $0x1468] ss:$16 sps:$4 sm:$0xff]  }
 0x258   :  { %7067 = vmatprep.subr.bf16.mxu0 %v10735_v33  ;;  %7915 = vmatprep.subr.bf16.mxu1 %v10738_v35  ;;  %v10819_v33 = vld [vmem:[%s14826_s1 + $0x1484] ss:$16 sps:$4 sm:$0xff]   ;;  %v10822_v35 = vld [vmem:[%s14826_s1 + $0x148c] ss:$16 sps:$4 sm:$0xff]  }
 0x25b   :  { %7068 = vmatpush1.bf16.msra.mxu0 %v10733_v37  ;;  %7916 = vmatpush1.bf16.msra.mxu1 %v10736_v38  ;;  %v10817_v37 = vld [vmem:[%s14826_s1 + $0x1480] ss:$16 sps:$4 sm:$0xff]   ;;  %v10820_v38 = vld [vmem:[%s14826_s1 + $0x1488] ss:$16 sps:$4 sm:$0xff]  }
 0x25c   :  { %7069 = vmatprep.subr.bf16.mxu0 %v10741_v39  ;;  %7917 = vmatprep.subr.bf16.mxu1 %v10744_v40  ;;  %v10825_v39 = vld [vmem:[%s14826_s1 + $0x14a4] ss:$16 sps:$4 sm:$0xff]   ;;  %v10828_v40 = vld [vmem:[%s14826_s1 + $0x14ac] ss:$16 sps:$4 sm:$0xff]  }
 0x25f   :  { %7070 = vmatpush1.bf16.msra.mxu0 %v10739_v42  ;;  %7918 = vmatpush1.bf16.msra.mxu1 %v10742_v44  ;;  %v10823_v42 = vld [vmem:[%s14826_s1 + $0x14a0] ss:$16 sps:$4 sm:$0xff]   ;;  %v10826_v44 = vld [vmem:[%s14826_s1 + $0x14a8] ss:$16 sps:$4 sm:$0xff]  }
 0x260   :  { %7071 = vmatprep.subr.bf16.mxu0 %v10747_v41  ;;  %7919 = vmatprep.subr.bf16.mxu1 %v10750_v43  ;;  %v10831_v41 = vld [vmem:[%s14826_s1 + $0x14c4] ss:$16 sps:$4 sm:$0xff]   ;;  %v10834_v43 = vld [vmem:[%s14826_s1 + $0x14cc] ss:$16 sps:$4 sm:$0xff]  }
 0x263   :  { %7072 = vmatpush1.bf16.msra.mxu0 %v10745_v45  ;;  %7920 = vmatpush1.bf16.msra.mxu1 %v10748_v46  ;;  %v10829_v45 = vld [vmem:[%s14826_s1 + $0x14c0] ss:$16 sps:$4 sm:$0xff]   ;;  %v10832_v46 = vld [vmem:[%s14826_s1 + $0x14c8] ss:$16 sps:$4 sm:$0xff]  }
 0x264   :  { %7073 = vmatprep.subr.bf16.mxu0 %v10753_v47  ;;  %7921 = vmatprep.subr.bf16.mxu1 %v10756_v48  ;;  %v10837_v47 = vld [vmem:[%s14826_s1 + $0x14e4] ss:$16 sps:$4 sm:$0xff]   ;;  %v10840_v48 = vld [vmem:[%s14826_s1 + $0x14ec] ss:$16 sps:$4 sm:$0xff]  }
 0x267   :  { %7074 = vmatpush1.bf16.msra.mxu0 %v10751_v51  ;;  %7922 = vmatpush1.bf16.msra.mxu1 %v10754_v52  ;;  %v10835_v51 = vld [vmem:[%s14826_s1 + $0x14e0] ss:$16 sps:$4 sm:$0xff]   ;;  %v10838_v52 = vld [vmem:[%s14826_s1 + $0x14e8] ss:$16 sps:$4 sm:$0xff]  }
 0x268   :  { %7075 = vmatprep.subr.bf16.mxu0 %v10759_v49  ;;  %7923 = vmatprep.subr.bf16.mxu1 %v10762_v50  ;;  %v10843_v49 = vld [vmem:[%s14826_s1 + $0x1504] ss:$16 sps:$4 sm:$0xff]   ;;  %v10846_v50 = vld [vmem:[%s14826_s1 + $0x150c] ss:$16 sps:$4 sm:$0xff]  }
 0x26b   :  { %7076 = vmatpush1.bf16.msra.mxu0 %v10757_v53  ;;  %7924 = vmatpush1.bf16.msra.mxu1 %v10760_v54  ;;  %v10841_v53 = vld [vmem:[%s14826_s1 + $0x1500] ss:$16 sps:$4 sm:$0xff]   ;;  %v10844_v54 = vld [vmem:[%s14826_s1 + $0x1508] ss:$16 sps:$4 sm:$0xff]  }
 0x26c   :  { %7077 = vmatprep.subr.bf16.mxu0 %v10765_v55  ;;  %7925 = vmatprep.subr.bf16.mxu1 %v10768_v56  ;;  %v10849_v55 = vld [vmem:[%s14826_s1 + $0x1524] ss:$16 sps:$4 sm:$0xff]   ;;  %v10852_v56 = vld [vmem:[%s14826_s1 + $0x152c] ss:$16 sps:$4 sm:$0xff]  }
 0x26f   :  { %7078 = vmatpush1.bf16.msra.mxu0 %v10763_v59  ;;  %7926 = vmatpush1.bf16.msra.mxu1 %v10766_v60  ;;  %v10847_v59 = vld [vmem:[%s14826_s1 + $0x1520] ss:$16 sps:$4 sm:$0xff]   ;;  %v10850_v60 = vld [vmem:[%s14826_s1 + $0x1528] ss:$16 sps:$4 sm:$0xff]  }
 0x270   :  { %7079 = vmatprep.subr.bf16.mxu0 %v10771_v57  ;;  %7927 = vmatprep.subr.bf16.mxu1 %v10774_v58  ;;  %v10855_v57 = vld [vmem:[%s14826_s1 + $0x1544] ss:$16 sps:$4 sm:$0xff]   ;;  %v10858_v58 = vld [vmem:[%s14826_s1 + $0x154c] ss:$16 sps:$4 sm:$0xff]  }
 0x273   :  { %7080 = vmatpush1.bf16.msra.mxu0 %v10769_v61  ;;  %7928 = vmatpush1.bf16.msra.mxu1 %v10772_v62  ;;  %v10853_v61 = vld [vmem:[%s14826_s1 + $0x1540] ss:$16 sps:$4 sm:$0xff]   ;;  %v10856_v62 = vld [vmem:[%s14826_s1 + $0x1548] ss:$16 sps:$4 sm:$0xff]  }
 0x274   :  { %7081 = vmatprep.subr.bf16.mxu0 %v10777_v63  ;;  %7929 = vmatprep.subr.bf16.mxu1 %v10780_v0  ;;  %v10861_v63 = vld [vmem:[%s14826_s1 + $0x1564] ss:$16 sps:$4 sm:$0xff]   ;;  %v10864_v0 = vld [vmem:[%s14826_s1 + $0x156c] ss:$16 sps:$4 sm:$0xff]  }
 0x277   :  { %7082 = vmatpush1.bf16.msra.mxu0 %v10775_v3  ;;  %7930 = vmatpush1.bf16.msra.mxu1 %v10778_v4  ;;  %v10859_v3 = vld [vmem:[%s14826_s1 + $0x1560] ss:$16 sps:$4 sm:$0xff]   ;;  %v10862_v4 = vld [vmem:[%s14826_s1 + $0x1568] ss:$16 sps:$4 sm:$0xff]  }
 0x278   :  { %7083 = vmatprep.subr.bf16.mxu0 %v10783_v1  ;;  %7931 = vmatprep.subr.bf16.mxu1 %v10786_v2  ;;  %v10867_v1 = vld [vmem:[%s14826_s1 + $0x1584] ss:$16 sps:$4 sm:$0xff]   ;;  %v10870_v2 = vld [vmem:[%s14826_s1 + $0x158c] ss:$16 sps:$4 sm:$0xff]  }
 0x27b   :  { %7084 = vmatpush1.bf16.msra.mxu0 %v10781_v5  ;;  %7932 = vmatpush1.bf16.msra.mxu1 %v10784_v6  ;;  %v10865_v5 = vld [vmem:[%s14826_s1 + $0x1580] ss:$16 sps:$4 sm:$0xff]   ;;  %v10868_v6 = vld [vmem:[%s14826_s1 + $0x1588] ss:$16 sps:$4 sm:$0xff]  }
 0x27c   :  { %7085 = vmatprep.subr.bf16.mxu0 %v10789_v7  ;;  %7933 = vmatprep.subr.bf16.mxu1 %v10792_v8  ;;  %v10873_v7 = vld [vmem:[%s14826_s1 + $0x15a4] ss:$16 sps:$4 sm:$0xff]   ;;  %v10876_v8 = vld [vmem:[%s14826_s1 + $0x15ac] ss:$16 sps:$4 sm:$0xff]  }
 0x27f   :  { %7086 = vmatpush1.bf16.msra.mxu0 %v10787_v11  ;;  %7934 = vmatpush1.bf16.msra.mxu1 %v10790_v12  ;;  %v10871_v11 = vld [vmem:[%s14826_s1 + $0x15a0] ss:$16 sps:$4 sm:$0xff]   ;;  %v10874_v12 = vld [vmem:[%s14826_s1 + $0x15a8] ss:$16 sps:$4 sm:$0xff]  }
 0x280   :  { %7108 = vmatprep.subr.bf16.mxu0 %v10795_v9  ;;  %7956 = vmatprep.subr.bf16.mxu1 %v10798_v10  ;;  %v10879_v9 = vld [vmem:[%s14826_s1 + $0x15c4] ss:$16 sps:$4 sm:$0xff]   ;;  %v10882_v10 = vld [vmem:[%s14826_s1 + $0x15cc] ss:$16 sps:$4 sm:$0xff]  }
 0x282   :  { %7088 = vmatmul.mubr.bf16.vlgmr.msra.gmra.mrb[0].mxu0 %v8507_v13  ;;  %7936 = vmatmul.mubr.bf16.vlgmr.msra.gmra.mrb[0].mxu1 %v8507_v13  ;;  %v10877_v13 = vld [vmem:[%s14826_s1 + $0x15c0] ss:$16 sps:$4 sm:$0xff]  }
 0x283   :  { %7109 = vmatpush1.bf16.msra.mxu0 %v10793_v16  ;;  %7957 = vmatpush1.bf16.msra.mxu1 %v10796_v19  ;;  %v10888_v16 = vld [vmem:[%s14826_s1 + $0x15ec] ss:$16 sps:$4 sm:$0xff]   ;;  %v10883_v19 = vld [vmem:[%s14826_s1 + $0x15e0] ss:$16 sps:$4 sm:$0xff]  }
 0x284   :  { %7110 = vmatprep.subr.bf16.mxu0 %v10801_v17  ;;  %7958 = vmatprep.subr.bf16.mxu1 %v10804_v18  ;;  %v10886_v17 = vld [vmem:[%s14826_s1 + $0x15e8] ss:$16 sps:$4 sm:$0xff]   ;;  %v10891_v18 = vld [vmem:[%s14826_s1 + $0x1604] ss:$16 sps:$4 sm:$0xff]  }
 0x285   :  { %7097 = vmatprep.mubr.bf16.mxu0 %v8540_v20  ;;  %7945 = vmatprep.mubr.bf16.mxu1 %v8540_v20  ;;  %v10894_v20 = vld [vmem:[%s14826_s1 + $0x160c] ss:$16 sps:$4 sm:$0xff]  }
 0x287   :  { %7111 = vmatpush1.bf16.msra.mxu0 %v10799_v21  ;;  %7959 = vmatpush1.bf16.msra.mxu1 %v10802_v22  ;;  %v8509_v21 = vcombine.low %v13539_v25, %v13544_v27  ;;  %v92_v22 = vld [vmem:[%s14827_s0 + $0x150] sm:$0xff]  ;;  %v10900_v27 = vld [vmem:[%s14826_s1 + $0x162c] ss:$16 sps:$4 sm:$0xff]  }
 0x288   :  { %7112 = vmatprep.subr.bf16.mxu0 %v10807_v23  ;;  %7960 = vmatprep.subr.bf16.mxu1 %v10810_v24  ;;  %v108_v23 = vld [vmem:[%s14827_s0 + $0x1d0] sm:$0xff] }
 0x289   :  { %v10889_v24 = vld [vmem:[%s14826_s1 + $0x1600] ss:$16 sps:$4 sm:$0xff]   ;;  %v10897_v25 = vld [vmem:[%s14826_s1 + $0x1624] ss:$16 sps:$4 sm:$0xff]  }
 0x28a   :  { %7098 = vmatmul.mubr.bf16.gmra.mrb[4].mxu0 %v8539_v26  ;;  %7946 = vmatmul.mubr.bf16.gmra.mrb[4].mxu1 %v8539_v26  ;;  %v10892_v26 = vld [vmem:[%s14826_s1 + $0x1608] ss:$16 sps:$4 sm:$0xff]  }
 0x28b   :  { %7113 = vmatpush1.bf16.msra.mxu0 %v10805_v28  ;;  %7961 = vmatpush1.bf16.msra.mxu1 %v10808_v29  ;;  %v8542_v28 = vcombine.high %v92_v22, %v108_v23  ;;  %v10895_v29 = vld [vmem:[%s14826_s1 + $0x1620] ss:$16 sps:$4 sm:$0xff]  }
 0x28c   :  { %7114 = vmatprep.subr.bf16.mxu0 %v10813_v30  ;;  %7962 = vmatprep.subr.bf16.mxu1 %v10816_v31  ;;  %v10898_v30 = vld [vmem:[%s14826_s1 + $0x1628] ss:$16 sps:$4 sm:$0xff]   ;;  %v10903_v31 = vld [vmem:[%s14826_s1 + $0x1644] ss:$16 sps:$4 sm:$0xff]  }
 0x28d   :  { %7140 = vmatprep.mubr.bf16.mxu0 %v8510_v32  ;;  %7988 = vmatprep.mubr.bf16.mxu1 %v8510_v32  ;;  %v10906_v32 = vld [vmem:[%s14826_s1 + $0x164c] ss:$16 sps:$4 sm:$0xff]  }
 0x28f   :  { %7115 = vmatpush1.bf16.msra.mxu0 %v10811_v34  ;;  %7963 = vmatpush1.bf16.msra.mxu1 %v10814_v36  ;;  %v8541_v34 = vcombine.low %v92_v22, %v108_v23  ;;  %v13751_v36 = vld [vmem:[%s14827_s0 + $0x58] sm:$0xff]  ;;  %v10981_v23 = vld [vmem:[%s14826_s1 + $0x17e4] ss:$16 sps:$4 sm:$0xff]  }
 0x290   :  { %7116 = vmatprep.subr.bf16.mxu0 %v10819_v33  ;;  %7964 = vmatprep.subr.bf16.mxu1 %v10822_v35  ;;  %v13756_v33 = vld [vmem:[%s14827_s0 + $0xd8] sm:$0xff]  ;;  %v10901_v35 = vld [vmem:[%s14826_s1 + $0x1640] ss:$16 sps:$4 sm:$0xff]  }
 0x291   :  { %v10976_v22 = vld [vmem:[%s14826_s1 + $0x17c8] ss:$16 sps:$4 sm:$0xff]  }
 0x293   :  { %7117 = vmatpush1.bf16.msra.mxu0 %v10817_v37  ;;  %7965 = vmatpush1.bf16.msra.mxu1 %v10820_v38  ;;  %v10904_v37 = vld [vmem:[%s14826_s1 + $0x1648] ss:$16 sps:$4 sm:$0xff]   ;;  %v10909_v38 = vld [vmem:[%s14826_s1 + $0x1664] ss:$16 sps:$4 sm:$0xff]  }
 0x294   :  { %7118 = vmatprep.subr.bf16.mxu0 %v10825_v39  ;;  %7966 = vmatprep.subr.bf16.mxu1 %v10828_v40  ;;  %v10912_v39 = vld [vmem:[%s14826_s1 + $0x166c] ss:$16 sps:$4 sm:$0xff]   ;;  %v8512_v40 = vcombine.high %v13751_v36, %v13756_v33 }
 0x297   :  { %7119 = vmatpush1.bf16.msra.mxu0 %v10823_v42  ;;  %7967 = vmatpush1.bf16.msra.mxu1 %v10826_v44  ;;  %v10907_v42 = vld [vmem:[%s14826_s1 + $0x1660] ss:$16 sps:$4 sm:$0xff]   ;;  %v10910_v44 = vld [vmem:[%s14826_s1 + $0x1668] ss:$16 sps:$4 sm:$0xff]  }
 0x298   :  { %7120 = vmatprep.subr.bf16.mxu0 %v10831_v41  ;;  %7968 = vmatprep.subr.bf16.mxu1 %v10834_v43  ;;  %v10915_v41 = vld [vmem:[%s14826_s1 + $0x1684] ss:$16 sps:$4 sm:$0xff]   ;;  %v10918_v43 = vld [vmem:[%s14826_s1 + $0x168c] ss:$16 sps:$4 sm:$0xff]  }
 0x29b   :  { %7121 = vmatpush1.bf16.msra.mxu0 %v10829_v45  ;;  %7969 = vmatpush1.bf16.msra.mxu1 %v10832_v46  ;;  %v10913_v45 = vld [vmem:[%s14826_s1 + $0x1680] ss:$16 sps:$4 sm:$0xff]   ;;  %v10916_v46 = vld [vmem:[%s14826_s1 + $0x1688] ss:$16 sps:$4 sm:$0xff]  }
 0x29c   :  { %7122 = vmatprep.subr.bf16.mxu0 %v10837_v47  ;;  %7970 = vmatprep.subr.bf16.mxu1 %v10840_v48  ;;  %v10921_v47 = vld [vmem:[%s14826_s1 + $0x16a4] ss:$16 sps:$4 sm:$0xff]   ;;  %v10924_v48 = vld [vmem:[%s14826_s1 + $0x16ac] ss:$16 sps:$4 sm:$0xff]  }
 0x29f   :  { %7123 = vmatpush1.bf16.msra.mxu0 %v10835_v51  ;;  %7971 = vmatpush1.bf16.msra.mxu1 %v10838_v52  ;;  %v10919_v51 = vld [vmem:[%s14826_s1 + $0x16a0] ss:$16 sps:$4 sm:$0xff]   ;;  %v10922_v52 = vld [vmem:[%s14826_s1 + $0x16a8] ss:$16 sps:$4 sm:$0xff]  }
 0x2a0   :  { %7124 = vmatprep.subr.bf16.mxu0 %v10843_v49  ;;  %7972 = vmatprep.subr.bf16.mxu1 %v10846_v50  ;;  %v10927_v49 = vld [vmem:[%s14826_s1 + $0x16c4] ss:$16 sps:$4 sm:$0xff]   ;;  %v10930_v50 = vld [vmem:[%s14826_s1 + $0x16cc] ss:$16 sps:$4 sm:$0xff]  }
 0x2a3   :  { %7125 = vmatpush1.bf16.msra.mxu0 %v10841_v53  ;;  %7973 = vmatpush1.bf16.msra.mxu1 %v10844_v54  ;;  %v10925_v53 = vld [vmem:[%s14826_s1 + $0x16c0] ss:$16 sps:$4 sm:$0xff]   ;;  %v10928_v54 = vld [vmem:[%s14826_s1 + $0x16c8] ss:$16 sps:$4 sm:$0xff]  }
 0x2a4   :  { %7126 = vmatprep.subr.bf16.mxu0 %v10849_v55  ;;  %7974 = vmatprep.subr.bf16.mxu1 %v10852_v56  ;;  %v10933_v55 = vld [vmem:[%s14826_s1 + $0x16e4] ss:$16 sps:$4 sm:$0xff]   ;;  %v10936_v56 = vld [vmem:[%s14826_s1 + $0x16ec] ss:$16 sps:$4 sm:$0xff]  }
 0x2a7   :  { %7127 = vmatpush1.bf16.msra.mxu0 %v10847_v59  ;;  %7975 = vmatpush1.bf16.msra.mxu1 %v10850_v60  ;;  %v10931_v59 = vld [vmem:[%s14826_s1 + $0x16e0] ss:$16 sps:$4 sm:$0xff]   ;;  %v10934_v60 = vld [vmem:[%s14826_s1 + $0x16e8] ss:$16 sps:$4 sm:$0xff]  }
 0x2a8   :  { %7128 = vmatprep.subr.bf16.mxu0 %v10855_v57  ;;  %7976 = vmatprep.subr.bf16.mxu1 %v10858_v58  ;;  %v10939_v57 = vld [vmem:[%s14826_s1 + $0x1704] ss:$16 sps:$4 sm:$0xff]   ;;  %v10942_v58 = vld [vmem:[%s14826_s1 + $0x170c] ss:$16 sps:$4 sm:$0xff]  }
 0x2ab   :  { %7129 = vmatpush1.bf16.msra.mxu0 %v10853_v61  ;;  %7977 = vmatpush1.bf16.msra.mxu1 %v10856_v62  ;;  %v10937_v61 = vld [vmem:[%s14826_s1 + $0x1700] ss:$16 sps:$4 sm:$0xff]   ;;  %v10940_v62 = vld [vmem:[%s14826_s1 + $0x1708] ss:$16 sps:$4 sm:$0xff]  }
 0x2ac   :  { %7130 = vmatprep.subr.bf16.mxu0 %v10861_v63  ;;  %7978 = vmatprep.subr.bf16.mxu1 %v10864_v0  ;;  %v10945_v63 = vld [vmem:[%s14826_s1 + $0x1724] ss:$16 sps:$4 sm:$0xff]   ;;  %v10948_v0 = vld [vmem:[%s14826_s1 + $0x172c] ss:$16 sps:$4 sm:$0xff]  }
 0x2af   :  { %7131 = vmatpush1.bf16.msra.mxu0 %v10859_v3  ;;  %7979 = vmatpush1.bf16.msra.mxu1 %v10862_v4  ;;  %v10943_v3 = vld [vmem:[%s14826_s1 + $0x1720] ss:$16 sps:$4 sm:$0xff]   ;;  %v10946_v4 = vld [vmem:[%s14826_s1 + $0x1728] ss:$16 sps:$4 sm:$0xff]  }
 0x2b0   :  { %7132 = vmatprep.subr.bf16.mxu0 %v10867_v1  ;;  %7980 = vmatprep.subr.bf16.mxu1 %v10870_v2  ;;  %v10951_v1 = vld [vmem:[%s14826_s1 + $0x1744] ss:$16 sps:$4 sm:$0xff]   ;;  %v10954_v2 = vld [vmem:[%s14826_s1 + $0x174c] ss:$16 sps:$4 sm:$0xff]  }
 0x2b3   :  { %7133 = vmatpush1.bf16.msra.mxu0 %v10865_v5  ;;  %7981 = vmatpush1.bf16.msra.mxu1 %v10868_v6  ;;  %v10949_v5 = vld [vmem:[%s14826_s1 + $0x1740] ss:$16 sps:$4 sm:$0xff]   ;;  %v10952_v6 = vld [vmem:[%s14826_s1 + $0x1748] ss:$16 sps:$4 sm:$0xff]  }
 0x2b4   :  { %7134 = vmatprep.subr.bf16.mxu0 %v10873_v7  ;;  %7982 = vmatprep.subr.bf16.mxu1 %v10876_v8  ;;  %v10957_v7 = vld [vmem:[%s14826_s1 + $0x1764] ss:$16 sps:$4 sm:$0xff]   ;;  %v10960_v8 = vld [vmem:[%s14826_s1 + $0x176c] ss:$16 sps:$4 sm:$0xff]  }
 0x2b7   :  { %7135 = vmatpush1.bf16.msra.mxu0 %v10871_v11  ;;  %7983 = vmatpush1.bf16.msra.mxu1 %v10874_v12  ;;  %v10955_v11 = vld [vmem:[%s14826_s1 + $0x1760] ss:$16 sps:$4 sm:$0xff]   ;;  %v10958_v12 = vld [vmem:[%s14826_s1 + $0x1768] ss:$16 sps:$4 sm:$0xff]  }
 0x2b8   :  { %7136 = vmatprep.subr.bf16.mxu0 %v10879_v9  ;;  %7984 = vmatprep.subr.bf16.mxu1 %v10882_v10  ;;  %v10963_v9 = vld [vmem:[%s14826_s1 + $0x1784] ss:$16 sps:$4 sm:$0xff]   ;;  %v10966_v10 = vld [vmem:[%s14826_s1 + $0x178c] ss:$16 sps:$4 sm:$0xff]  }
 0x2bb   :  { %7137 = vmatpush1.bf16.msra.mxu0 %v10877_v13  ;;  %7985 = vmatpush1.bf16.msra.mxu1 %v10880_v14  ;;  %v10961_v13 = vld [vmem:[%s14826_s1 + $0x1780] ss:$16 sps:$4 sm:$0xff]   ;;  %v10964_v14 = vld [vmem:[%s14826_s1 + $0x1788] ss:$16 sps:$4 sm:$0xff]  }
 0x2bc   :  { %7138 = vmatprep.subr.bf16.mxu0 %v10885_v15  ;;  %7986 = vmatprep.subr.bf16.mxu1 %v10888_v16  ;;  %v10969_v15 = vld [vmem:[%s14826_s1 + $0x17a4] ss:$16 sps:$4 sm:$0xff]   ;;  %v10972_v16 = vld [vmem:[%s14826_s1 + $0x17ac] ss:$16 sps:$4 sm:$0xff]  }
 0x2bf   :  { %7139 = vmatpush1.bf16.msra.mxu0 %v10883_v19  ;;  %7987 = vmatpush1.bf16.msra.mxu1 %v10886_v17  ;;  %v10967_v19 = vld [vmem:[%s14826_s1 + $0x17a0] ss:$16 sps:$4 sm:$0xff]   ;;  %v10970_v17 = vld [vmem:[%s14826_s1 + $0x17a8] ss:$16 sps:$4 sm:$0xff]  }
 0x2c0   :  { %7161 = vmatprep.subr.bf16.mxu0 %v10891_v18  ;;  %8009 = vmatprep.subr.bf16.mxu1 %v10894_v20  ;;  %v10975_v18 = vld [vmem:[%s14826_s1 + $0x17c4] ss:$16 sps:$4 sm:$0xff]   ;;  %v10978_v20 = vld [vmem:[%s14826_s1 + $0x17cc] ss:$16 sps:$4 sm:$0xff]  }
 0x2c2   :  { %7141 = vmatmul.mubr.bf16.vlgmr.msra.gmra.mrb[0].mxu0 %v8509_v21  ;;  %7989 = vmatmul.mubr.bf16.vlgmr.msra.gmra.mrb[0].mxu1 %v8509_v21  ;;  %v10973_v21 = vld [vmem:[%s14826_s1 + $0x17c0] ss:$16 sps:$4 sm:$0xff]  }
 0x2c3   :  { %7162 = vmatpush1.bf16.msra.mxu0 %v10889_v24  ;;  %8010 = vmatpush1.bf16.msra.mxu1 %v10892_v26  ;;  %v10984_v24 = vld [vmem:[%s14826_s1 + $0x17ec] ss:$16 sps:$4 sm:$0xff]   ;;  %v10979_v26 = vld [vmem:[%s14826_s1 + $0x17e0] ss:$16 sps:$4 sm:$0xff]  }
 0x2c4   :  { %7163 = vmatprep.subr.bf16.mxu0 %v10897_v25  ;;  %8011 = vmatprep.subr.bf16.mxu1 %v10900_v27  ;;  %v10982_v25 = vld [vmem:[%s14826_s1 + $0x17e8] ss:$16 sps:$4 sm:$0xff]   ;;  %v10987_v27 = vld [vmem:[%s14826_s1 + $0x1804] ss:$16 sps:$4 sm:$0xff]  }
 0x2c5   :  { %7150 = vmatprep.mubr.bf16.mxu0 %v8542_v28  ;;  %7998 = vmatprep.mubr.bf16.mxu1 %v8542_v28  ;;  %v10990_v28 = vld [vmem:[%s14826_s1 + $0x180c] ss:$16 sps:$4 sm:$0xff]  }
 0x2c7   :  { %7164 = vmatpush1.bf16.msra.mxu0 %v10895_v29  ;;  %8012 = vmatpush1.bf16.msra.mxu1 %v10898_v30  ;;  %v8511_v29 = vcombine.low %v13751_v36, %v13756_v33  ;;  %v93_v30 = vld [vmem:[%s14827_s0 + $0x158] sm:$0xff]  ;;  %v10993_v36 = vld [vmem:[%s14826_s1 + $0x1824] ss:$16 sps:$4 sm:$0xff]  }
 0x2c8   :  { %7165 = vmatprep.subr.bf16.mxu0 %v10903_v31  ;;  %8013 = vmatprep.subr.bf16.mxu1 %v10906_v32  ;;  %v109_v31 = vld [vmem:[%s14827_s0 + $0x1d8] sm:$0xff]  ;;  %v10985_v32 = vld [vmem:[%s14826_s1 + $0x1800] ss:$16 sps:$4 sm:$0xff]  }
 0x2c9   :  { %v10996_v33 = vld [vmem:[%s14826_s1 + $0x182c] ss:$16 sps:$4 sm:$0xff]  }
 0x2ca   :  { %7151 = vmatmul.mubr.bf16.gmra.mrb[4].mxu0 %v8541_v34  ;;  %7999 = vmatmul.mubr.bf16.gmra.mrb[4].mxu1 %v8541_v34  ;;  %v10988_v34 = vld [vmem:[%s14826_s1 + $0x1808] ss:$16 sps:$4 sm:$0xff]  }
 0x2cb   :  { %7166 = vmatpush1.bf16.msra.mxu0 %v10901_v35  ;;  %8014 = vmatpush1.bf16.msra.mxu1 %v10904_v37  ;;  %v8544_v35 = vcombine.high %v93_v30, %v109_v31  ;;  %v10991_v37 = vld [vmem:[%s14826_s1 + $0x1820] ss:$16 sps:$4 sm:$0xff]  }
 0x2cc   :  { %7167 = vmatprep.subr.bf16.mxu0 %v10909_v38  ;;  %8015 = vmatprep.subr.bf16.mxu1 %v10912_v39  ;;  %v10994_v38 = vld [vmem:[%s14826_s1 + $0x1828] ss:$16 sps:$4 sm:$0xff]   ;;  %v10999_v39 = vld [vmem:[%s14826_s1 + $0x1844] ss:$16 sps:$4 sm:$0xff]  }
 0x2cd   :  { %7193 = vmatprep.mubr.bf16.mxu0 %v8512_v40  ;;  %8041 = vmatprep.mubr.bf16.mxu1 %v8512_v40  ;;  %v11002_v40 = vld [vmem:[%s14826_s1 + $0x184c] ss:$16 sps:$4 sm:$0xff]  }
 0x2cf   :  { %7168 = vmatpush1.bf16.msra.mxu0 %v10907_v42  ;;  %8016 = vmatpush1.bf16.msra.mxu1 %v10910_v44  ;;  %v8543_v42 = vcombine.low %v93_v30, %v109_v31  ;;  %v13963_v44 = vld [vmem:[%s14827_s0 + $0x60] sm:$0xff]  ;;  %v11072_v30 = vld [vmem:[%s14826_s1 + $0x19c8] ss:$16 sps:$4 sm:$0xff]  }
 0x2d0   :  { %7169 = vmatprep.subr.bf16.mxu0 %v10915_v41  ;;  %8017 = vmatprep.subr.bf16.mxu1 %v10918_v43  ;;  %v13968_v41 = vld [vmem:[%s14827_s0 + $0xe0] sm:$0xff] }
 0x2d1   :  { %v10997_v43 = vld [vmem:[%s14826_s1 + $0x1840] ss:$16 sps:$4 sm:$0xff]   ;;  %v11077_v31 = vld [vmem:[%s14826_s1 + $0x19e4] ss:$16 sps:$4 sm:$0xff]  }
 0x2d3   :  { %7170 = vmatpush1.bf16.msra.mxu0 %v10913_v45  ;;  %8018 = vmatpush1.bf16.msra.mxu1 %v10916_v46  ;;  %v11000_v45 = vld [vmem:[%s14826_s1 + $0x1848] ss:$16 sps:$4 sm:$0xff]   ;;  %v11005_v46 = vld [vmem:[%s14826_s1 + $0x1864] ss:$16 sps:$4 sm:$0xff]  }
 0x2d4   :  { %7171 = vmatprep.subr.bf16.mxu0 %v10921_v47  ;;  %8019 = vmatprep.subr.bf16.mxu1 %v10924_v48  ;;  %v11008_v47 = vld [vmem:[%s14826_s1 + $0x186c] ss:$16 sps:$4 sm:$0xff]   ;;  %v8514_v48 = vcombine.high %v13963_v44, %v13968_v41 }
 0x2d7   :  { %7172 = vmatpush1.bf16.msra.mxu0 %v10919_v51  ;;  %8020 = vmatpush1.bf16.msra.mxu1 %v10922_v52  ;;  %v11003_v51 = vld [vmem:[%s14826_s1 + $0x1860] ss:$16 sps:$4 sm:$0xff]   ;;  %v11006_v52 = vld [vmem:[%s14826_s1 + $0x1868] ss:$16 sps:$4 sm:$0xff]  }
 0x2d8   :  { %7173 = vmatprep.subr.bf16.mxu0 %v10927_v49  ;;  %8021 = vmatprep.subr.bf16.mxu1 %v10930_v50  ;;  %v11011_v49 = vld [vmem:[%s14826_s1 + $0x1884] ss:$16 sps:$4 sm:$0xff]   ;;  %v11014_v50 = vld [vmem:[%s14826_s1 + $0x188c] ss:$16 sps:$4 sm:$0xff]  }
 0x2db   :  { %7174 = vmatpush1.bf16.msra.mxu0 %v10925_v53  ;;  %8022 = vmatpush1.bf16.msra.mxu1 %v10928_v54  ;;  %v11009_v53 = vld [vmem:[%s14826_s1 + $0x1880] ss:$16 sps:$4 sm:$0xff]   ;;  %v11012_v54 = vld [vmem:[%s14826_s1 + $0x1888] ss:$16 sps:$4 sm:$0xff]  }
 0x2dc   :  { %7175 = vmatprep.subr.bf16.mxu0 %v10933_v55  ;;  %8023 = vmatprep.subr.bf16.mxu1 %v10936_v56  ;;  %v11017_v55 = vld [vmem:[%s14826_s1 + $0x18a4] ss:$16 sps:$4 sm:$0xff]   ;;  %v11020_v56 = vld [vmem:[%s14826_s1 + $0x18ac] ss:$16 sps:$4 sm:$0xff]  }
 0x2df   :  { %7176 = vmatpush1.bf16.msra.mxu0 %v10931_v59  ;;  %8024 = vmatpush1.bf16.msra.mxu1 %v10934_v60  ;;  %v11015_v59 = vld [vmem:[%s14826_s1 + $0x18a0] ss:$16 sps:$4 sm:$0xff]   ;;  %v11018_v60 = vld [vmem:[%s14826_s1 + $0x18a8] ss:$16 sps:$4 sm:$0xff]  }
 0x2e0   :  { %7177 = vmatprep.subr.bf16.mxu0 %v10939_v57  ;;  %8025 = vmatprep.subr.bf16.mxu1 %v10942_v58  ;;  %v11023_v57 = vld [vmem:[%s14826_s1 + $0x18c4] ss:$16 sps:$4 sm:$0xff]   ;;  %v11026_v58 = vld [vmem:[%s14826_s1 + $0x18cc] ss:$16 sps:$4 sm:$0xff]  }
 0x2e3   :  { %7178 = vmatpush1.bf16.msra.mxu0 %v10937_v61  ;;  %8026 = vmatpush1.bf16.msra.mxu1 %v10940_v62  ;;  %v11021_v61 = vld [vmem:[%s14826_s1 + $0x18c0] ss:$16 sps:$4 sm:$0xff]   ;;  %v11024_v62 = vld [vmem:[%s14826_s1 + $0x18c8] ss:$16 sps:$4 sm:$0xff]  }
 0x2e4   :  { %7179 = vmatprep.subr.bf16.mxu0 %v10945_v63  ;;  %8027 = vmatprep.subr.bf16.mxu1 %v10948_v0  ;;  %v11029_v63 = vld [vmem:[%s14826_s1 + $0x18e4] ss:$16 sps:$4 sm:$0xff]   ;;  %v11032_v0 = vld [vmem:[%s14826_s1 + $0x18ec] ss:$16 sps:$4 sm:$0xff]  }
 0x2e7   :  { %7180 = vmatpush1.bf16.msra.mxu0 %v10943_v3  ;;  %8028 = vmatpush1.bf16.msra.mxu1 %v10946_v4  ;;  %v11027_v3 = vld [vmem:[%s14826_s1 + $0x18e0] ss:$16 sps:$4 sm:$0xff]   ;;  %v11030_v4 = vld [vmem:[%s14826_s1 + $0x18e8] ss:$16 sps:$4 sm:$0xff]  }
 0x2e8   :  { %7181 = vmatprep.subr.bf16.mxu0 %v10951_v1  ;;  %8029 = vmatprep.subr.bf16.mxu1 %v10954_v2  ;;  %v11035_v1 = vld [vmem:[%s14826_s1 + $0x1904] ss:$16 sps:$4 sm:$0xff]   ;;  %v11038_v2 = vld [vmem:[%s14826_s1 + $0x190c] ss:$16 sps:$4 sm:$0xff]  }
 0x2eb   :  { %7182 = vmatpush1.bf16.msra.mxu0 %v10949_v5  ;;  %8030 = vmatpush1.bf16.msra.mxu1 %v10952_v6  ;;  %v11033_v5 = vld [vmem:[%s14826_s1 + $0x1900] ss:$16 sps:$4 sm:$0xff]   ;;  %v11036_v6 = vld [vmem:[%s14826_s1 + $0x1908] ss:$16 sps:$4 sm:$0xff]  }
 0x2ec   :  { %7183 = vmatprep.subr.bf16.mxu0 %v10957_v7  ;;  %8031 = vmatprep.subr.bf16.mxu1 %v10960_v8  ;;  %v11041_v7 = vld [vmem:[%s14826_s1 + $0x1924] ss:$16 sps:$4 sm:$0xff]   ;;  %v11044_v8 = vld [vmem:[%s14826_s1 + $0x192c] ss:$16 sps:$4 sm:$0xff]  }
 0x2ef   :  { %7184 = vmatpush1.bf16.msra.mxu0 %v10955_v11  ;;  %8032 = vmatpush1.bf16.msra.mxu1 %v10958_v12  ;;  %v11039_v11 = vld [vmem:[%s14826_s1 + $0x1920] ss:$16 sps:$4 sm:$0xff]   ;;  %v11042_v12 = vld [vmem:[%s14826_s1 + $0x1928] ss:$16 sps:$4 sm:$0xff]  }
 0x2f0   :  { %7185 = vmatprep.subr.bf16.mxu0 %v10963_v9  ;;  %8033 = vmatprep.subr.bf16.mxu1 %v10966_v10  ;;  %v11047_v9 = vld [vmem:[%s14826_s1 + $0x1944] ss:$16 sps:$4 sm:$0xff]   ;;  %v11050_v10 = vld [vmem:[%s14826_s1 + $0x194c] ss:$16 sps:$4 sm:$0xff]  }
 0x2f3   :  { %7186 = vmatpush1.bf16.msra.mxu0 %v10961_v13  ;;  %8034 = vmatpush1.bf16.msra.mxu1 %v10964_v14  ;;  %v11045_v13 = vld [vmem:[%s14826_s1 + $0x1940] ss:$16 sps:$4 sm:$0xff]   ;;  %v11048_v14 = vld [vmem:[%s14826_s1 + $0x1948] ss:$16 sps:$4 sm:$0xff]  }
 0x2f4   :  { %7187 = vmatprep.subr.bf16.mxu0 %v10969_v15  ;;  %8035 = vmatprep.subr.bf16.mxu1 %v10972_v16  ;;  %v11053_v15 = vld [vmem:[%s14826_s1 + $0x1964] ss:$16 sps:$4 sm:$0xff]   ;;  %v11056_v16 = vld [vmem:[%s14826_s1 + $0x196c] ss:$16 sps:$4 sm:$0xff]  }
 0x2f7   :  { %7188 = vmatpush1.bf16.msra.mxu0 %v10967_v19  ;;  %8036 = vmatpush1.bf16.msra.mxu1 %v10970_v17  ;;  %v11051_v19 = vld [vmem:[%s14826_s1 + $0x1960] ss:$16 sps:$4 sm:$0xff]   ;;  %v11054_v17 = vld [vmem:[%s14826_s1 + $0x1968] ss:$16 sps:$4 sm:$0xff]  }
 0x2f8   :  { %7189 = vmatprep.subr.bf16.mxu0 %v10975_v18  ;;  %8037 = vmatprep.subr.bf16.mxu1 %v10978_v20  ;;  %v11059_v18 = vld [vmem:[%s14826_s1 + $0x1984] ss:$16 sps:$4 sm:$0xff]   ;;  %v11062_v20 = vld [vmem:[%s14826_s1 + $0x198c] ss:$16 sps:$4 sm:$0xff]  }
 0x2fb   :  { %7190 = vmatpush1.bf16.msra.mxu0 %v10973_v21  ;;  %8038 = vmatpush1.bf16.msra.mxu1 %v10976_v22  ;;  %v11057_v21 = vld [vmem:[%s14826_s1 + $0x1980] ss:$16 sps:$4 sm:$0xff]   ;;  %v11060_v22 = vld [vmem:[%s14826_s1 + $0x1988] ss:$16 sps:$4 sm:$0xff]  }
 0x2fc   :  { %7191 = vmatprep.subr.bf16.mxu0 %v10981_v23  ;;  %8039 = vmatprep.subr.bf16.mxu1 %v10984_v24  ;;  %v11065_v23 = vld [vmem:[%s14826_s1 + $0x19a4] ss:$16 sps:$4 sm:$0xff]   ;;  %v11068_v24 = vld [vmem:[%s14826_s1 + $0x19ac] ss:$16 sps:$4 sm:$0xff]  }
 0x2ff   :  { %7192 = vmatpush1.bf16.msra.mxu0 %v10979_v26  ;;  %8040 = vmatpush1.bf16.msra.mxu1 %v10982_v25  ;;  %v11063_v26 = vld [vmem:[%s14826_s1 + $0x19a0] ss:$16 sps:$4 sm:$0xff]   ;;  %v11066_v25 = vld [vmem:[%s14826_s1 + $0x19a8] ss:$16 sps:$4 sm:$0xff]  }
 0x300   :  { %7214 = vmatprep.subr.bf16.mxu0 %v10987_v27  ;;  %8062 = vmatprep.subr.bf16.mxu1 %v10990_v28  ;;  %v11071_v27 = vld [vmem:[%s14826_s1 + $0x19c4] ss:$16 sps:$4 sm:$0xff]   ;;  %v11074_v28 = vld [vmem:[%s14826_s1 + $0x19cc] ss:$16 sps:$4 sm:$0xff]  }
 0x302   :  { %7194 = vmatmul.mubr.bf16.vlgmr.msra.gmra.mrb[0].mxu0 %v8511_v29  ;;  %8042 = vmatmul.mubr.bf16.vlgmr.msra.gmra.mrb[0].mxu1 %v8511_v29  ;;  %v11069_v29 = vld [vmem:[%s14826_s1 + $0x19c0] ss:$16 sps:$4 sm:$0xff]  }
 0x303   :  { %7215 = vmatpush1.bf16.msra.mxu0 %v10985_v32  ;;  %8063 = vmatpush1.bf16.msra.mxu1 %v10988_v34  ;;  %v11080_v32 = vld [vmem:[%s14826_s1 + $0x19ec] ss:$16 sps:$4 sm:$0xff]   ;;  %v11075_v34 = vld [vmem:[%s14826_s1 + $0x19e0] ss:$16 sps:$4 sm:$0xff]  }
 0x304   :  { %7216 = vmatprep.subr.bf16.mxu0 %v10993_v36  ;;  %8064 = vmatprep.subr.bf16.mxu1 %v10996_v33  ;;  %v11078_v36 = vld [vmem:[%s14826_s1 + $0x19e8] ss:$16 sps:$4 sm:$0xff]   ;;  %v11083_v33 = vld [vmem:[%s14826_s1 + $0x1a04] ss:$16 sps:$4 sm:$0xff]  }
 0x305   :  { %7203 = vmatprep.mubr.bf16.mxu0 %v8544_v35  ;;  %8051 = vmatprep.mubr.bf16.mxu1 %v8544_v35  ;;  %v11086_v35 = vld [vmem:[%s14826_s1 + $0x1a0c] ss:$16 sps:$4 sm:$0xff]  }
 0x307   :  { %7217 = vmatpush1.bf16.msra.mxu0 %v10991_v37  ;;  %8065 = vmatpush1.bf16.msra.mxu1 %v10994_v38  ;;  %v8513_v37 = vcombine.low %v13963_v44, %v13968_v41  ;;  %v94_v38 = vld [vmem:[%s14827_s0 + $0x160] sm:$0xff]  ;;  %v11092_v41 = vld [vmem:[%s14826_s1 + $0x1a2c] ss:$16 sps:$4 sm:$0xff]  }
 0x308   :  { %7218 = vmatprep.subr.bf16.mxu0 %v10999_v39  ;;  %8066 = vmatprep.subr.bf16.mxu1 %v11002_v40  ;;  %v110_v39 = vld [vmem:[%s14827_s0 + $0x1e0] sm:$0xff] }
 0x309   :  { %v11081_v40 = vld [vmem:[%s14826_s1 + $0x1a00] ss:$16 sps:$4 sm:$0xff]   ;;  %v11089_v44 = vld [vmem:[%s14826_s1 + $0x1a24] ss:$16 sps:$4 sm:$0xff]  }
 0x30a   :  { %7204 = vmatmul.mubr.bf16.gmra.mrb[4].mxu0 %v8543_v42  ;;  %8052 = vmatmul.mubr.bf16.gmra.mrb[4].mxu1 %v8543_v42  ;;  %v11084_v42 = vld [vmem:[%s14826_s1 + $0x1a08] ss:$16 sps:$4 sm:$0xff]  }
 0x30b   :  { %7219 = vmatpush1.bf16.msra.mxu0 %v10997_v43  ;;  %8067 = vmatpush1.bf16.msra.mxu1 %v11000_v45  ;;  %v8546_v43 = vcombine.high %v94_v38, %v110_v39  ;;  %v11087_v45 = vld [vmem:[%s14826_s1 + $0x1a20] ss:$16 sps:$4 sm:$0xff]  }
 0x30c   :  { %7220 = vmatprep.subr.bf16.mxu0 %v11005_v46  ;;  %8068 = vmatprep.subr.bf16.mxu1 %v11008_v47  ;;  %v11090_v46 = vld [vmem:[%s14826_s1 + $0x1a28] ss:$16 sps:$4 sm:$0xff]   ;;  %v11095_v47 = vld [vmem:[%s14826_s1 + $0x1a44] ss:$16 sps:$4 sm:$0xff]  }
 0x30d   :  { %7246 = vmatprep.mubr.bf16.mxu0 %v8514_v48  ;;  %8094 = vmatprep.mubr.bf16.mxu1 %v8514_v48  ;;  %v11098_v48 = vld [vmem:[%s14826_s1 + $0x1a4c] ss:$16 sps:$4 sm:$0xff]  }
 0x30f   :  { %7221 = vmatpush1.bf16.msra.mxu0 %v11003_v51  ;;  %8069 = vmatpush1.bf16.msra.mxu1 %v11006_v52  ;;  %v8545_v51 = vcombine.low %v94_v38, %v110_v39  ;;  %v14175_v52 = vld [vmem:[%s14827_s0 + $0x68] sm:$0xff]  ;;  %v11173_v39 = vld [vmem:[%s14826_s1 + $0x1be4] ss:$16 sps:$4 sm:$0xff]  }
 0x310   :  { %7222 = vmatprep.subr.bf16.mxu0 %v11011_v49  ;;  %8070 = vmatprep.subr.bf16.mxu1 %v11014_v50  ;;  %v14180_v49 = vld [vmem:[%s14827_s0 + $0xe8] sm:$0xff]  ;;  %v11093_v50 = vld [vmem:[%s14826_s1 + $0x1a40] ss:$16 sps:$4 sm:$0xff]  }
 0x311   :  { %v11168_v38 = vld [vmem:[%s14826_s1 + $0x1bc8] ss:$16 sps:$4 sm:$0xff]  }
 0x313   :  { %7223 = vmatpush1.bf16.msra.mxu0 %v11009_v53  ;;  %8071 = vmatpush1.bf16.msra.mxu1 %v11012_v54  ;;  %v11096_v53 = vld [vmem:[%s14826_s1 + $0x1a48] ss:$16 sps:$4 sm:$0xff]   ;;  %v11101_v54 = vld [vmem:[%s14826_s1 + $0x1a64] ss:$16 sps:$4 sm:$0xff]  }
 0x314   :  { %7224 = vmatprep.subr.bf16.mxu0 %v11017_v55  ;;  %8072 = vmatprep.subr.bf16.mxu1 %v11020_v56  ;;  %v11104_v55 = vld [vmem:[%s14826_s1 + $0x1a6c] ss:$16 sps:$4 sm:$0xff]   ;;  %v8516_v56 = vcombine.high %v14175_v52, %v14180_v49 }
 0x317   :  { %7225 = vmatpush1.bf16.msra.mxu0 %v11015_v59  ;;  %8073 = vmatpush1.bf16.msra.mxu1 %v11018_v60  ;;  %v11099_v59 = vld [vmem:[%s14826_s1 + $0x1a60] ss:$16 sps:$4 sm:$0xff]   ;;  %v11102_v60 = vld [vmem:[%s14826_s1 + $0x1a68] ss:$16 sps:$4 sm:$0xff]  }
 0x318   :  { %7226 = vmatprep.subr.bf16.mxu0 %v11023_v57  ;;  %8074 = vmatprep.subr.bf16.mxu1 %v11026_v58  ;;  %v11107_v57 = vld [vmem:[%s14826_s1 + $0x1a84] ss:$16 sps:$4 sm:$0xff]   ;;  %v11110_v58 = vld [vmem:[%s14826_s1 + $0x1a8c] ss:$16 sps:$4 sm:$0xff]  }
 0x31b   :  { %7227 = vmatpush1.bf16.msra.mxu0 %v11021_v61  ;;  %8075 = vmatpush1.bf16.msra.mxu1 %v11024_v62  ;;  %v11105_v61 = vld [vmem:[%s14826_s1 + $0x1a80] ss:$16 sps:$4 sm:$0xff]   ;;  %v11108_v62 = vld [vmem:[%s14826_s1 + $0x1a88] ss:$16 sps:$4 sm:$0xff]  }
 0x31c   :  { %7228 = vmatprep.subr.bf16.mxu0 %v11029_v63  ;;  %8076 = vmatprep.subr.bf16.mxu1 %v11032_v0  ;;  %v11113_v63 = vld [vmem:[%s14826_s1 + $0x1aa4] ss:$16 sps:$4 sm:$0xff]   ;;  %v11116_v0 = vld [vmem:[%s14826_s1 + $0x1aac] ss:$16 sps:$4 sm:$0xff]  }
 0x31f   :  { %7229 = vmatpush1.bf16.msra.mxu0 %v11027_v3  ;;  %8077 = vmatpush1.bf16.msra.mxu1 %v11030_v4  ;;  %v11111_v3 = vld [vmem:[%s14826_s1 + $0x1aa0] ss:$16 sps:$4 sm:$0xff]   ;;  %v11114_v4 = vld [vmem:[%s14826_s1 + $0x1aa8] ss:$16 sps:$4 sm:$0xff]  }
 0x320   :  { %7230 = vmatprep.subr.bf16.mxu0 %v11035_v1  ;;  %8078 = vmatprep.subr.bf16.mxu1 %v11038_v2  ;;  %v11119_v1 = vld [vmem:[%s14826_s1 + $0x1ac4] ss:$16 sps:$4 sm:$0xff]   ;;  %v11122_v2 = vld [vmem:[%s14826_s1 + $0x1acc] ss:$16 sps:$4 sm:$0xff]  }
 0x323   :  { %7231 = vmatpush1.bf16.msra.mxu0 %v11033_v5  ;;  %8079 = vmatpush1.bf16.msra.mxu1 %v11036_v6  ;;  %v11117_v5 = vld [vmem:[%s14826_s1 + $0x1ac0] ss:$16 sps:$4 sm:$0xff]   ;;  %v11120_v6 = vld [vmem:[%s14826_s1 + $0x1ac8] ss:$16 sps:$4 sm:$0xff]  }
 0x324   :  { %7232 = vmatprep.subr.bf16.mxu0 %v11041_v7  ;;  %8080 = vmatprep.subr.bf16.mxu1 %v11044_v8  ;;  %v11125_v7 = vld [vmem:[%s14826_s1 + $0x1ae4] ss:$16 sps:$4 sm:$0xff]   ;;  %v11128_v8 = vld [vmem:[%s14826_s1 + $0x1aec] ss:$16 sps:$4 sm:$0xff]  }
 0x327   :  { %7233 = vmatpush1.bf16.msra.mxu0 %v11039_v11  ;;  %8081 = vmatpush1.bf16.msra.mxu1 %v11042_v12  ;;  %v11123_v11 = vld [vmem:[%s14826_s1 + $0x1ae0] ss:$16 sps:$4 sm:$0xff]   ;;  %v11126_v12 = vld [vmem:[%s14826_s1 + $0x1ae8] ss:$16 sps:$4 sm:$0xff]  }
 0x328   :  { %7234 = vmatprep.subr.bf16.mxu0 %v11047_v9  ;;  %8082 = vmatprep.subr.bf16.mxu1 %v11050_v10  ;;  %v11131_v9 = vld [vmem:[%s14826_s1 + $0x1b04] ss:$16 sps:$4 sm:$0xff]   ;;  %v11134_v10 = vld [vmem:[%s14826_s1 + $0x1b0c] ss:$16 sps:$4 sm:$0xff]  }
 0x32b   :  { %7235 = vmatpush1.bf16.msra.mxu0 %v11045_v13  ;;  %8083 = vmatpush1.bf16.msra.mxu1 %v11048_v14  ;;  %v11129_v13 = vld [vmem:[%s14826_s1 + $0x1b00] ss:$16 sps:$4 sm:$0xff]   ;;  %v11132_v14 = vld [vmem:[%s14826_s1 + $0x1b08] ss:$16 sps:$4 sm:$0xff]  }
 0x32c   :  { %7236 = vmatprep.subr.bf16.mxu0 %v11053_v15  ;;  %8084 = vmatprep.subr.bf16.mxu1 %v11056_v16  ;;  %v11137_v15 = vld [vmem:[%s14826_s1 + $0x1b24] ss:$16 sps:$4 sm:$0xff]   ;;  %v11140_v16 = vld [vmem:[%s14826_s1 + $0x1b2c] ss:$16 sps:$4 sm:$0xff]  }
 0x32f   :  { %7237 = vmatpush1.bf16.msra.mxu0 %v11051_v19  ;;  %8085 = vmatpush1.bf16.msra.mxu1 %v11054_v17  ;;  %v11135_v19 = vld [vmem:[%s14826_s1 + $0x1b20] ss:$16 sps:$4 sm:$0xff]   ;;  %v11138_v17 = vld [vmem:[%s14826_s1 + $0x1b28] ss:$16 sps:$4 sm:$0xff]  }
 0x330   :  { %7238 = vmatprep.subr.bf16.mxu0 %v11059_v18  ;;  %8086 = vmatprep.subr.bf16.mxu1 %v11062_v20  ;;  %v11143_v18 = vld [vmem:[%s14826_s1 + $0x1b44] ss:$16 sps:$4 sm:$0xff]   ;;  %v11146_v20 = vld [vmem:[%s14826_s1 + $0x1b4c] ss:$16 sps:$4 sm:$0xff]  }
 0x333   :  { %7239 = vmatpush1.bf16.msra.mxu0 %v11057_v21  ;;  %8087 = vmatpush1.bf16.msra.mxu1 %v11060_v22  ;;  %v11141_v21 = vld [vmem:[%s14826_s1 + $0x1b40] ss:$16 sps:$4 sm:$0xff]   ;;  %v11144_v22 = vld [vmem:[%s14826_s1 + $0x1b48] ss:$16 sps:$4 sm:$0xff]  }
 0x334   :  { %7240 = vmatprep.subr.bf16.mxu0 %v11065_v23  ;;  %8088 = vmatprep.subr.bf16.mxu1 %v11068_v24  ;;  %v11149_v23 = vld [vmem:[%s14826_s1 + $0x1b64] ss:$16 sps:$4 sm:$0xff]   ;;  %v11152_v24 = vld [vmem:[%s14826_s1 + $0x1b6c] ss:$16 sps:$4 sm:$0xff]  }
 0x337   :  { %7241 = vmatpush1.bf16.msra.mxu0 %v11063_v26  ;;  %8089 = vmatpush1.bf16.msra.mxu1 %v11066_v25  ;;  %v11147_v26 = vld [vmem:[%s14826_s1 + $0x1b60] ss:$16 sps:$4 sm:$0xff]   ;;  %v11150_v25 = vld [vmem:[%s14826_s1 + $0x1b68] ss:$16 sps:$4 sm:$0xff]  }
 0x338   :  { %7242 = vmatprep.subr.bf16.mxu0 %v11071_v27  ;;  %8090 = vmatprep.subr.bf16.mxu1 %v11074_v28  ;;  %v11155_v27 = vld [vmem:[%s14826_s1 + $0x1b84] ss:$16 sps:$4 sm:$0xff]   ;;  %v11158_v28 = vld [vmem:[%s14826_s1 + $0x1b8c] ss:$16 sps:$4 sm:$0xff]  }
 0x33b   :  { %7243 = vmatpush1.bf16.msra.mxu0 %v11069_v29  ;;  %8091 = vmatpush1.bf16.msra.mxu1 %v11072_v30  ;;  %v11153_v29 = vld [vmem:[%s14826_s1 + $0x1b80] ss:$16 sps:$4 sm:$0xff]   ;;  %v11156_v30 = vld [vmem:[%s14826_s1 + $0x1b88] ss:$16 sps:$4 sm:$0xff]  }
 0x33c   :  { %7244 = vmatprep.subr.bf16.mxu0 %v11077_v31  ;;  %8092 = vmatprep.subr.bf16.mxu1 %v11080_v32  ;;  %v11161_v31 = vld [vmem:[%s14826_s1 + $0x1ba4] ss:$16 sps:$4 sm:$0xff]   ;;  %v11164_v32 = vld [vmem:[%s14826_s1 + $0x1bac] ss:$16 sps:$4 sm:$0xff]  }
 0x33f   :  { %7245 = vmatpush1.bf16.msra.mxu0 %v11075_v34  ;;  %8093 = vmatpush1.bf16.msra.mxu1 %v11078_v36  ;;  %v11159_v34 = vld [vmem:[%s14826_s1 + $0x1ba0] ss:$16 sps:$4 sm:$0xff]   ;;  %v11162_v36 = vld [vmem:[%s14826_s1 + $0x1ba8] ss:$16 sps:$4 sm:$0xff]  }
 0x340   :  { %7267 = vmatprep.subr.bf16.mxu0 %v11083_v33  ;;  %8115 = vmatprep.subr.bf16.mxu1 %v11086_v35  ;;  %v11167_v33 = vld [vmem:[%s14826_s1 + $0x1bc4] ss:$16 sps:$4 sm:$0xff]   ;;  %v11170_v35 = vld [vmem:[%s14826_s1 + $0x1bcc] ss:$16 sps:$4 sm:$0xff]  }
 0x342   :  { %7247 = vmatmul.mubr.bf16.vlgmr.msra.gmra.mrb[0].mxu0 %v8513_v37  ;;  %8095 = vmatmul.mubr.bf16.vlgmr.msra.gmra.mrb[0].mxu1 %v8513_v37  ;;  %v11165_v37 = vld [vmem:[%s14826_s1 + $0x1bc0] ss:$16 sps:$4 sm:$0xff]  }
 0x343   :  { %7268 = vmatpush1.bf16.msra.mxu0 %v11081_v40  ;;  %8116 = vmatpush1.bf16.msra.mxu1 %v11084_v42  ;;  %v11176_v40 = vld [vmem:[%s14826_s1 + $0x1bec] ss:$16 sps:$4 sm:$0xff]   ;;  %v11171_v42 = vld [vmem:[%s14826_s1 + $0x1be0] ss:$16 sps:$4 sm:$0xff]  }
 0x344   :  { %7269 = vmatprep.subr.bf16.mxu0 %v11089_v44  ;;  %8117 = vmatprep.subr.bf16.mxu1 %v11092_v41  ;;  %v11174_v44 = vld [vmem:[%s14826_s1 + $0x1be8] ss:$16 sps:$4 sm:$0xff]   ;;  %v11179_v41 = vld [vmem:[%s14826_s1 + $0x1c04] ss:$16 sps:$4 sm:$0xff]  }
 0x345   :  { %7256 = vmatprep.mubr.bf16.mxu0 %v8546_v43  ;;  %8104 = vmatprep.mubr.bf16.mxu1 %v8546_v43  ;;  %v11182_v43 = vld [vmem:[%s14826_s1 + $0x1c0c] ss:$16 sps:$4 sm:$0xff]  }
 0x347   :  { %7270 = vmatpush1.bf16.msra.mxu0 %v11087_v45  ;;  %8118 = vmatpush1.bf16.msra.mxu1 %v11090_v46  ;;  %v8515_v45 = vcombine.low %v14175_v52, %v14180_v49  ;;  %v95_v46 = vld [vmem:[%s14827_s0 + $0x168] sm:$0xff]  ;;  %v11185_v52 = vld [vmem:[%s14826_s1 + $0x1c24] ss:$16 sps:$4 sm:$0xff]  }
 0x348   :  { %7271 = vmatprep.subr.bf16.mxu0 %v11095_v47  ;;  %8119 = vmatprep.subr.bf16.mxu1 %v11098_v48  ;;  %v111_v47 = vld [vmem:[%s14827_s0 + $0x1e8] sm:$0xff]  ;;  %v11177_v48 = vld [vmem:[%s14826_s1 + $0x1c00] ss:$16 sps:$4 sm:$0xff]  }
 0x349   :  { %v11188_v49 = vld [vmem:[%s14826_s1 + $0x1c2c] ss:$16 sps:$4 sm:$0xff]  }
 0x34a   :  { %7257 = vmatmul.mubr.bf16.gmra.mrb[4].mxu0 %v8545_v51  ;;  %8105 = vmatmul.mubr.bf16.gmra.mrb[4].mxu1 %v8545_v51  ;;  %v11180_v51 = vld [vmem:[%s14826_s1 + $0x1c08] ss:$16 sps:$4 sm:$0xff]  }
 0x34b   :  { %7272 = vmatpush1.bf16.msra.mxu0 %v11093_v50  ;;  %8120 = vmatpush1.bf16.msra.mxu1 %v11096_v53  ;;  %v8548_v50 = vcombine.high %v95_v46, %v111_v47  ;;  %v11183_v53 = vld [vmem:[%s14826_s1 + $0x1c20] ss:$16 sps:$4 sm:$0xff]  }
 0x34c   :  { %7273 = vmatprep.subr.bf16.mxu0 %v11101_v54  ;;  %8121 = vmatprep.subr.bf16.mxu1 %v11104_v55  ;;  %v11186_v54 = vld [vmem:[%s14826_s1 + $0x1c28] ss:$16 sps:$4 sm:$0xff]   ;;  %v11191_v55 = vld [vmem:[%s14826_s1 + $0x1c44] ss:$16 sps:$4 sm:$0xff]  }
 0x34d   :  { %7299 = vmatprep.mubr.bf16.mxu0 %v8516_v56  ;;  %8147 = vmatprep.mubr.bf16.mxu1 %v8516_v56  ;;  %v11194_v56 = vld [vmem:[%s14826_s1 + $0x1c4c] ss:$16 sps:$4 sm:$0xff]  }
 0x34f   :  { %7274 = vmatpush1.bf16.msra.mxu0 %v11099_v59  ;;  %8122 = vmatpush1.bf16.msra.mxu1 %v11102_v60  ;;  %v8547_v59 = vcombine.low %v95_v46, %v111_v47  ;;  %v14387_v60 = vld [vmem:[%s14827_s0 + $0x70] sm:$0xff]  ;;  %v11264_v46 = vld [vmem:[%s14826_s1 + $0x1dc8] ss:$16 sps:$4 sm:$0xff]  }
 0x350   :  { %7275 = vmatprep.subr.bf16.mxu0 %v11107_v57  ;;  %8123 = vmatprep.subr.bf16.mxu1 %v11110_v58  ;;  %v14392_v57 = vld [vmem:[%s14827_s0 + $0xf0] sm:$0xff] }
 0x351   :  { %v11189_v58 = vld [vmem:[%s14826_s1 + $0x1c40] ss:$16 sps:$4 sm:$0xff]   ;;  %v11269_v47 = vld [vmem:[%s14826_s1 + $0x1de4] ss:$16 sps:$4 sm:$0xff]  }
 0x353   :  { %7276 = vmatpush1.bf16.msra.mxu0 %v11105_v61  ;;  %8124 = vmatpush1.bf16.msra.mxu1 %v11108_v62  ;;  %v11192_v61 = vld [vmem:[%s14826_s1 + $0x1c48] ss:$16 sps:$4 sm:$0xff]   ;;  %v11197_v62 = vld [vmem:[%s14826_s1 + $0x1c64] ss:$16 sps:$4 sm:$0xff]  }
 0x354   :  { %7277 = vmatprep.subr.bf16.mxu0 %v11113_v63  ;;  %8125 = vmatprep.subr.bf16.mxu1 %v11116_v0  ;;  %v11200_v63 = vld [vmem:[%s14826_s1 + $0x1c6c] ss:$16 sps:$4 sm:$0xff]   ;;  %v8518_v0 = vcombine.high %v14387_v60, %v14392_v57 }
 0x357   :  { %7278 = vmatpush1.bf16.msra.mxu0 %v11111_v3  ;;  %8126 = vmatpush1.bf16.msra.mxu1 %v11114_v4  ;;  %v11195_v3 = vld [vmem:[%s14826_s1 + $0x1c60] ss:$16 sps:$4 sm:$0xff]   ;;  %v11198_v4 = vld [vmem:[%s14826_s1 + $0x1c68] ss:$16 sps:$4 sm:$0xff]  }
 0x358   :  { %7279 = vmatprep.subr.bf16.mxu0 %v11119_v1  ;;  %8127 = vmatprep.subr.bf16.mxu1 %v11122_v2  ;;  %v11203_v1 = vld [vmem:[%s14826_s1 + $0x1c84] ss:$16 sps:$4 sm:$0xff]   ;;  %v11206_v2 = vld [vmem:[%s14826_s1 + $0x1c8c] ss:$16 sps:$4 sm:$0xff]  }
 0x35b   :  { %7280 = vmatpush1.bf16.msra.mxu0 %v11117_v5  ;;  %8128 = vmatpush1.bf16.msra.mxu1 %v11120_v6  ;;  %v11201_v5 = vld [vmem:[%s14826_s1 + $0x1c80] ss:$16 sps:$4 sm:$0xff]   ;;  %v11204_v6 = vld [vmem:[%s14826_s1 + $0x1c88] ss:$16 sps:$4 sm:$0xff]  }
 0x35c   :  { %7281 = vmatprep.subr.bf16.mxu0 %v11125_v7  ;;  %8129 = vmatprep.subr.bf16.mxu1 %v11128_v8  ;;  %v11209_v7 = vld [vmem:[%s14826_s1 + $0x1ca4] ss:$16 sps:$4 sm:$0xff]   ;;  %v11212_v8 = vld [vmem:[%s14826_s1 + $0x1cac] ss:$16 sps:$4 sm:$0xff]  }
 0x35f   :  { %7282 = vmatpush1.bf16.msra.mxu0 %v11123_v11  ;;  %8130 = vmatpush1.bf16.msra.mxu1 %v11126_v12  ;;  %v11207_v11 = vld [vmem:[%s14826_s1 + $0x1ca0] ss:$16 sps:$4 sm:$0xff]   ;;  %v11210_v12 = vld [vmem:[%s14826_s1 + $0x1ca8] ss:$16 sps:$4 sm:$0xff]  }
 0x360   :  { %7283 = vmatprep.subr.bf16.mxu0 %v11131_v9  ;;  %8131 = vmatprep.subr.bf16.mxu1 %v11134_v10  ;;  %v11215_v9 = vld [vmem:[%s14826_s1 + $0x1cc4] ss:$16 sps:$4 sm:$0xff]   ;;  %v11218_v10 = vld [vmem:[%s14826_s1 + $0x1ccc] ss:$16 sps:$4 sm:$0xff]  }
 0x363   :  { %7284 = vmatpush1.bf16.msra.mxu0 %v11129_v13  ;;  %8132 = vmatpush1.bf16.msra.mxu1 %v11132_v14  ;;  %v11213_v13 = vld [vmem:[%s14826_s1 + $0x1cc0] ss:$16 sps:$4 sm:$0xff]   ;;  %v11216_v14 = vld [vmem:[%s14826_s1 + $0x1cc8] ss:$16 sps:$4 sm:$0xff]  }
 0x364   :  { %7285 = vmatprep.subr.bf16.mxu0 %v11137_v15  ;;  %8133 = vmatprep.subr.bf16.mxu1 %v11140_v16  ;;  %v11221_v15 = vld [vmem:[%s14826_s1 + $0x1ce4] ss:$16 sps:$4 sm:$0xff]   ;;  %v11224_v16 = vld [vmem:[%s14826_s1 + $0x1cec] ss:$16 sps:$4 sm:$0xff]  }
 0x367   :  { %7286 = vmatpush1.bf16.msra.mxu0 %v11135_v19  ;;  %8134 = vmatpush1.bf16.msra.mxu1 %v11138_v17  ;;  %v11219_v19 = vld [vmem:[%s14826_s1 + $0x1ce0] ss:$16 sps:$4 sm:$0xff]   ;;  %v11222_v17 = vld [vmem:[%s14826_s1 + $0x1ce8] ss:$16 sps:$4 sm:$0xff]  }
 0x368   :  { %7287 = vmatprep.subr.bf16.mxu0 %v11143_v18  ;;  %8135 = vmatprep.subr.bf16.mxu1 %v11146_v20  ;;  %v11227_v18 = vld [vmem:[%s14826_s1 + $0x1d04] ss:$16 sps:$4 sm:$0xff]   ;;  %v11230_v20 = vld [vmem:[%s14826_s1 + $0x1d0c] ss:$16 sps:$4 sm:$0xff]  }
 0x36b   :  { %7288 = vmatpush1.bf16.msra.mxu0 %v11141_v21  ;;  %8136 = vmatpush1.bf16.msra.mxu1 %v11144_v22  ;;  %v11225_v21 = vld [vmem:[%s14826_s1 + $0x1d00] ss:$16 sps:$4 sm:$0xff]   ;;  %v11228_v22 = vld [vmem:[%s14826_s1 + $0x1d08] ss:$16 sps:$4 sm:$0xff]  }
 0x36c   :  { %7289 = vmatprep.subr.bf16.mxu0 %v11149_v23  ;;  %8137 = vmatprep.subr.bf16.mxu1 %v11152_v24  ;;  %v11233_v23 = vld [vmem:[%s14826_s1 + $0x1d24] ss:$16 sps:$4 sm:$0xff]   ;;  %v11236_v24 = vld [vmem:[%s14826_s1 + $0x1d2c] ss:$16 sps:$4 sm:$0xff]  }
 0x36f   :  { %7290 = vmatpush1.bf16.msra.mxu0 %v11147_v26  ;;  %8138 = vmatpush1.bf16.msra.mxu1 %v11150_v25  ;;  %v11231_v26 = vld [vmem:[%s14826_s1 + $0x1d20] ss:$16 sps:$4 sm:$0xff]   ;;  %v11234_v25 = vld [vmem:[%s14826_s1 + $0x1d28] ss:$16 sps:$4 sm:$0xff]  }
 0x370   :  { %7291 = vmatprep.subr.bf16.mxu0 %v11155_v27  ;;  %8139 = vmatprep.subr.bf16.mxu1 %v11158_v28  ;;  %v11239_v27 = vld [vmem:[%s14826_s1 + $0x1d44] ss:$16 sps:$4 sm:$0xff]   ;;  %v11242_v28 = vld [vmem:[%s14826_s1 + $0x1d4c] ss:$16 sps:$4 sm:$0xff]  }
 0x373   :  { %7292 = vmatpush1.bf16.msra.mxu0 %v11153_v29  ;;  %8140 = vmatpush1.bf16.msra.mxu1 %v11156_v30  ;;  %v11237_v29 = vld [vmem:[%s14826_s1 + $0x1d40] ss:$16 sps:$4 sm:$0xff]   ;;  %v11240_v30 = vld [vmem:[%s14826_s1 + $0x1d48] ss:$16 sps:$4 sm:$0xff]  }
 0x374   :  { %7293 = vmatprep.subr.bf16.mxu0 %v11161_v31  ;;  %8141 = vmatprep.subr.bf16.mxu1 %v11164_v32  ;;  %v11245_v31 = vld [vmem:[%s14826_s1 + $0x1d64] ss:$16 sps:$4 sm:$0xff]   ;;  %v11248_v32 = vld [vmem:[%s14826_s1 + $0x1d6c] ss:$16 sps:$4 sm:$0xff]  }
 0x377   :  { %7294 = vmatpush1.bf16.msra.mxu0 %v11159_v34  ;;  %8142 = vmatpush1.bf16.msra.mxu1 %v11162_v36  ;;  %v11243_v34 = vld [vmem:[%s14826_s1 + $0x1d60] ss:$16 sps:$4 sm:$0xff]   ;;  %v11246_v36 = vld [vmem:[%s14826_s1 + $0x1d68] ss:$16 sps:$4 sm:$0xff]  }
 0x378   :  { %7295 = vmatprep.subr.bf16.mxu0 %v11167_v33  ;;  %8143 = vmatprep.subr.bf16.mxu1 %v11170_v35  ;;  %v11251_v33 = vld [vmem:[%s14826_s1 + $0x1d84] ss:$16 sps:$4 sm:$0xff]   ;;  %v11254_v35 = vld [vmem:[%s14826_s1 + $0x1d8c] ss:$16 sps:$4 sm:$0xff]  }
 0x37b   :  { %7296 = vmatpush1.bf16.msra.mxu0 %v11165_v37  ;;  %8144 = vmatpush1.bf16.msra.mxu1 %v11168_v38  ;;  %v11249_v37 = vld [vmem:[%s14826_s1 + $0x1d80] ss:$16 sps:$4 sm:$0xff]   ;;  %v11252_v38 = vld [vmem:[%s14826_s1 + $0x1d88] ss:$16 sps:$4 sm:$0xff]  }
 0x37c   :  { %7297 = vmatprep.subr.bf16.mxu0 %v11173_v39  ;;  %8145 = vmatprep.subr.bf16.mxu1 %v11176_v40  ;;  %v11257_v39 = vld [vmem:[%s14826_s1 + $0x1da4] ss:$16 sps:$4 sm:$0xff]   ;;  %v11260_v40 = vld [vmem:[%s14826_s1 + $0x1dac] ss:$16 sps:$4 sm:$0xff]  }
 0x37f   :  { %7298 = vmatpush1.bf16.msra.mxu0 %v11171_v42  ;;  %8146 = vmatpush1.bf16.msra.mxu1 %v11174_v44  ;;  %v11255_v42 = vld [vmem:[%s14826_s1 + $0x1da0] ss:$16 sps:$4 sm:$0xff]   ;;  %v11258_v44 = vld [vmem:[%s14826_s1 + $0x1da8] ss:$16 sps:$4 sm:$0xff]  }
 0x380   :  { %7320 = vmatprep.subr.bf16.mxu0 %v11179_v41  ;;  %8168 = vmatprep.subr.bf16.mxu1 %v11182_v43  ;;  %v11263_v41 = vld [vmem:[%s14826_s1 + $0x1dc4] ss:$16 sps:$4 sm:$0xff]   ;;  %v11266_v43 = vld [vmem:[%s14826_s1 + $0x1dcc] ss:$16 sps:$4 sm:$0xff]  }
 0x382   :  { %7300 = vmatmul.mubr.bf16.vlgmr.msra.gmra.mrb[0].mxu0 %v8515_v45  ;;  %8148 = vmatmul.mubr.bf16.vlgmr.msra.gmra.mrb[0].mxu1 %v8515_v45  ;;  %v11261_v45 = vld [vmem:[%s14826_s1 + $0x1dc0] ss:$16 sps:$4 sm:$0xff]  }
 0x383   :  { %7321 = vmatpush1.bf16.msra.mxu0 %v11177_v48  ;;  %8169 = vmatpush1.bf16.msra.mxu1 %v11180_v51  ;;  %v11272_v48 = vld [vmem:[%s14826_s1 + $0x1dec] ss:$16 sps:$4 sm:$0xff]   ;;  %v11267_v51 = vld [vmem:[%s14826_s1 + $0x1de0] ss:$16 sps:$4 sm:$0xff]  }
 0x384   :  { %7322 = vmatprep.subr.bf16.mxu0 %v11185_v52  ;;  %8170 = vmatprep.subr.bf16.mxu1 %v11188_v49  ;;  %v11270_v52 = vld [vmem:[%s14826_s1 + $0x1de8] ss:$16 sps:$4 sm:$0xff]   ;;  %v11275_v49 = vld [vmem:[%s14826_s1 + $0x1e04] ss:$16 sps:$4 sm:$0xff]  }
 0x385   :  { %7309 = vmatprep.mubr.bf16.mxu0 %v8548_v50  ;;  %8157 = vmatprep.mubr.bf16.mxu1 %v8548_v50  ;;  %v11278_v50 = vld [vmem:[%s14826_s1 + $0x1e0c] ss:$16 sps:$4 sm:$0xff]  }
 0x387   :  { %7323 = vmatpush1.bf16.msra.mxu0 %v11183_v53  ;;  %8171 = vmatpush1.bf16.msra.mxu1 %v11186_v54  ;;  %v8517_v53 = vcombine.low %v14387_v60, %v14392_v57  ;;  %v96_v54 = vld [vmem:[%s14827_s0 + $0x170] sm:$0xff]  ;;  %v11284_v57 = vld [vmem:[%s14826_s1 + $0x1e2c] ss:$16 sps:$4 sm:$0xff]  }
 0x388   :  { %7324 = vmatprep.subr.bf16.mxu0 %v11191_v55  ;;  %8172 = vmatprep.subr.bf16.mxu1 %v11194_v56  ;;  %v112_v55 = vld [vmem:[%s14827_s0 + $0x1f0] sm:$0xff] }
 0x389   :  { %v11273_v56 = vld [vmem:[%s14826_s1 + $0x1e00] ss:$16 sps:$4 sm:$0xff]   ;;  %v11281_v60 = vld [vmem:[%s14826_s1 + $0x1e24] ss:$16 sps:$4 sm:$0xff]  }
 0x38a   :  { %7310 = vmatmul.mubr.bf16.gmra.mrb[4].mxu0 %v8547_v59  ;;  %8158 = vmatmul.mubr.bf16.gmra.mrb[4].mxu1 %v8547_v59  ;;  %v11276_v59 = vld [vmem:[%s14826_s1 + $0x1e08] ss:$16 sps:$4 sm:$0xff]  }
 0x38b   :  { %7325 = vmatpush1.bf16.msra.mxu0 %v11189_v58  ;;  %8173 = vmatpush1.bf16.msra.mxu1 %v11192_v61  ;;  %v8550_v58 = vcombine.high %v96_v54, %v112_v55  ;;  %v11279_v61 = vld [vmem:[%s14826_s1 + $0x1e20] ss:$16 sps:$4 sm:$0xff]  }
 0x38c   :  { %7326 = vmatprep.subr.bf16.mxu0 %v11197_v62  ;;  %8174 = vmatprep.subr.bf16.mxu1 %v11200_v63  ;;  %v11282_v62 = vld [vmem:[%s14826_s1 + $0x1e28] ss:$16 sps:$4 sm:$0xff]   ;;  %v11287_v63 = vld [vmem:[%s14826_s1 + $0x1e44] ss:$16 sps:$4 sm:$0xff]  }
 0x38d   :  { %7352 = vmatprep.mubr.bf16.mxu0 %v8518_v0  ;;  %8200 = vmatprep.mubr.bf16.mxu1 %v8518_v0  ;;  %v11290_v0 = vld [vmem:[%s14826_s1 + $0x1e4c] ss:$16 sps:$4 sm:$0xff]  }
 0x38f   :  { %7327 = vmatpush1.bf16.msra.mxu0 %v11195_v3  ;;  %8175 = vmatpush1.bf16.msra.mxu1 %v11198_v4  ;;  %v8549_v3 = vcombine.low %v96_v54, %v112_v55  ;;  %v14599_v4 = vld [vmem:[%s14827_s0 + $0x78] sm:$0xff]  ;;  %v11365_v55 = vld [vmem:[%s14826_s1 + $0x1fe4] ss:$16 sps:$4 sm:$0xff]  }
 0x390   :  { %7328 = vmatprep.subr.bf16.mxu0 %v11203_v1  ;;  %8176 = vmatprep.subr.bf16.mxu1 %v11206_v2  ;;  %v14604_v1 = vld [vmem:[%s14827_s0 + $0xf8] sm:$0xff]  ;;  %v11285_v2 = vld [vmem:[%s14826_s1 + $0x1e40] ss:$16 sps:$4 sm:$0xff]  }
 0x391   :  { %v11360_v54 = vld [vmem:[%s14826_s1 + $0x1fc8] ss:$16 sps:$4 sm:$0xff]  }
 0x393   :  { %7329 = vmatpush1.bf16.msra.mxu0 %v11201_v5  ;;  %8177 = vmatpush1.bf16.msra.mxu1 %v11204_v6  ;;  %v11288_v5 = vld [vmem:[%s14826_s1 + $0x1e48] ss:$16 sps:$4 sm:$0xff]   ;;  %v11293_v6 = vld [vmem:[%s14826_s1 + $0x1e64] ss:$16 sps:$4 sm:$0xff]  }
 0x394   :  { %7330 = vmatprep.subr.bf16.mxu0 %v11209_v7  ;;  %8178 = vmatprep.subr.bf16.mxu1 %v11212_v8  ;;  %v11296_v7 = vld [vmem:[%s14826_s1 + $0x1e6c] ss:$16 sps:$4 sm:$0xff]   ;;  %v8520_v8 = vcombine.high %v14599_v4, %v14604_v1 }
 0x397   :  { %7331 = vmatpush1.bf16.msra.mxu0 %v11207_v11  ;;  %8179 = vmatpush1.bf16.msra.mxu1 %v11210_v12  ;;  %v11291_v11 = vld [vmem:[%s14826_s1 + $0x1e60] ss:$16 sps:$4 sm:$0xff]   ;;  %v11294_v12 = vld [vmem:[%s14826_s1 + $0x1e68] ss:$16 sps:$4 sm:$0xff]  }
 0x398   :  { %7332 = vmatprep.subr.bf16.mxu0 %v11215_v9  ;;  %8180 = vmatprep.subr.bf16.mxu1 %v11218_v10  ;;  %v11299_v9 = vld [vmem:[%s14826_s1 + $0x1e84] ss:$16 sps:$4 sm:$0xff]   ;;  %v11302_v10 = vld [vmem:[%s14826_s1 + $0x1e8c] ss:$16 sps:$4 sm:$0xff]  }
 0x39b   :  { %7333 = vmatpush1.bf16.msra.mxu0 %v11213_v13  ;;  %8181 = vmatpush1.bf16.msra.mxu1 %v11216_v14  ;;  %v11297_v13 = vld [vmem:[%s14826_s1 + $0x1e80] ss:$16 sps:$4 sm:$0xff]   ;;  %v11300_v14 = vld [vmem:[%s14826_s1 + $0x1e88] ss:$16 sps:$4 sm:$0xff]  }
 0x39c   :  { %7334 = vmatprep.subr.bf16.mxu0 %v11221_v15  ;;  %8182 = vmatprep.subr.bf16.mxu1 %v11224_v16  ;;  %v11305_v15 = vld [vmem:[%s14826_s1 + $0x1ea4] ss:$16 sps:$4 sm:$0xff]   ;;  %v11308_v16 = vld [vmem:[%s14826_s1 + $0x1eac] ss:$16 sps:$4 sm:$0xff]  }
 0x39f   :  { %7335 = vmatpush1.bf16.msra.mxu0 %v11219_v19  ;;  %8183 = vmatpush1.bf16.msra.mxu1 %v11222_v17  ;;  %v11303_v19 = vld [vmem:[%s14826_s1 + $0x1ea0] ss:$16 sps:$4 sm:$0xff]   ;;  %v11306_v17 = vld [vmem:[%s14826_s1 + $0x1ea8] ss:$16 sps:$4 sm:$0xff]  }
 0x3a0   :  { %7336 = vmatprep.subr.bf16.mxu0 %v11227_v18  ;;  %8184 = vmatprep.subr.bf16.mxu1 %v11230_v20  ;;  %v11311_v18 = vld [vmem:[%s14826_s1 + $0x1ec4] ss:$16 sps:$4 sm:$0xff]   ;;  %v11314_v20 = vld [vmem:[%s14826_s1 + $0x1ecc] ss:$16 sps:$4 sm:$0xff]  }
 0x3a3   :  { %7337 = vmatpush1.bf16.msra.mxu0 %v11225_v21  ;;  %8185 = vmatpush1.bf16.msra.mxu1 %v11228_v22  ;;  %v11309_v21 = vld [vmem:[%s14826_s1 + $0x1ec0] ss:$16 sps:$4 sm:$0xff]   ;;  %v11312_v22 = vld [vmem:[%s14826_s1 + $0x1ec8] ss:$16 sps:$4 sm:$0xff]  }
 0x3a4   :  { %7338 = vmatprep.subr.bf16.mxu0 %v11233_v23  ;;  %8186 = vmatprep.subr.bf16.mxu1 %v11236_v24  ;;  %v11317_v23 = vld [vmem:[%s14826_s1 + $0x1ee4] ss:$16 sps:$4 sm:$0xff]   ;;  %v11320_v24 = vld [vmem:[%s14826_s1 + $0x1eec] ss:$16 sps:$4 sm:$0xff]  }
 0x3a7   :  { %7339 = vmatpush1.bf16.msra.mxu0 %v11231_v26  ;;  %8187 = vmatpush1.bf16.msra.mxu1 %v11234_v25  ;;  %v11315_v26 = vld [vmem:[%s14826_s1 + $0x1ee0] ss:$16 sps:$4 sm:$0xff]   ;;  %v11318_v25 = vld [vmem:[%s14826_s1 + $0x1ee8] ss:$16 sps:$4 sm:$0xff]  }
 0x3a8   :  { %7340 = vmatprep.subr.bf16.mxu0 %v11239_v27  ;;  %8188 = vmatprep.subr.bf16.mxu1 %v11242_v28  ;;  %v11323_v27 = vld [vmem:[%s14826_s1 + $0x1f04] ss:$16 sps:$4 sm:$0xff]   ;;  %v11326_v28 = vld [vmem:[%s14826_s1 + $0x1f0c] ss:$16 sps:$4 sm:$0xff]  }
 0x3ab   :  { %7341 = vmatpush1.bf16.msra.mxu0 %v11237_v29  ;;  %8189 = vmatpush1.bf16.msra.mxu1 %v11240_v30  ;;  %v11321_v29 = vld [vmem:[%s14826_s1 + $0x1f00] ss:$16 sps:$4 sm:$0xff]   ;;  %v11324_v30 = vld [vmem:[%s14826_s1 + $0x1f08] ss:$16 sps:$4 sm:$0xff]  }
 0x3ac   :  { %7342 = vmatprep.subr.bf16.mxu0 %v11245_v31  ;;  %8190 = vmatprep.subr.bf16.mxu1 %v11248_v32  ;;  %v11329_v31 = vld [vmem:[%s14826_s1 + $0x1f24] ss:$16 sps:$4 sm:$0xff]   ;;  %v11332_v32 = vld [vmem:[%s14826_s1 + $0x1f2c] ss:$16 sps:$4 sm:$0xff]  }
 0x3af   :  { %7343 = vmatpush1.bf16.msra.mxu0 %v11243_v34  ;;  %8191 = vmatpush1.bf16.msra.mxu1 %v11246_v36  ;;  %v11327_v34 = vld [vmem:[%s14826_s1 + $0x1f20] ss:$16 sps:$4 sm:$0xff]   ;;  %v11330_v36 = vld [vmem:[%s14826_s1 + $0x1f28] ss:$16 sps:$4 sm:$0xff]  }
 0x3b0   :  { %7344 = vmatprep.subr.bf16.mxu0 %v11251_v33  ;;  %8192 = vmatprep.subr.bf16.mxu1 %v11254_v35  ;;  %v11335_v33 = vld [vmem:[%s14826_s1 + $0x1f44] ss:$16 sps:$4 sm:$0xff]   ;;  %v11338_v35 = vld [vmem:[%s14826_s1 + $0x1f4c] ss:$16 sps:$4 sm:$0xff]  }
 0x3b3   :  { %7345 = vmatpush1.bf16.msra.mxu0 %v11249_v37  ;;  %8193 = vmatpush1.bf16.msra.mxu1 %v11252_v38  ;;  %v11333_v37 = vld [vmem:[%s14826_s1 + $0x1f40] ss:$16 sps:$4 sm:$0xff]   ;;  %v11336_v38 = vld [vmem:[%s14826_s1 + $0x1f48] ss:$16 sps:$4 sm:$0xff]  }
 0x3b4   :  { %7346 = vmatprep.subr.bf16.mxu0 %v11257_v39  ;;  %8194 = vmatprep.subr.bf16.mxu1 %v11260_v40  ;;  %v11341_v39 = vld [vmem:[%s14826_s1 + $0x1f64] ss:$16 sps:$4 sm:$0xff]   ;;  %v11344_v40 = vld [vmem:[%s14826_s1 + $0x1f6c] ss:$16 sps:$4 sm:$0xff]  }
 0x3b7   :  { %7347 = vmatpush1.bf16.msra.mxu0 %v11255_v42  ;;  %8195 = vmatpush1.bf16.msra.mxu1 %v11258_v44  ;;  %v11339_v42 = vld [vmem:[%s14826_s1 + $0x1f60] ss:$16 sps:$4 sm:$0xff]   ;;  %v11342_v44 = vld [vmem:[%s14826_s1 + $0x1f68] ss:$16 sps:$4 sm:$0xff]  }
 0x3b8   :  { %7348 = vmatprep.subr.bf16.mxu0 %v11263_v41  ;;  %8196 = vmatprep.subr.bf16.mxu1 %v11266_v43  ;;  %v11347_v41 = vld [vmem:[%s14826_s1 + $0x1f84] ss:$16 sps:$4 sm:$0xff]   ;;  %v11350_v43 = vld [vmem:[%s14826_s1 + $0x1f8c] ss:$16 sps:$4 sm:$0xff]  }
 0x3bb   :  { %7349 = vmatpush1.bf16.msra.mxu0 %v11261_v45  ;;  %8197 = vmatpush1.bf16.msra.mxu1 %v11264_v46  ;;  %v11345_v45 = vld [vmem:[%s14826_s1 + $0x1f80] ss:$16 sps:$4 sm:$0xff]   ;;  %v11348_v46 = vld [vmem:[%s14826_s1 + $0x1f88] ss:$16 sps:$4 sm:$0xff]  }
 0x3bc   :  { %7350 = vmatprep.subr.bf16.mxu0 %v11269_v47  ;;  %8198 = vmatprep.subr.bf16.mxu1 %v11272_v48  ;;  %v11353_v47 = vld [vmem:[%s14826_s1 + $0x1fa4] ss:$16 sps:$4 sm:$0xff]   ;;  %v11356_v48 = vld [vmem:[%s14826_s1 + $0x1fac] ss:$16 sps:$4 sm:$0xff]  }
 0x3bf   :  { %7351 = vmatpush1.bf16.msra.mxu0 %v11267_v51  ;;  %8199 = vmatpush1.bf16.msra.mxu1 %v11270_v52  ;;  %v11351_v51 = vld [vmem:[%s14826_s1 + $0x1fa0] ss:$16 sps:$4 sm:$0xff]   ;;  %v11354_v52 = vld [vmem:[%s14826_s1 + $0x1fa8] ss:$16 sps:$4 sm:$0xff]  }
 0x3c0   :  { %7373 = vmatprep.subr.bf16.mxu0 %v11275_v49  ;;  %8221 = vmatprep.subr.bf16.mxu1 %v11278_v50  ;;  %v11359_v49 = vld [vmem:[%s14826_s1 + $0x1fc4] ss:$16 sps:$4 sm:$0xff]   ;;  %v11362_v50 = vld [vmem:[%s14826_s1 + $0x1fcc] ss:$16 sps:$4 sm:$0xff]  }
 0x3c2   :  { %7353 = vmatmul.mubr.bf16.vlgmr.msra.gmra.mrb[0].mxu0 %v8517_v53  ;;  %8201 = vmatmul.mubr.bf16.vlgmr.msra.gmra.mrb[0].mxu1 %v8517_v53  ;;  %v11357_v53 = vld [vmem:[%s14826_s1 + $0x1fc0] ss:$16 sps:$4 sm:$0xff]  }
 0x3c3   :  { %7374 = vmatpush1.bf16.msra.mxu0 %v11273_v56  ;;  %8222 = vmatpush1.bf16.msra.mxu1 %v11276_v59  ;;  %v11368_v56 = vld [vmem:[%s14826_s1 + $0x1fec] ss:$16 sps:$4 sm:$0xff]   ;;  %v11363_v59 = vld [vmem:[%s14826_s1 + $0x1fe0] ss:$16 sps:$4 sm:$0xff]  }
 0x3c4   :  { %7375 = vmatprep.subr.bf16.mxu0 %v11281_v60  ;;  %8223 = vmatprep.subr.bf16.mxu1 %v11284_v57  ;;  %v11366_v60 = vld [vmem:[%s14826_s1 + $0x1fe8] ss:$16 sps:$4 sm:$0xff]  }
 0x3c5   :  { %7362 = vmatprep.mubr.bf16.mxu0 %v8550_v58  ;;  %8210 = vmatprep.mubr.bf16.mxu1 %v8550_v58  ;;  %v97_v57 = vld [vmem:[%s14827_s0 + $0x178] sm:$0xff] }
 0x3c6   :  { %v113_v58 = vld [vmem:[%s14827_s0 + $0x1f8] sm:$0xff] }
 0x3c7   :  { %7376 = vmatpush1.bf16.msra.mxu0 %v11279_v61  ;;  %8224 = vmatpush1.bf16.msra.mxu1 %v11282_v62  ;;  %v8519_v61 = vcombine.low %v14599_v4, %v14604_v1  ;;  %v8552_v62 = vcombine.high %v97_v57, %v113_v58 }
 0x3c8   :  { %7377 = vmatprep.subr.bf16.mxu0 %v11287_v63  ;;  %8225 = vmatprep.subr.bf16.mxu1 %v11290_v0  ;;  %v8551_v63 = vcombine.low %v97_v57, %v113_v58 }
 0x3ca   :  { %7363 = vmatmul.mubr.bf16.gmra.mrb[4].mxu0 %v8549_v3  ;;  %8211 = vmatmul.mubr.bf16.gmra.mrb[4].mxu1 %v8549_v3 }
 0x3cb   :  { %7378 = vmatpush1.bf16.msra.mxu0 %v11285_v2  ;;  %8226 = vmatpush1.bf16.msra.mxu1 %v11288_v5 }
 0x3cc   :  { %7379 = vmatprep.subr.bf16.mxu0 %v11293_v6  ;;  %8227 = vmatprep.subr.bf16.mxu1 %v11296_v7 }
 0x3cd   :  { %7405 = vmatprep.mubr.bf16.mxu0 %v8520_v8  ;;  %8253 = vmatprep.mubr.bf16.mxu1 %v8520_v8 }
 0x3cf   :  { %7380 = vmatpush1.bf16.msra.mxu0 %v11291_v11  ;;  %8228 = vmatpush1.bf16.msra.mxu1 %v11294_v12 }
 0x3d0   :  { %7381 = vmatprep.subr.bf16.mxu0 %v11299_v9  ;;  %8229 = vmatprep.subr.bf16.mxu1 %v11302_v10 }
 0x3d3   :  { %7382 = vmatpush1.bf16.msra.mxu0 %v11297_v13  ;;  %8230 = vmatpush1.bf16.msra.mxu1 %v11300_v14 }
 0x3d4   :  { %7383 = vmatprep.subr.bf16.mxu0 %v11305_v15  ;;  %8231 = vmatprep.subr.bf16.mxu1 %v11308_v16 }
 0x3d7   :  { %7384 = vmatpush1.bf16.msra.mxu0 %v11303_v19  ;;  %8232 = vmatpush1.bf16.msra.mxu1 %v11306_v17 }
 0x3d8   :  { %7385 = vmatprep.subr.bf16.mxu0 %v11311_v18  ;;  %8233 = vmatprep.subr.bf16.mxu1 %v11314_v20 }
 0x3db   :  { %7386 = vmatpush1.bf16.msra.mxu0 %v11309_v21  ;;  %8234 = vmatpush1.bf16.msra.mxu1 %v11312_v22 }
 0x3dc   :  { %7387 = vmatprep.subr.bf16.mxu0 %v11317_v23  ;;  %8235 = vmatprep.subr.bf16.mxu1 %v11320_v24 }
 0x3df   :  { %7388 = vmatpush1.bf16.msra.mxu0 %v11315_v26  ;;  %8236 = vmatpush1.bf16.msra.mxu1 %v11318_v25 }
 0x3e0   :  { %7389 = vmatprep.subr.bf16.mxu0 %v11323_v27  ;;  %8237 = vmatprep.subr.bf16.mxu1 %v11326_v28 }
 0x3e3   :  { %7390 = vmatpush1.bf16.msra.mxu0 %v11321_v29  ;;  %8238 = vmatpush1.bf16.msra.mxu1 %v11324_v30 }
 0x3e4   :  { %7391 = vmatprep.subr.bf16.mxu0 %v11329_v31  ;;  %8239 = vmatprep.subr.bf16.mxu1 %v11332_v32 }
 0x3e7   :  { %7392 = vmatpush1.bf16.msra.mxu0 %v11327_v34  ;;  %8240 = vmatpush1.bf16.msra.mxu1 %v11330_v36 }
 0x3e8   :  { %7393 = vmatprep.subr.bf16.mxu0 %v11335_v33  ;;  %8241 = vmatprep.subr.bf16.mxu1 %v11338_v35 }
 0x3eb   :  { %7394 = vmatpush1.bf16.msra.mxu0 %v11333_v37  ;;  %8242 = vmatpush1.bf16.msra.mxu1 %v11336_v38 }
 0x3ec   :  { %7395 = vmatprep.subr.bf16.mxu0 %v11341_v39  ;;  %8243 = vmatprep.subr.bf16.mxu1 %v11344_v40 }
 0x3ef   :  { %7396 = vmatpush1.bf16.msra.mxu0 %v11339_v42  ;;  %8244 = vmatpush1.bf16.msra.mxu1 %v11342_v44 }
 0x3f0   :  { %7397 = vmatprep.subr.bf16.mxu0 %v11347_v41  ;;  %8245 = vmatprep.subr.bf16.mxu1 %v11350_v43 }
 0x3f3   :  { %7398 = vmatpush1.bf16.msra.mxu0 %v11345_v45  ;;  %8246 = vmatpush1.bf16.msra.mxu1 %v11348_v46 }
 0x3f4   :  { %7399 = vmatprep.subr.bf16.mxu0 %v11353_v47  ;;  %8247 = vmatprep.subr.bf16.mxu1 %v11356_v48 }
 0x3f7   :  { %7400 = vmatpush1.bf16.msra.mxu0 %v11351_v51  ;;  %8248 = vmatpush1.bf16.msra.mxu1 %v11354_v52 }
 0x3f8   :  { %7401 = vmatprep.subr.bf16.mxu0 %v11359_v49  ;;  %8249 = vmatprep.subr.bf16.mxu1 %v11362_v50 }
 0x3fb   :  { %7402 = vmatpush1.bf16.msra.mxu0 %v11357_v53  ;;  %8250 = vmatpush1.bf16.msra.mxu1 %v11360_v54 }
 0x3fc   :  { %7403 = vmatprep.subr.bf16.mxu0 %v11365_v55  ;;  %8251 = vmatprep.subr.bf16.mxu1 %v11368_v56 }
 0x3ff   :  { %7404 = vmatpush1.bf16.msra.mxu0 %v11363_v59  ;;  %8252 = vmatpush1.bf16.msra.mxu1 %v11366_v60 }
 0x402   :  { %7406 = vmatmul.mubr.bf16.vlgmr.msra.gmra.mrb[0].mxu0 %v8519_v61  ;;  %8254 = vmatmul.mubr.bf16.vlgmr.msra.gmra.mrb[0].mxu1 %v8519_v61 }
 0x403   :  { %7415 = vmatprep.mubr.bf16.mxu0 %v8552_v62  ;;  %8263 = vmatprep.mubr.bf16.mxu1 %v8552_v62 }
 0x40a   :  { %7416 = vmatmul.mubr.bf16.gmra.mrb[4].mxu0 %v8551_v63  ;;  %8264 = vmatmul.mubr.bf16.gmra.mrb[4].mxu1 %v8551_v63 }
 0x4d5   :  { %v7407_v0 = vpop.f32.mrb[0].mxu0  ;;  %v8255_v3 = vpop.f32.mrb[0].mxu1 }
 0x4d6   :  { %v8421_v2 = vmul.f32 %v7407_v0, %v7407_v0  ;;  %v8423_v5 = vmul.f32 %v8255_v3, %v8255_v3  ;;  %v7409_v6 = vpop.f32.mrb[1].mxu0  ;;  %v8257_v7 = vpop.f32.mrb[1].mxu1 }
 0x4d7   :  { %v9585_v8 = vpack.c.bf16 %v7409_v6, %v7407_v0  ;;  %v8422_v11 = vmul.f32 %v7409_v6, %v7409_v6  ;;  %v9586_v12 = vpack.c.bf16 %v8257_v7, %v8255_v3  ;;  %v8424_v4 = vmul.f32 %v8257_v7, %v8257_v7  ;;  %v7411_v1 = vpop.f32.mrb[2].mxu0  ;;  %v8259_v9 = vpop.f32.mrb[2].mxu1 }
 0x4d8   :  { %v8381_v10 = vadd.f32 %v7411_v1, %v7407_v0  ;;  %v8425_v13 = vmul.f32 %v7411_v1, %v7411_v1  ;;  %v8399_v14 = vadd.f32 %v8259_v9, %v8255_v3  ;;  %v8427_v15 = vmul.f32 %v8259_v9, %v8259_v9  ;;  %v7413_v16 = vpop.f32.mrb[3].mxu0  ;;  %v8261_v19 = vpop.f32.mrb[3].mxu1 }
 0x4d9   :  { %8373 = vst [vmem:[%s14828_s2] sm:$0xff] %v9585_v8  ;;  %8374 = vst [vmem:[%s14828_s2 + $0x8] sm:$0xff] %v9586_v12  ;;  %v9587_v17 = vpack.c.bf16 %v7413_v16, %v7411_v1  ;;  %v8390_v18 = vadd.f32 %v7413_v16, %v7409_v6  ;;  %v8426_v20 = vmul.f32 %v7413_v16, %v7413_v16 }
 0x4da   :  { %v9588_v21 = vpack.c.bf16 %v8261_v19, %v8259_v9  ;;  %v8437_v22 = vadd.f32 %v8425_v13, %v8421_v2  ;;  %v8455_v23 = vadd.f32 %v8427_v15, %v8423_v5  ;;  %v8408_v24 = vadd.f32 %v8261_v19, %v8257_v7 }
 0x4db   :  { %v8428_v26 = vmul.f32 %v8261_v19, %v8261_v19  ;;  %8375 = vst [vmem:[%s14828_s2 + $0x10] sm:$0xff] %v9587_v17  ;;  %v8446_v25 = vadd.f32 %v8426_v20, %v8422_v11 }
 0x4dc   :  { %8376 = vst [vmem:[%s14828_s2 + $0x18] sm:$0xff] %v9588_v21 }
 0x4dd   :  { %v8464_v27 = vadd.f32 %v8428_v26, %v8424_v4  ;;  %v7417_v28 = vpop.f32.mrb[4].mxu0  ;;  %v8265_v29 = vpop.f32.mrb[4].mxu1 }
 0x4de   :  { %v8382_v30 = vadd.f32 %v8381_v10, %v7417_v28  ;;  %v8429_v31 = vmul.f32 %v7417_v28, %v7417_v28  ;;  %v8400_v32 = vadd.f32 %v8399_v14, %v8265_v29  ;;  %v8431_v34 = vmul.f32 %v8265_v29, %v8265_v29  ;;  %v7419_v36 = vpop.f32.mrb[5].mxu0  ;;  %v8267_v33 = vpop.f32.mrb[5].mxu1 }
 0x4df   :  { %v9589_v35 = vpack.c.bf16 %v7419_v36, %v7417_v28  ;;  %v8391_v37 = vadd.f32 %v8390_v18, %v7419_v36  ;;  %v8430_v38 = vmul.f32 %v7419_v36, %v7419_v36  ;;  %v9590_v39 = vpack.c.bf16 %v8267_v33, %v8265_v29  ;;  %v7421_v40 = vpop.f32.mrb[6].mxu0  ;;  %v8269_v42 = vpop.f32.mrb[6].mxu1 }
 0x4e0   :  { %v8438_v44 = vadd.f32 %v8437_v22, %v8429_v31  ;;  %v8456_v41 = vadd.f32 %v8455_v23, %v8431_v34  ;;  %v8409_v43 = vadd.f32 %v8408_v24, %v8267_v33  ;;  %v8432_v45 = vmul.f32 %v8267_v33, %v8267_v33  ;;  %v7423_v46 = vpop.f32.mrb[7].mxu0  ;;  %v8271_v47 = vpop.f32.mrb[7].mxu1 }
 0x4e1   :  { %8377 = vst [vmem:[%s14828_s2 + $0x20] sm:$0xff] %v9589_v35  ;;  %v8447_v48 = vadd.f32 %v8446_v25, %v8430_v38  ;;  %8378 = vst [vmem:[%s14828_s2 + $0x28] sm:$0xff] %v9590_v39  ;;  %v8383_v51 = vadd.f32 %v8382_v30, %v7421_v40  ;;  %v8433_v52 = vmul.f32 %v7421_v40, %v7421_v40 }
 0x4e2   :  { %v8401_v49 = vadd.f32 %v8400_v32, %v8269_v42  ;;  %v8465_v50 = vadd.f32 %v8464_v27, %v8432_v45  ;;  %v8435_v53 = vmul.f32 %v8269_v42, %v8269_v42  ;;  %v9591_v54 = vpack.c.bf16 %v7423_v46, %v7421_v40 }
 0x4e3   :  { %v8392_v55 = vadd.f32 %v8391_v37, %v7423_v46  ;;  %v8384_v56 = vrot.slane %v8383_v51, 4  ;;  %v8439_v59 = vadd.f32 %v8438_v44, %v8433_v52  ;;  %v8434_v57 = vmul.f32 %v7423_v46, %v7423_v46 }
 0x4e4   :  { %v8402_v60 = vrot.slane %v8401_v49, 4  ;;  %v8457_v58 = vadd.f32 %v8456_v41, %v8435_v53  ;;  %8379 = vst [vmem:[%s14828_s2 + $0x30] sm:$0xff] %v9591_v54  ;;  %v9592_v62 = vpack.c.bf16 %v8271_v47, %v8269_v42  ;;  %v8410_v63 = vadd.f32 %v8409_v43, %v8271_v47 }
 0x4e5   :  { %v8393_v61 = vrot.slane %v8392_v55, 4  ;;  %v8385_v0 = vadd.f32 %v8384_v56, %v8383_v51  ;;  %v8440_v3 = vrot.slane %v8439_v59, 4  ;;  %v8448_v5 = vadd.f32 %v8447_v48, %v8434_v57 }
 0x4e6   :  { %v8403_v2 = vadd.f32 %v8402_v60, %v8401_v49  ;;  %v8458_v6 = vrot.slane %v8457_v58, 4  ;;  %8380 = vst [vmem:[%s14828_s2 + $0x38] sm:$0xff] %v9592_v62  ;;  %v8411_v8 = vrot.slane %v8410_v63, 4  ;;  %v8436_v11 = vmul.f32 %v8271_v47, %v8271_v47 }
 0x4e7   :  { %v8394_v7 = vadd.f32 %v8393_v61, %v8392_v55  ;;  %v8386_v12 = vrot.slane %v8385_v0, 2  ;;  %v8441_v4 = vadd.f32 %v8440_v3, %v8439_v59  ;;  %v8449_v9 = vrot.slane %v8448_v5, 4 }
 0x4e8   :  { %v8404_v1 = vrot.slane %v8403_v2, 2  ;;  %v8459_v10 = vadd.f32 %v8458_v6, %v8457_v58  ;;  %v8412_v14 = vadd.f32 %v8411_v8, %v8410_v63  ;;  %v8466_v15 = vadd.f32 %v8465_v50, %v8436_v11 }
 0x4e9   :  { %v8395_v13 = vrot.slane %v8394_v7, 2  ;;  %v8387_v16 = vadd.f32 %v8386_v12, %v8385_v0  ;;  %v8442_v19 = vrot.slane %v8441_v4, 2  ;;  %v8450_v18 = vadd.f32 %v8449_v9, %v8448_v5 }
 0x4ea   :  { %v8405_v17 = vadd.f32 %v8404_v1, %v8403_v2  ;;  %v8460_v20 = vrot.slane %v8459_v10, 2  ;;  %v8413_v22 = vrot.slane %v8412_v14, 2  ;;  %v8467_v23 = vrot.slane %v8466_v15, 4 }
 0x4eb   :  { %v8396_v21 = vadd.f32 %v8395_v13, %v8394_v7  ;;  %v8388_v24 = vrot.slane %v8387_v16, 1  ;;  %v8443_v26 = vadd.f32 %v8442_v19, %v8441_v4  ;;  %v8451_v27 = vrot.slane %v8450_v18, 2 }
 0x4ec   :  { %v8406_v25 = vrot.slane %v8405_v17, 1  ;;  %v8461_v28 = vadd.f32 %v8460_v20, %v8459_v10  ;;  %v8414_v30 = vadd.f32 %v8413_v22, %v8412_v14  ;;  %v8468_v31 = vadd.f32 %v8467_v23, %v8466_v15 }
 0x4ed   :  { %v8397_v29 = vrot.slane %v8396_v21, 1  ;;  %v8389_v32 = vadd.f32 %v8388_v24, %v8387_v16  ;;  %v8444_v34 = vrot.slane %v8443_v26, 1  ;;  %v8452_v33 = vadd.f32 %v8451_v27, %v8450_v18 }
 0x4ee   :  { %v8407_v36 = vadd.f32 %v8406_v25, %v8405_v17  ;;  %v8462_v35 = vrot.slane %v8461_v28, 1  ;;  %v8415_v38 = vrot.slane %v8414_v30, 1  ;;  %v8469_v39 = vrot.slane %v8468_v31, 2 }
 0x4ef   :  { %v8398_v37 = vadd.f32 %v8397_v29, %v8396_v21  ;;  %8417 = vst [vmem:[%s14829_s3] sm:$0xff] %v8389_v32  ;;  %v8445_v40 = vadd.f32 %v8444_v34, %v8443_v26  ;;  %v8453_v42 = vrot.slane %v8452_v33, 1 }
 0x4f0   :  { %8419 = vst [vmem:[%s14829_s3 + $0x10] sm:$0xff] %v8407_v36  ;;  %v8463_v44 = vadd.f32 %v8462_v35, %v8461_v28  ;;  %v8416_v41 = vadd.f32 %v8415_v38, %v8414_v30  ;;  %v8470_v43 = vadd.f32 %v8469_v39, %v8468_v31 }
 0x4f1   :  { %8418 = vst [vmem:[%s14829_s3 + $0x8] sm:$0xff] %v8398_v37  ;;  %8473 = vst [vmem:[%s14830_s4] sm:$0xff] %v8445_v40  ;;  %v8454_v45 = vadd.f32 %v8453_v42, %v8452_v33 }
 0x4f2   :  { %8475 = vst [vmem:[%s14830_s4 + $0x10] sm:$0xff] %v8463_v44  ;;  %8420 = vst [vmem:[%s14829_s3 + $0x18] sm:$0xff] %v8416_v41  ;;  %v8471_v46 = vrot.slane %v8470_v43, 1 }
 0x4f3   :  { %8474 = vst [vmem:[%s14830_s4 + $0x8] sm:$0xff] %v8454_v45 }
 0x4f4   :  { %v8472_v47 = vadd.f32 %v8471_v46, %v8470_v43 }
 0x4f6   :  { %8476 = vst [vmem:[%s14830_s4 + $0x18] sm:$0xff] %v8472_v47 }

// kernel: discriminator_forward.15
= control target key start
LH: loop header
LB: loop body
LE: loop exit
PB: predicated region body
PF: predicated region fallthrough
CT: control target
= control target key end

     0   :  { %s9457_s1 = inlined_call_operand.vmem [shape: bf16[8192,128], index: 1, kind: input, shape index: {}]   ;;  %s9458_s0 = inlined_call_operand.vmem [shape: bf16[16,8192], index: 0, kind: input, shape index: {}]   ;;  %s9459_s2 = inlined_call_operand.vmem [shape: f32[1,128], index: 2, kind: input, shape index: {}]   ;;  %s9460_s3 = inlined_call_operand.vmem [shape: f32[16,128], index: 3, kind: output, shape index: {}]  }
   0x1   :  { %v7132_v0 = vld [vmem:[%s9457_s1 + $0x40] sm:$0xff]   ;;  %v7136_v4 = vld [vmem:[%s9457_s1 + $0x48] sm:$0xff]   ;;  %v7140_v8 = vld [vmem:[%s9457_s1 + $0x50] sm:$0xff]  }
   0x2   :  { %v7133_v1 = vld [vmem:[%s9457_s1 + $0xc0] sm:$0xff]   ;;  %6428 = vmatprep.subr.bf16.mxu0 %v7132_v0  ;;  %v7137_v5 = vld [vmem:[%s9457_s1 + $0xc8] sm:$0xff]   ;;  %v7141_v9 = vld [vmem:[%s9457_s1 + $0xd0] sm:$0xff]  }
   0x3   :  { %v7134_v2 = vld [vmem:[%s9457_s1] sm:$0xff]   ;;  %6450 = vmatprep.subr.bf16.mxu1 %v7133_v1  ;;  %v7138_v6 = vld [vmem:[%s9457_s1 + $0x8] sm:$0xff]   ;;  %v7142_v10 = vld [vmem:[%s9457_s1 + $0x10] sm:$0xff]  }
   0x4   :  { %v7135_v3 = vld [vmem:[%s9457_s1 + $0x80] sm:$0xff]   ;;  %6429 = vmatpush3.bf16.msra.mxu0 %v7134_v2  ;;  %v7139_v7 = vld [vmem:[%s9457_s1 + $0x88] sm:$0xff]   ;;  %v7143_v11 = vld [vmem:[%s9457_s1 + $0x90] sm:$0xff]  }
   0x5   :  { %6451 = vmatpush3.bf16.msra.mxu1 %v7135_v3  ;;  %6430 = vmatprep.subr.bf16.mxu0 %v7136_v4  ;;  %v7144_v12 = vld [vmem:[%s9457_s1 + $0x58] sm:$0xff]   ;;  %v7148_v16 = vld [vmem:[%s9457_s1 + $0x60] sm:$0xff]   ;;  %v7152_v20 = vld [vmem:[%s9457_s1 + $0x68] sm:$0xff]  }
   0x6   :  { %6452 = vmatprep.subr.bf16.mxu1 %v7137_v5  ;;  %v7145_v13 = vld [vmem:[%s9457_s1 + $0xd8] sm:$0xff]   ;;  %v7149_v17 = vld [vmem:[%s9457_s1 + $0xe0] sm:$0xff]   ;;  %v7153_v21 = vld [vmem:[%s9457_s1 + $0xe8] sm:$0xff]  }
   0x7   :  { %v7146_v14 = vld [vmem:[%s9457_s1 + $0x18] sm:$0xff]   ;;  %v7150_v18 = vld [vmem:[%s9457_s1 + $0x20] sm:$0xff]   ;;  %v7154_v22 = vld [vmem:[%s9457_s1 + $0x28] sm:$0xff]  }
   0x8   :  { %6431 = vmatpush3.bf16.msra.mxu0 %v7138_v6  ;;  %v7147_v15 = vld [vmem:[%s9457_s1 + $0x98] sm:$0xff]   ;;  %v7151_v19 = vld [vmem:[%s9457_s1 + $0xa0] sm:$0xff]   ;;  %v7155_v23 = vld [vmem:[%s9457_s1 + $0xa8] sm:$0xff]  }
   0x9   :  { %6453 = vmatpush3.bf16.msra.mxu1 %v7139_v7  ;;  %6432 = vmatprep.subr.bf16.mxu0 %v7140_v8  ;;  %v7156_v24 = vld [vmem:[%s9457_s1 + $0x70] sm:$0xff]   ;;  %v7160_v28 = vld [vmem:[%s9457_s1 + $0x78] sm:$0xff]   ;;  %v23_v32 = vld [vmem:[%s9458_s0] sm:$0xff] }
   0xa   :  { %6454 = vmatprep.subr.bf16.mxu1 %v7141_v9  ;;  %v7157_v25 = vld [vmem:[%s9457_s1 + $0xf0] sm:$0xff]   ;;  %v7161_v29 = vld [vmem:[%s9457_s1 + $0xf8] sm:$0xff]   ;;  %v55_v33 = vld [vmem:[%s9458_s0 + $0x100] sm:$0xff] }
   0xb   :  { %v7158_v26 = vld [vmem:[%s9457_s1 + $0x30] sm:$0xff]   ;;  %v7162_v30 = vld [vmem:[%s9457_s1 + $0x38] sm:$0xff]   ;;  %v24_v34 = vld [vmem:[%s9458_s0 + $0x8] sm:$0xff]  ;;  %v5851_v35 = vcombine.low %v23_v32, %v55_v33  ;;  %v5852_v36 = vcombine.high %v23_v32, %v55_v33 }
   0xc   :  { %6433 = vmatpush3.bf16.msra.mxu0 %v7142_v10  ;;  %v7159_v27 = vld [vmem:[%s9457_s1 + $0xb0] sm:$0xff]   ;;  %v7163_v31 = vld [vmem:[%s9457_s1 + $0xb8] sm:$0xff]   ;;  %v56_v37 = vld [vmem:[%s9458_s0 + $0x108] sm:$0xff] }
   0xd   :  { %6455 = vmatpush3.bf16.msra.mxu1 %v7143_v11  ;;  %6434 = vmatprep.subr.bf16.mxu0 %v7144_v12  ;;  %v5853_v38 = vcombine.low %v24_v34, %v56_v37  ;;  %v5854_v39 = vcombine.high %v24_v34, %v56_v37  ;;  %v7164_v40 = vld [vmem:[%s9457_s1 + $0x140] sm:$0xff]   ;;  %v7168_v44 = vld [vmem:[%s9457_s1 + $0x148] sm:$0xff]   ;;  %v7172_v48 = vld [vmem:[%s9457_s1 + $0x150] sm:$0xff]  }
   0xe   :  { %6456 = vmatprep.subr.bf16.mxu1 %v7145_v13  ;;  %4535 = vmatprep.mubr.bf16.mxu0 %v5852_v36  ;;  %v7165_v41 = vld [vmem:[%s9457_s1 + $0x1c0] sm:$0xff]   ;;  %v7169_v45 = vld [vmem:[%s9457_s1 + $0x1c8] sm:$0xff]   ;;  %v7173_v49 = vld [vmem:[%s9457_s1 + $0x1d0] sm:$0xff]  }
   0xf   :  { %4576 = vmatprep.mubr.bf16.mxu1 %v5854_v39  ;;  %v7166_v42 = vld [vmem:[%s9457_s1 + $0x100] sm:$0xff]   ;;  %v7170_v46 = vld [vmem:[%s9457_s1 + $0x108] sm:$0xff]   ;;  %v7174_v50 = vld [vmem:[%s9457_s1 + $0x110] sm:$0xff]  }
  0x10   :  { %6435 = vmatpush3.bf16.msra.mxu0 %v7146_v14  ;;  %v7167_v43 = vld [vmem:[%s9457_s1 + $0x180] sm:$0xff]   ;;  %v7171_v47 = vld [vmem:[%s9457_s1 + $0x188] sm:$0xff]   ;;  %v7175_v51 = vld [vmem:[%s9457_s1 + $0x190] sm:$0xff]  }
  0x11   :  { %6457 = vmatpush3.bf16.msra.mxu1 %v7147_v15  ;;  %6436 = vmatprep.subr.bf16.mxu0 %v7148_v16  ;;  %v7176_v52 = vld [vmem:[%s9457_s1 + $0x158] sm:$0xff]   ;;  %v7180_v56 = vld [vmem:[%s9457_s1 + $0x160] sm:$0xff]   ;;  %v7184_v60 = vld [vmem:[%s9457_s1 + $0x168] sm:$0xff]  }
  0x12   :  { %6458 = vmatprep.subr.bf16.mxu1 %v7149_v17  ;;  %v7177_v53 = vld [vmem:[%s9457_s1 + $0x1d8] sm:$0xff]   ;;  %v7181_v57 = vld [vmem:[%s9457_s1 + $0x1e0] sm:$0xff]   ;;  %v7185_v61 = vld [vmem:[%s9457_s1 + $0x1e8] sm:$0xff]  }
  0x13   :  { %v7178_v54 = vld [vmem:[%s9457_s1 + $0x118] sm:$0xff]   ;;  %v7182_v58 = vld [vmem:[%s9457_s1 + $0x120] sm:$0xff]   ;;  %v7186_v62 = vld [vmem:[%s9457_s1 + $0x128] sm:$0xff]  }
  0x14   :  { %6437 = vmatpush3.bf16.msra.mxu0 %v7150_v18  ;;  %v7179_v55 = vld [vmem:[%s9457_s1 + $0x198] sm:$0xff]   ;;  %v7183_v59 = vld [vmem:[%s9457_s1 + $0x1a0] sm:$0xff]   ;;  %v7187_v63 = vld [vmem:[%s9457_s1 + $0x1a8] sm:$0xff]  }
  0x15   :  { %6459 = vmatpush3.bf16.msra.mxu1 %v7151_v19  ;;  %6438 = vmatprep.subr.bf16.mxu0 %v7152_v20  ;;  %v7188_v0 = vld [vmem:[%s9457_s1 + $0x170] sm:$0xff]   ;;  %v7192_v4 = vld [vmem:[%s9457_s1 + $0x178] sm:$0xff]   ;;  %v7196_v16 = vld [vmem:[%s9457_s1 + $0x240] sm:$0xff]  }
  0x16   :  { %6460 = vmatprep.subr.bf16.mxu1 %v7153_v21  ;;  %v7189_v1 = vld [vmem:[%s9457_s1 + $0x1f0] sm:$0xff]   ;;  %v7193_v5 = vld [vmem:[%s9457_s1 + $0x1f8] sm:$0xff]   ;;  %v7197_v17 = vld [vmem:[%s9457_s1 + $0x2c0] sm:$0xff]  }
  0x17   :  { %v7190_v2 = vld [vmem:[%s9457_s1 + $0x130] sm:$0xff]   ;;  %v7194_v6 = vld [vmem:[%s9457_s1 + $0x138] sm:$0xff]   ;;  %v7198_v18 = vld [vmem:[%s9457_s1 + $0x200] sm:$0xff]  }
  0x18   :  { %6439 = vmatpush3.bf16.msra.mxu0 %v7154_v22  ;;  %v7191_v3 = vld [vmem:[%s9457_s1 + $0x1b0] sm:$0xff]   ;;  %v7195_v7 = vld [vmem:[%s9457_s1 + $0x1b8] sm:$0xff]   ;;  %v7199_v19 = vld [vmem:[%s9457_s1 + $0x280] sm:$0xff]  }
  0x19   :  { %6461 = vmatpush3.bf16.msra.mxu1 %v7155_v23  ;;  %6440 = vmatprep.subr.bf16.mxu0 %v7156_v24  ;;  %v25_v8 = vld [vmem:[%s9458_s0 + $0x10] sm:$0xff]  ;;  %v26_v12 = vld [vmem:[%s9458_s0 + $0x18] sm:$0xff]  ;;  %v7200_v20 = vld [vmem:[%s9457_s1 + $0x248] sm:$0xff]  }
  0x1a   :  { %6462 = vmatprep.subr.bf16.mxu1 %v7157_v25  ;;  %v57_v9 = vld [vmem:[%s9458_s0 + $0x110] sm:$0xff]  ;;  %v58_v13 = vld [vmem:[%s9458_s0 + $0x118] sm:$0xff]  ;;  %v7201_v21 = vld [vmem:[%s9457_s1 + $0x2c8] sm:$0xff]  }
  0x1b   :  { %v5855_v10 = vcombine.low %v25_v8, %v57_v9  ;;  %v5856_v11 = vcombine.high %v25_v8, %v57_v9  ;;  %v5857_v14 = vcombine.low %v26_v12, %v58_v13  ;;  %v5858_v15 = vcombine.high %v26_v12, %v58_v13  ;;  %v7202_v22 = vld [vmem:[%s9457_s1 + $0x208] sm:$0xff]   ;;  %v7204_v24 = vld [vmem:[%s9457_s1 + $0x250] sm:$0xff]   ;;  %v7212_v32 = vld [vmem:[%s9457_s1 + $0x260] sm:$0xff]  }
  0x1c   :  { %6441 = vmatpush3.bf16.msra.mxu0 %v7158_v26  ;;  %v7203_v23 = vld [vmem:[%s9457_s1 + $0x288] sm:$0xff]   ;;  %v7205_v25 = vld [vmem:[%s9457_s1 + $0x2d0] sm:$0xff]   ;;  %v7213_v33 = vld [vmem:[%s9457_s1 + $0x2e0] sm:$0xff]  }
  0x1d   :  { %6463 = vmatpush3.bf16.msra.mxu1 %v7159_v27  ;;  %6442 = vmatprep.subr.bf16.mxu0 %v7160_v28  ;;  %v7206_v26 = vld [vmem:[%s9457_s1 + $0x210] sm:$0xff]   ;;  %v7208_v28 = vld [vmem:[%s9457_s1 + $0x258] sm:$0xff]   ;;  %v7214_v34 = vld [vmem:[%s9457_s1 + $0x220] sm:$0xff]  }
  0x1e   :  { %6464 = vmatprep.subr.bf16.mxu1 %v7161_v29  ;;  %v7207_v27 = vld [vmem:[%s9457_s1 + $0x290] sm:$0xff]   ;;  %v7209_v29 = vld [vmem:[%s9457_s1 + $0x2d8] sm:$0xff]   ;;  %v7216_v36 = vld [vmem:[%s9457_s1 + $0x268] sm:$0xff]  }
  0x1f   :  { %v7217_v37 = vld [vmem:[%s9457_s1 + $0x2e8] sm:$0xff]   ;;  %v7244_v8 = vld [vmem:[%s9457_s1 + $0x360] sm:$0xff]  }
  0x20   :  { %6443 = vmatpush3.bf16.msra.mxu0 %v7162_v30  ;;  %v7210_v30 = vld [vmem:[%s9457_s1 + $0x218] sm:$0xff]   ;;  %v7219_v39 = vld [vmem:[%s9457_s1 + $0x2a8] sm:$0xff]   ;;  %v7245_v9 = vld [vmem:[%s9457_s1 + $0x3e0] sm:$0xff]  }
  0x21   :  { %6465 = vmatpush3.bf16.msra.mxu1 %v7163_v31  ;;  %6472 = vmatprep.subr.bf16.mxu0 %v7164_v40  ;;  %v7211_v31 = vld [vmem:[%s9457_s1 + $0x298] sm:$0xff]   ;;  %v7220_v40 = vld [vmem:[%s9457_s1 + $0x270] sm:$0xff]   ;;  %v7248_v12 = vld [vmem:[%s9457_s1 + $0x368] sm:$0xff]  }
  0x22   :  { %6494 = vmatprep.subr.bf16.mxu1 %v7165_v41  ;;  %v7221_v41 = vld [vmem:[%s9457_s1 + $0x2f0] sm:$0xff]   ;;  %v7249_v13 = vld [vmem:[%s9457_s1 + $0x3e8] sm:$0xff]  }
  0x23   :  { %4536 = vmatmul.mubr.bf16.vlgmr.msra.gmra.mrb[0].mxu0 %v5851_v35  ;;  %v7215_v35 = vld [vmem:[%s9457_s1 + $0x2a0] sm:$0xff]  }
  0x24   :  { %4577 = vmatmul.mubr.bf16.vlgmr.msra.gmra.mrb[0].mxu1 %v5853_v38  ;;  %6473 = vmatpush3.bf16.msra.mxu0 %v7166_v42  ;;  %v7218_v38 = vld [vmem:[%s9457_s1 + $0x228] sm:$0xff]   ;;  %v7222_v42 = vld [vmem:[%s9457_s1 + $0x230] sm:$0xff]  }
  0x25   :  { %6495 = vmatpush3.bf16.msra.mxu1 %v7167_v43  ;;  %6474 = vmatprep.subr.bf16.mxu0 %v7168_v44  ;;  %v7223_v43 = vld [vmem:[%s9457_s1 + $0x2b0] sm:$0xff]   ;;  %v7224_v44 = vld [vmem:[%s9457_s1 + $0x278] sm:$0xff]  }
  0x26   :  { %6496 = vmatprep.subr.bf16.mxu1 %v7169_v45  ;;  %4617 = vmatprep.mubr.bf16.mxu0 %v5856_v11  ;;  %v7225_v45 = vld [vmem:[%s9457_s1 + $0x2f8] sm:$0xff]   ;;  %v7247_v11 = vld [vmem:[%s9457_s1 + $0x3a0] sm:$0xff]  }
  0x27   :  { %4658 = vmatprep.mubr.bf16.mxu1 %v5858_v15  ;;  %v7251_v15 = vld [vmem:[%s9457_s1 + $0x3a8] sm:$0xff]  }
  0x28   :  { %6475 = vmatpush3.bf16.msra.mxu0 %v7170_v46  ;;  %v7226_v46 = vld [vmem:[%s9457_s1 + $0x238] sm:$0xff]  }
  0x29   :  { %6497 = vmatpush3.bf16.msra.mxu1 %v7171_v47  ;;  %6476 = vmatprep.subr.bf16.mxu0 %v7172_v48  ;;  %v7227_v47 = vld [vmem:[%s9457_s1 + $0x2b8] sm:$0xff]   ;;  %v27_v48 = vld [vmem:[%s9458_s0 + $0x20] sm:$0xff] }
  0x2a   :  { %6498 = vmatprep.subr.bf16.mxu1 %v7173_v49  ;;  %v59_v49 = vld [vmem:[%s9458_s0 + $0x120] sm:$0xff] }
  0x2c   :  { %6477 = vmatpush3.bf16.msra.mxu0 %v7174_v50  ;;  %v28_v50 = vld [vmem:[%s9458_s0 + $0x28] sm:$0xff] }
  0x2d   :  { %6499 = vmatpush3.bf16.msra.mxu1 %v7175_v51  ;;  %6478 = vmatprep.subr.bf16.mxu0 %v7176_v52  ;;  %v60_v51 = vld [vmem:[%s9458_s0 + $0x128] sm:$0xff]  ;;  %v5859_v52 = vcombine.low %v27_v48, %v59_v49 }
  0x2e   :  { %6500 = vmatprep.subr.bf16.mxu1 %v7177_v53  ;;  %v5860_v53 = vcombine.high %v27_v48, %v59_v49  ;;  %v7276_v48 = vld [vmem:[%s9457_s1 + $0x460] sm:$0xff]  }
  0x2f   :  { %v7277_v49 = vld [vmem:[%s9457_s1 + $0x4e0] sm:$0xff]  }
  0x30   :  { %6479 = vmatpush3.bf16.msra.mxu0 %v7178_v54  ;;  %v5861_v54 = vcombine.low %v28_v50, %v60_v51 }
  0x31   :  { %6501 = vmatpush3.bf16.msra.mxu1 %v7179_v55  ;;  %6480 = vmatprep.subr.bf16.mxu0 %v7180_v56  ;;  %v5862_v55 = vcombine.high %v28_v50, %v60_v51  ;;  %v7228_v56 = vld [vmem:[%s9457_s1 + $0x340] sm:$0xff]  }
  0x32   :  { %6502 = vmatprep.subr.bf16.mxu1 %v7181_v57  ;;  %v7229_v57 = vld [vmem:[%s9457_s1 + $0x3c0] sm:$0xff]  }
  0x33   :  { %v7278_v50 = vld [vmem:[%s9457_s1 + $0x420] sm:$0xff]  }
  0x34   :  { %6481 = vmatpush3.bf16.msra.mxu0 %v7182_v58  ;;  %v7230_v58 = vld [vmem:[%s9457_s1 + $0x300] sm:$0xff]  }
  0x35   :  { %6503 = vmatpush3.bf16.msra.mxu1 %v7183_v59  ;;  %6482 = vmatprep.subr.bf16.mxu0 %v7184_v60  ;;  %v7231_v59 = vld [vmem:[%s9457_s1 + $0x380] sm:$0xff]   ;;  %v7232_v60 = vld [vmem:[%s9457_s1 + $0x348] sm:$0xff]  }
  0x36   :  { %6504 = vmatprep.subr.bf16.mxu1 %v7185_v61  ;;  %v7233_v61 = vld [vmem:[%s9457_s1 + $0x3c8] sm:$0xff]   ;;  %v7279_v51 = vld [vmem:[%s9457_s1 + $0x4a0] sm:$0xff]  }
  0x38   :  { %6483 = vmatpush3.bf16.msra.mxu0 %v7186_v62  ;;  %v7234_v62 = vld [vmem:[%s9457_s1 + $0x308] sm:$0xff]  }
  0x39   :  { %6505 = vmatpush3.bf16.msra.mxu1 %v7187_v63  ;;  %6484 = vmatprep.subr.bf16.mxu0 %v7188_v0  ;;  %v7235_v63 = vld [vmem:[%s9457_s1 + $0x388] sm:$0xff]   ;;  %v7236_v0 = vld [vmem:[%s9457_s1 + $0x350] sm:$0xff]  }
  0x3a   :  { %6506 = vmatprep.subr.bf16.mxu1 %v7189_v1  ;;  %v7237_v1 = vld [vmem:[%s9457_s1 + $0x3d0] sm:$0xff]  }
  0x3c   :  { %6485 = vmatpush3.bf16.msra.mxu0 %v7190_v2  ;;  %v7238_v2 = vld [vmem:[%s9457_s1 + $0x310] sm:$0xff]  }
  0x3d   :  { %6507 = vmatpush3.bf16.msra.mxu1 %v7191_v3  ;;  %6486 = vmatprep.subr.bf16.mxu0 %v7192_v4  ;;  %v7239_v3 = vld [vmem:[%s9457_s1 + $0x390] sm:$0xff]   ;;  %v7240_v4 = vld [vmem:[%s9457_s1 + $0x358] sm:$0xff]  }
  0x3e   :  { %6508 = vmatprep.subr.bf16.mxu1 %v7193_v5  ;;  %v7241_v5 = vld [vmem:[%s9457_s1 + $0x3d8] sm:$0xff]  }
  0x40   :  { %6487 = vmatpush3.bf16.msra.mxu0 %v7194_v6  ;;  %v7242_v6 = vld [vmem:[%s9457_s1 + $0x318] sm:$0xff]  }
  0x41   :  { %6509 = vmatpush3.bf16.msra.mxu1 %v7195_v7  ;;  %6516 = vmatprep.subr.bf16.mxu0 %v7196_v16  ;;  %v7243_v7 = vld [vmem:[%s9457_s1 + $0x398] sm:$0xff]   ;;  %v7252_v16 = vld [vmem:[%s9457_s1 + $0x370] sm:$0xff]  }
  0x42   :  { %6538 = vmatprep.subr.bf16.mxu1 %v7197_v17  ;;  %v7253_v17 = vld [vmem:[%s9457_s1 + $0x3f0] sm:$0xff]  }
  0x43   :  { %4618 = vmatmul.mubr.bf16.vlgmr.msra.gmra.mrb[4].mxu0 %v5855_v10  ;;  %v7246_v10 = vld [vmem:[%s9457_s1 + $0x320] sm:$0xff]  }
  0x44   :  { %4659 = vmatmul.mubr.bf16.vlgmr.msra.gmra.mrb[4].mxu1 %v5857_v14  ;;  %6517 = vmatpush3.bf16.msra.mxu0 %v7198_v18  ;;  %v7250_v14 = vld [vmem:[%s9457_s1 + $0x328] sm:$0xff]   ;;  %v7254_v18 = vld [vmem:[%s9457_s1 + $0x330] sm:$0xff]  }
  0x45   :  { %6539 = vmatpush3.bf16.msra.mxu1 %v7199_v19  ;;  %6518 = vmatprep.subr.bf16.mxu0 %v7200_v20  ;;  %v7255_v19 = vld [vmem:[%s9457_s1 + $0x3b0] sm:$0xff]   ;;  %v7256_v20 = vld [vmem:[%s9457_s1 + $0x378] sm:$0xff]  }
  0x46   :  { %6540 = vmatprep.subr.bf16.mxu1 %v7201_v21  ;;  %4699 = vmatprep.mubr.bf16.mxu0 %v5860_v53  ;;  %v7257_v21 = vld [vmem:[%s9457_s1 + $0x3f8] sm:$0xff]   ;;  %v7281_v53 = vld [vmem:[%s9457_s1 + $0x4e8] sm:$0xff]  }
  0x47   :  { %4740 = vmatprep.mubr.bf16.mxu1 %v5862_v55  ;;  %v7283_v55 = vld [vmem:[%s9457_s1 + $0x4a8] sm:$0xff]  }
  0x48   :  { %6519 = vmatpush3.bf16.msra.mxu0 %v7202_v22  ;;  %v7258_v22 = vld [vmem:[%s9457_s1 + $0x338] sm:$0xff]  }
  0x49   :  { %6541 = vmatpush3.bf16.msra.mxu1 %v7203_v23  ;;  %6520 = vmatprep.subr.bf16.mxu0 %v7204_v24  ;;  %v7259_v23 = vld [vmem:[%s9457_s1 + $0x3b8] sm:$0xff]   ;;  %v29_v24 = vld [vmem:[%s9458_s0 + $0x30] sm:$0xff] }
  0x4a   :  { %6542 = vmatprep.subr.bf16.mxu1 %v7205_v25  ;;  %v61_v25 = vld [vmem:[%s9458_s0 + $0x130] sm:$0xff] }
  0x4c   :  { %6521 = vmatpush3.bf16.msra.mxu0 %v7206_v26  ;;  %v30_v26 = vld [vmem:[%s9458_s0 + $0x38] sm:$0xff] }
  0x4d   :  { %6543 = vmatpush3.bf16.msra.mxu1 %v7207_v27  ;;  %6522 = vmatprep.subr.bf16.mxu0 %v7208_v28  ;;  %v5863_v27 = vcombine.low %v29_v24, %v61_v25  ;;  %v5864_v28 = vcombine.high %v29_v24, %v61_v25  ;;  %v7308_v24 = vld [vmem:[%s9457_s1 + $0x560] sm:$0xff]  }
  0x4e   :  { %6544 = vmatprep.subr.bf16.mxu1 %v7209_v29  ;;  %v62_v29 = vld [vmem:[%s9458_s0 + $0x138] sm:$0xff]  ;;  %v7309_v25 = vld [vmem:[%s9457_s1 + $0x5e0] sm:$0xff]  }
  0x50   :  { %6523 = vmatpush3.bf16.msra.mxu0 %v7210_v30  ;;  %v5865_v30 = vcombine.low %v30_v26, %v62_v29 }
  0x51   :  { %6545 = vmatpush3.bf16.msra.mxu1 %v7211_v31  ;;  %6524 = vmatprep.subr.bf16.mxu0 %v7212_v32  ;;  %v5866_v31 = vcombine.high %v30_v26, %v62_v29  ;;  %v7260_v32 = vld [vmem:[%s9457_s1 + $0x440] sm:$0xff]   ;;  %v7313_v29 = vld [vmem:[%s9457_s1 + $0x5e8] sm:$0xff]  }
  0x52   :  { %6546 = vmatprep.subr.bf16.mxu1 %v7213_v33  ;;  %v7261_v33 = vld [vmem:[%s9457_s1 + $0x4c0] sm:$0xff]  }
  0x53   :  { %v7310_v26 = vld [vmem:[%s9457_s1 + $0x520] sm:$0xff]  }
  0x54   :  { %6525 = vmatpush3.bf16.msra.mxu0 %v7214_v34  ;;  %v7262_v34 = vld [vmem:[%s9457_s1 + $0x400] sm:$0xff]  }
  0x55   :  { %6547 = vmatpush3.bf16.msra.mxu1 %v7215_v35  ;;  %6526 = vmatprep.subr.bf16.mxu0 %v7216_v36  ;;  %v7263_v35 = vld [vmem:[%s9457_s1 + $0x480] sm:$0xff]   ;;  %v7264_v36 = vld [vmem:[%s9457_s1 + $0x448] sm:$0xff]  }
  0x56   :  { %6548 = vmatprep.subr.bf16.mxu1 %v7217_v37  ;;  %v7265_v37 = vld [vmem:[%s9457_s1 + $0x4c8] sm:$0xff]  }
  0x58   :  { %6527 = vmatpush3.bf16.msra.mxu0 %v7218_v38  ;;  %v7266_v38 = vld [vmem:[%s9457_s1 + $0x408] sm:$0xff]  }
  0x59   :  { %6549 = vmatpush3.bf16.msra.mxu1 %v7219_v39  ;;  %6528 = vmatprep.subr.bf16.mxu0 %v7220_v40  ;;  %v7267_v39 = vld [vmem:[%s9457_s1 + $0x488] sm:$0xff]   ;;  %v7268_v40 = vld [vmem:[%s9457_s1 + $0x450] sm:$0xff]  }
  0x5a   :  { %6550 = vmatprep.subr.bf16.mxu1 %v7221_v41  ;;  %v7269_v41 = vld [vmem:[%s9457_s1 + $0x4d0] sm:$0xff]  }
  0x5c   :  { %6529 = vmatpush3.bf16.msra.mxu0 %v7222_v42  ;;  %v7270_v42 = vld [vmem:[%s9457_s1 + $0x410] sm:$0xff]  }
  0x5d   :  { %6551 = vmatpush3.bf16.msra.mxu1 %v7223_v43  ;;  %6530 = vmatprep.subr.bf16.mxu0 %v7224_v44  ;;  %v7271_v43 = vld [vmem:[%s9457_s1 + $0x490] sm:$0xff]   ;;  %v7272_v44 = vld [vmem:[%s9457_s1 + $0x458] sm:$0xff]  }
  0x5e   :  { %6552 = vmatprep.subr.bf16.mxu1 %v7225_v45  ;;  %v7273_v45 = vld [vmem:[%s9457_s1 + $0x4d8] sm:$0xff]  }
  0x60   :  { %6531 = vmatpush3.bf16.msra.mxu0 %v7226_v46  ;;  %v7274_v46 = vld [vmem:[%s9457_s1 + $0x418] sm:$0xff]  }
  0x61   :  { %6553 = vmatpush3.bf16.msra.mxu1 %v7227_v47  ;;  %6560 = vmatprep.subr.bf16.mxu0 %v7228_v56  ;;  %v7275_v47 = vld [vmem:[%s9457_s1 + $0x498] sm:$0xff]   ;;  %v7284_v56 = vld [vmem:[%s9457_s1 + $0x470] sm:$0xff]  }
  0x62   :  { %6582 = vmatprep.subr.bf16.mxu1 %v7229_v57  ;;  %v7285_v57 = vld [vmem:[%s9457_s1 + $0x4f0] sm:$0xff]  }
  0x63   :  { %4700 = vmatmul.mubr.bf16.vlgmr.msra.gmra.mrb[8].mxu0 %v5859_v52  ;;  %v7280_v52 = vld [vmem:[%s9457_s1 + $0x468] sm:$0xff]  }
  0x64   :  { %4741 = vmatmul.mubr.bf16.vlgmr.msra.gmra.mrb[8].mxu1 %v5861_v54  ;;  %6561 = vmatpush3.bf16.msra.mxu0 %v7230_v58  ;;  %v7282_v54 = vld [vmem:[%s9457_s1 + $0x428] sm:$0xff]   ;;  %v7286_v58 = vld [vmem:[%s9457_s1 + $0x430] sm:$0xff]  }
  0x65   :  { %6583 = vmatpush3.bf16.msra.mxu1 %v7231_v59  ;;  %6562 = vmatprep.subr.bf16.mxu0 %v7232_v60  ;;  %v7287_v59 = vld [vmem:[%s9457_s1 + $0x4b0] sm:$0xff]   ;;  %v7288_v60 = vld [vmem:[%s9457_s1 + $0x478] sm:$0xff]  }
  0x66   :  { %6584 = vmatprep.subr.bf16.mxu1 %v7233_v61  ;;  %4781 = vmatprep.mubr.bf16.mxu0 %v5864_v28  ;;  %v7289_v61 = vld [vmem:[%s9457_s1 + $0x4f8] sm:$0xff]   ;;  %v7312_v28 = vld [vmem:[%s9457_s1 + $0x568] sm:$0xff]  }
  0x67   :  { %4822 = vmatprep.mubr.bf16.mxu1 %v5866_v31  ;;  %v7315_v31 = vld [vmem:[%s9457_s1 + $0x5a8] sm:$0xff]  }
  0x68   :  { %6563 = vmatpush3.bf16.msra.mxu0 %v7234_v62  ;;  %v7290_v62 = vld [vmem:[%s9457_s1 + $0x438] sm:$0xff]  }
  0x69   :  { %6585 = vmatpush3.bf16.msra.mxu1 %v7235_v63  ;;  %6564 = vmatprep.subr.bf16.mxu0 %v7236_v0  ;;  %v7291_v63 = vld [vmem:[%s9457_s1 + $0x4b8] sm:$0xff]   ;;  %v31_v0 = vld [vmem:[%s9458_s0 + $0x40] sm:$0xff] }
  0x6a   :  { %6586 = vmatprep.subr.bf16.mxu1 %v7237_v1  ;;  %v63_v1 = vld [vmem:[%s9458_s0 + $0x140] sm:$0xff] }
  0x6c   :  { %6565 = vmatpush3.bf16.msra.mxu0 %v7238_v2  ;;  %v5867_v2 = vcombine.low %v31_v0, %v63_v1 }
  0x6d   :  { %6587 = vmatpush3.bf16.msra.mxu1 %v7239_v3  ;;  %6566 = vmatprep.subr.bf16.mxu0 %v7240_v4  ;;  %v5868_v3 = vcombine.high %v31_v0, %v63_v1  ;;  %v32_v4 = vld [vmem:[%s9458_s0 + $0x48] sm:$0xff]  ;;  %v7340_v0 = vld [vmem:[%s9457_s1 + $0x660] sm:$0xff]  }
  0x6e   :  { %6588 = vmatprep.subr.bf16.mxu1 %v7241_v5  ;;  %v64_v5 = vld [vmem:[%s9458_s0 + $0x148] sm:$0xff]  ;;  %v7341_v1 = vld [vmem:[%s9457_s1 + $0x6e0] sm:$0xff]  }
  0x70   :  { %6567 = vmatpush3.bf16.msra.mxu0 %v7242_v6  ;;  %v5869_v6 = vcombine.low %v32_v4, %v64_v5 }
  0x71   :  { %6589 = vmatpush3.bf16.msra.mxu1 %v7243_v7  ;;  %6568 = vmatprep.subr.bf16.mxu0 %v7244_v8  ;;  %v5870_v7 = vcombine.high %v32_v4, %v64_v5  ;;  %v7292_v8 = vld [vmem:[%s9457_s1 + $0x540] sm:$0xff]   ;;  %v7344_v4 = vld [vmem:[%s9457_s1 + $0x668] sm:$0xff]  }
  0x72   :  { %6590 = vmatprep.subr.bf16.mxu1 %v7245_v9  ;;  %v7293_v9 = vld [vmem:[%s9457_s1 + $0x5c0] sm:$0xff]   ;;  %v7345_v5 = vld [vmem:[%s9457_s1 + $0x6e8] sm:$0xff]  }
  0x74   :  { %6569 = vmatpush3.bf16.msra.mxu0 %v7246_v10  ;;  %v7294_v10 = vld [vmem:[%s9457_s1 + $0x500] sm:$0xff]  }
  0x75   :  { %6591 = vmatpush3.bf16.msra.mxu1 %v7247_v11  ;;  %6570 = vmatprep.subr.bf16.mxu0 %v7248_v12  ;;  %v7295_v11 = vld [vmem:[%s9457_s1 + $0x580] sm:$0xff]   ;;  %v7296_v12 = vld [vmem:[%s9457_s1 + $0x548] sm:$0xff]  }
  0x76   :  { %6592 = vmatprep.subr.bf16.mxu1 %v7249_v13  ;;  %v7297_v13 = vld [vmem:[%s9457_s1 + $0x5c8] sm:$0xff]  }
  0x78   :  { %6571 = vmatpush3.bf16.msra.mxu0 %v7250_v14  ;;  %v7298_v14 = vld [vmem:[%s9457_s1 + $0x508] sm:$0xff]  }
  0x79   :  { %6593 = vmatpush3.bf16.msra.mxu1 %v7251_v15  ;;  %6572 = vmatprep.subr.bf16.mxu0 %v7252_v16  ;;  %v7299_v15 = vld [vmem:[%s9457_s1 + $0x588] sm:$0xff]   ;;  %v7300_v16 = vld [vmem:[%s9457_s1 + $0x550] sm:$0xff]  }
  0x7a   :  { %6594 = vmatprep.subr.bf16.mxu1 %v7253_v17  ;;  %v7301_v17 = vld [vmem:[%s9457_s1 + $0x5d0] sm:$0xff]  }
  0x7c   :  { %6573 = vmatpush3.bf16.msra.mxu0 %v7254_v18  ;;  %v7302_v18 = vld [vmem:[%s9457_s1 + $0x510] sm:$0xff]  }
  0x7d   :  { %6595 = vmatpush3.bf16.msra.mxu1 %v7255_v19  ;;  %6574 = vmatprep.subr.bf16.mxu0 %v7256_v20  ;;  %v7303_v19 = vld [vmem:[%s9457_s1 + $0x590] sm:$0xff]   ;;  %v7304_v20 = vld [vmem:[%s9457_s1 + $0x558] sm:$0xff]  }
  0x7e   :  { %6596 = vmatprep.subr.bf16.mxu1 %v7257_v21  ;;  %v7305_v21 = vld [vmem:[%s9457_s1 + $0x5d8] sm:$0xff]  }
  0x80   :  { %6575 = vmatpush3.bf16.msra.mxu0 %v7258_v22  ;;  %v7306_v22 = vld [vmem:[%s9457_s1 + $0x518] sm:$0xff]  }
  0x81   :  { %6597 = vmatpush3.bf16.msra.mxu1 %v7259_v23  ;;  %6604 = vmatprep.subr.bf16.mxu0 %v7260_v32  ;;  %v7307_v23 = vld [vmem:[%s9457_s1 + $0x598] sm:$0xff]   ;;  %v7316_v32 = vld [vmem:[%s9457_s1 + $0x570] sm:$0xff]  }
  0x82   :  { %6626 = vmatprep.subr.bf16.mxu1 %v7261_v33  ;;  %v7317_v33 = vld [vmem:[%s9457_s1 + $0x5f0] sm:$0xff]  }
  0x83   :  { %4782 = vmatmul.mubr.bf16.vlgmr.msra.gmra.mrb[12].mxu0 %v5863_v27  ;;  %v7311_v27 = vld [vmem:[%s9457_s1 + $0x5a0] sm:$0xff]  }
  0x84   :  { %4823 = vmatmul.mubr.bf16.vlgmr.msra.gmra.mrb[12].mxu1 %v5865_v30  ;;  %6605 = vmatpush3.bf16.msra.mxu0 %v7262_v34  ;;  %v7314_v30 = vld [vmem:[%s9457_s1 + $0x528] sm:$0xff]   ;;  %v7318_v34 = vld [vmem:[%s9457_s1 + $0x530] sm:$0xff]  }
  0x85   :  { %6627 = vmatpush3.bf16.msra.mxu1 %v7263_v35  ;;  %6606 = vmatprep.subr.bf16.mxu0 %v7264_v36  ;;  %v7319_v35 = vld [vmem:[%s9457_s1 + $0x5b0] sm:$0xff]   ;;  %v7320_v36 = vld [vmem:[%s9457_s1 + $0x578] sm:$0xff]  }
  0x86   :  { %6628 = vmatprep.subr.bf16.mxu1 %v7265_v37  ;;  %4863 = vmatprep.mubr.bf16.mxu0 %v5868_v3  ;;  %v7321_v37 = vld [vmem:[%s9457_s1 + $0x5f8] sm:$0xff]   ;;  %v7343_v3 = vld [vmem:[%s9457_s1 + $0x6a0] sm:$0xff]  }
  0x87   :  { %4904 = vmatprep.mubr.bf16.mxu1 %v5870_v7  ;;  %v7347_v7 = vld [vmem:[%s9457_s1 + $0x6a8] sm:$0xff]  }
  0x88   :  { %6607 = vmatpush3.bf16.msra.mxu0 %v7266_v38  ;;  %v7322_v38 = vld [vmem:[%s9457_s1 + $0x538] sm:$0xff]  }
  0x89   :  { %6629 = vmatpush3.bf16.msra.mxu1 %v7267_v39  ;;  %6608 = vmatprep.subr.bf16.mxu0 %v7268_v40  ;;  %v7323_v39 = vld [vmem:[%s9457_s1 + $0x5b8] sm:$0xff]   ;;  %v33_v40 = vld [vmem:[%s9458_s0 + $0x50] sm:$0xff] }
  0x8a   :  { %6630 = vmatprep.subr.bf16.mxu1 %v7269_v41  ;;  %v65_v41 = vld [vmem:[%s9458_s0 + $0x150] sm:$0xff] }
  0x8c   :  { %6609 = vmatpush3.bf16.msra.mxu0 %v7270_v42  ;;  %v34_v42 = vld [vmem:[%s9458_s0 + $0x58] sm:$0xff] }
  0x8d   :  { %6631 = vmatpush3.bf16.msra.mxu1 %v7271_v43  ;;  %6610 = vmatprep.subr.bf16.mxu0 %v7272_v44  ;;  %v66_v43 = vld [vmem:[%s9458_s0 + $0x158] sm:$0xff]  ;;  %v5871_v44 = vcombine.low %v33_v40, %v65_v41 }
  0x8e   :  { %6632 = vmatprep.subr.bf16.mxu1 %v7273_v45  ;;  %v5872_v45 = vcombine.high %v33_v40, %v65_v41  ;;  %v7371_v41 = vld [vmem:[%s9457_s1 + $0x798] sm:$0xff]  }
  0x90   :  { %6611 = vmatpush3.bf16.msra.mxu0 %v7274_v46  ;;  %v5873_v46 = vcombine.low %v34_v42, %v66_v43 }
  0x91   :  { %6633 = vmatpush3.bf16.msra.mxu1 %v7275_v47  ;;  %6612 = vmatprep.subr.bf16.mxu0 %v7276_v48  ;;  %v5874_v47 = vcombine.high %v34_v42, %v66_v43  ;;  %v7324_v48 = vld [vmem:[%s9457_s1 + $0x640] sm:$0xff]  }
  0x92   :  { %6634 = vmatprep.subr.bf16.mxu1 %v7277_v49  ;;  %v7325_v49 = vld [vmem:[%s9457_s1 + $0x6c0] sm:$0xff]  }
  0x93   :  { %v7372_v43 = vld [vmem:[%s9457_s1 + $0x760] sm:$0xff]  }
  0x94   :  { %6613 = vmatpush3.bf16.msra.mxu0 %v7278_v50  ;;  %v7326_v50 = vld [vmem:[%s9457_s1 + $0x600] sm:$0xff]  }
  0x95   :  { %6635 = vmatpush3.bf16.msra.mxu1 %v7279_v51  ;;  %6614 = vmatprep.subr.bf16.mxu0 %v7280_v52  ;;  %v7327_v51 = vld [vmem:[%s9457_s1 + $0x680] sm:$0xff]   ;;  %v7328_v52 = vld [vmem:[%s9457_s1 + $0x648] sm:$0xff]  }
  0x96   :  { %6636 = vmatprep.subr.bf16.mxu1 %v7281_v53  ;;  %v7329_v53 = vld [vmem:[%s9457_s1 + $0x6c8] sm:$0xff]  }
  0x98   :  { %6615 = vmatpush3.bf16.msra.mxu0 %v7282_v54  ;;  %v7330_v54 = vld [vmem:[%s9457_s1 + $0x608] sm:$0xff]  }
  0x99   :  { %6637 = vmatpush3.bf16.msra.mxu1 %v7283_v55  ;;  %6616 = vmatprep.subr.bf16.mxu0 %v7284_v56  ;;  %v7331_v55 = vld [vmem:[%s9457_s1 + $0x688] sm:$0xff]   ;;  %v7332_v56 = vld [vmem:[%s9457_s1 + $0x650] sm:$0xff]  }
  0x9a   :  { %6638 = vmatprep.subr.bf16.mxu1 %v7285_v57  ;;  %v7333_v57 = vld [vmem:[%s9457_s1 + $0x6d0] sm:$0xff]  }
  0x9c   :  { %6617 = vmatpush3.bf16.msra.mxu0 %v7286_v58  ;;  %v7334_v58 = vld [vmem:[%s9457_s1 + $0x610] sm:$0xff]  }
  0x9d   :  { %6639 = vmatpush3.bf16.msra.mxu1 %v7287_v59  ;;  %6618 = vmatprep.subr.bf16.mxu0 %v7288_v60  ;;  %v7335_v59 = vld [vmem:[%s9457_s1 + $0x690] sm:$0xff]   ;;  %v7336_v60 = vld [vmem:[%s9457_s1 + $0x658] sm:$0xff]  }
  0x9e   :  { %6640 = vmatprep.subr.bf16.mxu1 %v7289_v61  ;;  %v7337_v61 = vld [vmem:[%s9457_s1 + $0x6d8] sm:$0xff]  }
  0xa0   :  { %6619 = vmatpush3.bf16.msra.mxu0 %v7290_v62  ;;  %v7338_v62 = vld [vmem:[%s9457_s1 + $0x618] sm:$0xff]  }
  0xa1   :  { %6641 = vmatpush3.bf16.msra.mxu1 %v7291_v63  ;;  %6648 = vmatprep.subr.bf16.mxu0 %v7292_v8  ;;  %v7339_v63 = vld [vmem:[%s9457_s1 + $0x698] sm:$0xff]   ;;  %v7348_v8 = vld [vmem:[%s9457_s1 + $0x670] sm:$0xff]  }
  0xa2   :  { %6670 = vmatprep.subr.bf16.mxu1 %v7293_v9  ;;  %v7349_v9 = vld [vmem:[%s9457_s1 + $0x6f0] sm:$0xff]  }
  0xa3   :  { %4864 = vmatmul.mubr.bf16.vlgmr.msra.gmra.mrb[16].mxu0 %v5867_v2  ;;  %v7342_v2 = vld [vmem:[%s9457_s1 + $0x620] sm:$0xff]  }
  0xa4   :  { %4905 = vmatmul.mubr.bf16.vlgmr.msra.gmra.mrb[16].mxu1 %v5869_v6  ;;  %6649 = vmatpush3.bf16.msra.mxu0 %v7294_v10  ;;  %v7346_v6 = vld [vmem:[%s9457_s1 + $0x628] sm:$0xff]   ;;  %v7350_v10 = vld [vmem:[%s9457_s1 + $0x630] sm:$0xff]  }
  0xa5   :  { %6671 = vmatpush3.bf16.msra.mxu1 %v7295_v11  ;;  %6650 = vmatprep.subr.bf16.mxu0 %v7296_v12  ;;  %v7351_v11 = vld [vmem:[%s9457_s1 + $0x6b0] sm:$0xff]   ;;  %v7352_v12 = vld [vmem:[%s9457_s1 + $0x678] sm:$0xff]  }
  0xa6   :  { %6672 = vmatprep.subr.bf16.mxu1 %v7297_v13  ;;  %4945 = vmatprep.mubr.bf16.mxu0 %v5872_v45  ;;  %v7353_v13 = vld [vmem:[%s9457_s1 + $0x6f8] sm:$0xff]  }
  0xa7   :  { %4986 = vmatprep.mubr.bf16.mxu1 %v5874_v47 }
  0xa8   :  { %6651 = vmatpush3.bf16.msra.mxu0 %v7298_v14  ;;  %v7354_v14 = vld [vmem:[%s9457_s1 + $0x638] sm:$0xff]  }
  0xa9   :  { %6673 = vmatpush3.bf16.msra.mxu1 %v7299_v15  ;;  %6652 = vmatprep.subr.bf16.mxu0 %v7300_v16  ;;  %v7355_v15 = vld [vmem:[%s9457_s1 + $0x6b8] sm:$0xff]   ;;  %v35_v16 = vld [vmem:[%s9458_s0 + $0x60] sm:$0xff] }
  0xaa   :  { %6674 = vmatprep.subr.bf16.mxu1 %v7301_v17  ;;  %v67_v17 = vld [vmem:[%s9458_s0 + $0x160] sm:$0xff] }
  0xac   :  { %6653 = vmatpush3.bf16.msra.mxu0 %v7302_v18  ;;  %v36_v18 = vld [vmem:[%s9458_s0 + $0x68] sm:$0xff] }
  0xad   :  { %6675 = vmatpush3.bf16.msra.mxu1 %v7303_v19  ;;  %6654 = vmatprep.subr.bf16.mxu0 %v7304_v20  ;;  %v5875_v19 = vcombine.low %v35_v16, %v67_v17  ;;  %v5876_v20 = vcombine.high %v35_v16, %v67_v17  ;;  %v7390_v16 = vld [vmem:[%s9457_s1 + $0x800] sm:$0xff]  }
  0xae   :  { %6676 = vmatprep.subr.bf16.mxu1 %v7305_v21  ;;  %v68_v21 = vld [vmem:[%s9458_s0 + $0x168] sm:$0xff]  ;;  %v7391_v17 = vld [vmem:[%s9457_s1 + $0x880] sm:$0xff]  }
  0xb0   :  { %6655 = vmatpush3.bf16.msra.mxu0 %v7306_v22  ;;  %v5877_v22 = vcombine.low %v36_v18, %v68_v21 }
  0xb1   :  { %6677 = vmatpush3.bf16.msra.mxu1 %v7307_v23  ;;  %6656 = vmatprep.subr.bf16.mxu0 %v7308_v24  ;;  %v5878_v23 = vcombine.high %v36_v18, %v68_v21  ;;  %v7356_v24 = vld [vmem:[%s9457_s1 + $0x740] sm:$0xff]   ;;  %v7392_v18 = vld [vmem:[%s9457_s1 + $0x848] sm:$0xff]  }
  0xb2   :  { %6678 = vmatprep.subr.bf16.mxu1 %v7309_v25  ;;  %v7357_v25 = vld [vmem:[%s9457_s1 + $0x7c0] sm:$0xff]   ;;  %v7395_v21 = vld [vmem:[%s9457_s1 + $0x888] sm:$0xff]  }
  0xb4   :  { %6657 = vmatpush3.bf16.msra.mxu0 %v7310_v26  ;;  %v7358_v26 = vld [vmem:[%s9457_s1 + $0x700] sm:$0xff]  }
  0xb5   :  { %6679 = vmatpush3.bf16.msra.mxu1 %v7311_v27  ;;  %6658 = vmatprep.subr.bf16.mxu0 %v7312_v28  ;;  %v7359_v27 = vld [vmem:[%s9457_s1 + $0x780] sm:$0xff]   ;;  %v7360_v28 = vld [vmem:[%s9457_s1 + $0x748] sm:$0xff]  }
  0xb6   :  { %6680 = vmatprep.subr.bf16.mxu1 %v7313_v29  ;;  %v7361_v29 = vld [vmem:[%s9457_s1 + $0x7c8] sm:$0xff]  }
  0xb8   :  { %6659 = vmatpush3.bf16.msra.mxu0 %v7314_v30  ;;  %v7362_v30 = vld [vmem:[%s9457_s1 + $0x708] sm:$0xff]  }
  0xb9   :  { %6681 = vmatpush3.bf16.msra.mxu1 %v7315_v31  ;;  %6660 = vmatprep.subr.bf16.mxu0 %v7316_v32  ;;  %v7363_v31 = vld [vmem:[%s9457_s1 + $0x788] sm:$0xff]   ;;  %v7364_v32 = vld [vmem:[%s9457_s1 + $0x750] sm:$0xff]  }
  0xba   :  { %6682 = vmatprep.subr.bf16.mxu1 %v7317_v33  ;;  %v7365_v33 = vld [vmem:[%s9457_s1 + $0x7d0] sm:$0xff]  }
  0xbc   :  { %6661 = vmatpush3.bf16.msra.mxu0 %v7318_v34  ;;  %v7366_v34 = vld [vmem:[%s9457_s1 + $0x710] sm:$0xff]  }
  0xbd   :  { %6683 = vmatpush3.bf16.msra.mxu1 %v7319_v35  ;;  %6662 = vmatprep.subr.bf16.mxu0 %v7320_v36  ;;  %v7367_v35 = vld [vmem:[%s9457_s1 + $0x790] sm:$0xff]   ;;  %v7368_v36 = vld [vmem:[%s9457_s1 + $0x758] sm:$0xff]  }
  0xbe   :  { %6684 = vmatprep.subr.bf16.mxu1 %v7321_v37  ;;  %v7369_v37 = vld [vmem:[%s9457_s1 + $0x7d8] sm:$0xff]  }
  0xc0   :  { %6663 = vmatpush3.bf16.msra.mxu0 %v7322_v38 }
  0xc1   :  { %6685 = vmatpush3.bf16.msra.mxu1 %v7323_v39  ;;  %6692 = vmatprep.subr.bf16.mxu0 %v7324_v48  ;;  %v7370_v39 = vld [vmem:[%s9457_s1 + $0x718] sm:$0xff]  }
  0xc2   :  { %6714 = vmatprep.subr.bf16.mxu1 %v7325_v49  ;;  %v7374_v49 = vld [vmem:[%s9457_s1 + $0x720] sm:$0xff]  }
  0xc3   :  { %4946 = vmatmul.mubr.bf16.vlgmr.msra.gmra.mrb[20].mxu0 %v5871_v44 }
  0xc4   :  { %4987 = vmatmul.mubr.bf16.vlgmr.msra.gmra.mrb[20].mxu1 %v5873_v46  ;;  %6693 = vmatpush3.bf16.msra.mxu0 %v7326_v50  ;;  %v7373_v46 = vld [vmem:[%s9457_s1 + $0x7e0] sm:$0xff]  }
  0xc5   :  { %6715 = vmatpush3.bf16.msra.mxu1 %v7327_v51  ;;  %6694 = vmatprep.subr.bf16.mxu0 %v7328_v52  ;;  %v7375_v51 = vld [vmem:[%s9457_s1 + $0x7a0] sm:$0xff]  }
  0xc6   :  { %6716 = vmatprep.subr.bf16.mxu1 %v7329_v53  ;;  %5027 = vmatprep.mubr.bf16.mxu0 %v5876_v20  ;;  %v7394_v20 = vld [vmem:[%s9457_s1 + $0x808] sm:$0xff]  }
  0xc7   :  { %5068 = vmatprep.mubr.bf16.mxu1 %v5878_v23  ;;  %v7397_v23 = vld [vmem:[%s9457_s1 + $0x8d0] sm:$0xff]  }
  0xc8   :  { %6695 = vmatpush3.bf16.msra.mxu0 %v7330_v54  ;;  %v7376_v54 = vld [vmem:[%s9457_s1 + $0x768] sm:$0xff]  }
  0xc9   :  { %6717 = vmatpush3.bf16.msra.mxu1 %v7331_v55  ;;  %6696 = vmatprep.subr.bf16.mxu0 %v7332_v56 }
  0xca   :  { %6718 = vmatprep.subr.bf16.mxu1 %v7333_v57  ;;  %v7377_v57 = vld [vmem:[%s9457_s1 + $0x7e8] sm:$0xff]  }
  0xcc   :  { %6697 = vmatpush3.bf16.msra.mxu0 %v7334_v58 }
  0xcd   :  { %6719 = vmatpush3.bf16.msra.mxu1 %v7335_v59  ;;  %6698 = vmatprep.subr.bf16.mxu0 %v7336_v60  ;;  %v7378_v59 = vld [vmem:[%s9457_s1 + $0x728] sm:$0xff]  }
  0xce   :  { %6720 = vmatprep.subr.bf16.mxu1 %v7337_v61  ;;  %v7379_v60 = vld [vmem:[%s9457_s1 + $0x7a8] sm:$0xff]  }
  0xd0   :  { %6699 = vmatpush3.bf16.msra.mxu0 %v7338_v62  ;;  %v7380_v62 = vld [vmem:[%s9457_s1 + $0x770] sm:$0xff]  }
  0xd1   :  { %6721 = vmatpush3.bf16.msra.mxu1 %v7339_v63  ;;  %6700 = vmatprep.subr.bf16.mxu0 %v7340_v0  ;;  %v7381_v63 = vld [vmem:[%s9457_s1 + $0x7f0] sm:$0xff]  }
  0xd2   :  { %6722 = vmatprep.subr.bf16.mxu1 %v7341_v1  ;;  %v7382_v0 = vld [vmem:[%s9457_s1 + $0x730] sm:$0xff]  }
  0xd3   :  { %v7383_v1 = vld [vmem:[%s9457_s1 + $0x7b0] sm:$0xff]  }
  0xd4   :  { %6701 = vmatpush3.bf16.msra.mxu0 %v7342_v2  ;;  %v7384_v2 = vld [vmem:[%s9457_s1 + $0x778] sm:$0xff]  }
  0xd5   :  { %6723 = vmatpush3.bf16.msra.mxu1 %v7343_v3  ;;  %6702 = vmatprep.subr.bf16.mxu0 %v7344_v4  ;;  %v7385_v3 = vld [vmem:[%s9457_s1 + $0x7f8] sm:$0xff]  }
  0xd6   :  { %6724 = vmatprep.subr.bf16.mxu1 %v7345_v5  ;;  %v7386_v4 = vld [vmem:[%s9457_s1 + $0x738] sm:$0xff]  }
  0xd7   :  { %v7387_v5 = vld [vmem:[%s9457_s1 + $0x7b8] sm:$0xff]  }
  0xd8   :  { %6703 = vmatpush3.bf16.msra.mxu0 %v7346_v6  ;;  %v37_v6 = vld [vmem:[%s9458_s0 + $0x70] sm:$0xff] }
  0xd9   :  { %6725 = vmatpush3.bf16.msra.mxu1 %v7347_v7  ;;  %6704 = vmatprep.subr.bf16.mxu0 %v7348_v8  ;;  %v69_v7 = vld [vmem:[%s9458_s0 + $0x170] sm:$0xff] }
  0xda   :  { %6726 = vmatprep.subr.bf16.mxu1 %v7349_v9  ;;  %v5879_v8 = vcombine.low %v37_v6, %v69_v7  ;;  %v5880_v9 = vcombine.high %v37_v6, %v69_v7  ;;  %v7420_v6 = vld [vmem:[%s9457_s1 + $0x940] sm:$0xff]  }
  0xdb   :  { %v7421_v7 = vld [vmem:[%s9457_s1 + $0x9c0] sm:$0xff]  }
  0xdc   :  { %6705 = vmatpush3.bf16.msra.mxu0 %v7350_v10  ;;  %v38_v10 = vld [vmem:[%s9458_s0 + $0x78] sm:$0xff] }
  0xdd   :  { %6727 = vmatpush3.bf16.msra.mxu1 %v7351_v11  ;;  %6706 = vmatprep.subr.bf16.mxu0 %v7352_v12  ;;  %v70_v11 = vld [vmem:[%s9458_s0 + $0x178] sm:$0xff] }
  0xde   :  { %6728 = vmatprep.subr.bf16.mxu1 %v7353_v13  ;;  %v5881_v12 = vcombine.low %v38_v10, %v70_v11  ;;  %v5882_v13 = vcombine.high %v38_v10, %v70_v11  ;;  %v7424_v10 = vld [vmem:[%s9457_s1 + $0x948] sm:$0xff]  }
  0xdf   :  { %v7425_v11 = vld [vmem:[%s9457_s1 + $0x9c8] sm:$0xff]  }
  0xe0   :  { %6707 = vmatpush3.bf16.msra.mxu0 %v7354_v14  ;;  %v7388_v14 = vld [vmem:[%s9457_s1 + $0x840] sm:$0xff]  }
  0xe1   :  { %6729 = vmatpush3.bf16.msra.mxu1 %v7355_v15  ;;  %6736 = vmatprep.subr.bf16.mxu0 %v7356_v24  ;;  %v7389_v15 = vld [vmem:[%s9457_s1 + $0x8c0] sm:$0xff]   ;;  %v7398_v24 = vld [vmem:[%s9457_s1 + $0x810] sm:$0xff]  }
  0xe2   :  { %6758 = vmatprep.subr.bf16.mxu1 %v7357_v25  ;;  %v7399_v25 = vld [vmem:[%s9457_s1 + $0x890] sm:$0xff]  }
  0xe3   :  { %5028 = vmatmul.mubr.bf16.vlgmr.msra.gmra.mrb[24].mxu0 %v5875_v19  ;;  %v7393_v19 = vld [vmem:[%s9457_s1 + $0x8c8] sm:$0xff]  }
  0xe4   :  { %5069 = vmatmul.mubr.bf16.vlgmr.msra.gmra.mrb[24].mxu1 %v5877_v22  ;;  %6737 = vmatpush3.bf16.msra.mxu0 %v7358_v26  ;;  %v7396_v22 = vld [vmem:[%s9457_s1 + $0x850] sm:$0xff]   ;;  %v7400_v26 = vld [vmem:[%s9457_s1 + $0x858] sm:$0xff]  }
  0xe5   :  { %6759 = vmatpush3.bf16.msra.mxu1 %v7359_v27  ;;  %6738 = vmatprep.subr.bf16.mxu0 %v7360_v28  ;;  %v7401_v27 = vld [vmem:[%s9457_s1 + $0x8d8] sm:$0xff]  }
  0xe6   :  { %6760 = vmatprep.subr.bf16.mxu1 %v7361_v29  ;;  %5109 = vmatprep.mubr.bf16.mxu0 %v5880_v9  ;;  %v7402_v29 = vld [vmem:[%s9457_s1 + $0x818] sm:$0xff]   ;;  %v7423_v9 = vld [vmem:[%s9457_s1 + $0x980] sm:$0xff]  }
  0xe7   :  { %5150 = vmatprep.mubr.bf16.mxu1 %v5882_v13  ;;  %v7427_v13 = vld [vmem:[%s9457_s1 + $0x988] sm:$0xff]  }
  0xe8   :  { %6739 = vmatpush3.bf16.msra.mxu0 %v7362_v30 }
  0xe9   :  { %6761 = vmatpush3.bf16.msra.mxu1 %v7363_v31  ;;  %6740 = vmatprep.subr.bf16.mxu0 %v7364_v32  ;;  %v7403_v31 = vld [vmem:[%s9457_s1 + $0x898] sm:$0xff]  }
  0xea   :  { %6762 = vmatprep.subr.bf16.mxu1 %v7365_v33  ;;  %v7404_v33 = vld [vmem:[%s9457_s1 + $0x860] sm:$0xff]  }
  0xec   :  { %6741 = vmatpush3.bf16.msra.mxu0 %v7366_v34 }
  0xed   :  { %6763 = vmatpush3.bf16.msra.mxu1 %v7367_v35  ;;  %6742 = vmatprep.subr.bf16.mxu0 %v7368_v36  ;;  %v7405_v36 = vld [vmem:[%s9457_s1 + $0x8e0] sm:$0xff]  }
  0xee   :  { %6764 = vmatprep.subr.bf16.mxu1 %v7369_v37 }
  0xf0   :  { %6743 = vmatpush3.bf16.msra.mxu0 %v7370_v39  ;;  %v7406_v39 = vld [vmem:[%s9457_s1 + $0x820] sm:$0xff]  }
  0xf1   :  { %6765 = vmatpush3.bf16.msra.mxu1 %v7371_v41  ;;  %6744 = vmatprep.subr.bf16.mxu0 %v7372_v43 }
  0xf2   :  { %6766 = vmatprep.subr.bf16.mxu1 %v7373_v46 }
  0xf4   :  { %6745 = vmatpush3.bf16.msra.mxu0 %v7374_v49 }
  0xf5   :  { %6767 = vmatpush3.bf16.msra.mxu1 %v7375_v51  ;;  %6746 = vmatprep.subr.bf16.mxu0 %v7376_v54  ;;  %v7412_v54 = vld [vmem:[%s9457_s1 + $0x870] sm:$0xff]  }
  0xf6   :  { %v6444_v38 = vpop.f32.mrb[0].mxu0  ;;  %6768 = vmatprep.subr.bf16.mxu1 %v7377_v57  ;;  %v7415_v57 = vld [vmem:[%s9457_s1 + $0x8b0] sm:$0xff]  }
  0xf7   :  { %v6466_v40 = vpop.f32.mrb[0].mxu1  ;;  %v6445_v42 = vpop.f32.mrb[1].mxu0 }
  0xf8   :  { %v6446_v44 = vadd.f32 %v6445_v42, %v6444_v38  ;;  %v6467_v45 = vpop.f32.mrb[1].mxu1  ;;  %v6447_v48 = vpop.f32.mrb[2].mxu0  ;;  %6747 = vmatpush3.bf16.msra.mxu0 %v7378_v59  ;;  %v7407_v42 = vld [vmem:[%s9457_s1 + $0x8a0] sm:$0xff]   ;;  %v7417_v59 = vld [vmem:[%s9457_s1 + $0x8f8] sm:$0xff]  }
  0xf9   :  { %v6468_v47 = vadd.f32 %v6467_v45, %v6466_v40  ;;  %v6469_v50 = vpop.f32.mrb[2].mxu1  ;;  %v6448_v53 = vpop.f32.mrb[3].mxu0  ;;  %6769 = vmatpush3.bf16.msra.mxu1 %v7379_v60  ;;  %6748 = vmatprep.subr.bf16.mxu0 %v7380_v62  ;;  %v7408_v45 = vld [vmem:[%s9457_s1 + $0x868] sm:$0xff]   ;;  %v7418_v60 = vld [vmem:[%s9457_s1 + $0x838] sm:$0xff]   ;;  %v39_v62 = vld [vmem:[%s9458_s0 + $0x80] sm:$0xff] }
  0xfa   :  { %v6449_v55 = vadd.f32 %v6448_v53, %v6447_v48  ;;  %v6470_v56 = vpop.f32.mrb[3].mxu1  ;;  %6770 = vmatprep.subr.bf16.mxu1 %v7381_v63  ;;  %v7409_v48 = vld [vmem:[%s9457_s1 + $0x8e8] sm:$0xff]   ;;  %v71_v63 = vld [vmem:[%s9458_s0 + $0x180] sm:$0xff] }
  0xfb   :  { %v8488_v52 = vadd.f32 %v6468_v47, %v6446_v44  ;;  %v6471_v58 = vadd.f32 %v6470_v56, %v6469_v50  ;;  %v7410_v50 = vld [vmem:[%s9457_s1 + $0x828] sm:$0xff]   ;;  %v7414_v56 = vld [vmem:[%s9457_s1 + $0x830] sm:$0xff]  }
  0xfc   :  { %6749 = vmatpush3.bf16.msra.mxu0 %v7382_v0  ;;  %v40_v0 = vld [vmem:[%s9458_s0 + $0x88] sm:$0xff] }
  0xfd   :  { %v8502_v61 = vadd.f32 %v6471_v58, %v6449_v55  ;;  %6771 = vmatpush3.bf16.msra.mxu1 %v7383_v1  ;;  %6750 = vmatprep.subr.bf16.mxu0 %v7384_v2  ;;  %v7413_v55 = vld [vmem:[%s9457_s1 + $0x8f0] sm:$0xff]   ;;  %v7416_v58 = vld [vmem:[%s9457_s1 + $0x878] sm:$0xff]   ;;  %v72_v1 = vld [vmem:[%s9458_s0 + $0x188] sm:$0xff]  ;;  %v5883_v2 = vcombine.low %v39_v62, %v71_v63 }
  0xfe   :  { %6772 = vmatprep.subr.bf16.mxu1 %v7385_v3  ;;  %v5884_v3 = vcombine.high %v39_v62, %v71_v63  ;;  %v7452_v62 = vld [vmem:[%s9457_s1 + $0xa40] sm:$0xff]  }
  0xff   :  { %v7453_v63 = vld [vmem:[%s9457_s1 + $0xac0] sm:$0xff]  }
 0x100   :  { %6751 = vmatpush3.bf16.msra.mxu0 %v7386_v4  ;;  %v5885_v4 = vcombine.low %v40_v0, %v72_v1 }
 0x101   :  { %6773 = vmatpush3.bf16.msra.mxu1 %v7387_v5  ;;  %6780 = vmatprep.subr.bf16.mxu0 %v7388_v14  ;;  %v5886_v5 = vcombine.high %v40_v0, %v72_v1  ;;  %v7428_v14 = vld [vmem:[%s9457_s1 + $0x950] sm:$0xff]   ;;  %v7454_v0 = vld [vmem:[%s9457_s1 + $0xa00] sm:$0xff]  }
 0x102   :  { %6802 = vmatprep.subr.bf16.mxu1 %v7389_v15  ;;  %v7429_v15 = vld [vmem:[%s9457_s1 + $0x9d0] sm:$0xff]   ;;  %v7455_v1 = vld [vmem:[%s9457_s1 + $0xa80] sm:$0xff]  }
 0x103   :  { %5110 = vmatmul.mubr.bf16.vlgmr.msra.gmra.mrb[28].mxu0 %v5879_v8  ;;  %v7422_v8 = vld [vmem:[%s9457_s1 + $0x900] sm:$0xff]  }
 0x104   :  { %5151 = vmatmul.mubr.bf16.vlgmr.msra.gmra.mrb[28].mxu1 %v5881_v12  ;;  %6781 = vmatpush3.bf16.msra.mxu0 %v7390_v16  ;;  %v7426_v12 = vld [vmem:[%s9457_s1 + $0x908] sm:$0xff]   ;;  %v7430_v16 = vld [vmem:[%s9457_s1 + $0x910] sm:$0xff]  }
 0x105   :  { %6803 = vmatpush3.bf16.msra.mxu1 %v7391_v17  ;;  %6782 = vmatprep.subr.bf16.mxu0 %v7392_v18  ;;  %v7431_v17 = vld [vmem:[%s9457_s1 + $0x990] sm:$0xff]   ;;  %v7432_v18 = vld [vmem:[%s9457_s1 + $0x958] sm:$0xff]  }
 0x106   :  { %6804 = vmatprep.subr.bf16.mxu1 %v7393_v19  ;;  %5191 = vmatprep.mubr.bf16.mxu0 %v5884_v3  ;;  %v7433_v19 = vld [vmem:[%s9457_s1 + $0x9d8] sm:$0xff]   ;;  %v7457_v3 = vld [vmem:[%s9457_s1 + $0xac8] sm:$0xff]  }
 0x107   :  { %5232 = vmatprep.mubr.bf16.mxu1 %v5886_v5  ;;  %v7459_v5 = vld [vmem:[%s9457_s1 + $0xa88] sm:$0xff]  }
 0x108   :  { %6783 = vmatpush3.bf16.msra.mxu0 %v7394_v20  ;;  %v7434_v20 = vld [vmem:[%s9457_s1 + $0x918] sm:$0xff]  }
 0x109   :  { %6805 = vmatpush3.bf16.msra.mxu1 %v7395_v21  ;;  %6784 = vmatprep.subr.bf16.mxu0 %v7396_v22  ;;  %v7435_v22 = vld [vmem:[%s9457_s1 + $0x998] sm:$0xff]  }
 0x10a   :  { %6806 = vmatprep.subr.bf16.mxu1 %v7397_v23 }
 0x10c   :  { %6785 = vmatpush3.bf16.msra.mxu0 %v7398_v24  ;;  %v7436_v24 = vld [vmem:[%s9457_s1 + $0x960] sm:$0xff]  }
 0x10d   :  { %6807 = vmatpush3.bf16.msra.mxu1 %v7399_v25  ;;  %6786 = vmatprep.subr.bf16.mxu0 %v7400_v26  ;;  %v7437_v26 = vld [vmem:[%s9457_s1 + $0x9e0] sm:$0xff]  }
 0x10e   :  { %6808 = vmatprep.subr.bf16.mxu1 %v7401_v27 }
 0x110   :  { %6787 = vmatpush3.bf16.msra.mxu0 %v7402_v29  ;;  %v7438_v29 = vld [vmem:[%s9457_s1 + $0x920] sm:$0xff]  }
 0x111   :  { %6809 = vmatpush3.bf16.msra.mxu1 %v7403_v31  ;;  %6788 = vmatprep.subr.bf16.mxu0 %v7404_v33 }
 0x112   :  { %6810 = vmatprep.subr.bf16.mxu1 %v7405_v36 }
 0x114   :  { %6789 = vmatpush3.bf16.msra.mxu0 %v7406_v39 }
 0x115   :  { %6811 = vmatpush3.bf16.msra.mxu1 %v7407_v42  ;;  %6790 = vmatprep.subr.bf16.mxu0 %v7408_v45  ;;  %v7444_v45 = vld [vmem:[%s9457_s1 + $0x970] sm:$0xff]  }
 0x116   :  { %v6488_v28 = vpop.f32.mrb[4].mxu0  ;;  %6812 = vmatprep.subr.bf16.mxu1 %v7409_v48  ;;  %v7446_v48 = vld [vmem:[%s9457_s1 + $0x930] sm:$0xff]  }
 0x117   :  { %v6510_v30 = vpop.f32.mrb[4].mxu1  ;;  %v6489_v32 = vpop.f32.mrb[5].mxu0 }
 0x118   :  { %v6490_v34 = vadd.f32 %v6489_v32, %v6488_v28  ;;  %v6511_v35 = vpop.f32.mrb[5].mxu1  ;;  %v6491_v38 = vpop.f32.mrb[6].mxu0  ;;  %6791 = vmatpush3.bf16.msra.mxu0 %v7410_v50  ;;  %v7439_v32 = vld [vmem:[%s9457_s1 + $0x9a0] sm:$0xff]   ;;  %v7448_v50 = vld [vmem:[%s9457_s1 + $0x978] sm:$0xff]  }
 0x119   :  { %v6512_v37 = vadd.f32 %v6511_v35, %v6510_v30  ;;  %v6513_v41 = vpop.f32.mrb[6].mxu1  ;;  %v6492_v43 = vpop.f32.mrb[7].mxu0  ;;  %6792 = vmatprep.subr.bf16.mxu0 %v7412_v54  ;;  %v7440_v35 = vld [vmem:[%s9457_s1 + $0x968] sm:$0xff]   ;;  %v41_v54 = vld [vmem:[%s9458_s0 + $0x90] sm:$0xff] }
 0x11a   :  { %v4620_v40 = vadd.f32 %v6490_v34, %v8488_v52  ;;  %v6493_v46 = vadd.f32 %v6492_v43, %v6491_v38  ;;  %v6514_v47 = vpop.f32.mrb[7].mxu1  ;;  %v7411_v52 = vld [vmem:[%s9457_s1 + $0x8a8] sm:$0xff]  }
 0x11b   :  { %v6515_v49 = vadd.f32 %v6514_v47, %v6513_v41  ;;  %6813 = vmatpush3.bf16.msra.mxu1 %v7411_v52  ;;  %v7441_v38 = vld [vmem:[%s9457_s1 + $0x9e8] sm:$0xff]   ;;  %v7445_v47 = vld [vmem:[%s9457_s1 + $0x9f0] sm:$0xff]   ;;  %v7450_v52 = vld [vmem:[%s9457_s1 + $0x938] sm:$0xff]  }
 0x11c   :  { %v8601_v44 = vadd.f32 %v6512_v37, %v4620_v40  ;;  %v4623_v51 = vadd.f32 %v6493_v46, %v8502_v61  ;;  %6814 = vmatprep.subr.bf16.mxu1 %v7413_v55  ;;  %6793 = vmatpush3.bf16.msra.mxu0 %v7414_v56  ;;  %v7419_v61 = vld [vmem:[%s9457_s1 + $0x8b8] sm:$0xff]   ;;  %v7442_v41 = vld [vmem:[%s9457_s1 + $0x928] sm:$0xff]   ;;  %v73_v55 = vld [vmem:[%s9458_s0 + $0x190] sm:$0xff] }
 0x11d   :  { %6794 = vmatprep.subr.bf16.mxu0 %v7416_v58  ;;  %v7443_v43 = vld [vmem:[%s9457_s1 + $0x9a8] sm:$0xff]   ;;  %v42_v56 = vld [vmem:[%s9458_s0 + $0x98] sm:$0xff]  ;;  %v5888_v58 = vcombine.high %v41_v54, %v73_v55 }
 0x11e   :  { %v8616_v53 = vadd.f32 %v6515_v49, %v4623_v51  ;;  %v7447_v49 = vld [vmem:[%s9457_s1 + $0x9b0] sm:$0xff]   ;;  %v7449_v51 = vld [vmem:[%s9457_s1 + $0x9f8] sm:$0xff]  }
 0x11f   :  { %6815 = vmatpush3.bf16.msra.mxu1 %v7415_v57  ;;  %v5887_v57 = vcombine.low %v41_v54, %v73_v55  ;;  %v7484_v54 = vld [vmem:[%s9457_s1 + $0xb40] sm:$0xff]  }
 0x120   :  { %6816 = vmatprep.subr.bf16.mxu1 %v7417_v59  ;;  %6795 = vmatpush3.bf16.msra.mxu0 %v7418_v60  ;;  %v74_v59 = vld [vmem:[%s9458_s0 + $0x198] sm:$0xff]  ;;  %v7485_v55 = vld [vmem:[%s9457_s1 + $0xbc0] sm:$0xff]  }
 0x121   :  { %6824 = vmatprep.subr.bf16.mxu0 %v7420_v6  ;;  %v5889_v60 = vcombine.low %v42_v56, %v74_v59  ;;  %v7460_v6 = vld [vmem:[%s9457_s1 + $0xa50] sm:$0xff]  }
 0x123   :  { %6817 = vmatpush3.bf16.msra.mxu1 %v7419_v61  ;;  %5192 = vmatmul.mubr.bf16.vlgmr.msra.gmra.mrb[32].mxu0 %v5883_v2  ;;  %v5890_v61 = vcombine.high %v42_v56, %v74_v59  ;;  %v7456_v2 = vld [vmem:[%s9457_s1 + $0xa48] sm:$0xff]   ;;  %v7486_v56 = vld [vmem:[%s9457_s1 + $0xb00] sm:$0xff]  }
 0x124   :  { %6846 = vmatprep.subr.bf16.mxu1 %v7421_v7  ;;  %6825 = vmatpush3.bf16.msra.mxu0 %v7422_v8  ;;  %v7461_v7 = vld [vmem:[%s9457_s1 + $0xad0] sm:$0xff]   ;;  %v7489_v59 = vld [vmem:[%s9457_s1 + $0xbc8] sm:$0xff]  }
 0x125   :  { %6826 = vmatprep.subr.bf16.mxu0 %v7424_v10  ;;  %5273 = vmatprep.mubr.bf16.mxu0 %v5888_v58  ;;  %v7462_v8 = vld [vmem:[%s9457_s1 + $0xa10] sm:$0xff]   ;;  %v7464_v10 = vld [vmem:[%s9457_s1 + $0xa58] sm:$0xff]   ;;  %v7488_v58 = vld [vmem:[%s9457_s1 + $0xb48] sm:$0xff]  }
 0x126   :  { %5233 = vmatmul.mubr.bf16.vlgmr.msra.gmra.mrb[32].mxu1 %v5885_v4  ;;  %v7458_v4 = vld [vmem:[%s9457_s1 + $0xa08] sm:$0xff]  }
 0x127   :  { %6847 = vmatpush3.bf16.msra.mxu1 %v7423_v9  ;;  %5314 = vmatprep.mubr.bf16.mxu1 %v5890_v61  ;;  %v7463_v9 = vld [vmem:[%s9457_s1 + $0xa90] sm:$0xff]   ;;  %v7491_v61 = vld [vmem:[%s9457_s1 + $0xb88] sm:$0xff]  }
 0x128   :  { %6848 = vmatprep.subr.bf16.mxu1 %v7425_v11  ;;  %6827 = vmatpush3.bf16.msra.mxu0 %v7426_v12  ;;  %v7465_v11 = vld [vmem:[%s9457_s1 + $0xad8] sm:$0xff]  }
 0x129   :  { %6828 = vmatprep.subr.bf16.mxu0 %v7428_v14 }
 0x12b   :  { %6849 = vmatpush3.bf16.msra.mxu1 %v7427_v13  ;;  %v7466_v13 = vld [vmem:[%s9457_s1 + $0xa18] sm:$0xff]  }
 0x12c   :  { %6850 = vmatprep.subr.bf16.mxu1 %v7429_v15  ;;  %6829 = vmatpush3.bf16.msra.mxu0 %v7430_v16  ;;  %v7467_v15 = vld [vmem:[%s9457_s1 + $0xa98] sm:$0xff]  }
 0x12d   :  { %6830 = vmatprep.subr.bf16.mxu0 %v7432_v18 }
 0x12f   :  { %6851 = vmatpush3.bf16.msra.mxu1 %v7431_v17  ;;  %v7468_v17 = vld [vmem:[%s9457_s1 + $0xa60] sm:$0xff]  }
 0x130   :  { %6852 = vmatprep.subr.bf16.mxu1 %v7433_v19  ;;  %6831 = vmatpush3.bf16.msra.mxu0 %v7434_v20  ;;  %v7469_v20 = vld [vmem:[%s9457_s1 + $0xae0] sm:$0xff]  }
 0x131   :  { %6832 = vmatprep.subr.bf16.mxu0 %v7436_v24 }
 0x133   :  { %6853 = vmatpush3.bf16.msra.mxu1 %v7435_v22 }
 0x134   :  { %6854 = vmatprep.subr.bf16.mxu1 %v7437_v26  ;;  %6833 = vmatpush3.bf16.msra.mxu0 %v7438_v29  ;;  %v7471_v26 = vld [vmem:[%s9457_s1 + $0xaa0] sm:$0xff]   ;;  %v7472_v29 = vld [vmem:[%s9457_s1 + $0xa68] sm:$0xff]  }
 0x135   :  { %6834 = vmatprep.subr.bf16.mxu0 %v7440_v35 }
 0x136   :  { %v6532_v21 = vpop.f32.mrb[8].mxu0 }
 0x137   :  { %v6554_v23 = vpop.f32.mrb[8].mxu1  ;;  %v6533_v25 = vpop.f32.mrb[9].mxu0  ;;  %6855 = vmatpush3.bf16.msra.mxu1 %v7439_v32  ;;  %v7473_v32 = vld [vmem:[%s9457_s1 + $0xae8] sm:$0xff]  }
 0x138   :  { %v6534_v27 = vadd.f32 %v6533_v25, %v6532_v21  ;;  %v6555_v28 = vpop.f32.mrb[9].mxu1  ;;  %v6535_v31 = vpop.f32.mrb[10].mxu0  ;;  %6856 = vmatprep.subr.bf16.mxu1 %v7441_v38  ;;  %6835 = vmatpush3.bf16.msra.mxu0 %v7442_v41  ;;  %v7476_v38 = vld [vmem:[%s9457_s1 + $0xa70] sm:$0xff]  }
 0x139   :  { %v6556_v30 = vadd.f32 %v6555_v28, %v6554_v23  ;;  %v6557_v34 = vpop.f32.mrb[10].mxu1  ;;  %v6536_v36 = vpop.f32.mrb[11].mxu0  ;;  %6836 = vmatprep.subr.bf16.mxu0 %v7444_v45  ;;  %v7470_v23 = vld [vmem:[%s9457_s1 + $0xa20] sm:$0xff]   ;;  %v7479_v41 = vld [vmem:[%s9457_s1 + $0xab0] sm:$0xff]   ;;  %v7483_v45 = vld [vmem:[%s9457_s1 + $0xab8] sm:$0xff]  }
 0x13a   :  { %v4702_v33 = vadd.f32 %v6534_v27, %v8601_v44  ;;  %v6537_v39 = vadd.f32 %v6536_v36, %v6535_v31  ;;  %v6558_v40 = vpop.f32.mrb[11].mxu1  ;;  %v7475_v36 = vld [vmem:[%s9457_s1 + $0xaa8] sm:$0xff]  }
 0x13b   :  { %v6559_v42 = vadd.f32 %v6558_v40, %v6557_v34  ;;  %6857 = vmatpush3.bf16.msra.mxu1 %v7443_v43  ;;  %v7474_v34 = vld [vmem:[%s9457_s1 + $0xa28] sm:$0xff]   ;;  %v7478_v40 = vld [vmem:[%s9457_s1 + $0xa30] sm:$0xff]   ;;  %v7481_v43 = vld [vmem:[%s9457_s1 + $0xaf8] sm:$0xff]  }
 0x13c   :  { %v8718_v37 = vadd.f32 %v6556_v30, %v4702_v33  ;;  %v4705_v44 = vadd.f32 %v6537_v39, %v8616_v53  ;;  %6858 = vmatprep.subr.bf16.mxu1 %v7445_v47  ;;  %6837 = vmatpush3.bf16.msra.mxu0 %v7446_v48  ;;  %v7451_v53 = vld [vmem:[%s9457_s1 + $0x9b8] sm:$0xff]   ;;  %v7477_v39 = vld [vmem:[%s9457_s1 + $0xaf0] sm:$0xff]   ;;  %v75_v47 = vld [vmem:[%s9458_s0 + $0x1a0] sm:$0xff] }
 0x13d   :  { %6838 = vmatprep.subr.bf16.mxu0 %v7448_v50  ;;  %v44_v50 = vld [vmem:[%s9458_s0 + $0xa8] sm:$0xff] }
 0x13e   :  { %v8733_v46 = vadd.f32 %v6559_v42, %v4705_v44  ;;  %v7480_v42 = vld [vmem:[%s9457_s1 + $0xa78] sm:$0xff]  }
 0x13f   :  { %6859 = vmatpush3.bf16.msra.mxu1 %v7447_v49  ;;  %v7482_v44 = vld [vmem:[%s9457_s1 + $0xa38] sm:$0xff]  }
 0x140   :  { %6860 = vmatprep.subr.bf16.mxu1 %v7449_v51  ;;  %6839 = vmatpush3.bf16.msra.mxu0 %v7450_v52  ;;  %v76_v51 = vld [vmem:[%s9458_s0 + $0x1a8] sm:$0xff] }
 0x141   :  { %6868 = vmatprep.subr.bf16.mxu0 %v7452_v62  ;;  %v5893_v52 = vcombine.low %v44_v50, %v76_v51  ;;  %v7492_v62 = vld [vmem:[%s9457_s1 + $0xb50] sm:$0xff]  }
 0x143   :  { %6861 = vmatpush3.bf16.msra.mxu1 %v7451_v53  ;;  %5274 = vmatmul.mubr.bf16.vlgmr.msra.gmra.mrb[36].mxu0 %v5887_v57  ;;  %v5894_v53 = vcombine.high %v44_v50, %v76_v51  ;;  %v7487_v57 = vld [vmem:[%s9457_s1 + $0xb80] sm:$0xff]   ;;  %v7520_v50 = vld [vmem:[%s9457_s1 + $0xc48] sm:$0xff]  }
 0x144   :  { %6890 = vmatprep.subr.bf16.mxu1 %v7453_v63  ;;  %6869 = vmatpush3.bf16.msra.mxu0 %v7454_v0  ;;  %v7493_v63 = vld [vmem:[%s9457_s1 + $0xbd0] sm:$0xff]   ;;  %v7521_v51 = vld [vmem:[%s9457_s1 + $0xcc8] sm:$0xff]  }
 0x145   :  { %6870 = vmatprep.subr.bf16.mxu0 %v7456_v2  ;;  %v7494_v0 = vld [vmem:[%s9457_s1 + $0xb10] sm:$0xff]   ;;  %v7496_v2 = vld [vmem:[%s9457_s1 + $0xb58] sm:$0xff]  }
 0x146   :  { %5315 = vmatmul.mubr.bf16.vlgmr.msra.gmra.mrb[36].mxu1 %v5889_v60  ;;  %v7490_v60 = vld [vmem:[%s9457_s1 + $0xb08] sm:$0xff]  }
 0x147   :  { %6891 = vmatpush3.bf16.msra.mxu1 %v7455_v1  ;;  %5396 = vmatprep.mubr.bf16.mxu1 %v5894_v53  ;;  %v7495_v1 = vld [vmem:[%s9457_s1 + $0xb90] sm:$0xff]   ;;  %v7523_v53 = vld [vmem:[%s9457_s1 + $0xc88] sm:$0xff]  }
 0x148   :  { %6892 = vmatprep.subr.bf16.mxu1 %v7457_v3  ;;  %6871 = vmatpush3.bf16.msra.mxu0 %v7458_v4  ;;  %v7497_v3 = vld [vmem:[%s9457_s1 + $0xbd8] sm:$0xff]  }
 0x149   :  { %6872 = vmatprep.subr.bf16.mxu0 %v7460_v6 }
 0x14b   :  { %6893 = vmatpush3.bf16.msra.mxu1 %v7459_v5  ;;  %v7498_v5 = vld [vmem:[%s9457_s1 + $0xb18] sm:$0xff]  }
 0x14c   :  { %6894 = vmatprep.subr.bf16.mxu1 %v7461_v7  ;;  %6873 = vmatpush3.bf16.msra.mxu0 %v7462_v8  ;;  %v7499_v7 = vld [vmem:[%s9457_s1 + $0xb98] sm:$0xff]  }
 0x14d   :  { %6874 = vmatprep.subr.bf16.mxu0 %v7464_v10 }
 0x14f   :  { %6895 = vmatpush3.bf16.msra.mxu1 %v7463_v9  ;;  %v7500_v9 = vld [vmem:[%s9457_s1 + $0xb60] sm:$0xff]  }
 0x150   :  { %6896 = vmatprep.subr.bf16.mxu1 %v7465_v11  ;;  %6875 = vmatpush3.bf16.msra.mxu0 %v7466_v13 }
 0x151   :  { %6876 = vmatprep.subr.bf16.mxu0 %v7468_v17 }
 0x153   :  { %6897 = vmatpush3.bf16.msra.mxu1 %v7467_v15  ;;  %v7502_v15 = vld [vmem:[%s9457_s1 + $0xb20] sm:$0xff]  }
 0x154   :  { %6898 = vmatprep.subr.bf16.mxu1 %v7469_v20  ;;  %6877 = vmatpush3.bf16.msra.mxu0 %v7470_v23 }
 0x155   :  { %6878 = vmatprep.subr.bf16.mxu0 %v7472_v29 }
 0x156   :  { %v6576_v12 = vpop.f32.mrb[12].mxu0 }
 0x157   :  { %v6598_v14 = vpop.f32.mrb[12].mxu1  ;;  %v6577_v16 = vpop.f32.mrb[13].mxu0  ;;  %6899 = vmatpush3.bf16.msra.mxu1 %v7471_v26  ;;  %v7506_v26 = vld [vmem:[%s9457_s1 + $0xb28] sm:$0xff]  }
 0x158   :  { %v6578_v18 = vadd.f32 %v6577_v16, %v6576_v12  ;;  %v6599_v19 = vpop.f32.mrb[13].mxu1  ;;  %v6579_v22 = vpop.f32.mrb[14].mxu0  ;;  %6900 = vmatprep.subr.bf16.mxu1 %v7473_v32  ;;  %6879 = vmatpush3.bf16.msra.mxu0 %v7474_v34  ;;  %v7501_v12 = vld [vmem:[%s9457_s1 + $0xbe0] sm:$0xff]   ;;  %v7510_v32 = vld [vmem:[%s9457_s1 + $0xb30] sm:$0xff]   ;;  %v7512_v34 = vld [vmem:[%s9457_s1 + $0xb78] sm:$0xff]  }
 0x159   :  { %v6600_v21 = vadd.f32 %v6599_v19, %v6598_v14  ;;  %v6601_v25 = vpop.f32.mrb[14].mxu1  ;;  %v6580_v27 = vpop.f32.mrb[15].mxu0  ;;  %6880 = vmatprep.subr.bf16.mxu0 %v7476_v38  ;;  %v45_v38 = vld [vmem:[%s9458_s0 + $0xb0] sm:$0xff] }
 0x15a   :  { %v4784_v24 = vadd.f32 %v6578_v18, %v8718_v37  ;;  %v6581_v30 = vadd.f32 %v6580_v27, %v6579_v22  ;;  %v6602_v31 = vpop.f32.mrb[15].mxu1  ;;  %v7503_v18 = vld [vmem:[%s9457_s1 + $0xba0] sm:$0xff]  }
 0x15b   :  { %v6603_v33 = vadd.f32 %v6602_v31, %v6601_v25  ;;  %6901 = vmatpush3.bf16.msra.mxu1 %v7475_v36  ;;  %v7509_v31 = vld [vmem:[%s9457_s1 + $0xbf0] sm:$0xff]   ;;  %v7514_v36 = vld [vmem:[%s9457_s1 + $0xb38] sm:$0xff]  }
 0x15c   :  { %v8829_v28 = vadd.f32 %v6600_v21, %v4784_v24  ;;  %v4787_v35 = vadd.f32 %v6581_v30, %v8733_v46  ;;  %6902 = vmatprep.subr.bf16.mxu1 %v7477_v39  ;;  %6881 = vmatpush3.bf16.msra.mxu0 %v7478_v40  ;;  %v43_v46 = vld [vmem:[%s9458_s0 + $0xa0] sm:$0xff]  ;;  %v7504_v21 = vld [vmem:[%s9457_s1 + $0xb68] sm:$0xff]   ;;  %v7508_v30 = vld [vmem:[%s9457_s1 + $0xb70] sm:$0xff]  }
 0x15d   :  { %6882 = vmatprep.subr.bf16.mxu0 %v7480_v42  ;;  %v5891_v48 = vcombine.low %v43_v46, %v75_v47  ;;  %v5892_v49 = vcombine.high %v43_v46, %v75_v47  ;;  %v7505_v24 = vld [vmem:[%s9457_s1 + $0xbe8] sm:$0xff]   ;;  %v77_v39 = vld [vmem:[%s9458_s0 + $0x1b0] sm:$0xff]  ;;  %v46_v40 = vld [vmem:[%s9458_s0 + $0xb8] sm:$0xff] }
 0x15e   :  { %v8844_v37 = vadd.f32 %v6603_v33, %v4787_v35  ;;  %v7511_v33 = vld [vmem:[%s9457_s1 + $0xbb0] sm:$0xff]   ;;  %v7513_v35 = vld [vmem:[%s9457_s1 + $0xbf8] sm:$0xff]   ;;  %v5895_v42 = vcombine.low %v45_v38, %v77_v39  ;;  %v7516_v46 = vld [vmem:[%s9457_s1 + $0xc40] sm:$0xff]  }
 0x15f   :  { %6903 = vmatpush3.bf16.msra.mxu1 %v7479_v41  ;;  %5355 = vmatprep.mubr.bf16.mxu0 %v5892_v49  ;;  %v78_v41 = vld [vmem:[%s9458_s0 + $0x1b8] sm:$0xff]  ;;  %v7517_v47 = vld [vmem:[%s9457_s1 + $0xcc0] sm:$0xff]  }
 0x160   :  { %6904 = vmatprep.subr.bf16.mxu1 %v7481_v43  ;;  %6883 = vmatpush3.bf16.msra.mxu0 %v7482_v44  ;;  %v5896_v43 = vcombine.high %v45_v38, %v77_v39  ;;  %v5897_v44 = vcombine.low %v46_v40, %v78_v41  ;;  %v7519_v49 = vld [vmem:[%s9457_s1 + $0xc80] sm:$0xff]  }
 0x161   :  { %6912 = vmatprep.subr.bf16.mxu0 %v7484_v54  ;;  %v7524_v54 = vld [vmem:[%s9457_s1 + $0xc50] sm:$0xff]   ;;  %v7548_v38 = vld [vmem:[%s9457_s1 + $0xd40] sm:$0xff]  }
 0x162   :  { %v7549_v39 = vld [vmem:[%s9457_s1 + $0xdc0] sm:$0xff]  }
 0x163   :  { %6905 = vmatpush3.bf16.msra.mxu1 %v7483_v45  ;;  %5356 = vmatmul.mubr.bf16.vlgmr.msra.gmra.mrb[40].mxu0 %v5891_v48  ;;  %v5898_v45 = vcombine.high %v46_v40, %v78_v41  ;;  %v7518_v48 = vld [vmem:[%s9457_s1 + $0xc00] sm:$0xff]  }
 0x164   :  { %6934 = vmatprep.subr.bf16.mxu1 %v7485_v55  ;;  %6913 = vmatpush3.bf16.msra.mxu0 %v7486_v56  ;;  %v7525_v55 = vld [vmem:[%s9457_s1 + $0xcd0] sm:$0xff]   ;;  %v7550_v40 = vld [vmem:[%s9457_s1 + $0xd00] sm:$0xff]  }
 0x165   :  { %6914 = vmatprep.subr.bf16.mxu0 %v7488_v58  ;;  %5437 = vmatprep.mubr.bf16.mxu0 %v5896_v43  ;;  %v7526_v56 = vld [vmem:[%s9457_s1 + $0xc10] sm:$0xff]   ;;  %v7528_v58 = vld [vmem:[%s9457_s1 + $0xc58] sm:$0xff]   ;;  %v7551_v41 = vld [vmem:[%s9457_s1 + $0xd80] sm:$0xff]  }
 0x166   :  { %5397 = vmatmul.mubr.bf16.vlgmr.msra.gmra.mrb[40].mxu1 %v5893_v52  ;;  %v7522_v52 = vld [vmem:[%s9457_s1 + $0xc08] sm:$0xff]  }
 0x167   :  { %6935 = vmatpush3.bf16.msra.mxu1 %v7487_v57  ;;  %5478 = vmatprep.mubr.bf16.mxu1 %v5898_v45  ;;  %v7527_v57 = vld [vmem:[%s9457_s1 + $0xc90] sm:$0xff]   ;;  %v7553_v43 = vld [vmem:[%s9457_s1 + $0xdc8] sm:$0xff]  }
 0x168   :  { %6936 = vmatprep.subr.bf16.mxu1 %v7489_v59  ;;  %6915 = vmatpush3.bf16.msra.mxu0 %v7490_v60  ;;  %v7529_v59 = vld [vmem:[%s9457_s1 + $0xcd8] sm:$0xff]   ;;  %v7555_v45 = vld [vmem:[%s9457_s1 + $0xd88] sm:$0xff]  }
 0x169   :  { %6916 = vmatprep.subr.bf16.mxu0 %v7492_v62  ;;  %v7530_v60 = vld [vmem:[%s9457_s1 + $0xc18] sm:$0xff]  }
 0x16a   :  { %v7531_v62 = vld [vmem:[%s9457_s1 + $0xc98] sm:$0xff]  }
 0x16b   :  { %6937 = vmatpush3.bf16.msra.mxu1 %v7491_v61 }
 0x16c   :  { %6938 = vmatprep.subr.bf16.mxu1 %v7493_v63  ;;  %6917 = vmatpush3.bf16.msra.mxu0 %v7494_v0  ;;  %v7532_v0 = vld [vmem:[%s9457_s1 + $0xc60] sm:$0xff]  }
 0x16d   :  { %6918 = vmatprep.subr.bf16.mxu0 %v7496_v2  ;;  %v7533_v2 = vld [vmem:[%s9457_s1 + $0xce0] sm:$0xff]  }
 0x16f   :  { %6939 = vmatpush3.bf16.msra.mxu1 %v7495_v1 }
 0x170   :  { %6940 = vmatprep.subr.bf16.mxu1 %v7497_v3  ;;  %6919 = vmatpush3.bf16.msra.mxu0 %v7498_v5  ;;  %v7534_v5 = vld [vmem:[%s9457_s1 + $0xc20] sm:$0xff]  }
 0x171   :  { %6920 = vmatprep.subr.bf16.mxu0 %v7500_v9 }
 0x173   :  { %6941 = vmatpush3.bf16.msra.mxu1 %v7499_v7 }
 0x174   :  { %6942 = vmatprep.subr.bf16.mxu1 %v7501_v12  ;;  %6921 = vmatpush3.bf16.msra.mxu0 %v7502_v15 }
 0x175   :  { %6922 = vmatprep.subr.bf16.mxu0 %v7504_v21  ;;  %v7540_v21 = vld [vmem:[%s9457_s1 + $0xc70] sm:$0xff]  }
 0x176   :  { %v6620_v4 = vpop.f32.mrb[16].mxu0 }
 0x177   :  { %v6642_v6 = vpop.f32.mrb[16].mxu1  ;;  %v6621_v8 = vpop.f32.mrb[17].mxu0  ;;  %6943 = vmatpush3.bf16.msra.mxu1 %v7503_v18 }
 0x178   :  { %v6622_v10 = vadd.f32 %v6621_v8, %v6620_v4  ;;  %v6643_v11 = vpop.f32.mrb[17].mxu1  ;;  %v6623_v14 = vpop.f32.mrb[18].mxu0  ;;  %6944 = vmatprep.subr.bf16.mxu1 %v7505_v24  ;;  %6923 = vmatpush3.bf16.msra.mxu0 %v7506_v26  ;;  %v7535_v8 = vld [vmem:[%s9457_s1 + $0xca0] sm:$0xff]   ;;  %v7542_v24 = vld [vmem:[%s9457_s1 + $0xc30] sm:$0xff]   ;;  %v7544_v26 = vld [vmem:[%s9457_s1 + $0xc78] sm:$0xff]  }
 0x179   :  { %v6644_v13 = vadd.f32 %v6643_v11, %v6642_v6  ;;  %v6645_v17 = vpop.f32.mrb[18].mxu1  ;;  %v6624_v19 = vpop.f32.mrb[19].mxu0  ;;  %6924 = vmatprep.subr.bf16.mxu0 %v7508_v30  ;;  %v7536_v11 = vld [vmem:[%s9457_s1 + $0xc68] sm:$0xff]   ;;  %v47_v30 = vld [vmem:[%s9458_s0 + $0xc0] sm:$0xff] }
 0x17a   :  { %v4866_v16 = vadd.f32 %v6622_v10, %v8829_v28  ;;  %v6625_v22 = vadd.f32 %v6624_v19, %v6623_v14  ;;  %v6646_v23 = vpop.f32.mrb[19].mxu1  ;;  %v7507_v28 = vld [vmem:[%s9457_s1 + $0xba8] sm:$0xff]  }
 0x17b   :  { %v6647_v25 = vadd.f32 %v6646_v23, %v6645_v17  ;;  %6945 = vmatpush3.bf16.msra.mxu1 %v7507_v28  ;;  %v7537_v14 = vld [vmem:[%s9457_s1 + $0xce8] sm:$0xff]   ;;  %v7541_v23 = vld [vmem:[%s9457_s1 + $0xcf0] sm:$0xff]   ;;  %v7546_v28 = vld [vmem:[%s9457_s1 + $0xc38] sm:$0xff]  }
 0x17c   :  { %v8943_v20 = vadd.f32 %v6644_v13, %v4866_v16  ;;  %v4869_v27 = vadd.f32 %v6625_v22, %v8844_v37  ;;  %6946 = vmatprep.subr.bf16.mxu1 %v7509_v31  ;;  %6925 = vmatpush3.bf16.msra.mxu0 %v7510_v32  ;;  %v7515_v37 = vld [vmem:[%s9457_s1 + $0xbb8] sm:$0xff]   ;;  %v7538_v17 = vld [vmem:[%s9457_s1 + $0xc28] sm:$0xff]   ;;  %v79_v31 = vld [vmem:[%s9458_s0 + $0x1c0] sm:$0xff] }
 0x17d   :  { %6926 = vmatprep.subr.bf16.mxu0 %v7512_v34  ;;  %v7539_v19 = vld [vmem:[%s9457_s1 + $0xca8] sm:$0xff]   ;;  %v5900_v34 = vcombine.high %v47_v30, %v79_v31 }
 0x17e   :  { %v8958_v29 = vadd.f32 %v6647_v25, %v4869_v27  ;;  %v7543_v25 = vld [vmem:[%s9457_s1 + $0xcb0] sm:$0xff]   ;;  %v7545_v27 = vld [vmem:[%s9457_s1 + $0xcf8] sm:$0xff]   ;;  %v48_v32 = vld [vmem:[%s9458_s0 + $0xc8] sm:$0xff] }
 0x17f   :  { %6947 = vmatpush3.bf16.msra.mxu1 %v7511_v33  ;;  %v5899_v33 = vcombine.low %v47_v30, %v79_v31  ;;  %v7580_v30 = vld [vmem:[%s9457_s1 + $0xe40] sm:$0xff]  }
 0x180   :  { %6948 = vmatprep.subr.bf16.mxu1 %v7513_v35  ;;  %6927 = vmatpush3.bf16.msra.mxu0 %v7514_v36  ;;  %v80_v35 = vld [vmem:[%s9458_s0 + $0x1c8] sm:$0xff]  ;;  %v7581_v31 = vld [vmem:[%s9457_s1 + $0xec0] sm:$0xff]  }
 0x181   :  { %6956 = vmatprep.subr.bf16.mxu0 %v7516_v46  ;;  %v5901_v36 = vcombine.low %v48_v32, %v80_v35  ;;  %v7556_v46 = vld [vmem:[%s9457_s1 + $0xd50] sm:$0xff]  }
 0x183   :  { %6949 = vmatpush3.bf16.msra.mxu1 %v7515_v37  ;;  %5438 = vmatmul.mubr.bf16.vlgmr.msra.gmra.mrb[44].mxu0 %v5895_v42  ;;  %v5902_v37 = vcombine.high %v48_v32, %v80_v35  ;;  %v7552_v42 = vld [vmem:[%s9457_s1 + $0xd48] sm:$0xff]   ;;  %v7582_v32 = vld [vmem:[%s9457_s1 + $0xe00] sm:$0xff]  }
 0x184   :  { %6978 = vmatprep.subr.bf16.mxu1 %v7517_v47  ;;  %6957 = vmatpush3.bf16.msra.mxu0 %v7518_v48  ;;  %v7557_v47 = vld [vmem:[%s9457_s1 + $0xdd0] sm:$0xff]   ;;  %v7585_v35 = vld [vmem:[%s9457_s1 + $0xec8] sm:$0xff]  }
 0x185   :  { %6958 = vmatprep.subr.bf16.mxu0 %v7520_v50  ;;  %5519 = vmatprep.mubr.bf16.mxu0 %v5900_v34  ;;  %v7558_v48 = vld [vmem:[%s9457_s1 + $0xd10] sm:$0xff]   ;;  %v7560_v50 = vld [vmem:[%s9457_s1 + $0xd58] sm:$0xff]   ;;  %v7584_v34 = vld [vmem:[%s9457_s1 + $0xe48] sm:$0xff]  }
 0x186   :  { %5479 = vmatmul.mubr.bf16.vlgmr.msra.gmra.mrb[44].mxu1 %v5897_v44  ;;  %v7554_v44 = vld [vmem:[%s9457_s1 + $0xd08] sm:$0xff]  }
 0x187   :  { %6979 = vmatpush3.bf16.msra.mxu1 %v7519_v49  ;;  %5560 = vmatprep.mubr.bf16.mxu1 %v5902_v37  ;;  %v7559_v49 = vld [vmem:[%s9457_s1 + $0xd90] sm:$0xff]   ;;  %v7587_v37 = vld [vmem:[%s9457_s1 + $0xe88] sm:$0xff]  }
 0x188   :  { %6980 = vmatprep.subr.bf16.mxu1 %v7521_v51  ;;  %6959 = vmatpush3.bf16.msra.mxu0 %v7522_v52  ;;  %v7561_v51 = vld [vmem:[%s9457_s1 + $0xdd8] sm:$0xff]  }
 0x189   :  { %6960 = vmatprep.subr.bf16.mxu0 %v7524_v54 }
 0x18b   :  { %6981 = vmatpush3.bf16.msra.mxu1 %v7523_v53  ;;  %v7562_v53 = vld [vmem:[%s9457_s1 + $0xd18] sm:$0xff]  }
 0x18c   :  { %6982 = vmatprep.subr.bf16.mxu1 %v7525_v55  ;;  %6961 = vmatpush3.bf16.msra.mxu0 %v7526_v56  ;;  %v7563_v55 = vld [vmem:[%s9457_s1 + $0xd98] sm:$0xff]  }
 0x18d   :  { %6962 = vmatprep.subr.bf16.mxu0 %v7528_v58 }
 0x18f   :  { %6983 = vmatpush3.bf16.msra.mxu1 %v7527_v57  ;;  %v7564_v57 = vld [vmem:[%s9457_s1 + $0xd60] sm:$0xff]  }
 0x190   :  { %6984 = vmatprep.subr.bf16.mxu1 %v7529_v59  ;;  %6963 = vmatpush3.bf16.msra.mxu0 %v7530_v60  ;;  %v7565_v60 = vld [vmem:[%s9457_s1 + $0xde0] sm:$0xff]  }
 0x191   :  { %6964 = vmatprep.subr.bf16.mxu0 %v7532_v0 }
 0x193   :  { %6985 = vmatpush3.bf16.msra.mxu1 %v7531_v62 }
 0x194   :  { %6986 = vmatprep.subr.bf16.mxu1 %v7533_v2  ;;  %6965 = vmatpush3.bf16.msra.mxu0 %v7534_v5  ;;  %v7567_v2 = vld [vmem:[%s9457_s1 + $0xda0] sm:$0xff]   ;;  %v7568_v5 = vld [vmem:[%s9457_s1 + $0xd68] sm:$0xff]  }
 0x195   :  { %6966 = vmatprep.subr.bf16.mxu0 %v7536_v11 }
 0x196   :  { %v6664_v61 = vpop.f32.mrb[20].mxu0 }
 0x197   :  { %v6686_v63 = vpop.f32.mrb[20].mxu1  ;;  %v6665_v1 = vpop.f32.mrb[21].mxu0  ;;  %6987 = vmatpush3.bf16.msra.mxu1 %v7535_v8  ;;  %v7569_v8 = vld [vmem:[%s9457_s1 + $0xde8] sm:$0xff]  }
 0x198   :  { %v6666_v3 = vadd.f32 %v6665_v1, %v6664_v61  ;;  %v6687_v4 = vpop.f32.mrb[21].mxu1  ;;  %v6667_v7 = vpop.f32.mrb[22].mxu0  ;;  %6988 = vmatprep.subr.bf16.mxu1 %v7537_v14  ;;  %6967 = vmatpush3.bf16.msra.mxu0 %v7538_v17  ;;  %v7572_v14 = vld [vmem:[%s9457_s1 + $0xd70] sm:$0xff]  }
 0x199   :  { %v6688_v6 = vadd.f32 %v6687_v4, %v6686_v63  ;;  %v6689_v10 = vpop.f32.mrb[22].mxu1  ;;  %v6668_v12 = vpop.f32.mrb[23].mxu0  ;;  %6968 = vmatprep.subr.bf16.mxu0 %v7540_v21  ;;  %v7566_v63 = vld [vmem:[%s9457_s1 + $0xd20] sm:$0xff]   ;;  %v7575_v17 = vld [vmem:[%s9457_s1 + $0xdb0] sm:$0xff]   ;;  %v7579_v21 = vld [vmem:[%s9457_s1 + $0xdb8] sm:$0xff]  }
 0x19a   :  { %v4948_v9 = vadd.f32 %v6666_v3, %v8943_v20  ;;  %v6669_v15 = vadd.f32 %v6668_v12, %v6667_v7  ;;  %v6690_v16 = vpop.f32.mrb[23].mxu1  ;;  %v7571_v12 = vld [vmem:[%s9457_s1 + $0xda8] sm:$0xff]  }
 0x19b   :  { %v6691_v18 = vadd.f32 %v6690_v16, %v6689_v10  ;;  %6989 = vmatpush3.bf16.msra.mxu1 %v7539_v19  ;;  %v7570_v10 = vld [vmem:[%s9457_s1 + $0xd28] sm:$0xff]   ;;  %v7574_v16 = vld [vmem:[%s9457_s1 + $0xd30] sm:$0xff]   ;;  %v7577_v19 = vld [vmem:[%s9457_s1 + $0xdf8] sm:$0xff]  }
 0x19c   :  { %v9060_v13 = vadd.f32 %v6688_v6, %v4948_v9  ;;  %v4951_v20 = vadd.f32 %v6669_v15, %v8958_v29  ;;  %6990 = vmatprep.subr.bf16.mxu1 %v7541_v23  ;;  %6969 = vmatpush3.bf16.msra.mxu0 %v7542_v24  ;;  %v7547_v29 = vld [vmem:[%s9457_s1 + $0xcb8] sm:$0xff]   ;;  %v7573_v15 = vld [vmem:[%s9457_s1 + $0xdf0] sm:$0xff]  }
 0x19d   :  { %6970 = vmatprep.subr.bf16.mxu0 %v7544_v26  ;;  %v81_v23 = vld [vmem:[%s9458_s0 + $0x1d0] sm:$0xff]  ;;  %v50_v26 = vld [vmem:[%s9458_s0 + $0xd8] sm:$0xff] }
 0x19e   :  { %v9075_v22 = vadd.f32 %v6691_v18, %v4951_v20  ;;  %v7576_v18 = vld [vmem:[%s9457_s1 + $0xd78] sm:$0xff]  }
 0x19f   :  { %6991 = vmatpush3.bf16.msra.mxu1 %v7543_v25  ;;  %v7578_v20 = vld [vmem:[%s9457_s1 + $0xd38] sm:$0xff]  }
 0x1a0   :  { %6992 = vmatprep.subr.bf16.mxu1 %v7545_v27  ;;  %6971 = vmatpush3.bf16.msra.mxu0 %v7546_v28  ;;  %v82_v27 = vld [vmem:[%s9458_s0 + $0x1d8] sm:$0xff] }
 0x1a1   :  { %7000 = vmatprep.subr.bf16.mxu0 %v7548_v38  ;;  %v5905_v28 = vcombine.low %v50_v26, %v82_v27  ;;  %v7588_v38 = vld [vmem:[%s9457_s1 + $0xe50] sm:$0xff]  }
 0x1a3   :  { %6993 = vmatpush3.bf16.msra.mxu1 %v7547_v29  ;;  %5520 = vmatmul.mubr.bf16.vlgmr.msra.gmra.mrb[48].mxu0 %v5899_v33  ;;  %v5906_v29 = vcombine.high %v50_v26, %v82_v27  ;;  %v7583_v33 = vld [vmem:[%s9457_s1 + $0xe80] sm:$0xff]   ;;  %v7616_v26 = vld [vmem:[%s9457_s1 + $0xf48] sm:$0xff]  }
 0x1a4   :  { %7022 = vmatprep.subr.bf16.mxu1 %v7549_v39  ;;  %7001 = vmatpush3.bf16.msra.mxu0 %v7550_v40  ;;  %v7589_v39 = vld [vmem:[%s9457_s1 + $0xed0] sm:$0xff]   ;;  %v7617_v27 = vld [vmem:[%s9457_s1 + $0xfc8] sm:$0xff]  }
 0x1a5   :  { %7002 = vmatprep.subr.bf16.mxu0 %v7552_v42  ;;  %v7590_v40 = vld [vmem:[%s9457_s1 + $0xe10] sm:$0xff]   ;;  %v7592_v42 = vld [vmem:[%s9457_s1 + $0xe58] sm:$0xff]  }
 0x1a6   :  { %5561 = vmatmul.mubr.bf16.vlgmr.msra.gmra.mrb[48].mxu1 %v5901_v36  ;;  %v7586_v36 = vld [vmem:[%s9457_s1 + $0xe08] sm:$0xff]  }
 0x1a7   :  { %7023 = vmatpush3.bf16.msra.mxu1 %v7551_v41  ;;  %5642 = vmatprep.mubr.bf16.mxu1 %v5906_v29  ;;  %v7591_v41 = vld [vmem:[%s9457_s1 + $0xe90] sm:$0xff]   ;;  %v7619_v29 = vld [vmem:[%s9457_s1 + $0xf88] sm:$0xff]  }
 0x1a8   :  { %7024 = vmatprep.subr.bf16.mxu1 %v7553_v43  ;;  %7003 = vmatpush3.bf16.msra.mxu0 %v7554_v44  ;;  %v7593_v43 = vld [vmem:[%s9457_s1 + $0xed8] sm:$0xff]  }
 0x1a9   :  { %7004 = vmatprep.subr.bf16.mxu0 %v7556_v46 }
 0x1ab   :  { %7025 = vmatpush3.bf16.msra.mxu1 %v7555_v45  ;;  %v7594_v45 = vld [vmem:[%s9457_s1 + $0xe18] sm:$0xff]  }
 0x1ac   :  { %7026 = vmatprep.subr.bf16.mxu1 %v7557_v47  ;;  %7005 = vmatpush3.bf16.msra.mxu0 %v7558_v48  ;;  %v7595_v47 = vld [vmem:[%s9457_s1 + $0xe98] sm:$0xff]  }
 0x1ad   :  { %7006 = vmatprep.subr.bf16.mxu0 %v7560_v50 }
 0x1af   :  { %7027 = vmatpush3.bf16.msra.mxu1 %v7559_v49  ;;  %v7596_v49 = vld [vmem:[%s9457_s1 + $0xe60] sm:$0xff]  }
 0x1b0   :  { %7028 = vmatprep.subr.bf16.mxu1 %v7561_v51  ;;  %7007 = vmatpush3.bf16.msra.mxu0 %v7562_v53 }
 0x1b1   :  { %7008 = vmatprep.subr.bf16.mxu0 %v7564_v57 }
 0x1b3   :  { %7029 = vmatpush3.bf16.msra.mxu1 %v7563_v55  ;;  %v7598_v55 = vld [vmem:[%s9457_s1 + $0xe20] sm:$0xff]  }
 0x1b4   :  { %7030 = vmatprep.subr.bf16.mxu1 %v7565_v60  ;;  %7009 = vmatpush3.bf16.msra.mxu0 %v7566_v63 }
 0x1b5   :  { %7010 = vmatprep.subr.bf16.mxu0 %v7568_v5 }
 0x1b6   :  { %v6708_v52 = vpop.f32.mrb[24].mxu0 }
 0x1b7   :  { %v6730_v54 = vpop.f32.mrb[24].mxu1  ;;  %v6709_v56 = vpop.f32.mrb[25].mxu0  ;;  %7031 = vmatpush3.bf16.msra.mxu1 %v7567_v2  ;;  %v7602_v2 = vld [vmem:[%s9457_s1 + $0xe28] sm:$0xff]  }
 0x1b8   :  { %v6710_v58 = vadd.f32 %v6709_v56, %v6708_v52  ;;  %v6731_v59 = vpop.f32.mrb[25].mxu1  ;;  %v6711_v62 = vpop.f32.mrb[26].mxu0  ;;  %7032 = vmatprep.subr.bf16.mxu1 %v7569_v8  ;;  %7011 = vmatpush3.bf16.msra.mxu0 %v7570_v10  ;;  %v7597_v52 = vld [vmem:[%s9457_s1 + $0xee0] sm:$0xff]   ;;  %v7606_v8 = vld [vmem:[%s9457_s1 + $0xe30] sm:$0xff]   ;;  %v7608_v10 = vld [vmem:[%s9457_s1 + $0xe78] sm:$0xff]  }
 0x1b9   :  { %v6732_v61 = vadd.f32 %v6731_v59, %v6730_v54  ;;  %v6733_v1 = vpop.f32.mrb[26].mxu1  ;;  %v6712_v3 = vpop.f32.mrb[27].mxu0  ;;  %7012 = vmatprep.subr.bf16.mxu0 %v7572_v14  ;;  %v51_v14 = vld [vmem:[%s9458_s0 + $0xe0] sm:$0xff] }
 0x1ba   :  { %v5030_v0 = vadd.f32 %v6710_v58, %v9060_v13  ;;  %v6713_v6 = vadd.f32 %v6712_v3, %v6711_v62  ;;  %v6734_v7 = vpop.f32.mrb[27].mxu1  ;;  %v7599_v58 = vld [vmem:[%s9457_s1 + $0xea0] sm:$0xff]  }
 0x1bb   :  { %v6735_v9 = vadd.f32 %v6734_v7, %v6733_v1  ;;  %7033 = vmatpush3.bf16.msra.mxu1 %v7571_v12  ;;  %v7605_v7 = vld [vmem:[%s9457_s1 + $0xef0] sm:$0xff]   ;;  %v7610_v12 = vld [vmem:[%s9457_s1 + $0xe38] sm:$0xff]  }
 0x1bc   :  { %v9171_v4 = vadd.f32 %v6732_v61, %v5030_v0  ;;  %v5033_v11 = vadd.f32 %v6713_v6, %v9075_v22  ;;  %7034 = vmatprep.subr.bf16.mxu1 %v7573_v15  ;;  %7013 = vmatpush3.bf16.msra.mxu0 %v7574_v16  ;;  %v49_v22 = vld [vmem:[%s9458_s0 + $0xd0] sm:$0xff]  ;;  %v7600_v61 = vld [vmem:[%s9457_s1 + $0xe68] sm:$0xff]   ;;  %v83_v15 = vld [vmem:[%s9458_s0 + $0x1e0] sm:$0xff] }
 0x1bd   :  { %7014 = vmatprep.subr.bf16.mxu0 %v7576_v18  ;;  %v5903_v24 = vcombine.low %v49_v22, %v81_v23  ;;  %v5904_v25 = vcombine.high %v49_v22, %v81_v23  ;;  %v7601_v0 = vld [vmem:[%s9457_s1 + $0xee8] sm:$0xff]   ;;  %v7604_v6 = vld [vmem:[%s9457_s1 + $0xe70] sm:$0xff]   ;;  %v5907_v18 = vcombine.low %v51_v14, %v83_v15  ;;  %v7612_v22 = vld [vmem:[%s9457_s1 + $0xf40] sm:$0xff]  }
 0x1be   :  { %v9186_v13 = vadd.f32 %v6735_v9, %v5033_v11  ;;  %v7607_v9 = vld [vmem:[%s9457_s1 + $0xeb0] sm:$0xff]   ;;  %v7609_v11 = vld [vmem:[%s9457_s1 + $0xef8] sm:$0xff]   ;;  %v52_v16 = vld [vmem:[%s9458_s0 + $0xe8] sm:$0xff] }
 0x1bf   :  { %7035 = vmatpush3.bf16.msra.mxu1 %v7575_v17  ;;  %5601 = vmatprep.mubr.bf16.mxu0 %v5904_v25  ;;  %v84_v17 = vld [vmem:[%s9458_s0 + $0x1e8] sm:$0xff]  ;;  %v7613_v23 = vld [vmem:[%s9457_s1 + $0xfc0] sm:$0xff]  }
 0x1c0   :  { %7036 = vmatprep.subr.bf16.mxu1 %v7577_v19  ;;  %7015 = vmatpush3.bf16.msra.mxu0 %v7578_v20  ;;  %v5908_v19 = vcombine.high %v51_v14, %v83_v15  ;;  %v5909_v20 = vcombine.low %v52_v16, %v84_v17  ;;  %v7615_v25 = vld [vmem:[%s9457_s1 + $0xf80] sm:$0xff]  }
 0x1c1   :  { %7044 = vmatprep.subr.bf16.mxu0 %v7580_v30  ;;  %v7620_v30 = vld [vmem:[%s9457_s1 + $0xf50] sm:$0xff]  }
 0x1c3   :  { %7037 = vmatpush3.bf16.msra.mxu1 %v7579_v21  ;;  %5602 = vmatmul.mubr.bf16.vlgmr.msra.gmra.mrb[52].mxu0 %v5903_v24  ;;  %v5910_v21 = vcombine.high %v52_v16, %v84_v17  ;;  %v7614_v24 = vld [vmem:[%s9457_s1 + $0xf00] sm:$0xff]  }
 0x1c4   :  { %7066 = vmatprep.subr.bf16.mxu1 %v7581_v31  ;;  %7045 = vmatpush3.bf16.msra.mxu0 %v7582_v32  ;;  %v7621_v31 = vld [vmem:[%s9457_s1 + $0xfd0] sm:$0xff]  }
 0x1c5   :  { %7046 = vmatprep.subr.bf16.mxu0 %v7584_v34  ;;  %5683 = vmatprep.mubr.bf16.mxu0 %v5908_v19  ;;  %v7622_v32 = vld [vmem:[%s9457_s1 + $0xf10] sm:$0xff]   ;;  %v7624_v34 = vld [vmem:[%s9457_s1 + $0xf58] sm:$0xff]  }
 0x1c6   :  { %5643 = vmatmul.mubr.bf16.vlgmr.msra.gmra.mrb[52].mxu1 %v5905_v28  ;;  %v7618_v28 = vld [vmem:[%s9457_s1 + $0xf08] sm:$0xff]  }
 0x1c7   :  { %7067 = vmatpush3.bf16.msra.mxu1 %v7583_v33  ;;  %5724 = vmatprep.mubr.bf16.mxu1 %v5910_v21  ;;  %v7623_v33 = vld [vmem:[%s9457_s1 + $0xf90] sm:$0xff]  }
 0x1c8   :  { %7068 = vmatprep.subr.bf16.mxu1 %v7585_v35  ;;  %7047 = vmatpush3.bf16.msra.mxu0 %v7586_v36  ;;  %v7625_v35 = vld [vmem:[%s9457_s1 + $0xfd8] sm:$0xff]  }
 0x1c9   :  { %7048 = vmatprep.subr.bf16.mxu0 %v7588_v38  ;;  %v7626_v36 = vld [vmem:[%s9457_s1 + $0xf18] sm:$0xff]  }
 0x1ca   :  { %v7627_v38 = vld [vmem:[%s9457_s1 + $0xf98] sm:$0xff]  }
 0x1cb   :  { %7069 = vmatpush3.bf16.msra.mxu1 %v7587_v37 }
 0x1cc   :  { %7070 = vmatprep.subr.bf16.mxu1 %v7589_v39  ;;  %7049 = vmatpush3.bf16.msra.mxu0 %v7590_v40  ;;  %v7628_v40 = vld [vmem:[%s9457_s1 + $0xf60] sm:$0xff]  }
 0x1cd   :  { %7050 = vmatprep.subr.bf16.mxu0 %v7592_v42  ;;  %v7629_v42 = vld [vmem:[%s9457_s1 + $0xfe0] sm:$0xff]  }
 0x1cf   :  { %7071 = vmatpush3.bf16.msra.mxu1 %v7591_v41 }
 0x1d0   :  { %7072 = vmatprep.subr.bf16.mxu1 %v7593_v43  ;;  %7051 = vmatpush3.bf16.msra.mxu0 %v7594_v45  ;;  %v7630_v45 = vld [vmem:[%s9457_s1 + $0xf20] sm:$0xff]  }
 0x1d1   :  { %7052 = vmatprep.subr.bf16.mxu0 %v7596_v49 }
 0x1d3   :  { %7073 = vmatpush3.bf16.msra.mxu1 %v7595_v47 }
 0x1d4   :  { %7074 = vmatprep.subr.bf16.mxu1 %v7597_v52  ;;  %7053 = vmatpush3.bf16.msra.mxu0 %v7598_v55 }
 0x1d5   :  { %7054 = vmatprep.subr.bf16.mxu0 %v7600_v61  ;;  %v7636_v61 = vld [vmem:[%s9457_s1 + $0xf70] sm:$0xff]  }
 0x1d6   :  { %v6752_v44 = vpop.f32.mrb[28].mxu0 }
 0x1d7   :  { %v6774_v46 = vpop.f32.mrb[28].mxu1  ;;  %v6753_v48 = vpop.f32.mrb[29].mxu0  ;;  %7075 = vmatpush3.bf16.msra.mxu1 %v7599_v58 }
 0x1d8   :  { %v6754_v50 = vadd.f32 %v6753_v48, %v6752_v44  ;;  %v6775_v51 = vpop.f32.mrb[29].mxu1  ;;  %v6755_v54 = vpop.f32.mrb[30].mxu0  ;;  %7076 = vmatprep.subr.bf16.mxu1 %v7601_v0  ;;  %7055 = vmatpush3.bf16.msra.mxu0 %v7602_v2  ;;  %v7631_v48 = vld [vmem:[%s9457_s1 + $0xfa0] sm:$0xff]   ;;  %v7638_v0 = vld [vmem:[%s9457_s1 + $0xf30] sm:$0xff]   ;;  %v7640_v2 = vld [vmem:[%s9457_s1 + $0xf78] sm:$0xff]  }
 0x1d9   :  { %v6776_v53 = vadd.f32 %v6775_v51, %v6774_v46  ;;  %v6777_v57 = vpop.f32.mrb[30].mxu1  ;;  %v6756_v59 = vpop.f32.mrb[31].mxu0  ;;  %7056 = vmatprep.subr.bf16.mxu0 %v7604_v6  ;;  %v7632_v51 = vld [vmem:[%s9457_s1 + $0xf68] sm:$0xff]   ;;  %v53_v6 = vld [vmem:[%s9458_s0 + $0xf0] sm:$0xff] }
 0x1da   :  { %v5112_v56 = vadd.f32 %v6754_v50, %v9171_v4  ;;  %v6757_v62 = vadd.f32 %v6756_v59, %v6755_v54  ;;  %v6778_v63 = vpop.f32.mrb[31].mxu1  ;;  %v7603_v4 = vld [vmem:[%s9457_s1 + $0xea8] sm:$0xff]  }
 0x1db   :  { %v6779_v1 = vadd.f32 %v6778_v63, %v6777_v57  ;;  %7077 = vmatpush3.bf16.msra.mxu1 %v7603_v4  ;;  %v7633_v54 = vld [vmem:[%s9457_s1 + $0xfe8] sm:$0xff]   ;;  %v7637_v63 = vld [vmem:[%s9457_s1 + $0xff0] sm:$0xff]   ;;  %v7642_v4 = vld [vmem:[%s9457_s1 + $0xf38] sm:$0xff]  }
 0x1dc   :  { %v9285_v60 = vadd.f32 %v6776_v53, %v5112_v56  ;;  %v5115_v3 = vadd.f32 %v6757_v62, %v9186_v13  ;;  %7078 = vmatprep.subr.bf16.mxu1 %v7605_v7  ;;  %7057 = vmatpush3.bf16.msra.mxu0 %v7606_v8  ;;  %v7611_v13 = vld [vmem:[%s9457_s1 + $0xeb8] sm:$0xff]   ;;  %v7634_v57 = vld [vmem:[%s9457_s1 + $0xf28] sm:$0xff]   ;;  %v85_v7 = vld [vmem:[%s9458_s0 + $0x1f0] sm:$0xff] }
 0x1dd   :  { %7058 = vmatprep.subr.bf16.mxu0 %v7608_v10  ;;  %v7635_v59 = vld [vmem:[%s9457_s1 + $0xfa8] sm:$0xff]   ;;  %v54_v8 = vld [vmem:[%s9458_s0 + $0xf8] sm:$0xff]  ;;  %v5912_v10 = vcombine.high %v53_v6, %v85_v7 }
 0x1de   :  { %v9300_v5 = vadd.f32 %v6779_v1, %v5115_v3  ;;  %v7639_v1 = vld [vmem:[%s9457_s1 + $0xfb0] sm:$0xff]   ;;  %v7641_v3 = vld [vmem:[%s9457_s1 + $0xff8] sm:$0xff]  }
 0x1df   :  { %7079 = vmatpush3.bf16.msra.mxu1 %v7607_v9  ;;  %v5911_v9 = vcombine.low %v53_v6, %v85_v7 }
 0x1e0   :  { %7080 = vmatprep.subr.bf16.mxu1 %v7609_v11  ;;  %7059 = vmatpush3.bf16.msra.mxu0 %v7610_v12  ;;  %v86_v11 = vld [vmem:[%s9458_s0 + $0x1f8] sm:$0xff] }
 0x1e1   :  { %7088 = vmatprep.subr.bf16.mxu0 %v7612_v22  ;;  %v5913_v12 = vcombine.low %v54_v8, %v86_v11 }
 0x1e3   :  { %7081 = vmatpush3.bf16.msra.mxu1 %v7611_v13  ;;  %5684 = vmatmul.mubr.bf16.vlgmr.msra.gmra.mrb[56].mxu0 %v5907_v18  ;;  %v5914_v13 = vcombine.high %v54_v8, %v86_v11 }
 0x1e4   :  { %7110 = vmatprep.subr.bf16.mxu1 %v7613_v23  ;;  %7089 = vmatpush3.bf16.msra.mxu0 %v7614_v24 }
 0x1e5   :  { %7090 = vmatprep.subr.bf16.mxu0 %v7616_v26  ;;  %5765 = vmatprep.mubr.bf16.mxu0 %v5912_v10 }
 0x1e6   :  { %5725 = vmatmul.mubr.bf16.vlgmr.msra.gmra.mrb[56].mxu1 %v5909_v20 }
 0x1e7   :  { %7111 = vmatpush3.bf16.msra.mxu1 %v7615_v25  ;;  %5806 = vmatprep.mubr.bf16.mxu1 %v5914_v13 }
 0x1e8   :  { %7112 = vmatprep.subr.bf16.mxu1 %v7617_v27  ;;  %7091 = vmatpush3.bf16.msra.mxu0 %v7618_v28 }
 0x1e9   :  { %7092 = vmatprep.subr.bf16.mxu0 %v7620_v30 }
 0x1eb   :  { %7113 = vmatpush3.bf16.msra.mxu1 %v7619_v29 }
 0x1ec   :  { %7114 = vmatprep.subr.bf16.mxu1 %v7621_v31  ;;  %7093 = vmatpush3.bf16.msra.mxu0 %v7622_v32 }
 0x1ed   :  { %7094 = vmatprep.subr.bf16.mxu0 %v7624_v34 }
 0x1ef   :  { %7115 = vmatpush3.bf16.msra.mxu1 %v7623_v33 }
 0x1f0   :  { %7116 = vmatprep.subr.bf16.mxu1 %v7625_v35  ;;  %7095 = vmatpush3.bf16.msra.mxu0 %v7626_v36 }
 0x1f1   :  { %7096 = vmatprep.subr.bf16.mxu0 %v7628_v40 }
 0x1f3   :  { %7117 = vmatpush3.bf16.msra.mxu1 %v7627_v38 }
 0x1f4   :  { %7118 = vmatprep.subr.bf16.mxu1 %v7629_v42  ;;  %7097 = vmatpush3.bf16.msra.mxu0 %v7630_v45 }
 0x1f5   :  { %7098 = vmatprep.subr.bf16.mxu0 %v7632_v51 }
 0x1f6   :  { %v6796_v37 = vpop.f32.mrb[32].mxu0 }
 0x1f7   :  { %v6797_v41 = vpop.f32.mrb[33].mxu0  ;;  %7119 = vmatpush3.bf16.msra.mxu1 %v7631_v48 }
 0x1f8   :  { %v6798_v43 = vadd.f32 %v6797_v41, %v6796_v37  ;;  %v6799_v47 = vpop.f32.mrb[34].mxu0  ;;  %7120 = vmatprep.subr.bf16.mxu1 %v7633_v54  ;;  %7099 = vmatpush3.bf16.msra.mxu0 %v7634_v57 }
 0x1f9   :  { %v6818_v39 = vpop.f32.mrb[32].mxu1  ;;  %v6800_v52 = vpop.f32.mrb[35].mxu0  ;;  %7100 = vmatprep.subr.bf16.mxu0 %v7636_v61 }
 0x1fa   :  { %v6819_v44 = vpop.f32.mrb[33].mxu1  ;;  %v5194_v49 = vadd.f32 %v6798_v43, %v9285_v60  ;;  %v6801_v55 = vadd.f32 %v6800_v52, %v6799_v47 }
 0x1fb   :  { %v6820_v46 = vadd.f32 %v6819_v44, %v6818_v39  ;;  %v6821_v50 = vpop.f32.mrb[34].mxu1  ;;  %7121 = vmatpush3.bf16.msra.mxu1 %v7635_v59 }
 0x1fc   :  { %v6822_v56 = vpop.f32.mrb[35].mxu1  ;;  %v5197_v60 = vadd.f32 %v6801_v55, %v9300_v5  ;;  %7122 = vmatprep.subr.bf16.mxu1 %v7637_v63  ;;  %7101 = vmatpush3.bf16.msra.mxu0 %v7638_v0  ;;  %v7643_v5 = vld [vmem:[%s9457_s1 + $0xfb8] sm:$0xff]  }
 0x1fd   :  { %v5235_v53 = vadd.f32 %v6820_v46, %v5194_v49  ;;  %v6823_v58 = vadd.f32 %v6822_v56, %v6821_v50  ;;  %7102 = vmatprep.subr.bf16.mxu0 %v7640_v2 }
 0x1ff   :  { %v5238_v62 = vadd.f32 %v6823_v58, %v5197_v60  ;;  %7123 = vmatpush3.bf16.msra.mxu1 %v7639_v1 }
 0x200   :  { %7124 = vmatprep.subr.bf16.mxu1 %v7641_v3  ;;  %7103 = vmatpush3.bf16.msra.mxu0 %v7642_v4 }
 0x203   :  { %7125 = vmatpush3.bf16.msra.mxu1 %v7643_v5  ;;  %5766 = vmatmul.mubr.bf16.vlgmr.msra.gmra.mrb[60].mxu0 %v5911_v9 }
 0x206   :  { %5807 = vmatmul.mubr.bf16.vlgmr.msra.gmra.mrb[60].mxu1 %v5913_v12 }
 0x216   :  { %v6840_v14 = vpop.f32.mrb[36].mxu0 }
 0x217   :  { %v6841_v16 = vpop.f32.mrb[37].mxu0 }
 0x218   :  { %v6842_v17 = vadd.f32 %v6841_v16, %v6840_v14  ;;  %v6843_v19 = vpop.f32.mrb[38].mxu0 }
 0x219   :  { %v6862_v15 = vpop.f32.mrb[36].mxu1  ;;  %v6844_v22 = vpop.f32.mrb[39].mxu0 }
 0x21a   :  { %v6863_v18 = vpop.f32.mrb[37].mxu1  ;;  %v5276_v23 = vadd.f32 %v6842_v17, %v5235_v53  ;;  %v6845_v24 = vadd.f32 %v6844_v22, %v6843_v19 }
 0x21b   :  { %v6864_v20 = vadd.f32 %v6863_v18, %v6862_v15  ;;  %v6865_v21 = vpop.f32.mrb[38].mxu1 }
 0x21c   :  { %v6866_v25 = vpop.f32.mrb[39].mxu1  ;;  %v5279_v28 = vadd.f32 %v6845_v24, %v5238_v62 }
 0x21d   :  { %v6867_v26 = vadd.f32 %v6866_v25, %v6865_v21  ;;  %v5317_v27 = vadd.f32 %v6864_v20, %v5276_v23 }
 0x21f   :  { %v5320_v29 = vadd.f32 %v6867_v26, %v5279_v28 }
 0x236   :  { %v6884_v30 = vpop.f32.mrb[40].mxu0 }
 0x237   :  { %v6885_v32 = vpop.f32.mrb[41].mxu0 }
 0x238   :  { %v6886_v33 = vadd.f32 %v6885_v32, %v6884_v30  ;;  %v6887_v35 = vpop.f32.mrb[42].mxu0 }
 0x239   :  { %v6906_v31 = vpop.f32.mrb[40].mxu1  ;;  %v6888_v38 = vpop.f32.mrb[43].mxu0 }
 0x23a   :  { %v6907_v34 = vpop.f32.mrb[41].mxu1  ;;  %v5358_v39 = vadd.f32 %v6886_v33, %v5317_v27  ;;  %v6889_v40 = vadd.f32 %v6888_v38, %v6887_v35 }
 0x23b   :  { %v6908_v36 = vadd.f32 %v6907_v34, %v6906_v31  ;;  %v6909_v37 = vpop.f32.mrb[42].mxu1 }
 0x23c   :  { %v6910_v41 = vpop.f32.mrb[43].mxu1  ;;  %v5361_v44 = vadd.f32 %v6889_v40, %v5320_v29 }
 0x23d   :  { %v6911_v42 = vadd.f32 %v6910_v41, %v6909_v37  ;;  %v5399_v43 = vadd.f32 %v6908_v36, %v5358_v39 }
 0x23f   :  { %v5402_v45 = vadd.f32 %v6911_v42, %v5361_v44 }
 0x256   :  { %v6928_v46 = vpop.f32.mrb[44].mxu0 }
 0x257   :  { %v6929_v48 = vpop.f32.mrb[45].mxu0 }
 0x258   :  { %v6930_v50 = vadd.f32 %v6929_v48, %v6928_v46  ;;  %v6931_v52 = vpop.f32.mrb[46].mxu0 }
 0x259   :  { %v6950_v47 = vpop.f32.mrb[44].mxu1  ;;  %v6932_v54 = vpop.f32.mrb[47].mxu0 }
 0x25a   :  { %v6951_v49 = vpop.f32.mrb[45].mxu1  ;;  %v5440_v56 = vadd.f32 %v6930_v50, %v5399_v43  ;;  %v6933_v57 = vadd.f32 %v6932_v54, %v6931_v52 }
 0x25b   :  { %v6952_v51 = vadd.f32 %v6951_v49, %v6950_v47  ;;  %v6953_v53 = vpop.f32.mrb[46].mxu1 }
 0x25c   :  { %v6954_v55 = vpop.f32.mrb[47].mxu1  ;;  %v5443_v60 = vadd.f32 %v6933_v57, %v5402_v45 }
 0x25d   :  { %v6955_v58 = vadd.f32 %v6954_v55, %v6953_v53  ;;  %v5481_v59 = vadd.f32 %v6952_v51, %v5440_v56 }
 0x25f   :  { %v5484_v61 = vadd.f32 %v6955_v58, %v5443_v60  ;;  %v6427_v58 = vld [vmem:[%s9459_s2] ss:$0 sm:$0xff] }
 0x276   :  { %v6972_v62 = vpop.f32.mrb[48].mxu0 }
 0x277   :  { %v6973_v0 = vpop.f32.mrb[49].mxu0 }
 0x278   :  { %v6974_v1 = vadd.f32 %v6973_v0, %v6972_v62  ;;  %v6975_v3 = vpop.f32.mrb[50].mxu0 }
 0x279   :  { %v6994_v63 = vpop.f32.mrb[48].mxu1  ;;  %v6976_v6 = vpop.f32.mrb[51].mxu0 }
 0x27a   :  { %v6995_v2 = vpop.f32.mrb[49].mxu1  ;;  %v5522_v7 = vadd.f32 %v6974_v1, %v5481_v59  ;;  %v6977_v8 = vadd.f32 %v6976_v6, %v6975_v3 }
 0x27b   :  { %v6996_v4 = vadd.f32 %v6995_v2, %v6994_v63  ;;  %v6997_v5 = vpop.f32.mrb[50].mxu1 }
 0x27c   :  { %v6998_v9 = vpop.f32.mrb[51].mxu1  ;;  %v5525_v12 = vadd.f32 %v6977_v8, %v5484_v61 }
 0x27d   :  { %v6999_v10 = vadd.f32 %v6998_v9, %v6997_v5  ;;  %v5563_v11 = vadd.f32 %v6996_v4, %v5522_v7 }
 0x27f   :  { %v5566_v13 = vadd.f32 %v6999_v10, %v5525_v12 }
 0x296   :  { %v7016_v14 = vpop.f32.mrb[52].mxu0 }
 0x297   :  { %v7017_v16 = vpop.f32.mrb[53].mxu0 }
 0x298   :  { %v7018_v17 = vadd.f32 %v7017_v16, %v7016_v14  ;;  %v7019_v19 = vpop.f32.mrb[54].mxu0 }
 0x299   :  { %v7038_v15 = vpop.f32.mrb[52].mxu1  ;;  %v7020_v22 = vpop.f32.mrb[55].mxu0 }
 0x29a   :  { %v7039_v18 = vpop.f32.mrb[53].mxu1  ;;  %v5604_v23 = vadd.f32 %v7018_v17, %v5563_v11  ;;  %v7021_v24 = vadd.f32 %v7020_v22, %v7019_v19 }
 0x29b   :  { %v7040_v20 = vadd.f32 %v7039_v18, %v7038_v15  ;;  %v7041_v21 = vpop.f32.mrb[54].mxu1 }
 0x29c   :  { %v7042_v25 = vpop.f32.mrb[55].mxu1  ;;  %v5607_v28 = vadd.f32 %v7021_v24, %v5566_v13 }
 0x29d   :  { %v7043_v26 = vadd.f32 %v7042_v25, %v7041_v21  ;;  %v5645_v27 = vadd.f32 %v7040_v20, %v5604_v23 }
 0x29f   :  { %v5648_v29 = vadd.f32 %v7043_v26, %v5607_v28 }
 0x2b6   :  { %v7060_v30 = vpop.f32.mrb[56].mxu0 }
 0x2b7   :  { %v7061_v32 = vpop.f32.mrb[57].mxu0 }
 0x2b8   :  { %v7062_v34 = vadd.f32 %v7061_v32, %v7060_v30  ;;  %v7063_v36 = vpop.f32.mrb[58].mxu0 }
 0x2b9   :  { %v7082_v31 = vpop.f32.mrb[56].mxu1  ;;  %v7064_v38 = vpop.f32.mrb[59].mxu0 }
 0x2ba   :  { %v7083_v33 = vpop.f32.mrb[57].mxu1  ;;  %v5686_v40 = vadd.f32 %v7062_v34, %v5645_v27  ;;  %v7065_v41 = vadd.f32 %v7064_v38, %v7063_v36 }
 0x2bb   :  { %v7084_v35 = vadd.f32 %v7083_v33, %v7082_v31  ;;  %v7085_v37 = vpop.f32.mrb[58].mxu1 }
 0x2bc   :  { %v7086_v39 = vpop.f32.mrb[59].mxu1  ;;  %v5689_v44 = vadd.f32 %v7065_v41, %v5648_v29 }
 0x2bd   :  { %v7087_v42 = vadd.f32 %v7086_v39, %v7085_v37  ;;  %v5727_v43 = vadd.f32 %v7084_v35, %v5686_v40 }
 0x2bf   :  { %v5730_v45 = vadd.f32 %v7087_v42, %v5689_v44 }
 0x2d6   :  { %v7104_v46 = vpop.f32.mrb[60].mxu0 }
 0x2d7   :  { %v7105_v48 = vpop.f32.mrb[61].mxu0 }
 0x2d8   :  { %v7106_v49 = vadd.f32 %v7105_v48, %v7104_v46  ;;  %v7107_v51 = vpop.f32.mrb[62].mxu0 }
 0x2d9   :  { %v7126_v47 = vpop.f32.mrb[60].mxu1  ;;  %v7108_v54 = vpop.f32.mrb[63].mxu0 }
 0x2da   :  { %v7127_v50 = vpop.f32.mrb[61].mxu1  ;;  %v5768_v55 = vadd.f32 %v7106_v49, %v5727_v43  ;;  %v7109_v56 = vadd.f32 %v7108_v54, %v7107_v51 }
 0x2db   :  { %v7128_v52 = vadd.f32 %v7127_v50, %v7126_v47  ;;  %v7129_v53 = vpop.f32.mrb[62].mxu1 }
 0x2dc   :  { %v7130_v57 = vpop.f32.mrb[63].mxu1  ;;  %v5771_v61 = vadd.f32 %v7109_v56, %v5730_v45 }
 0x2dd   :  { %v7131_v59 = vadd.f32 %v7130_v57, %v7129_v53  ;;  %v5809_v60 = vadd.f32 %v7128_v52, %v5768_v55 }
 0x2df   :  { %v5831_v62 = vadd.f32 %v6427_v58, %v5809_v60  ;;  %v5812_v63 = vadd.f32 %v7131_v59, %v5771_v61 }
 0x2e1   :  { %v5833_v0 = vsub.f32 0.0, %v5831_v62  ;;  %v5832_v1 = vadd.f32 %v6427_v58, %v5812_v63 }
 0x2e3   :  { %v5835_v2 = vmul.f32 1.442695, %v5833_v0  ;;  %v5834_v3 = vsub.f32 0.0, %v5832_v1 }
 0x2e5   :  { %7644 = vpow2.f32 %v5835_v2  ;;  %v5837_v4 = vmul.f32 1.442695, %v5834_v3 }
 0x2e7   :  { %7646 = vpow2.f32 %v5837_v4 }
 0x2ef   :  { %v7645_v5 = vpop.eup %7644 }
 0x2f0   :  { %v5839_v6 = vadd.f32 1.0, %v7645_v5 }
 0x2f1   :  { %v7647_v7 = vpop.eup %7646 }
 0x2f2   :  { %7648 = vrcp.f32 %v5839_v6  ;;  %v5840_v8 = vadd.f32 1.0, %v7647_v7 }
 0x2f4   :  { %7650 = vrcp.f32 %v5840_v8 }
 0x2fc   :  { %v7649_v9 = vpop.eup %7648 }
 0x2fd   :  { %5845 = vst [vmem:[%s9460_s3] sm:$0xff] %v7649_v9 }
 0x2fe   :  { %v7651_v10 = vpop.eup %7650 }
 0x2ff   :  { %5846 = vst [vmem:[%s9460_s3 + $0x8] sm:$0xff] %v7651_v10 }

</bundles_post_ra>
